<compile_context>
chip_gen: v7x
topology: tpu7x:2x2x1
jax: 0.10.0
libtpu: 0.0.40
codegen_flags: <defaults>
</compile_context>

<pallas_src>
import functools

import numpy as np
import jax
import jax.numpy as jnp
from jax import lax
from jax.experimental import pallas as pl
from jax.experimental.pallas import tpu as pltpu


# ---------------------------------------------------------------------------
# Fixed architecture (28x28 input is forced by fc1 = Linear(16*3*3, 10)).
# ---------------------------------------------------------------------------
_H0 = 28                         # input spatial size, Cin = 1
_C1, _K1, _H1 = 16, 3, 26        # conv1: 1->16, 3x3   -> 26x26x16
_C2, _K2, _H2 = 8, 7, 20         # conv2: 16->8, 7x7   -> 20x20x8
_P1 = 10                         # maxpool 2x2         -> 10x10x8
_C3, _K3, _H3 = 16, 5, 6         # conv3: 8->16, 5x5   -> 6x6x16
_P2 = 3                          # maxpool 2x2         -> 3x3x16
_NCLS = 10
_FCK = _P2 * _C3                 # 48 (fc contraction chunk per pooled row)

# Row offsets of the small constants inside the packed bf16 slab (720, 80).
# All offsets are multiples of 16 (bf16 sublane tile) so every in-kernel
# slice starts on a packed-tile boundary.
_S1C0, _S1C1 = 0, 160            # pool1 column selectors, each (160, 80)
_S2C0, _S2C1 = 320, 416          # pool2 column selectors, each (96, 48)
_S1R0, _S1R1 = 512, 528          # pool1 row selectors,    each (10, 20)
_S2R0, _S2R1 = 544, 560          # pool2 row selectors,    each (3, 6)
_WFC0 = 576                      # fc weight, 3 blocks of (48, 10)
_SLAB_ROWS = _WFC0 + _P2 * _FCK  # 720
_SLAB_COLS = _P1 * _C2           # 80

# In-kernel matmul helper: bf16 operands, f32 accumulate on the MXU.
_kdot = functools.partial(jnp.dot, preferred_element_type=jnp.float32)


# ---------------------------------------------------------------------------
# Fused kernel.  One grid step = the whole (small) batch, unrolled in Python.
#
# Activation layout is 2-D (H, W*C), channel-minor.  Each conv is
#     out(OH, OW*Cout) = sum_kh  act[kh:kh+OH, :] @ B_kh(W_in*Cin, OW*Cout)
# with the banded B_kh built once at init, so the kernel only needs static
# ref slices, 2-D dots, and elementwise max/add.
# ---------------------------------------------------------------------------
def _cnn3_kernel(x_ref, w1_ref, w2_ref, w3_ref, slab_ref, bias_ref,
                 out_ref, a1_ref, a2_ref, a3_ref):
    n = x_ref.shape[0]
    bf16 = jnp.bfloat16

    # f32 bias rows (broadcast over output rows).
    b1 = bias_ref[0:1, :]                          # (1, 416)
    b2 = bias_ref[1:2, 0:_H2 * _C2]                # (1, 160)
    b3 = bias_ref[2:3, 0:_H3 * _C3]                # (1, 96)
    bfc = bias_ref[3:4, 0:_NCLS]                   # (1, 10)

    for i in range(n):                             # batch unrolled (n is tiny)
        # conv1 (1->16, 3x3) + ReLU : (28, 28) -> (26, 26*16)
        acc = _kdot(x_ref[i, 0:_H1, :].astype(bf16), w1_ref[0])
        for kh in range(1, _K1):
            acc = acc + _kdot(x_ref[i, kh:kh + _H1, :].astype(bf16), w1_ref[kh])
        a1_ref[...] = jnp.maximum(acc + b1, 0.0)

        # conv2 (16->8, 7x7) + ReLU : (26, 416) -> (20, 20*8)
        acc = _kdot(a1_ref[0:_H2, :].astype(bf16), w2_ref[0])
        for kh in range(1, _K2):
            acc = acc + _kdot(a1_ref[kh:kh + _H2, :].astype(bf16), w2_ref[kh])
        y2 = jnp.maximum(acc + b2, 0.0).astype(bf16)

        # maxpool 2x2 : (20, 160) -> (10, 80)   (exact 0/1 selection matmuls)
        yw = jnp.maximum(_kdot(y2, slab_ref[_S1C0:_S1C0 + _H2 * _C2, :]),
                         _kdot(y2, slab_ref[_S1C1:_S1C1 + _H2 * _C2, :]))
        ywb = yw.astype(bf16)
        a2_ref[...] = jnp.maximum(
            _kdot(slab_ref[_S1R0:_S1R0 + _P1, 0:_H2], ywb),
            _kdot(slab_ref[_S1R1:_S1R1 + _P1, 0:_H2], ywb))

        # conv3 (8->16, 5x5), no activation : (10, 80) -> (6, 6*16)
        acc = _kdot(a2_ref[0:_H3, :].astype(bf16), w3_ref[0])
        for kh in range(1, _K3):
            acc = acc + _kdot(a2_ref[kh:kh + _H3, :].astype(bf16), w3_ref[kh])
        y3 = (acc + b3).astype(bf16)

        # maxpool 2x2 : (6, 96) -> (3, 48)
        yw = jnp.maximum(
            _kdot(y3, slab_ref[_S2C0:_S2C0 + _H3 * _C3, 0:_P2 * _C3]),
            _kdot(y3, slab_ref[_S2C1:_S2C1 + _H3 * _C3, 0:_P2 * _C3]))
        ywb = yw.astype(bf16)
        a3_ref[...] = jnp.maximum(
            _kdot(slab_ref[_S2R0:_S2R0 + _P2, 0:_H3], ywb),
            _kdot(slab_ref[_S2R1:_S2R1 + _P2, 0:_H3], ywb))

        # flatten (h, w*c) + fc (144 -> 10); wfc was re-packed to (h, w*c, 10)
        y = bfc
        for h in range(_P2):
            y = y + _kdot(a3_ref[h:h + 1, :].astype(bf16),
                          slab_ref[_WFC0 + h * _FCK:_WFC0 + (h + 1) * _FCK,
                                   0:_NCLS])
        out_ref[i:i + 1, :] = y


# ---------------------------------------------------------------------------
# One-time weight re-packing (host side, at init).
# ---------------------------------------------------------------------------
def _banded_conv_weight(w_oihw, w_in):
    """PyTorch conv weight (Cout,Cin,KH,KW) -> banded mats (KH, W_in*Cin, OW*Cout).

    B[kh, wi*Cin+ci, ow*Cout+co] = w[co, ci, kh, wi-ow]  for 0 <= wi-ow < KW,
    so that sum_kh act[kh:kh+OH, :] @ B[kh] equals the valid cross-correlation
    on a channel-minor (H, W*Cin) activation layout.
    """
    w = np.asarray(w_oihw, np.float32)
    cout, cin, n_kh, n_kw = w.shape
    ow_out = w_in - n_kw + 1
    band = np.zeros((n_kh, w_in * cin, ow_out * cout), np.float32)
    for kh in range(n_kh):
        for ow in range(ow_out):
            for kw in range(n_kw):
                wi = ow + kw
                band[kh, wi * cin:(wi + 1) * cin,
                     ow * cout:(ow + 1) * cout] = w[:, :, kh, kw].T
    return band


def _pool_selectors(hw_in, c):
    """0/1 matrices implementing exact 2x2 stride-2 max-pool column/row picks."""
    ph = pw = hw_in // 2
    col = np.zeros((2, hw_in * c, pw * c), np.float32)   # even / odd W pick
    row = np.zeros((2, ph, hw_in), np.float32)           # even / odd H pick
    for par in range(2):
        for p in range(pw):
            for ch in range(c):
                col[par, (2 * p + par) * c + ch, p * c + ch] = 1.0
        for p in range(ph):
            row[par, p, 2 * p + par] = 1.0
    return col, row


def _uniform(key, shape, fan_in):
    bound = 1.0 / np.sqrt(fan_in)
    return jax.random.uniform(key, shape, jnp.float32, -bound, bound)


def make_raw_params(key):
    """PyTorch-layout parameters (same shapes / init scheme as the nn.Module)."""
    ks = jax.random.split(key, 8)
    return {
        "w1": _uniform(ks[0], (_C1, 1, _K1, _K1), 1 * _K1 * _K1),
        "b1": _uniform(ks[1], (_C1,), 1 * _K1 * _K1),
        "w2": _uniform(ks[2], (_C2, _C1, _K2, _K2), _C1 * _K2 * _K2),
        "b2": _uniform(ks[3], (_C2,), _C1 * _K2 * _K2),
        "w3": _uniform(ks[4], (_C3, _C2, _K3, _K3), _C2 * _K3 * _K3),
        "b3": _uniform(ks[5], (_C3,), _C2 * _K3 * _K3),
        "wfc": _uniform(ks[6], (_NCLS, _C3 * _P2 * _P2), _C3 * _P2 * _P2),
        "bfc": _uniform(ks[7], (_NCLS,), _C3 * _P2 * _P2),
    }


def prepare_params(raw):
    """Repack PyTorch-layout weights into kernel-friendly constants (once)."""
    w1b = _banded_conv_weight(raw["w1"], _H0)            # (3, 28, 416)
    w2b = _banded_conv_weight(raw["w2"], _H1)            # (7, 416, 160)
    w3b = _banded_conv_weight(raw["w3"], _P1)            # (5, 80, 96)
    s1c, s1r = _pool_selectors(_H2, _C2)                 # 20x20x8 -> 10x10x8
    s2c, s2r = _pool_selectors(_H3, _C3)                 # 6x6x16  -> 3x3x16
    # PyTorch fc columns are (c, h, w)-ordered; re-pack to (h, w*c, out).
    wfc = np.asarray(raw["wfc"], np.float32)
    wfc_hwc = (wfc.reshape(_NCLS, _C3, _P2, _P2)
                  .transpose(2, 3, 1, 0)                 # (h, w, c, o)
                  .reshape(_P2, _P2 * _C3, _NCLS))       # (3, 48, 10)

    # Pack all small bf16 constants into one lane-dense slab (one DMA).
    slab = np.zeros((_SLAB_ROWS, _SLAB_COLS), np.float32)

    def put(r, block):
        h, w = block.shape
        slab[r:r + h, 0:w] = block

    put(_S1C0, s1c[0]); put(_S1C1, s1c[1])
    put(_S2C0, s2c[0]); put(_S2C1, s2c[1])
    put(_S1R0, s1r[0]); put(_S1R1, s1r[1])
    put(_S2R0, s2r[0]); put(_S2R1, s2r[1])
    for h in range(_P2):
        put(_WFC0 + h * _FCK, wfc_hwc[h])

    # All biases in one f32 slab (row-tiled to the channel-minor layout).
    bias = np.zeros((4, _H1 * _C1), np.float32)          # (4, 416)
    bias[0, :] = np.tile(np.asarray(raw["b1"], np.float32), _H1)
    bias[1, 0:_H2 * _C2] = np.tile(np.asarray(raw["b2"], np.float32), _H2)
    bias[2, 0:_H3 * _C3] = np.tile(np.asarray(raw["b3"], np.float32), _H3)
    bias[3, 0:_NCLS] = np.asarray(raw["bfc"], np.float32)

    return {
        "w1b": jnp.asarray(w1b, jnp.bfloat16),
        "w2b": jnp.asarray(w2b, jnp.bfloat16),
        "w3b": jnp.asarray(w3b, jnp.bfloat16),
        "slab": jnp.asarray(slab, jnp.bfloat16),
        "bias": jnp.asarray(bias, jnp.float32),
    }


# ---------------------------------------------------------------------------
# Forward pass: one fused pallas_call, single grid step.
# ---------------------------------------------------------------------------
def cnn3_forward(x_nchw, P):
    n = x_nchw.shape[0]
    x = x_nchw.reshape(n, _H0, _H0).astype(jnp.float32)   # Cin == 1 -> squeeze

    def _const(arr):
        r = arr.ndim
        return pl.BlockSpec(arr.shape, lambda *_: (0,) * r)

    conv_macs = (_K1 * _K1 * 1 * _H1 * _H1 * _C1
                 + _K2 * _K2 * _C1 * _H2 * _H2 * _C2
                 + _K3 * _K3 * _C2 * _H3 * _H3 * _C3)
    pool_macs = (2 * _H2 * (_H2 * _C2) * (_P1 * _C2) + 2 * _P1 * _H2 * (_P1 * _C2)
                 + 2 * _H3 * (_H3 * _C3) * (_P2 * _C3) + 2 * _P2 * _H3 * (_P2 * _C3))
    fc_macs = _P2 * _FCK * _NCLS
    flops = 2 * n * (conv_macs + pool_macs + fc_macs)
    const_bytes = sum(int(v.size) * v.dtype.itemsize for v in P.values())
    bytes_accessed = const_bytes + int(x.size) * 4 + n * _NCLS * 4

    out = pl.pallas_call(
        _cnn3_kernel,
        out_shape=jax.ShapeDtypeStruct((n, _NCLS), jnp.float32),
        grid=(1,),
        in_specs=[
            pl.BlockSpec((n, _H0, _H0), lambda i: (0, 0, 0)),
            _const(P["w1b"]),
            _const(P["w2b"]),
            _const(P["w3b"]),
            _const(P["slab"]),
            _const(P["bias"]),
        ],
        out_specs=pl.BlockSpec((n, _NCLS), lambda i: (0, 0)),
        scratch_shapes=[
            pltpu.VMEM((_H1, _H1 * _C1), jnp.float32),   # conv1 out (26, 416)
            pltpu.VMEM((_P1, _P1 * _C2), jnp.float32),   # pool1 out (10, 80)
            pltpu.VMEM((_P2, _P2 * _C3), jnp.float32),   # pool2 out (3, 48)
        ],
        compiler_params=pltpu.CompilerParams(dimension_semantics=("arbitrary",)),
        cost_estimate=pl.CostEstimate(flops=flops, transcendentals=0,
                                      bytes_accessed=bytes_accessed),
    )(x, P["w1b"], P["w2b"], P["w3b"], P["slab"], P["bias"])
    return out


# ---------------------------------------------------------------------------
# Pure-XLA reference of the PyTorch module (for a numerical self-check).
# ---------------------------------------------------------------------------
def cnn3_reference(x_nchw, raw):
    dn = ("NCHW", "OIHW", "NCHW")
    conv = functools.partial(lax.conv_general_dilated, window_strides=(1, 1),
                             padding="VALID", dimension_numbers=dn,
                             precision=lax.Precision.HIGHEST)
    pool = functools.partial(lax.reduce_window, init_value=-jnp.inf,
                             computation=lax.max,
                             window_dimensions=(1, 1, 2, 2),
                             window_strides=(1, 1, 2, 2), padding="VALID")
    x = jnp.maximum(conv(x_nchw, raw["w1"]) + raw["b1"][None, :, None, None], 0.0)
    x = jnp.maximum(conv(x, raw["w2"]) + raw["b2"][None, :, None, None], 0.0)
    x = pool(x)
    x = conv(x, raw["w3"]) + raw["b3"][None, :, None, None]
    x = pool(x)
    xf = x.reshape(x.shape[0], -1)                       # PyTorch (c,h,w) flatten
    return jnp.dot(xf, raw["wfc"].T,
                   precision=lax.Precision.HIGHEST) + raw["bfc"][None, :]


if __name__ == "__main__":
    key = jax.random.PRNGKey(0)
    pkey, xkey = jax.random.split(key)
    raw = make_raw_params(pkey)
    params = prepare_params(raw)

    # fc1 = Linear(16*3*3, 10) forces 28x28 spatial input; keep batch small (2).
    x = jax.random.normal(xkey, (2, 1, _H0, _H0), jnp.float32)

    out = jax.block_until_ready(jax.jit(cnn3_forward)(x, params))
    assert out.shape == (2, _NCLS) and out.dtype == jnp.float32
    assert bool(jnp.all(jnp.isfinite(out)))

    # Numerical check against the pure-XLA f32 reference of the PyTorch module.
    # Tolerance reflects bf16 weights / dot operands (the MXU path).
    ref = jax.block_until_ready(jax.jit(cnn3_reference)(x, raw))
    assert bool(jnp.allclose(out, ref, rtol=3e-2, atol=3e-2)), (
        "max abs diff = %f" % float(jnp.max(jnp.abs(out - ref))))

    print("KERNEL_OK")
</pallas_src>

<mosaic_0001>
module attributes {stable_mosaic.version = 11 : i64} {
  func.func @_cnn3_kernel(%arg0: i32, %arg1: memref<2x28x28xf32, #tpu.memory_space<vmem>>, %arg2: memref<3x28x416xbf16, #tpu.memory_space<vmem>>, %arg3: memref<7x416x160xbf16, #tpu.memory_space<vmem>>, %arg4: memref<5x80x96xbf16, #tpu.memory_space<vmem>>, %arg5: memref<720x80xbf16, #tpu.memory_space<vmem>>, %arg6: memref<4x416xf32, #tpu.memory_space<vmem>>, %arg7: memref<2x10xf32, #tpu.memory_space<vmem>>, %arg8: memref<26x416xf32, #tpu.memory_space<vmem>>, %arg9: memref<10x80xf32, #tpu.memory_space<vmem>>, %arg10: memref<3x48xf32, #tpu.memory_space<vmem>>) attributes {dimension_semantics = [#tpu.dimension_semantics<arbitrary>], iteration_bounds = array<i64: 1>, scalar_prefetch = 0 : i64, scratch_operands = 3 : i64, tpu.core_type = #tpu.core_type<tc>, window_params = [{pipeline_mode = #tpu.pipeline_mode<synchronous>, transform_indices = @transform_0, window_bounds = array<i64: 2, 28, 28>}, {pipeline_mode = #tpu.pipeline_mode<synchronous>, transform_indices = @transform_1, window_bounds = array<i64: 3, 28, 416>}, {pipeline_mode = #tpu.pipeline_mode<synchronous>, transform_indices = @transform_2, window_bounds = array<i64: 7, 416, 160>}, {pipeline_mode = #tpu.pipeline_mode<synchronous>, transform_indices = @transform_3, window_bounds = array<i64: 5, 80, 96>}, {pipeline_mode = #tpu.pipeline_mode<synchronous>, transform_indices = @transform_4, window_bounds = array<i64: 720, 80>}, {pipeline_mode = #tpu.pipeline_mode<synchronous>, transform_indices = @transform_5, window_bounds = array<i64: 4, 416>}, {pipeline_mode = #tpu.pipeline_mode<synchronous>, transform_indices = @transform_6, window_bounds = array<i64: 2, 10>}]} {
    %c0 = arith.constant 0 : index
    %c0_0 = arith.constant 0 : index
    %0 = vector.load %arg6[%c0, %c0_0] : memref<4x416xf32, #tpu.memory_space<vmem>>, vector<1x416xf32>
    %c1 = arith.constant 1 : index
    %c0_1 = arith.constant 0 : index
    %1 = vector.load %arg6[%c1, %c0_1] : memref<4x416xf32, #tpu.memory_space<vmem>>, vector<1x160xf32>
    %c2 = arith.constant 2 : index
    %c0_2 = arith.constant 0 : index
    %2 = vector.load %arg6[%c2, %c0_2] : memref<4x416xf32, #tpu.memory_space<vmem>>, vector<1x96xf32>
    %c3 = arith.constant 3 : index
    %c0_3 = arith.constant 0 : index
    %3 = vector.load %arg6[%c3, %c0_3] : memref<4x416xf32, #tpu.memory_space<vmem>>, vector<1x10xf32>
    %c0_4 = arith.constant 0 : index
    %c0_5 = arith.constant 0 : index
    %c0_6 = arith.constant 0 : index
    %4 = vector.load %arg1[%c0_4, %c0_5, %c0_6] : memref<2x28x28xf32, #tpu.memory_space<vmem>>, vector<1x26x28xf32>
    %5 = vector.shape_cast %4 : vector<1x26x28xf32> to vector<26x28xf32>
    %6 = arith.truncf %5 : vector<26x28xf32> to vector<26x28xbf16>
    %c0_7 = arith.constant 0 : index
    %c0_8 = arith.constant 0 : index
    %c0_9 = arith.constant 0 : index
    %7 = vector.load %arg2[%c0_7, %c0_8, %c0_9] : memref<3x28x416xbf16, #tpu.memory_space<vmem>>, vector<1x28x416xbf16>
    %8 = vector.shape_cast %7 : vector<1x28x416xbf16> to vector<28x416xbf16>
    %cst = arith.constant dense<0.000000e+00> : vector<26x416xf32>
    %9 = tpu.matmul %6, %8, %cst {dimension_numbers = #tpu.dot_dimension_numbers<[1], [0], [0], [1], [0, 0, 1, 1], [], []>} : vector<26x28xbf16>, vector<28x416xbf16>, vector<26x416xf32> -> vector<26x416xf32>
    %c0_10 = arith.constant 0 : index
    %c1_11 = arith.constant 1 : index
    %c0_12 = arith.constant 0 : index
    %10 = vector.load %arg1[%c0_10, %c1_11, %c0_12] : memref<2x28x28xf32, #tpu.memory_space<vmem>>, vector<1x26x28xf32>
    %11 = vector.shape_cast %10 : vector<1x26x28xf32> to vector<26x28xf32>
    %12 = arith.truncf %11 : vector<26x28xf32> to vector<26x28xbf16>
    %c1_13 = arith.constant 1 : index
    %c0_14 = arith.constant 0 : index
    %c0_15 = arith.constant 0 : index
    %13 = vector.load %arg2[%c1_13, %c0_14, %c0_15] : memref<3x28x416xbf16, #tpu.memory_space<vmem>>, vector<1x28x416xbf16>
    %14 = vector.shape_cast %13 : vector<1x28x416xbf16> to vector<28x416xbf16>
    %cst_16 = arith.constant dense<0.000000e+00> : vector<26x416xf32>
    %15 = tpu.matmul %12, %14, %cst_16 {dimension_numbers = #tpu.dot_dimension_numbers<[1], [0], [0], [1], [0, 0, 1, 1], [], []>} : vector<26x28xbf16>, vector<28x416xbf16>, vector<26x416xf32> -> vector<26x416xf32>
    %16 = arith.addf %9, %15 : vector<26x416xf32>
    %c0_17 = arith.constant 0 : index
    %c2_18 = arith.constant 2 : index
    %c0_19 = arith.constant 0 : index
    %17 = vector.load %arg1[%c0_17, %c2_18, %c0_19] : memref<2x28x28xf32, #tpu.memory_space<vmem>>, vector<1x26x28xf32>
    %18 = vector.shape_cast %17 : vector<1x26x28xf32> to vector<26x28xf32>
    %19 = arith.truncf %18 : vector<26x28xf32> to vector<26x28xbf16>
    %c2_20 = arith.constant 2 : index
    %c0_21 = arith.constant 0 : index
    %c0_22 = arith.constant 0 : index
    %20 = vector.load %arg2[%c2_20, %c0_21, %c0_22] : memref<3x28x416xbf16, #tpu.memory_space<vmem>>, vector<1x28x416xbf16>
    %21 = vector.shape_cast %20 : vector<1x28x416xbf16> to vector<28x416xbf16>
    %cst_23 = arith.constant dense<0.000000e+00> : vector<26x416xf32>
    %22 = tpu.matmul %19, %21, %cst_23 {dimension_numbers = #tpu.dot_dimension_numbers<[1], [0], [0], [1], [0, 0, 1, 1], [], []>} : vector<26x28xbf16>, vector<28x416xbf16>, vector<26x416xf32> -> vector<26x416xf32>
    %23 = arith.addf %16, %22 : vector<26x416xf32>
    %24 = vector.broadcast %0 : vector<1x416xf32> to vector<26x416xf32>
    %25 = arith.addf %23, %24 : vector<26x416xf32>
    %cst_24 = arith.constant 0.000000e+00 : f32
    %26 = vector.broadcast %cst_24 : f32 to vector<26x416xf32>
    %27 = arith.maximumf %25, %26 : vector<26x416xf32>
    %c0_25 = arith.constant 0 : index
    %c0_26 = arith.constant 0 : index
    %28 = vector.load %arg8[%c0_25, %c0_26] : memref<26x416xf32, #tpu.memory_space<vmem>>, vector<26x416xf32>
    tpu.vector_store %arg8[%c0_25, %c0_26], %27 {strides = array<i32>} : memref<26x416xf32, #tpu.memory_space<vmem>>, vector<26x416xf32>,
    %c0_27 = arith.constant 0 : index
    %c0_28 = arith.constant 0 : index
    %29 = vector.load %arg8[%c0_27, %c0_28] : memref<26x416xf32, #tpu.memory_space<vmem>>, vector<20x416xf32>
    %30 = arith.truncf %29 : vector<20x416xf32> to vector<20x416xbf16>
    %c0_29 = arith.constant 0 : index
    %c0_30 = arith.constant 0 : index
    %c0_31 = arith.constant 0 : index
    %31 = vector.load %arg3[%c0_29, %c0_30, %c0_31] : memref<7x416x160xbf16, #tpu.memory_space<vmem>>, vector<1x416x160xbf16>
    %32 = vector.shape_cast %31 : vector<1x416x160xbf16> to vector<416x160xbf16>
    %cst_32 = arith.constant dense<0.000000e+00> : vector<20x160xf32>
    %33 = tpu.matmul %30, %32, %cst_32 {dimension_numbers = #tpu.dot_dimension_numbers<[1], [0], [0], [1], [0, 0, 1, 1], [], []>} : vector<20x416xbf16>, vector<416x160xbf16>, vector<20x160xf32> -> vector<20x160xf32>
    %c1_33 = arith.constant 1 : index
    %c0_34 = arith.constant 0 : index
    %34 = vector.load %arg8[%c1_33, %c0_34] : memref<26x416xf32, #tpu.memory_space<vmem>>, vector<20x416xf32>
    %35 = arith.truncf %34 : vector<20x416xf32> to vector<20x416xbf16>
    %c1_35 = arith.constant 1 : index
    %c0_36 = arith.constant 0 : index
    %c0_37 = arith.constant 0 : index
    %36 = vector.load %arg3[%c1_35, %c0_36, %c0_37] : memref<7x416x160xbf16, #tpu.memory_space<vmem>>, vector<1x416x160xbf16>
    %37 = vector.shape_cast %36 : vector<1x416x160xbf16> to vector<416x160xbf16>
    %cst_38 = arith.constant dense<0.000000e+00> : vector<20x160xf32>
    %38 = tpu.matmul %35, %37, %cst_38 {dimension_numbers = #tpu.dot_dimension_numbers<[1], [0], [0], [1], [0, 0, 1, 1], [], []>} : vector<20x416xbf16>, vector<416x160xbf16>, vector<20x160xf32> -> vector<20x160xf32>
    %39 = arith.addf %33, %38 : vector<20x160xf32>
    %c2_39 = arith.constant 2 : index
    %c0_40 = arith.constant 0 : index
    %40 = vector.load %arg8[%c2_39, %c0_40] : memref<26x416xf32, #tpu.memory_space<vmem>>, vector<20x416xf32>
    %41 = arith.truncf %40 : vector<20x416xf32> to vector<20x416xbf16>
    %c2_41 = arith.constant 2 : index
    %c0_42 = arith.constant 0 : index
    %c0_43 = arith.constant 0 : index
    %42 = vector.load %arg3[%c2_41, %c0_42, %c0_43] : memref<7x416x160xbf16, #tpu.memory_space<vmem>>, vector<1x416x160xbf16>
    %43 = vector.shape_cast %42 : vector<1x416x160xbf16> to vector<416x160xbf16>
    %cst_44 = arith.constant dense<0.000000e+00> : vector<20x160xf32>
    %44 = tpu.matmul %41, %43, %cst_44 {dimension_numbers = #tpu.dot_dimension_numbers<[1], [0], [0], [1], [0, 0, 1, 1], [], []>} : vector<20x416xbf16>, vector<416x160xbf16>, vector<20x160xf32> -> vector<20x160xf32>
    %45 = arith.addf %39, %44 : vector<20x160xf32>
    %c3_45 = arith.constant 3 : index
    %c0_46 = arith.constant 0 : index
    %46 = vector.load %arg8[%c3_45, %c0_46] : memref<26x416xf32, #tpu.memory_space<vmem>>, vector<20x416xf32>
    %47 = arith.truncf %46 : vector<20x416xf32> to vector<20x416xbf16>
    %c3_47 = arith.constant 3 : index
    %c0_48 = arith.constant 0 : index
    %c0_49 = arith.constant 0 : index
    %48 = vector.load %arg3[%c3_47, %c0_48, %c0_49] : memref<7x416x160xbf16, #tpu.memory_space<vmem>>, vector<1x416x160xbf16>
    %49 = vector.shape_cast %48 : vector<1x416x160xbf16> to vector<416x160xbf16>
    %cst_50 = arith.constant dense<0.000000e+00> : vector<20x160xf32>
    %50 = tpu.matmul %47, %49, %cst_50 {dimension_numbers = #tpu.dot_dimension_numbers<[1], [0], [0], [1], [0, 0, 1, 1], [], []>} : vector<20x416xbf16>, vector<416x160xbf16>, vector<20x160xf32> -> vector<20x160xf32>
    %51 = arith.addf %45, %50 : vector<20x160xf32>
    %c4 = arith.constant 4 : index
    %c0_51 = arith.constant 0 : index
    %52 = vector.load %arg8[%c4, %c0_51] : memref<26x416xf32, #tpu.memory_space<vmem>>, vector<20x416xf32>
    %53 = arith.truncf %52 : vector<20x416xf32> to vector<20x416xbf16>
    %c4_52 = arith.constant 4 : index
    %c0_53 = arith.constant 0 : index
    %c0_54 = arith.constant 0 : index
    %54 = vector.load %arg3[%c4_52, %c0_53, %c0_54] : memref<7x416x160xbf16, #tpu.memory_space<vmem>>, vector<1x416x160xbf16>
    %55 = vector.shape_cast %54 : vector<1x416x160xbf16> to vector<416x160xbf16>
    %cst_55 = arith.constant dense<0.000000e+00> : vector<20x160xf32>
    %56 = tpu.matmul %53, %55, %cst_55 {dimension_numbers = #tpu.dot_dimension_numbers<[1], [0], [0], [1], [0, 0, 1, 1], [], []>} : vector<20x416xbf16>, vector<416x160xbf16>, vector<20x160xf32> -> vector<20x160xf32>
    %57 = arith.addf %51, %56 : vector<20x160xf32>
    %c5 = arith.constant 5 : index
    %c0_56 = arith.constant 0 : index
    %58 = vector.load %arg8[%c5, %c0_56] : memref<26x416xf32, #tpu.memory_space<vmem>>, vector<20x416xf32>
    %59 = arith.truncf %58 : vector<20x416xf32> to vector<20x416xbf16>
    %c5_57 = arith.constant 5 : index
    %c0_58 = arith.constant 0 : index
    %c0_59 = arith.constant 0 : index
    %60 = vector.load %arg3[%c5_57, %c0_58, %c0_59] : memref<7x416x160xbf16, #tpu.memory_space<vmem>>, vector<1x416x160xbf16>
    %61 = vector.shape_cast %60 : vector<1x416x160xbf16> to vector<416x160xbf16>
    %cst_60 = arith.constant dense<0.000000e+00> : vector<20x160xf32>
    %62 = tpu.matmul %59, %61, %cst_60 {dimension_numbers = #tpu.dot_dimension_numbers<[1], [0], [0], [1], [0, 0, 1, 1], [], []>} : vector<20x416xbf16>, vector<416x160xbf16>, vector<20x160xf32> -> vector<20x160xf32>
    %63 = arith.addf %57, %62 : vector<20x160xf32>
    %c6 = arith.constant 6 : index
    %c0_61 = arith.constant 0 : index
    %64 = vector.load %arg8[%c6, %c0_61] : memref<26x416xf32, #tpu.memory_space<vmem>>, vector<20x416xf32>
    %65 = arith.truncf %64 : vector<20x416xf32> to vector<20x416xbf16>
    %c6_62 = arith.constant 6 : index
    %c0_63 = arith.constant 0 : index
    %c0_64 = arith.constant 0 : index
    %66 = vector.load %arg3[%c6_62, %c0_63, %c0_64] : memref<7x416x160xbf16, #tpu.memory_space<vmem>>, vector<1x416x160xbf16>
    %67 = vector.shape_cast %66 : vector<1x416x160xbf16> to vector<416x160xbf16>
    %cst_65 = arith.constant dense<0.000000e+00> : vector<20x160xf32>
    %68 = tpu.matmul %65, %67, %cst_65 {dimension_numbers = #tpu.dot_dimension_numbers<[1], [0], [0], [1], [0, 0, 1, 1], [], []>} : vector<20x416xbf16>, vector<416x160xbf16>, vector<20x160xf32> -> vector<20x160xf32>
    %69 = arith.addf %63, %68 : vector<20x160xf32>
    %70 = vector.broadcast %1 : vector<1x160xf32> to vector<20x160xf32>
    %71 = arith.addf %69, %70 : vector<20x160xf32>
    %cst_66 = arith.constant 0.000000e+00 : f32
    %72 = vector.broadcast %cst_66 : f32 to vector<20x160xf32>
    %73 = arith.maximumf %71, %72 : vector<20x160xf32>
    %74 = arith.truncf %73 : vector<20x160xf32> to vector<20x160xbf16>
    %c0_67 = arith.constant 0 : index
    %c0_68 = arith.constant 0 : index
    %75 = vector.load %arg5[%c0_67, %c0_68] : memref<720x80xbf16, #tpu.memory_space<vmem>>, vector<160x80xbf16>
    %cst_69 = arith.constant dense<0.000000e+00> : vector<20x80xf32>
    %76 = tpu.matmul %74, %75, %cst_69 {dimension_numbers = #tpu.dot_dimension_numbers<[1], [0], [0], [1], [0, 0, 1, 1], [], []>} : vector<20x160xbf16>, vector<160x80xbf16>, vector<20x80xf32> -> vector<20x80xf32>
    %c160 = arith.constant 160 : index
    %c0_70 = arith.constant 0 : index
    %77 = vector.load %arg5[%c160, %c0_70] : memref<720x80xbf16, #tpu.memory_space<vmem>>, vector<160x80xbf16>
    %cst_71 = arith.constant dense<0.000000e+00> : vector<20x80xf32>
    %78 = tpu.matmul %74, %77, %cst_71 {dimension_numbers = #tpu.dot_dimension_numbers<[1], [0], [0], [1], [0, 0, 1, 1], [], []>} : vector<20x160xbf16>, vector<160x80xbf16>, vector<20x80xf32> -> vector<20x80xf32>
    %79 = arith.maximumf %76, %78 : vector<20x80xf32>
    %80 = arith.truncf %79 : vector<20x80xf32> to vector<20x80xbf16>
    %c512 = arith.constant 512 : index
    %c0_72 = arith.constant 0 : index
    %81 = vector.load %arg5[%c512, %c0_72] : memref<720x80xbf16, #tpu.memory_space<vmem>>, vector<10x20xbf16>
    %cst_73 = arith.constant dense<0.000000e+00> : vector<10x80xf32>
    %82 = tpu.matmul %81, %80, %cst_73 {dimension_numbers = #tpu.dot_dimension_numbers<[1], [0], [0], [1], [0, 0, 1, 1], [], []>} : vector<10x20xbf16>, vector<20x80xbf16>, vector<10x80xf32> -> vector<10x80xf32>
    %c528 = arith.constant 528 : index
    %c0_74 = arith.constant 0 : index
    %83 = vector.load %arg5[%c528, %c0_74] : memref<720x80xbf16, #tpu.memory_space<vmem>>, vector<10x20xbf16>
    %cst_75 = arith.constant dense<0.000000e+00> : vector<10x80xf32>
    %84 = tpu.matmul %83, %80, %cst_75 {dimension_numbers = #tpu.dot_dimension_numbers<[1], [0], [0], [1], [0, 0, 1, 1], [], []>} : vector<10x20xbf16>, vector<20x80xbf16>, vector<10x80xf32> -> vector<10x80xf32>
    %85 = arith.maximumf %82, %84 : vector<10x80xf32>
    %c0_76 = arith.constant 0 : index
    %c0_77 = arith.constant 0 : index
    %86 = vector.load %arg9[%c0_76, %c0_77] : memref<10x80xf32, #tpu.memory_space<vmem>>, vector<10x80xf32>
    tpu.vector_store %arg9[%c0_76, %c0_77], %85 {strides = array<i32>} : memref<10x80xf32, #tpu.memory_space<vmem>>, vector<10x80xf32>,
    %c0_78 = arith.constant 0 : index
    %c0_79 = arith.constant 0 : index
    %87 = vector.load %arg9[%c0_78, %c0_79] : memref<10x80xf32, #tpu.memory_space<vmem>>, vector<6x80xf32>
    %88 = arith.truncf %87 : vector<6x80xf32> to vector<6x80xbf16>
    %c0_80 = arith.constant 0 : index
    %c0_81 = arith.constant 0 : index
    %c0_82 = arith.constant 0 : index
    %89 = vector.load %arg4[%c0_80, %c0_81, %c0_82] : memref<5x80x96xbf16, #tpu.memory_space<vmem>>, vector<1x80x96xbf16>
    %90 = vector.shape_cast %89 : vector<1x80x96xbf16> to vector<80x96xbf16>
    %cst_83 = arith.constant dense<0.000000e+00> : vector<6x96xf32>
    %91 = tpu.matmul %88, %90, %cst_83 {dimension_numbers = #tpu.dot_dimension_numbers<[1], [0], [0], [1], [0, 0, 1, 1], [], []>} : vector<6x80xbf16>, vector<80x96xbf16>, vector<6x96xf32> -> vector<6x96xf32>
    %c1_84 = arith.constant 1 : index
    %c0_85 = arith.constant 0 : index
    %92 = vector.load %arg9[%c1_84, %c0_85] : memref<10x80xf32, #tpu.memory_space<vmem>>, vector<6x80xf32>
    %93 = arith.truncf %92 : vector<6x80xf32> to vector<6x80xbf16>
    %c1_86 = arith.constant 1 : index
    %c0_87 = arith.constant 0 : index
    %c0_88 = arith.constant 0 : index
    %94 = vector.load %arg4[%c1_86, %c0_87, %c0_88] : memref<5x80x96xbf16, #tpu.memory_space<vmem>>, vector<1x80x96xbf16>
    %95 = vector.shape_cast %94 : vector<1x80x96xbf16> to vector<80x96xbf16>
    %cst_89 = arith.constant dense<0.000000e+00> : vector<6x96xf32>
    %96 = tpu.matmul %93, %95, %cst_89 {dimension_numbers = #tpu.dot_dimension_numbers<[1], [0], [0], [1], [0, 0, 1, 1], [], []>} : vector<6x80xbf16>, vector<80x96xbf16>, vector<6x96xf32> -> vector<6x96xf32>
    %97 = arith.addf %91, %96 : vector<6x96xf32>
    %c2_90 = arith.constant 2 : index
    %c0_91 = arith.constant 0 : index
    %98 = vector.load %arg9[%c2_90, %c0_91] : memref<10x80xf32, #tpu.memory_space<vmem>>, vector<6x80xf32>
    %99 = arith.truncf %98 : vector<6x80xf32> to vector<6x80xbf16>
    %c2_92 = arith.constant 2 : index
    %c0_93 = arith.constant 0 : index
    %c0_94 = arith.constant 0 : index
    %100 = vector.load %arg4[%c2_92, %c0_93, %c0_94] : memref<5x80x96xbf16, #tpu.memory_space<vmem>>, vector<1x80x96xbf16>
    %101 = vector.shape_cast %100 : vector<1x80x96xbf16> to vector<80x96xbf16>
    %cst_95 = arith.constant dense<0.000000e+00> : vector<6x96xf32>
    %102 = tpu.matmul %99, %101, %cst_95 {dimension_numbers = #tpu.dot_dimension_numbers<[1], [0], [0], [1], [0, 0, 1, 1], [], []>} : vector<6x80xbf16>, vector<80x96xbf16>, vector<6x96xf32> -> vector<6x96xf32>
    %103 = arith.addf %97, %102 : vector<6x96xf32>
    %c3_96 = arith.constant 3 : index
    %c0_97 = arith.constant 0 : index
    %104 = vector.load %arg9[%c3_96, %c0_97] : memref<10x80xf32, #tpu.memory_space<vmem>>, vector<6x80xf32>
    %105 = arith.truncf %104 : vector<6x80xf32> to vector<6x80xbf16>
    %c3_98 = arith.constant 3 : index
    %c0_99 = arith.constant 0 : index
    %c0_100 = arith.constant 0 : index
    %106 = vector.load %arg4[%c3_98, %c0_99, %c0_100] : memref<5x80x96xbf16, #tpu.memory_space<vmem>>, vector<1x80x96xbf16>
    %107 = vector.shape_cast %106 : vector<1x80x96xbf16> to vector<80x96xbf16>
    %cst_101 = arith.constant dense<0.000000e+00> : vector<6x96xf32>
    %108 = tpu.matmul %105, %107, %cst_101 {dimension_numbers = #tpu.dot_dimension_numbers<[1], [0], [0], [1], [0, 0, 1, 1], [], []>} : vector<6x80xbf16>, vector<80x96xbf16>, vector<6x96xf32> -> vector<6x96xf32>
    %109 = arith.addf %103, %108 : vector<6x96xf32>
    %c4_102 = arith.constant 4 : index
    %c0_103 = arith.constant 0 : index
    %110 = vector.load %arg9[%c4_102, %c0_103] : memref<10x80xf32, #tpu.memory_space<vmem>>, vector<6x80xf32>
    %111 = arith.truncf %110 : vector<6x80xf32> to vector<6x80xbf16>
    %c4_104 = arith.constant 4 : index
    %c0_105 = arith.constant 0 : index
    %c0_106 = arith.constant 0 : index
    %112 = vector.load %arg4[%c4_104, %c0_105, %c0_106] : memref<5x80x96xbf16, #tpu.memory_space<vmem>>, vector<1x80x96xbf16>
    %113 = vector.shape_cast %112 : vector<1x80x96xbf16> to vector<80x96xbf16>
    %cst_107 = arith.constant dense<0.000000e+00> : vector<6x96xf32>
    %114 = tpu.matmul %111, %113, %cst_107 {dimension_numbers = #tpu.dot_dimension_numbers<[1], [0], [0], [1], [0, 0, 1, 1], [], []>} : vector<6x80xbf16>, vector<80x96xbf16>, vector<6x96xf32> -> vector<6x96xf32>
    %115 = arith.addf %109, %114 : vector<6x96xf32>
    %116 = vector.broadcast %2 : vector<1x96xf32> to vector<6x96xf32>
    %117 = arith.addf %115, %116 : vector<6x96xf32>
    %118 = arith.truncf %117 : vector<6x96xf32> to vector<6x96xbf16>
    %c320 = arith.constant 320 : index
    %c0_108 = arith.constant 0 : index
    %119 = vector.load %arg5[%c320, %c0_108] : memref<720x80xbf16, #tpu.memory_space<vmem>>, vector<96x48xbf16>
    %cst_109 = arith.constant dense<0.000000e+00> : vector<6x48xf32>
    %120 = tpu.matmul %118, %119, %cst_109 {dimension_numbers = #tpu.dot_dimension_numbers<[1], [0], [0], [1], [0, 0, 1, 1], [], []>} : vector<6x96xbf16>, vector<96x48xbf16>, vector<6x48xf32> -> vector<6x48xf32>
    %c416 = arith.constant 416 : index
    %c0_110 = arith.constant 0 : index
    %121 = vector.load %arg5[%c416, %c0_110] : memref<720x80xbf16, #tpu.memory_space<vmem>>, vector<96x48xbf16>
    %cst_111 = arith.constant dense<0.000000e+00> : vector<6x48xf32>
    %122 = tpu.matmul %118, %121, %cst_111 {dimension_numbers = #tpu.dot_dimension_numbers<[1], [0], [0], [1], [0, 0, 1, 1], [], []>} : vector<6x96xbf16>, vector<96x48xbf16>, vector<6x48xf32> -> vector<6x48xf32>
    %123 = arith.maximumf %120, %122 : vector<6x48xf32>
    %124 = arith.truncf %123 : vector<6x48xf32> to vector<6x48xbf16>
    %c544 = arith.constant 544 : index
    %c0_112 = arith.constant 0 : index
    %125 = vector.load %arg5[%c544, %c0_112] : memref<720x80xbf16, #tpu.memory_space<vmem>>, vector<3x6xbf16>
    %cst_113 = arith.constant dense<0.000000e+00> : vector<3x48xf32>
    %126 = tpu.matmul %125, %124, %cst_113 {dimension_numbers = #tpu.dot_dimension_numbers<[1], [0], [0], [1], [0, 0, 1, 1], [], []>} : vector<3x6xbf16>, vector<6x48xbf16>, vector<3x48xf32> -> vector<3x48xf32>
    %c560 = arith.constant 560 : index
    %c0_114 = arith.constant 0 : index
    %127 = vector.load %arg5[%c560, %c0_114] : memref<720x80xbf16, #tpu.memory_space<vmem>>, vector<3x6xbf16>
    %cst_115 = arith.constant dense<0.000000e+00> : vector<3x48xf32>
    %128 = tpu.matmul %127, %124, %cst_115 {dimension_numbers = #tpu.dot_dimension_numbers<[1], [0], [0], [1], [0, 0, 1, 1], [], []>} : vector<3x6xbf16>, vector<6x48xbf16>, vector<3x48xf32> -> vector<3x48xf32>
    %129 = arith.maximumf %126, %128 : vector<3x48xf32>
    %c0_116 = arith.constant 0 : index
    %c0_117 = arith.constant 0 : index
    %130 = vector.load %arg10[%c0_116, %c0_117] : memref<3x48xf32, #tpu.memory_space<vmem>>, vector<3x48xf32>
    tpu.vector_store %arg10[%c0_116, %c0_117], %129 {strides = array<i32>} : memref<3x48xf32, #tpu.memory_space<vmem>>, vector<3x48xf32>,
    %c0_118 = arith.constant 0 : index
    %c0_119 = arith.constant 0 : index
    %131 = vector.load %arg10[%c0_118, %c0_119] : memref<3x48xf32, #tpu.memory_space<vmem>>, vector<1x48xf32>
    %132 = arith.truncf %131 : vector<1x48xf32> to vector<1x48xbf16>
    %c576 = arith.constant 576 : index
    %c0_120 = arith.constant 0 : index
    %133 = vector.load %arg5[%c576, %c0_120] : memref<720x80xbf16, #tpu.memory_space<vmem>>, vector<48x10xbf16>
    %cst_121 = arith.constant dense<0.000000e+00> : vector<1x10xf32>
    %134 = tpu.matmul %132, %133, %cst_121 {dimension_numbers = #tpu.dot_dimension_numbers<[1], [0], [0], [1], [0, 0, 1, 1], [], []>} : vector<1x48xbf16>, vector<48x10xbf16>, vector<1x10xf32> -> vector<1x10xf32>
    %135 = arith.addf %3, %134 : vector<1x10xf32>
    %c1_122 = arith.constant 1 : index
    %c0_123 = arith.constant 0 : index
    %136 = vector.load %arg10[%c1_122, %c0_123] : memref<3x48xf32, #tpu.memory_space<vmem>>, vector<1x48xf32>
    %137 = arith.truncf %136 : vector<1x48xf32> to vector<1x48xbf16>
    %c624 = arith.constant 624 : index
    %c0_124 = arith.constant 0 : index
    %138 = vector.load %arg5[%c624, %c0_124] : memref<720x80xbf16, #tpu.memory_space<vmem>>, vector<48x10xbf16>
    %cst_125 = arith.constant dense<0.000000e+00> : vector<1x10xf32>
    %139 = tpu.matmul %137, %138, %cst_125 {dimension_numbers = #tpu.dot_dimension_numbers<[1], [0], [0], [1], [0, 0, 1, 1], [], []>} : vector<1x48xbf16>, vector<48x10xbf16>, vector<1x10xf32> -> vector<1x10xf32>
    %140 = arith.addf %135, %139 : vector<1x10xf32>
    %c2_126 = arith.constant 2 : index
    %c0_127 = arith.constant 0 : index
    %141 = vector.load %arg10[%c2_126, %c0_127] : memref<3x48xf32, #tpu.memory_space<vmem>>, vector<1x48xf32>
    %142 = arith.truncf %141 : vector<1x48xf32> to vector<1x48xbf16>
    %c672 = arith.constant 672 : index
    %c0_128 = arith.constant 0 : index
    %143 = vector.load %arg5[%c672, %c0_128] : memref<720x80xbf16, #tpu.memory_space<vmem>>, vector<48x10xbf16>
    %cst_129 = arith.constant dense<0.000000e+00> : vector<1x10xf32>
    %144 = tpu.matmul %142, %143, %cst_129 {dimension_numbers = #tpu.dot_dimension_numbers<[1], [0], [0], [1], [0, 0, 1, 1], [], []>} : vector<1x48xbf16>, vector<48x10xbf16>, vector<1x10xf32> -> vector<1x10xf32>
    %145 = arith.addf %140, %144 : vector<1x10xf32>
    %c0_130 = arith.constant 0 : index
    %c0_131 = arith.constant 0 : index
    %146 = vector.load %arg7[%c0_130, %c0_131] : memref<2x10xf32, #tpu.memory_space<vmem>>, vector<1x10xf32>
    tpu.vector_store %arg7[%c0_130, %c0_131], %145 {strides = array<i32>} : memref<2x10xf32, #tpu.memory_space<vmem>>, vector<1x10xf32>,
    %c1_132 = arith.constant 1 : index
    %c0_133 = arith.constant 0 : index
    %c0_134 = arith.constant 0 : index
    %147 = vector.load %arg1[%c1_132, %c0_133, %c0_134] : memref<2x28x28xf32, #tpu.memory_space<vmem>>, vector<1x26x28xf32>
    %148 = vector.shape_cast %147 : vector<1x26x28xf32> to vector<26x28xf32>
    %149 = arith.truncf %148 : vector<26x28xf32> to vector<26x28xbf16>
    %c0_135 = arith.constant 0 : index
    %c0_136 = arith.constant 0 : index
    %c0_137 = arith.constant 0 : index
    %150 = vector.load %arg2[%c0_135, %c0_136, %c0_137] : memref<3x28x416xbf16, #tpu.memory_space<vmem>>, vector<1x28x416xbf16>
    %151 = vector.shape_cast %150 : vector<1x28x416xbf16> to vector<28x416xbf16>
    %cst_138 = arith.constant dense<0.000000e+00> : vector<26x416xf32>
    %152 = tpu.matmul %149, %151, %cst_138 {dimension_numbers = #tpu.dot_dimension_numbers<[1], [0], [0], [1], [0, 0, 1, 1], [], []>} : vector<26x28xbf16>, vector<28x416xbf16>, vector<26x416xf32> -> vector<26x416xf32>
    %c1_139 = arith.constant 1 : index
    %c1_140 = arith.constant 1 : index
    %c0_141 = arith.constant 0 : index
    %153 = vector.load %arg1[%c1_139, %c1_140, %c0_141] : memref<2x28x28xf32, #tpu.memory_space<vmem>>, vector<1x26x28xf32>
    %154 = vector.shape_cast %153 : vector<1x26x28xf32> to vector<26x28xf32>
    %155 = arith.truncf %154 : vector<26x28xf32> to vector<26x28xbf16>
    %c1_142 = arith.constant 1 : index
    %c0_143 = arith.constant 0 : index
    %c0_144 = arith.constant 0 : index
    %156 = vector.load %arg2[%c1_142, %c0_143, %c0_144] : memref<3x28x416xbf16, #tpu.memory_space<vmem>>, vector<1x28x416xbf16>
    %157 = vector.shape_cast %156 : vector<1x28x416xbf16> to vector<28x416xbf16>
    %cst_145 = arith.constant dense<0.000000e+00> : vector<26x416xf32>
    %158 = tpu.matmul %155, %157, %cst_145 {dimension_numbers = #tpu.dot_dimension_numbers<[1], [0], [0], [1], [0, 0, 1, 1], [], []>} : vector<26x28xbf16>, vector<28x416xbf16>, vector<26x416xf32> -> vector<26x416xf32>
    %159 = arith.addf %152, %158 : vector<26x416xf32>
    %c1_146 = arith.constant 1 : index
    %c2_147 = arith.constant 2 : index
    %c0_148 = arith.constant 0 : index
    %160 = vector.load %arg1[%c1_146, %c2_147, %c0_148] : memref<2x28x28xf32, #tpu.memory_space<vmem>>, vector<1x26x28xf32>
    %161 = vector.shape_cast %160 : vector<1x26x28xf32> to vector<26x28xf32>
    %162 = arith.truncf %161 : vector<26x28xf32> to vector<26x28xbf16>
    %c2_149 = arith.constant 2 : index
    %c0_150 = arith.constant 0 : index
    %c0_151 = arith.constant 0 : index
    %163 = vector.load %arg2[%c2_149, %c0_150, %c0_151] : memref<3x28x416xbf16, #tpu.memory_space<vmem>>, vector<1x28x416xbf16>
    %164 = vector.shape_cast %163 : vector<1x28x416xbf16> to vector<28x416xbf16>
    %cst_152 = arith.constant dense<0.000000e+00> : vector<26x416xf32>
    %165 = tpu.matmul %162, %164, %cst_152 {dimension_numbers = #tpu.dot_dimension_numbers<[1], [0], [0], [1], [0, 0, 1, 1], [], []>} : vector<26x28xbf16>, vector<28x416xbf16>, vector<26x416xf32> -> vector<26x416xf32>
    %166 = arith.addf %159, %165 : vector<26x416xf32>
    %167 = vector.broadcast %0 : vector<1x416xf32> to vector<26x416xf32>
    %168 = arith.addf %166, %167 : vector<26x416xf32>
    %cst_153 = arith.constant 0.000000e+00 : f32
    %169 = vector.broadcast %cst_153 : f32 to vector<26x416xf32>
    %170 = arith.maximumf %168, %169 : vector<26x416xf32>
    %c0_154 = arith.constant 0 : index
    %c0_155 = arith.constant 0 : index
    %171 = vector.load %arg8[%c0_154, %c0_155] : memref<26x416xf32, #tpu.memory_space<vmem>>, vector<26x416xf32>
    tpu.vector_store %arg8[%c0_154, %c0_155], %170 {strides = array<i32>} : memref<26x416xf32, #tpu.memory_space<vmem>>, vector<26x416xf32>,
    %c0_156 = arith.constant 0 : index
    %c0_157 = arith.constant 0 : index
    %172 = vector.load %arg8[%c0_156, %c0_157] : memref<26x416xf32, #tpu.memory_space<vmem>>, vector<20x416xf32>
    %173 = arith.truncf %172 : vector<20x416xf32> to vector<20x416xbf16>
    %c0_158 = arith.constant 0 : index
    %c0_159 = arith.constant 0 : index
    %c0_160 = arith.constant 0 : index
    %174 = vector.load %arg3[%c0_158, %c0_159, %c0_160] : memref<7x416x160xbf16, #tpu.memory_space<vmem>>, vector<1x416x160xbf16>
    %175 = vector.shape_cast %174 : vector<1x416x160xbf16> to vector<416x160xbf16>
    %cst_161 = arith.constant dense<0.000000e+00> : vector<20x160xf32>
    %176 = tpu.matmul %173, %175, %cst_161 {dimension_numbers = #tpu.dot_dimension_numbers<[1], [0], [0], [1], [0, 0, 1, 1], [], []>} : vector<20x416xbf16>, vector<416x160xbf16>, vector<20x160xf32> -> vector<20x160xf32>
    %c1_162 = arith.constant 1 : index
    %c0_163 = arith.constant 0 : index
    %177 = vector.load %arg8[%c1_162, %c0_163] : memref<26x416xf32, #tpu.memory_space<vmem>>, vector<20x416xf32>
    %178 = arith.truncf %177 : vector<20x416xf32> to vector<20x416xbf16>
    %c1_164 = arith.constant 1 : index
    %c0_165 = arith.constant 0 : index
    %c0_166 = arith.constant 0 : index
    %179 = vector.load %arg3[%c1_164, %c0_165, %c0_166] : memref<7x416x160xbf16, #tpu.memory_space<vmem>>, vector<1x416x160xbf16>
    %180 = vector.shape_cast %179 : vector<1x416x160xbf16> to vector<416x160xbf16>
    %cst_167 = arith.constant dense<0.000000e+00> : vector<20x160xf32>
    %181 = tpu.matmul %178, %180, %cst_167 {dimension_numbers = #tpu.dot_dimension_numbers<[1], [0], [0], [1], [0, 0, 1, 1], [], []>} : vector<20x416xbf16>, vector<416x160xbf16>, vector<20x160xf32> -> vector<20x160xf32>
    %182 = arith.addf %176, %181 : vector<20x160xf32>
    %c2_168 = arith.constant 2 : index
    %c0_169 = arith.constant 0 : index
    %183 = vector.load %arg8[%c2_168, %c0_169] : memref<26x416xf32, #tpu.memory_space<vmem>>, vector<20x416xf32>
    %184 = arith.truncf %183 : vector<20x416xf32> to vector<20x416xbf16>
    %c2_170 = arith.constant 2 : index
    %c0_171 = arith.constant 0 : index
    %c0_172 = arith.constant 0 : index
    %185 = vector.load %arg3[%c2_170, %c0_171, %c0_172] : memref<7x416x160xbf16, #tpu.memory_space<vmem>>, vector<1x416x160xbf16>
    %186 = vector.shape_cast %185 : vector<1x416x160xbf16> to vector<416x160xbf16>
    %cst_173 = arith.constant dense<0.000000e+00> : vector<20x160xf32>
    %187 = tpu.matmul %184, %186, %cst_173 {dimension_numbers = #tpu.dot_dimension_numbers<[1], [0], [0], [1], [0, 0, 1, 1], [], []>} : vector<20x416xbf16>, vector<416x160xbf16>, vector<20x160xf32> -> vector<20x160xf32>
    %188 = arith.addf %182, %187 : vector<20x160xf32>
    %c3_174 = arith.constant 3 : index
    %c0_175 = arith.constant 0 : index
    %189 = vector.load %arg8[%c3_174, %c0_175] : memref<26x416xf32, #tpu.memory_space<vmem>>, vector<20x416xf32>
    %190 = arith.truncf %189 : vector<20x416xf32> to vector<20x416xbf16>
    %c3_176 = arith.constant 3 : index
    %c0_177 = arith.constant 0 : index
    %c0_178 = arith.constant 0 : index
    %191 = vector.load %arg3[%c3_176, %c0_177, %c0_178] : memref<7x416x160xbf16, #tpu.memory_space<vmem>>, vector<1x416x160xbf16>
    %192 = vector.shape_cast %191 : vector<1x416x160xbf16> to vector<416x160xbf16>
    %cst_179 = arith.constant dense<0.000000e+00> : vector<20x160xf32>
    %193 = tpu.matmul %190, %192, %cst_179 {dimension_numbers = #tpu.dot_dimension_numbers<[1], [0], [0], [1], [0, 0, 1, 1], [], []>} : vector<20x416xbf16>, vector<416x160xbf16>, vector<20x160xf32> -> vector<20x160xf32>
    %194 = arith.addf %188, %193 : vector<20x160xf32>
    %c4_180 = arith.constant 4 : index
    %c0_181 = arith.constant 0 : index
    %195 = vector.load %arg8[%c4_180, %c0_181] : memref<26x416xf32, #tpu.memory_space<vmem>>, vector<20x416xf32>
    %196 = arith.truncf %195 : vector<20x416xf32> to vector<20x416xbf16>
    %c4_182 = arith.constant 4 : index
    %c0_183 = arith.constant 0 : index
    %c0_184 = arith.constant 0 : index
    %197 = vector.load %arg3[%c4_182, %c0_183, %c0_184] : memref<7x416x160xbf16, #tpu.memory_space<vmem>>, vector<1x416x160xbf16>
    %198 = vector.shape_cast %197 : vector<1x416x160xbf16> to vector<416x160xbf16>
    %cst_185 = arith.constant dense<0.000000e+00> : vector<20x160xf32>
    %199 = tpu.matmul %196, %198, %cst_185 {dimension_numbers = #tpu.dot_dimension_numbers<[1], [0], [0], [1], [0, 0, 1, 1], [], []>} : vector<20x416xbf16>, vector<416x160xbf16>, vector<20x160xf32> -> vector<20x160xf32>
    %200 = arith.addf %194, %199 : vector<20x160xf32>
    %c5_186 = arith.constant 5 : index
    %c0_187 = arith.constant 0 : index
    %201 = vector.load %arg8[%c5_186, %c0_187] : memref<26x416xf32, #tpu.memory_space<vmem>>, vector<20x416xf32>
    %202 = arith.truncf %201 : vector<20x416xf32> to vector<20x416xbf16>
    %c5_188 = arith.constant 5 : index
    %c0_189 = arith.constant 0 : index
    %c0_190 = arith.constant 0 : index
    %203 = vector.load %arg3[%c5_188, %c0_189, %c0_190] : memref<7x416x160xbf16, #tpu.memory_space<vmem>>, vector<1x416x160xbf16>
    %204 = vector.shape_cast %203 : vector<1x416x160xbf16> to vector<416x160xbf16>
    %cst_191 = arith.constant dense<0.000000e+00> : vector<20x160xf32>
    %205 = tpu.matmul %202, %204, %cst_191 {dimension_numbers = #tpu.dot_dimension_numbers<[1], [0], [0], [1], [0, 0, 1, 1], [], []>} : vector<20x416xbf16>, vector<416x160xbf16>, vector<20x160xf32> -> vector<20x160xf32>
    %206 = arith.addf %200, %205 : vector<20x160xf32>
    %c6_192 = arith.constant 6 : index
    %c0_193 = arith.constant 0 : index
    %207 = vector.load %arg8[%c6_192, %c0_193] : memref<26x416xf32, #tpu.memory_space<vmem>>, vector<20x416xf32>
    %208 = arith.truncf %207 : vector<20x416xf32> to vector<20x416xbf16>
    %c6_194 = arith.constant 6 : index
    %c0_195 = arith.constant 0 : index
    %c0_196 = arith.constant 0 : index
    %209 = vector.load %arg3[%c6_194, %c0_195, %c0_196] : memref<7x416x160xbf16, #tpu.memory_space<vmem>>, vector<1x416x160xbf16>
    %210 = vector.shape_cast %209 : vector<1x416x160xbf16> to vector<416x160xbf16>
    %cst_197 = arith.constant dense<0.000000e+00> : vector<20x160xf32>
    %211 = tpu.matmul %208, %210, %cst_197 {dimension_numbers = #tpu.dot_dimension_numbers<[1], [0], [0], [1], [0, 0, 1, 1], [], []>} : vector<20x416xbf16>, vector<416x160xbf16>, vector<20x160xf32> -> vector<20x160xf32>
    %212 = arith.addf %206, %211 : vector<20x160xf32>
    %213 = vector.broadcast %1 : vector<1x160xf32> to vector<20x160xf32>
    %214 = arith.addf %212, %213 : vector<20x160xf32>
    %cst_198 = arith.constant 0.000000e+00 : f32
    %215 = vector.broadcast %cst_198 : f32 to vector<20x160xf32>
    %216 = arith.maximumf %214, %215 : vector<20x160xf32>
    %217 = arith.truncf %216 : vector<20x160xf32> to vector<20x160xbf16>
    %c0_199 = arith.constant 0 : index
    %c0_200 = arith.constant 0 : index
    %218 = vector.load %arg5[%c0_199, %c0_200] : memref<720x80xbf16, #tpu.memory_space<vmem>>, vector<160x80xbf16>
    %cst_201 = arith.constant dense<0.000000e+00> : vector<20x80xf32>
    %219 = tpu.matmul %217, %218, %cst_201 {dimension_numbers = #tpu.dot_dimension_numbers<[1], [0], [0], [1], [0, 0, 1, 1], [], []>} : vector<20x160xbf16>, vector<160x80xbf16>, vector<20x80xf32> -> vector<20x80xf32>
    %c160_202 = arith.constant 160 : index
    %c0_203 = arith.constant 0 : index
    %220 = vector.load %arg5[%c160_202, %c0_203] : memref<720x80xbf16, #tpu.memory_space<vmem>>, vector<160x80xbf16>
    %cst_204 = arith.constant dense<0.000000e+00> : vector<20x80xf32>
    %221 = tpu.matmul %217, %220, %cst_204 {dimension_numbers = #tpu.dot_dimension_numbers<[1], [0], [0], [1], [0, 0, 1, 1], [], []>} : vector<20x160xbf16>, vector<160x80xbf16>, vector<20x80xf32> -> vector<20x80xf32>
    %222 = arith.maximumf %219, %221 : vector<20x80xf32>
    %223 = arith.truncf %222 : vector<20x80xf32> to vector<20x80xbf16>
    %c512_205 = arith.constant 512 : index
    %c0_206 = arith.constant 0 : index
    %224 = vector.load %arg5[%c512_205, %c0_206] : memref<720x80xbf16, #tpu.memory_space<vmem>>, vector<10x20xbf16>
    %cst_207 = arith.constant dense<0.000000e+00> : vector<10x80xf32>
    %225 = tpu.matmul %224, %223, %cst_207 {dimension_numbers = #tpu.dot_dimension_numbers<[1], [0], [0], [1], [0, 0, 1, 1], [], []>} : vector<10x20xbf16>, vector<20x80xbf16>, vector<10x80xf32> -> vector<10x80xf32>
    %c528_208 = arith.constant 528 : index
    %c0_209 = arith.constant 0 : index
    %226 = vector.load %arg5[%c528_208, %c0_209] : memref<720x80xbf16, #tpu.memory_space<vmem>>, vector<10x20xbf16>
    %cst_210 = arith.constant dense<0.000000e+00> : vector<10x80xf32>
    %227 = tpu.matmul %226, %223, %cst_210 {dimension_numbers = #tpu.dot_dimension_numbers<[1], [0], [0], [1], [0, 0, 1, 1], [], []>} : vector<10x20xbf16>, vector<20x80xbf16>, vector<10x80xf32> -> vector<10x80xf32>
    %228 = arith.maximumf %225, %227 : vector<10x80xf32>
    %c0_211 = arith.constant 0 : index
    %c0_212 = arith.constant 0 : index
    %229 = vector.load %arg9[%c0_211, %c0_212] : memref<10x80xf32, #tpu.memory_space<vmem>>, vector<10x80xf32>
    tpu.vector_store %arg9[%c0_211, %c0_212], %228 {strides = array<i32>} : memref<10x80xf32, #tpu.memory_space<vmem>>, vector<10x80xf32>,
    %c0_213 = arith.constant 0 : index
    %c0_214 = arith.constant 0 : index
    %230 = vector.load %arg9[%c0_213, %c0_214] : memref<10x80xf32, #tpu.memory_space<vmem>>, vector<6x80xf32>
    %231 = arith.truncf %230 : vector<6x80xf32> to vector<6x80xbf16>
    %c0_215 = arith.constant 0 : index
    %c0_216 = arith.constant 0 : index
    %c0_217 = arith.constant 0 : index
    %232 = vector.load %arg4[%c0_215, %c0_216, %c0_217] : memref<5x80x96xbf16, #tpu.memory_space<vmem>>, vector<1x80x96xbf16>
    %233 = vector.shape_cast %232 : vector<1x80x96xbf16> to vector<80x96xbf16>
    %cst_218 = arith.constant dense<0.000000e+00> : vector<6x96xf32>
    %234 = tpu.matmul %231, %233, %cst_218 {dimension_numbers = #tpu.dot_dimension_numbers<[1], [0], [0], [1], [0, 0, 1, 1], [], []>} : vector<6x80xbf16>, vector<80x96xbf16>, vector<6x96xf32> -> vector<6x96xf32>
    %c1_219 = arith.constant 1 : index
    %c0_220 = arith.constant 0 : index
    %235 = vector.load %arg9[%c1_219, %c0_220] : memref<10x80xf32, #tpu.memory_space<vmem>>, vector<6x80xf32>
    %236 = arith.truncf %235 : vector<6x80xf32> to vector<6x80xbf16>
    %c1_221 = arith.constant 1 : index
    %c0_222 = arith.constant 0 : index
    %c0_223 = arith.constant 0 : index
    %237 = vector.load %arg4[%c1_221, %c0_222, %c0_223] : memref<5x80x96xbf16, #tpu.memory_space<vmem>>, vector<1x80x96xbf16>
    %238 = vector.shape_cast %237 : vector<1x80x96xbf16> to vector<80x96xbf16>
    %cst_224 = arith.constant dense<0.000000e+00> : vector<6x96xf32>
    %239 = tpu.matmul %236, %238, %cst_224 {dimension_numbers = #tpu.dot_dimension_numbers<[1], [0], [0], [1], [0, 0, 1, 1], [], []>} : vector<6x80xbf16>, vector<80x96xbf16>, vector<6x96xf32> -> vector<6x96xf32>
    %240 = arith.addf %234, %239 : vector<6x96xf32>
    %c2_225 = arith.constant 2 : index
    %c0_226 = arith.constant 0 : index
    %241 = vector.load %arg9[%c2_225, %c0_226] : memref<10x80xf32, #tpu.memory_space<vmem>>, vector<6x80xf32>
    %242 = arith.truncf %241 : vector<6x80xf32> to vector<6x80xbf16>
    %c2_227 = arith.constant 2 : index
    %c0_228 = arith.constant 0 : index
    %c0_229 = arith.constant 0 : index
    %243 = vector.load %arg4[%c2_227, %c0_228, %c0_229] : memref<5x80x96xbf16, #tpu.memory_space<vmem>>, vector<1x80x96xbf16>
    %244 = vector.shape_cast %243 : vector<1x80x96xbf16> to vector<80x96xbf16>
    %cst_230 = arith.constant dense<0.000000e+00> : vector<6x96xf32>
    %245 = tpu.matmul %242, %244, %cst_230 {dimension_numbers = #tpu.dot_dimension_numbers<[1], [0], [0], [1], [0, 0, 1, 1], [], []>} : vector<6x80xbf16>, vector<80x96xbf16>, vector<6x96xf32> -> vector<6x96xf32>
    %246 = arith.addf %240, %245 : vector<6x96xf32>
    %c3_231 = arith.constant 3 : index
    %c0_232 = arith.constant 0 : index
    %247 = vector.load %arg9[%c3_231, %c0_232] : memref<10x80xf32, #tpu.memory_space<vmem>>, vector<6x80xf32>
    %248 = arith.truncf %247 : vector<6x80xf32> to vector<6x80xbf16>
    %c3_233 = arith.constant 3 : index
    %c0_234 = arith.constant 0 : index
    %c0_235 = arith.constant 0 : index
    %249 = vector.load %arg4[%c3_233, %c0_234, %c0_235] : memref<5x80x96xbf16, #tpu.memory_space<vmem>>, vector<1x80x96xbf16>
    %250 = vector.shape_cast %249 : vector<1x80x96xbf16> to vector<80x96xbf16>
    %cst_236 = arith.constant dense<0.000000e+00> : vector<6x96xf32>
    %251 = tpu.matmul %248, %250, %cst_236 {dimension_numbers = #tpu.dot_dimension_numbers<[1], [0], [0], [1], [0, 0, 1, 1], [], []>} : vector<6x80xbf16>, vector<80x96xbf16>, vector<6x96xf32> -> vector<6x96xf32>
    %252 = arith.addf %246, %251 : vector<6x96xf32>
    %c4_237 = arith.constant 4 : index
    %c0_238 = arith.constant 0 : index
    %253 = vector.load %arg9[%c4_237, %c0_238] : memref<10x80xf32, #tpu.memory_space<vmem>>, vector<6x80xf32>
    %254 = arith.truncf %253 : vector<6x80xf32> to vector<6x80xbf16>
    %c4_239 = arith.constant 4 : index
    %c0_240 = arith.constant 0 : index
    %c0_241 = arith.constant 0 : index
    %255 = vector.load %arg4[%c4_239, %c0_240, %c0_241] : memref<5x80x96xbf16, #tpu.memory_space<vmem>>, vector<1x80x96xbf16>
    %256 = vector.shape_cast %255 : vector<1x80x96xbf16> to vector<80x96xbf16>
    %cst_242 = arith.constant dense<0.000000e+00> : vector<6x96xf32>
    %257 = tpu.matmul %254, %256, %cst_242 {dimension_numbers = #tpu.dot_dimension_numbers<[1], [0], [0], [1], [0, 0, 1, 1], [], []>} : vector<6x80xbf16>, vector<80x96xbf16>, vector<6x96xf32> -> vector<6x96xf32>
    %258 = arith.addf %252, %257 : vector<6x96xf32>
    %259 = vector.broadcast %2 : vector<1x96xf32> to vector<6x96xf32>
    %260 = arith.addf %258, %259 : vector<6x96xf32>
    %261 = arith.truncf %260 : vector<6x96xf32> to vector<6x96xbf16>
    %c320_243 = arith.constant 320 : index
    %c0_244 = arith.constant 0 : index
    %262 = vector.load %arg5[%c320_243, %c0_244] : memref<720x80xbf16, #tpu.memory_space<vmem>>, vector<96x48xbf16>
    %cst_245 = arith.constant dense<0.000000e+00> : vector<6x48xf32>
    %263 = tpu.matmul %261, %262, %cst_245 {dimension_numbers = #tpu.dot_dimension_numbers<[1], [0], [0], [1], [0, 0, 1, 1], [], []>} : vector<6x96xbf16>, vector<96x48xbf16>, vector<6x48xf32> -> vector<6x48xf32>
    %c416_246 = arith.constant 416 : index
    %c0_247 = arith.constant 0 : index
    %264 = vector.load %arg5[%c416_246, %c0_247] : memref<720x80xbf16, #tpu.memory_space<vmem>>, vector<96x48xbf16>
    %cst_248 = arith.constant dense<0.000000e+00> : vector<6x48xf32>
    %265 = tpu.matmul %261, %264, %cst_248 {dimension_numbers = #tpu.dot_dimension_numbers<[1], [0], [0], [1], [0, 0, 1, 1], [], []>} : vector<6x96xbf16>, vector<96x48xbf16>, vector<6x48xf32> -> vector<6x48xf32>
    %266 = arith.maximumf %263, %265 : vector<6x48xf32>
    %267 = arith.truncf %266 : vector<6x48xf32> to vector<6x48xbf16>
    %c544_249 = arith.constant 544 : index
    %c0_250 = arith.constant 0 : index
    %268 = vector.load %arg5[%c544_249, %c0_250] : memref<720x80xbf16, #tpu.memory_space<vmem>>, vector<3x6xbf16>
    %cst_251 = arith.constant dense<0.000000e+00> : vector<3x48xf32>
    %269 = tpu.matmul %268, %267, %cst_251 {dimension_numbers = #tpu.dot_dimension_numbers<[1], [0], [0], [1], [0, 0, 1, 1], [], []>} : vector<3x6xbf16>, vector<6x48xbf16>, vector<3x48xf32> -> vector<3x48xf32>
    %c560_252 = arith.constant 560 : index
    %c0_253 = arith.constant 0 : index
    %270 = vector.load %arg5[%c560_252, %c0_253] : memref<720x80xbf16, #tpu.memory_space<vmem>>, vector<3x6xbf16>
    %cst_254 = arith.constant dense<0.000000e+00> : vector<3x48xf32>
    %271 = tpu.matmul %270, %267, %cst_254 {dimension_numbers = #tpu.dot_dimension_numbers<[1], [0], [0], [1], [0, 0, 1, 1], [], []>} : vector<3x6xbf16>, vector<6x48xbf16>, vector<3x48xf32> -> vector<3x48xf32>
    %272 = arith.maximumf %269, %271 : vector<3x48xf32>
    %c0_255 = arith.constant 0 : index
    %c0_256 = arith.constant 0 : index
    %273 = vector.load %arg10[%c0_255, %c0_256] : memref<3x48xf32, #tpu.memory_space<vmem>>, vector<3x48xf32>
    tpu.vector_store %arg10[%c0_255, %c0_256], %272 {strides = array<i32>} : memref<3x48xf32, #tpu.memory_space<vmem>>, vector<3x48xf32>,
    %c0_257 = arith.constant 0 : index
    %c0_258 = arith.constant 0 : index
    %274 = vector.load %arg10[%c0_257, %c0_258] : memref<3x48xf32, #tpu.memory_space<vmem>>, vector<1x48xf32>
    %275 = arith.truncf %274 : vector<1x48xf32> to vector<1x48xbf16>
    %c576_259 = arith.constant 576 : index
    %c0_260 = arith.constant 0 : index
    %276 = vector.load %arg5[%c576_259, %c0_260] : memref<720x80xbf16, #tpu.memory_space<vmem>>, vector<48x10xbf16>
    %cst_261 = arith.constant dense<0.000000e+00> : vector<1x10xf32>
    %277 = tpu.matmul %275, %276, %cst_261 {dimension_numbers = #tpu.dot_dimension_numbers<[1], [0], [0], [1], [0, 0, 1, 1], [], []>} : vector<1x48xbf16>, vector<48x10xbf16>, vector<1x10xf32> -> vector<1x10xf32>
    %278 = arith.addf %3, %277 : vector<1x10xf32>
    %c1_262 = arith.constant 1 : index
    %c0_263 = arith.constant 0 : index
    %279 = vector.load %arg10[%c1_262, %c0_263] : memref<3x48xf32, #tpu.memory_space<vmem>>, vector<1x48xf32>
    %280 = arith.truncf %279 : vector<1x48xf32> to vector<1x48xbf16>
    %c624_264 = arith.constant 624 : index
    %c0_265 = arith.constant 0 : index
    %281 = vector.load %arg5[%c624_264, %c0_265] : memref<720x80xbf16, #tpu.memory_space<vmem>>, vector<48x10xbf16>
    %cst_266 = arith.constant dense<0.000000e+00> : vector<1x10xf32>
    %282 = tpu.matmul %280, %281, %cst_266 {dimension_numbers = #tpu.dot_dimension_numbers<[1], [0], [0], [1], [0, 0, 1, 1], [], []>} : vector<1x48xbf16>, vector<48x10xbf16>, vector<1x10xf32> -> vector<1x10xf32>
    %283 = arith.addf %278, %282 : vector<1x10xf32>
    %c2_267 = arith.constant 2 : index
    %c0_268 = arith.constant 0 : index
    %284 = vector.load %arg10[%c2_267, %c0_268] : memref<3x48xf32, #tpu.memory_space<vmem>>, vector<1x48xf32>
    %285 = arith.truncf %284 : vector<1x48xf32> to vector<1x48xbf16>
    %c672_269 = arith.constant 672 : index
    %c0_270 = arith.constant 0 : index
    %286 = vector.load %arg5[%c672_269, %c0_270] : memref<720x80xbf16, #tpu.memory_space<vmem>>, vector<48x10xbf16>
    %cst_271 = arith.constant dense<0.000000e+00> : vector<1x10xf32>
    %287 = tpu.matmul %285, %286, %cst_271 {dimension_numbers = #tpu.dot_dimension_numbers<[1], [0], [0], [1], [0, 0, 1, 1], [], []>} : vector<1x48xbf16>, vector<48x10xbf16>, vector<1x10xf32> -> vector<1x10xf32>
    %288 = arith.addf %283, %287 : vector<1x10xf32>
    %c1_272 = arith.constant 1 : index
    %c0_273 = arith.constant 0 : index
    %289 = vector.load %arg7[%c1_272, %c0_273] : memref<2x10xf32, #tpu.memory_space<vmem>>, vector<1x10xf32>
    tpu.vector_store %arg7[%c1_272, %c0_273], %288 {strides = array<i32>} : memref<2x10xf32, #tpu.memory_space<vmem>>, vector<1x10xf32>,
    return
  }
  func.func @transform_0(%arg0: i32) -> (i32, i32, i32) {
    %c0_i32 = arith.constant 0 : i32
    %c0_i32_0 = arith.constant 0 : i32
    %c0_i32_1 = arith.constant 0 : i32
    %c0_i32_2 = arith.constant 0 : i32
    return %c0_i32, %c0_i32_0, %c0_i32_1 : i32, i32, i32
  }
  func.func @transform_1(%arg0: i32) -> (i32, i32, i32) {
    %c0_i32 = arith.constant 0 : i32
    %c0_i32_0 = arith.constant 0 : i32
    %c0_i32_1 = arith.constant 0 : i32
    %c0_i32_2 = arith.constant 0 : i32
    return %c0_i32, %c0_i32_0, %c0_i32_1 : i32, i32, i32
  }
  func.func @transform_2(%arg0: i32) -> (i32, i32, i32) {
    %c0_i32 = arith.constant 0 : i32
    %c0_i32_0 = arith.constant 0 : i32
    %c0_i32_1 = arith.constant 0 : i32
    %c0_i32_2 = arith.constant 0 : i32
    return %c0_i32, %c0_i32_0, %c0_i32_1 : i32, i32, i32
  }
  func.func @transform_3(%arg0: i32) -> (i32, i32, i32) {
    %c0_i32 = arith.constant 0 : i32
    %c0_i32_0 = arith.constant 0 : i32
    %c0_i32_1 = arith.constant 0 : i32
    %c0_i32_2 = arith.constant 0 : i32
    return %c0_i32, %c0_i32_0, %c0_i32_1 : i32, i32, i32
  }
  func.func @transform_4(%arg0: i32) -> (i32, i32) {
    %c0_i32 = arith.constant 0 : i32
    %c0_i32_0 = arith.constant 0 : i32
    %c0_i32_1 = arith.constant 0 : i32
    return %c0_i32, %c0_i32_0 : i32, i32
  }
  func.func @transform_5(%arg0: i32) -> (i32, i32) {
    %c0_i32 = arith.constant 0 : i32
    %c0_i32_0 = arith.constant 0 : i32
    %c0_i32_1 = arith.constant 0 : i32
    return %c0_i32, %c0_i32_0 : i32, i32
  }
  func.func @transform_6(%arg0: i32) -> (i32, i32) {
    %c0_i32 = arith.constant 0 : i32
    %c0_i32_0 = arith.constant 0 : i32
    %c0_i32_1 = arith.constant 0 : i32
    return %c0_i32, %c0_i32_0 : i32, i32
  }
}

</mosaic_0001>

<bundles_post_ra>
// kernel: cnn3_forward.1
= control target key start
LH: loop header
LB: loop body
LE: loop exit
PB: predicated region body
PF: predicated region fallthrough
CT: control target
= control target key end

     0   :  { %v14421_v2 = vmov 0   ;;  %vm102_vm0 = vcmask 1045504   ;;  %vm95_vm1 = vcmask 228352   ;;  %vm628_vm2 = vcmask 261120   ;;  %s18131_s0 = inlined_call_operand.vmem [shape: f32[2,28,28], index: 0, kind: input, shape index: {}]   ;;  %s18132_s1 = inlined_call_operand.vmem [shape: bf16[3,28,416], index: 1, kind: input, shape index: {}]   ;;  %s18133_s2 = inlined_call_operand.vmem [shape: bf16[7,416,160], index: 2, kind: input, shape index: {}]   ;;  %s18134_s3 = inlined_call_operand.vmem [shape: bf16[5,80,96], index: 3, kind: input, shape index: {}]   ;;  %s18135_s4 = inlined_call_operand.vmem [shape: bf16[720,80], index: 4, kind: input, shape index: {}]   ;;  %s18136_s5 = inlined_call_operand.vmem [shape: f32[4,416], index: 5, kind: input, shape index: {}]   ;;  %s18137_s6 = inlined_call_operand.hbm [shape: f32[2,10], index: 6, kind: output, shape index: {}]  }
   0x1   :  { %v13079_v0 = vld [vmem:[%s18132_s1 + $0x44] ss:$16 sps:$4 sm:$0xff]   ;;  %v13081_v1 = vld [vmem:[%s18132_s1 + $0x4c] ss:$16 sps:$4 sm:$0xff]   ;;  %147 = vmatprep.mubr.bf16.mxu0 %v14421_v2  ;;  %210 = vmatprep.mubr.bf16.mxu1 %v14421_v2  ;;  %v13083_v3 = vld [vmem:[%s18132_s1 + $0x40] ss:$16 sps:$4 sm:$0xff]  }
   0x2   :  { %115 = vmatprep.subr.bf16.mxu0 %v13079_v0  ;;  %v13084_v4 = vld [vmem:[%s18132_s1 + $0x48] ss:$16 sps:$4 sm:$0xff]   ;;  %12885 = vmatprep.subr.bf16.mxu1 %v13081_v1  ;;  %v13085_v5 = vld [vmem:[%s18132_s1 + $0x64] ss:$16 sps:$4 sm:$0x3f]   ;;  %vm641_vm3 = vcmask 254976  }
   0x3   :  { %116 = vmatpush1.bf16.msra.mxu0 %v13083_v3  ;;  %12887 = vmatpush1.bf16.msra.mxu1 %v13084_v4  ;;  %v13087_v6 = vld [vmem:[%s18132_s1 + $0x6c] ss:$16 sps:$4 sm:$0x3f]   ;;  %v44_v7 = vld [vmem:[%s18131_s0 + $0x1] sm:$0xff]  ;;  %v46_v11 = vld [vmem:[%s18131_s0 + $0x11] sm:$0xff]  ;;  %vm1664_vm5 = vcmask 1046528  }
   0x4   :  { %10688 = vmatprep.subr.msk.bf16.mxu0 %vm102_vm0, %v13085_v5  ;;  %v13089_v8 = vld [vmem:[%s18132_s1 + $0x60] ss:$16 sps:$4 sm:$0x3f]   ;;  %v13090_v9 = vld [vmem:[%s18132_s1 + $0x68] ss:$16 sps:$4 sm:$0x3f]   ;;  %12886 = vmatprep.subr.msk.bf16.mxu1 %vm102_vm0, %v13087_v6 }
   0x5   :  { %v45_v10 = vld [vmem:[%s18131_s0 + $0x9] sm:$0xff]  ;;  %v47_v12 = vld [vmem:[%s18131_s0 + $0x19] sm:$0x3]  ;;  %v104_v13 = vsel %vm102_vm0, %v13089_v8, 0  ;;  %v110_v14 = vsel %vm102_vm0, %v13090_v9, 0  ;;  %v30_v21 = vld [vmem:[%s18131_s0] sm:$0xff] }
   0x6   :  { %v48_v15 = vpack.c.bf16 %v45_v10, %v44_v7  ;;  %v49_v16 = vpack.c.bf16 %v47_v12, %v46_v11  ;;  %v13091_v17 = vld [vmem:[%s18132_s1 + $0x8] ss:$16 sps:$4 sm:$0xff]   ;;  %v13093_v18 = vld [vmem:[%s18132_s1 + $0xc] ss:$16 sps:$4 sm:$0xff]   ;;  %v13099_v24 = vld [vmem:[%s18132_s1 + $0x4] ss:$16 sps:$4 sm:$0xff]  }
   0x7   :  { %118 = vmatpush1.bf16.msra.mxu0 %v104_v13  ;;  %12888 = vmatpush1.bf16.msra.mxu1 %v110_v14  ;;  %v13094_v19 = vld [vmem:[%s18132_s1 + $0x2c] ss:$16 sps:$4 sm:$0x3f]   ;;  %v13096_v20 = vld [vmem:[%s18132_s1 + $0x28] ss:$16 sps:$4 sm:$0x3f]  }
   0x8   :  { %168 = vmatprep.subr.bf16.mxu0 %v13081_v1  ;;  %328 = vmatprep.subr.bf16.mxu1 %v13093_v18  ;;  %v31_v22 = vld [vmem:[%s18131_s0 + $0x8] sm:$0xff]  ;;  %v270_v23 = vsel %vm102_vm0, %v13096_v20, 0  ;;  %v32_v30 = vld [vmem:[%s18131_s0 + $0x10] sm:$0xff]  ;;  %v33_v31 = vld [vmem:[%s18131_s0 + $0x18] sm:$0x3] }
   0x9   :  { %v13102_v25 = vld [vmem:[%s18132_s1 + $0x8c] ss:$16 sps:$4 sm:$0xff]   ;;  %v34_v26 = vpack.c.bf16 %v31_v22, %v30_v21  ;;  %v13100_v27 = vld [vmem:[%s18132_s1 + $0x88] ss:$16 sps:$4 sm:$0xff]   ;;  %v35_v33 = vpack.c.bf16 %v33_v31, %v32_v30  ;;  %v13097_v35 = vld [vmem:[%s18132_s1] ss:$16 sps:$4 sm:$0xff]  }
   0xa   :  { %10689 = vmatmul.mubr.msk.bf16.vlgmr.msra.gmra.mrb[0].mxu0 %vm95_vm1, %v48_v15  ;;  %10693 = vmatmul.mubr.msk.bf16.vlgmr.msra.gmra.mrb[0].mxu1 %vm95_vm1, %v49_v16  ;;  %v13105_v28 = vld [vmem:[%s18132_s1 + $0xac] ss:$16 sps:$4 sm:$0x3f]   ;;  %v13108_v29 = vld [vmem:[%s18132_s1 + $0xa8] ss:$16 sps:$4 sm:$0x3f]  }
   0xb   :  { %329 = vmatpush1.bf16.msra.mxu1 %v13091_v17  ;;  %169 = vmatpush1.bf16.msra.mxu0 %v13084_v4  ;;  %v445_v32 = vsel %vm102_vm0, %v13108_v29, 0  ;;  %v13103_v34 = vld [vmem:[%s18132_s1 + $0x24] ss:$16 sps:$4 sm:$0x3f]   ;;  %v382_v38 = vld [vmem:[%s18131_s0 + $0xa] sm:$0xff] }
   0xc   :  { %10705 = vmatprep.subr.msk.bf16.mxu1 %vm102_vm0, %v13094_v19  ;;  %157 = vmatprep.mubr.bf16.mxu0 %v14421_v2  ;;  %v13107_v36 = vld [vmem:[%s18132_s1 + $0x20] ss:$16 sps:$4 sm:$0x3f]   ;;  %v13111_v39 = vld [vmem:[%s18132_s1 + $0x84] ss:$16 sps:$4 sm:$0xff]   ;;  %v573_v19 = vlaneseq }
   0xd   :  { %360 = vmatprep.mubr.bf16.mxu1 %v14421_v2  ;;  %10691 = vmatprep.subr.msk.bf16.mxu0 %vm102_vm0, %v13087_v6  ;;  %v381_v37 = vld [vmem:[%s18131_s0 + $0x2] sm:$0xff]  ;;  %v264_v40 = vsel %vm102_vm0, %v13107_v36, 0  ;;  %v383_v45 = vld [vmem:[%s18131_s0 + $0x12] sm:$0xff]  ;;  %v384_v46 = vld [vmem:[%s18131_s0 + $0x1a] sm:$0x3] }
   0xe   :  { %v13109_v41 = vld [vmem:[%s18132_s1 + $0x80] ss:$16 sps:$4 sm:$0xff]   ;;  %v385_v42 = vpack.c.bf16 %v382_v38, %v381_v37  ;;  %v13112_v43 = vld [vmem:[%s18132_s1 + $0xa4] ss:$16 sps:$4 sm:$0x3f]   ;;  %v386_v49 = vpack.c.bf16 %v384_v46, %v383_v45  ;;  %v14705_v20 = vshrl.u32 %v573_v19, 7 }
   0xf   :  { %331 = vmatpush1.bf16.msra.mxu1 %v270_v23  ;;  %171 = vmatpush1.bf16.msra.mxu0 %v110_v14  ;;  %v13114_v44 = vld [vmem:[%s18132_s1 + $0xa0] ss:$16 sps:$4 sm:$0x3f]   ;;  %v13117_v47 = vld [vmem:[%s18133_s2 + $0x1a4] ss:$8 sps:$4 sm:$0xff]  }
  0x10   :  { %275 = vmatprep.subr.bf16.mxu0 %v13099_v24  ;;  %503 = vmatprep.subr.bf16.mxu1 %v13102_v25  ;;  %v439_v48 = vsel %vm102_vm0, %v13114_v44, 0  ;;  %v13115_v50 = vld [vmem:[%s18133_s2 + $0x1a0] ss:$8 sps:$4 sm:$0xff]   ;;  %v13120_v51 = vld [vmem:[%s18133_s2 + $0x1b4] ss:$8 sps:$4 sm:$0xff]  }
  0x11   :  { %v13118_v52 = vld [vmem:[%s18133_s2 + $0x1b0] ss:$8 sps:$4 sm:$0xff]   ;;  %v13123_v53 = vld [vmem:[%s18133_s2 + $0x1c4] ss:$8 sps:$4 sm:$0xff]   ;;  %v13121_v54 = vld [vmem:[%s18133_s2 + $0x1c0] ss:$8 sps:$4 sm:$0xff]  }
  0x12   :  { %10690 = vmatmul.mubr.msk.bf16.gmra.mrb[4].mxu0 %vm95_vm1, %v49_v16  ;;  %10706 = vmatmul.mubr.msk.bf16.vlgmr.msra.gmra.mrb[4].mxu1 %vm95_vm1, %v34_v26  ;;  %v13126_v55 = vld [vmem:[%s18133_s2 + $0x1d4] ss:$8 sps:$4 sm:$0xff]   ;;  %v13124_v56 = vld [vmem:[%s18133_s2 + $0x1d0] ss:$8 sps:$4 sm:$0xff]   ;;  %v13127_v57 = vld [vmem:[%s18133_s2 + $0x1e0] ss:$8 sps:$4 sm:$0xff]  }
  0x13   :  { %200 = vmatprep.mubr.bf16.mxu0 %v14421_v2  ;;  %370 = vmatprep.mubr.bf16.mxu1 %v14421_v2  ;;  %v13129_v58 = vld [vmem:[%s18133_s2 + $0x1e4] ss:$8 sps:$4 sm:$0xff]   ;;  %v13132_v59 = vld [vmem:[%s18133_s2 + $0x1f4] ss:$8 sps:$4 sm:$0xff]   ;;  %v13130_v60 = vld [vmem:[%s18133_s2 + $0x1f0] ss:$8 sps:$4 sm:$0xff]  }
  0x14   :  { %504 = vmatpush1.bf16.msra.mxu1 %v13100_v27  ;;  %v13135_v61 = vld [vmem:[%s18133_s2 + $0x204] ss:$8 sps:$4 sm:$0xff]   ;;  %v13133_v62 = vld [vmem:[%s18133_s2 + $0x200] ss:$8 sps:$4 sm:$0xff]   ;;  %v13138_v63 = vld [vmem:[%s18133_s2 + $0x214] ss:$8 sps:$4 sm:$0xff]  }
  0x15   :  { %10727 = vmatprep.subr.msk.bf16.mxu1 %vm102_vm0, %v13105_v28  ;;  %v13136_v0 = vld [vmem:[%s18133_s2 + $0x210] ss:$8 sps:$4 sm:$0xff]   ;;  %v13141_v1 = vld [vmem:[%s18133_s2 + $0x224] ss:$8 sps:$4 sm:$0xff]   ;;  %v13139_v3 = vld [vmem:[%s18133_s2 + $0x220] ss:$8 sps:$4 sm:$0xff]  }
  0x16   :  { %v13144_v4 = vld [vmem:[%s18133_s2 + $0x234] ss:$8 sps:$4 sm:$0xff]   ;;  %v13142_v5 = vld [vmem:[%s18133_s2 + $0x230] ss:$8 sps:$4 sm:$0xff]   ;;  %v13147_v6 = vld [vmem:[%s18133_s2 + $0x244] ss:$8 sps:$4 sm:$0xff]  }
  0x17   :  { %v13145_v7 = vld [vmem:[%s18133_s2 + $0x240] ss:$8 sps:$4 sm:$0xff]   ;;  %v13150_v8 = vld [vmem:[%s18133_s2 + $0x254] ss:$8 sps:$4 sm:$0xff]   ;;  %v13148_v9 = vld [vmem:[%s18133_s2 + $0x250] ss:$8 sps:$4 sm:$0xff]  }
  0x18   :  { %506 = vmatpush1.bf16.msra.mxu1 %v445_v32  ;;  %v13153_v10 = vld [vmem:[%s18133_s2 + $0x264] ss:$8 sps:$4 sm:$0xff]   ;;  %v13151_v11 = vld [vmem:[%s18133_s2 + $0x260] ss:$8 sps:$4 sm:$0xff]   ;;  %v13156_v12 = vld [vmem:[%s18133_s2 + $0x274] ss:$8 sps:$4 sm:$0xff]  }
  0x19   :  { %4282 = vmatprep.subr.bf16.mxu1 %v14421_v2  ;;  %v13154_v13 = vld [vmem:[%s18133_s2 + $0x270] ss:$8 sps:$4 sm:$0xff]   ;;  %v13159_v14 = vld [vmem:[%s18133_s2 + $0x284] ss:$8 sps:$4 sm:$0xff]   ;;  %v13162_v16 = vld [vmem:[%s18133_s2 + $0x294] ss:$8 sps:$4 sm:$0xff]  }
  0x1a   :  { %10692 = vmatmul.mubr.msk.bf16.vlgmr.msra.gmra.mrb[8].mxu0 %vm95_vm1, %v48_v15  ;;  %10707 = vmatmul.mubr.msk.bf16.gmra.mrb[0].mxu1 %vm95_vm1, %v35_v33  ;;  %v13157_v15 = vld [vmem:[%s18133_s2 + $0x280] ss:$8 sps:$4 sm:$0xff]   ;;  %v13160_v17 = vld [vmem:[%s18133_s2 + $0x290] ss:$8 sps:$4 sm:$0xff]   ;;  %v13165_v18 = vld [vmem:[%s18133_s2 + $0x2a4] ss:$8 sps:$4 sm:$0xff]  }
  0x1b   :  { %276 = vmatpush1.bf16.msra.mxu0 %v13097_v35  ;;  %307 = vmatprep.mubr.bf16.mxu0 %v14421_v2  ;;  %v25_v25 = vld [vmem:[%s18136_s5] ss:$4 sm:$0xf]  ;;  %v587_v27 = vsub.s32 3, %v14705_v20  ;;  %vm784_vm4 = vsmask.f32 7424 }
  0x1c   :  { %10702 = vmatprep.subr.msk.bf16.mxu0 %vm102_vm0, %v13103_v34  ;;  %535 = vmatprep.mubr.bf16.mxu1 %v14421_v2 }
  0x1d   :  { %v14714_v30 = vrot.slane %v25_v25, %v587_v27 }
  0x1f   :  { %278 = vmatpush1.bf16.msra.mxu0 %v264_v40 }
  0x20   :  { %450 = vmatprep.subr.bf16.mxu0 %v13111_v39 }
  0x22   :  { %10703 = vmatmul.mubr.msk.bf16.vlgmr.msra.gmra.mrb[0].mxu0 %vm95_vm1, %v34_v26  ;;  %10728 = vmatmul.mubr.msk.bf16.vlgmr.msra.gmra.mrb[4].mxu1 %vm95_vm1, %v385_v42  ;;  %v583_v26 = vsub.s32 2, %v14705_v20 }
  0x23   :  { %451 = vmatpush1.bf16.msra.mxu0 %v13109_v41  ;;  %317 = vmatprep.mubr.bf16.mxu0 %v14421_v2 }
  0x24   :  { %545 = vmatprep.mubr.bf16.mxu1 %v14421_v2  ;;  %10724 = vmatprep.subr.msk.bf16.mxu0 %vm102_vm0, %v13112_v43  ;;  %v14712_v28 = vrot.slane %v25_v25, %v583_v26 }
  0x27   :  { %453 = vmatpush1.bf16.msra.mxu0 %v439_v48 }
  0x28   :  { %1117 = vmatprep.subr.bf16.mxu0 %v13117_v47 }
  0x2a   :  { %10704 = vmatmul.mubr.msk.bf16.gmra.mrb[4].mxu0 %vm95_vm1, %v35_v33  ;;  %10729 = vmatmul.mubr.msk.bf16.gmra.mrb[0].mxu1 %vm95_vm1, %v386_v49 }
  0x2b   :  { %482 = vmatprep.mubr.bf16.mxu0 %v14421_v2 }
  0x32   :  { %10725 = vmatmul.mubr.msk.bf16.vlgmr.msra.gmra.mrb[0].mxu0 %vm95_vm1, %v385_v42 }
  0x33   :  { %492 = vmatprep.mubr.bf16.mxu0 %v14421_v2  ;;  %1118 = vmatpush1.bf16.msra.mxu0 %v13115_v50 }
  0x34   :  { %1119 = vmatprep.subr.bf16.mxu0 %v13120_v51 }
  0x37   :  { %1120 = vmatpush1.bf16.msra.mxu0 %v13118_v52 }
  0x38   :  { %1121 = vmatprep.subr.bf16.mxu0 %v13123_v53  ;;  %v579_v53 = vsub.s32 1, %v14705_v20 }
  0x3a   :  { %10726 = vmatmul.mubr.msk.bf16.gmra.mrb[4].mxu0 %vm95_vm1, %v386_v49  ;;  %v575_v49 = vsub.s32 0, %v14705_v20 }
  0x3b   :  { %1122 = vmatpush1.bf16.msra.mxu0 %v13121_v54 }
  0x3c   :  { %1123 = vmatprep.subr.bf16.mxu0 %v13126_v55 }
  0x3f   :  { %1124 = vmatpush1.bf16.msra.mxu0 %v13124_v56 }
  0x40   :  { %1125 = vmatprep.subr.bf16.mxu0 %v13129_v58 }
  0x43   :  { %1126 = vmatpush1.bf16.msra.mxu0 %v13127_v57 }
  0x44   :  { %1127 = vmatprep.subr.bf16.mxu0 %v13132_v59 }
  0x47   :  { %1128 = vmatpush1.bf16.msra.mxu0 %v13130_v60  ;;  %v14736_v60 = vrot.slane %v25_v25, %v575_v49 }
  0x48   :  { %1129 = vmatprep.subr.bf16.mxu0 %v13135_v61 }
  0x4b   :  { %1130 = vmatpush1.bf16.msra.mxu0 %v13133_v62  ;;  %v14741_v62 = vrot.slane %v25_v25, %v579_v53 }
  0x4c   :  { %1131 = vmatprep.subr.bf16.mxu0 %v13138_v63 }
  0x4f   :  { %1132 = vmatpush1.bf16.msra.mxu0 %v13136_v0 }
  0x50   :  { %1133 = vmatprep.subr.bf16.mxu0 %v13141_v1 }
  0x53   :  { %1134 = vmatpush1.bf16.msra.mxu0 %v13139_v3 }
  0x54   :  { %1135 = vmatprep.subr.bf16.mxu0 %v13144_v4 }
  0x57   :  { %1136 = vmatpush1.bf16.msra.mxu0 %v13142_v5 }
  0x58   :  { %1137 = vmatprep.subr.bf16.mxu0 %v13147_v6 }
  0x5b   :  { %1138 = vmatpush1.bf16.msra.mxu0 %v13145_v7 }
  0x5c   :  { %1139 = vmatprep.subr.bf16.mxu0 %v13150_v8 }
  0x5f   :  { %1140 = vmatpush1.bf16.msra.mxu0 %v13148_v9 }
  0x60   :  { %1141 = vmatprep.subr.bf16.mxu0 %v13153_v10 }
  0x63   :  { %1142 = vmatpush1.bf16.msra.mxu0 %v13151_v11 }
  0x64   :  { %1143 = vmatprep.subr.bf16.mxu0 %v13156_v12 }
  0x67   :  { %1144 = vmatpush1.bf16.msra.mxu0 %v13154_v13 }
  0x68   :  { %1145 = vmatprep.subr.bf16.mxu0 %v13159_v14 }
  0x6b   :  { %1146 = vmatpush1.bf16.msra.mxu0 %v13157_v15 }
  0x6c   :  { %1147 = vmatprep.subr.bf16.mxu0 %v13162_v16 }
  0x6f   :  { %1148 = vmatpush1.bf16.msra.mxu0 %v13160_v17 }
  0x70   :  { %1168 = vmatprep.subr.bf16.mxu0 %v13165_v18 }
  0xed   :  { %v202_v21 = vpop.f32.mrb[8].mxu0 }
  0xee   :  { %v204_v22 = vpop.f32.mrb[9].mxu0 }
  0xef   :  { %v206_v23 = vpop.f32.mrb[10].mxu0 }
  0xf0   :  { %v208_v24 = vpop.f32.mrb[11].mxu0 }
  0xf5   :  { %v537_v29 = vpop.f32.mrb[4].mxu1 }
  0xf6   :  { %v12889_v31 = vadd.f32 %v537_v29, %v202_v21  ;;  %v539_v32 = vpop.f32.mrb[5].mxu1 }
  0xf7   :  { %v12890_v33 = vadd.f32 %v539_v32, %v204_v22  ;;  %v541_v34 = vpop.f32.mrb[6].mxu1 }
  0xf8   :  { %v595_v35 = vadd.f32 %v12889_v31, %v14712_v28  ;;  %v12891_v36 = vadd.f32 %v541_v34, %v206_v23  ;;  %v543_v37 = vpop.f32.mrb[7].mxu1 }
  0xf9   :  { %v596_v38 = vadd.f32 %v12890_v33, %v14714_v30  ;;  %v12892_v39 = vadd.f32 %v543_v37, %v208_v24 }
  0xfa   :  { %v611_v40 = vmax.f32 %v595_v35, 0.0  ;;  %v599_v41 = vadd.f32 %v12891_v36, %v14712_v28 }
  0xfb   :  { %v612_v42 = vmax.f32 %v596_v38, 0.0  ;;  %v600_v43 = vadd.f32 %v12892_v39, %v14714_v30 }
  0xfc   :  { %627 = vst [vmem:[#allocation2 + $0x10] sm:$0xff] %v611_v40  ;;  %v14720_v44 = vmax.f32 %v599_v41, 0.0 }
  0xfd   :  { %629 = vst.msk [vmem:[#allocation2 + $0x18] sm:$0xff] %vm628_vm2, %v612_v42  ;;  %v616_v45 = vmax.f32 %v600_v43, 0.0  ;;  %v547_v46 = vpop.f32.mrb[0].mxu1 }
  0xfe   :  { %632 = vst [vmem:[#allocation2 + $0x30] sm:$0xff] %v14720_v44  ;;  %v603_v47 = vadd.f32 %v14712_v28, %v547_v46  ;;  %v549_v48 = vpop.f32.mrb[1].mxu1  ;;  %v14727_v50 = vpack.c.bf16 %v14720_v44, %v611_v40 }
  0xff   :  { %633 = vst.msk [vmem:[#allocation2 + $0x38] sm:$0xff] %vm628_vm2, %v616_v45  ;;  %v604_v51 = vadd.f32 %v14714_v30, %v549_v48  ;;  %v551_v52 = vpop.f32.mrb[2].mxu1 }
 0x100   :  { %v619_v54 = vmax.f32 %v603_v47, 0.0  ;;  %v607_v55 = vadd.f32 %v14712_v28, %v551_v52  ;;  %v553_v56 = vpop.f32.mrb[3].mxu1 }
 0x101   :  { %v620_v57 = vmax.f32 %v604_v51, 0.0  ;;  %v608_v58 = vadd.f32 %v14714_v30, %v553_v56 }
 0x102   :  { %636 = vst [vmem:[#allocation2 + $0x50] sm:$0xff] %v619_v54  ;;  %v623_v59 = vmax.f32 %v607_v55, 0.0 }
 0x103   :  { %637 = vst.msk [vmem:[#allocation2 + $0x58] sm:$0xff] %vm628_vm2, %v620_v57  ;;  %v624_v61 = vmax.f32 %v608_v58, 0.0  ;;  %v13163_v58 = vld [vmem:[%s18133_s2 + $0x2a0] ss:$8 sps:$4 sm:$0xff]  }
 0x104   :  { %640 = vst [vmem:[#allocation2 + $0x70] sm:$0x3] %v623_v59  ;;  %v718_v43 = vld [vmem:[#allocation2 + $0x18] sm:$0xfe] }
 0x105   :  { %642 = vst.msk [vmem:[#allocation2 + $0x78] sm:$0x3] %vm641_vm3, %v624_v61  ;;  %v484_v63 = vpop.f32.mrb[0].mxu0 }
 0x106   :  { %v593_v0 = vadd.f32 %v14736_v60, %v484_v63  ;;  %v486_v1 = vpop.f32.mrb[1].mxu0  ;;  %v14756_v38 = vld [vmem:[#allocation2 + $0x38] sm:$0xff] }
 0x107   :  { %v594_v3 = vadd.f32 %v14741_v62, %v486_v1  ;;  %v488_v4 = vpop.f32.mrb[2].mxu0  ;;  %v726_v48 = vpack.c.bf16 %v14756_v38, %v718_v43 }
 0x108   :  { %v609_v5 = vmax.f32 %v593_v0, 0.0  ;;  %v597_v6 = vadd.f32 %v14736_v60, %v488_v4  ;;  %v490_v7 = vpop.f32.mrb[3].mxu0  ;;  %v13168_v0 = vld [vmem:[%s18133_s2 + $0x2b4] ss:$8 sps:$4 sm:$0xff]  }
 0x109   :  { %v610_v8 = vmax.f32 %v594_v3, 0.0  ;;  %v598_v9 = vadd.f32 %v14741_v62, %v490_v7  ;;  %v824_v1 = vshll.u32 %v726_v48, 16 }
 0x10a   :  { %625 = vst [vmem:[#allocation2] sm:$0xff] %v609_v5  ;;  %v613_v10 = vmax.f32 %v597_v6, 0.0  ;;  %v722_v45 = vld [vmem:[#allocation2 + $0x58] sm:$0x1f] }
 0x10b   :  { %626 = vst [vmem:[#allocation2 + $0x8] sm:$0xff] %v610_v8  ;;  %v614_v11 = vmax.f32 %v598_v9, 0.0  ;;  %v14759_v57 = vpack.c.bf16 %v722_v45, %v722_v45  ;;  %v13171_v6 = vld [vmem:[%s18133_s2 + $0x2c4] ss:$8 sps:$4 sm:$0xff]   ;;  %v826_v7 = vrot.slane %v824_v1, 1  ;;  %v822_v9 = vshrl.u32 %v726_v48, 16 }
 0x10c   :  { %630 = vst [vmem:[#allocation2 + $0x20] sm:$0xff] %v613_v10  ;;  %v14748_v12 = vpack.c.bf16 %v613_v10, %v609_v5  ;;  %v13166_v5 = vld [vmem:[%s18133_s2 + $0x2b0] ss:$8 sps:$4 sm:$0xff]   ;;  %v13198_v48 = vld [vmem:[%s18133_s2 + $0x14] ss:$8 sps:$4 sm:$0xff]  }
 0x10d   :  { %631 = vst [vmem:[#allocation2 + $0x28] sm:$0xff] %v614_v11  ;;  %v494_v13 = vpop.f32.mrb[4].mxu0  ;;  %v14750_v14 = vpack.c.bf16 %v614_v11, %v610_v8  ;;  %v829_v4 = vshll.u32 %v14759_v57, 16  ;;  %v842_v45 = vshrl.u32 %v14759_v57, 16  ;;  %v13199_v57 = vld [vmem:[%s18133_s2 + $0x20] ss:$8 sps:$4 sm:$0xff]  }
 0x10e   :  { %v601_v15 = vadd.f32 %v14736_v60, %v494_v13  ;;  %v496_v16 = vpop.f32.mrb[5].mxu0  ;;  %v13210_v1 = vld [vmem:[%s18133_s2 + $0x54] ss:$8 sps:$4 sm:$0xff]  }
 0x10f   :  { %v602_v17 = vadd.f32 %v14741_v62, %v496_v16  ;;  %v498_v18 = vpop.f32.mrb[6].mxu0  ;;  %v13174_v16 = vld [vmem:[%s18133_s2 + $0x2d4] ss:$8 sps:$4 sm:$0xff]  }
 0x110   :  { %v617_v19 = vmax.f32 %v601_v15, 0.0  ;;  %v605_v21 = vadd.f32 %v14736_v60, %v498_v18  ;;  %v500_v22 = vpop.f32.mrb[7].mxu0  ;;  %v827_v15 = vor.u32 %v826_v7, %v822_v9  ;;  %v13172_v18 = vld [vmem:[%s18133_s2 + $0x2d0] ss:$8 sps:$4 sm:$0xff]   ;;  %v13219_v7 = vld [vmem:[%s18133_s2 + $0x84] ss:$8 sps:$4 sm:$0xff]  }
 0x111   :  { %v618_v23 = vmax.f32 %v602_v17, 0.0  ;;  %v606_v24 = vadd.f32 %v14741_v62, %v500_v22  ;;  %v715_v25 = vld [vmem:[#allocation2] sm:$0xfe]  ;;  %v13180_v22 = vld [vmem:[%s18133_s2 + $0x2f4] ss:$8 sps:$4 sm:$0xff]  }
 0x112   :  { %634 = vst [vmem:[#allocation2 + $0x40] sm:$0xff] %v617_v19  ;;  %v621_v26 = vmax.f32 %v605_v21, 0.0  ;;  %v716_v27 = vld [vmem:[#allocation2 + $0x8] sm:$0xfe]  ;;  %v723_v32 = vpack.c.bf16 %v613_v10, %v715_v25  ;;  %v831_v10 = vrot.slane %v829_v4, 1 }
 0x113   :  { %635 = vst [vmem:[#allocation2 + $0x48] sm:$0xff] %v618_v23  ;;  %v622_v29 = vmax.f32 %v606_v24, 0.0  ;;  %v724_v31 = vpack.c.bf16 %v614_v11, %v716_v27  ;;  %v13169_v11 = vld [vmem:[%s18133_s2 + $0x2c0] ss:$8 sps:$4 sm:$0xff]   ;;  %v13177_v19 = vld [vmem:[%s18133_s2 + $0x2e4] ss:$8 sps:$4 sm:$0xff]  }
 0x114   :  { %638 = vst [vmem:[#allocation2 + $0x60] sm:$0x3] %v621_v26  ;;  %v788_v34 = vshll.u32 %v723_v32, 16  ;;  %v786_v51 = vshrl.u32 %v723_v32, 16  ;;  %v832_v17 = vsel %vm784_vm4, %v827_v15, %v831_v10  ;;  %v13175_v21 = vld [vmem:[%s18133_s2 + $0x2e0] ss:$8 sps:$4 sm:$0xff]  }
 0x115   :  { %639 = vst [vmem:[#allocation2 + $0x68] sm:$0x3] %v622_v29  ;;  %v800_v33 = vshll.u32 %v724_v31, 16  ;;  %v798_v46 = vshrl.u32 %v724_v31, 16  ;;  %v13178_v23 = vld [vmem:[%s18133_s2 + $0x2f0] ss:$8 sps:$4 sm:$0xff]  }
 0x116   :  { %v790_v41 = vrot.slane %v788_v34, 1  ;;  %v13183_v24 = vld [vmem:[%s18133_s2 + $0x304] ss:$8 sps:$4 sm:$0xff]   ;;  %v13181_v25 = vld [vmem:[%s18133_s2 + $0x300] ss:$8 sps:$4 sm:$0xff]  }
 0x117   :  { %v802_v40 = vrot.slane %v800_v33, 1  ;;  %v13186_v26 = vld [vmem:[%s18133_s2 + $0x314] ss:$8 sps:$4 sm:$0xff]   ;;  %v13184_v31 = vld [vmem:[%s18133_s2 + $0x310] ss:$8 sps:$4 sm:$0xff]  }
 0x118   :  { %v791_v59 = vor.u32 %v790_v41, %v786_v51  ;;  %v717_v27 = vld [vmem:[#allocation2 + $0x10] sm:$0xfe]  ;;  %v13189_v32 = vld [vmem:[%s18133_s2 + $0x324] ss:$8 sps:$4 sm:$0xff]   ;;  %v13211_v4 = vld [vmem:[%s18133_s2 + $0x60] ss:$8 sps:$4 sm:$0xff]  }
 0x119   :  { %v719_v35 = vld [vmem:[#allocation2 + $0x40] sm:$0x1f]  ;;  %v803_v54 = vor.u32 %v802_v40, %v798_v46  ;;  %v721_v29 = vld [vmem:[#allocation2 + $0x50] sm:$0x1f]  ;;  %v725_v33 = vpack.c.bf16 %v14720_v44, %v717_v27 }
 0x11a   :  { %v720_v36 = vld [vmem:[#allocation2 + $0x48] sm:$0x1f]  ;;  %v727_v37 = vpack.c.bf16 %v719_v35, %v719_v35  ;;  %v729_v34 = vpack.c.bf16 %v721_v29, %v721_v29  ;;  %v13187_v35 = vld [vmem:[%s18133_s2 + $0x320] ss:$8 sps:$4 sm:$0xff]   ;;  %v13195_v41 = vld [vmem:[%s18133_s2 + $0x4] ss:$8 sps:$4 sm:$0xff]  }
 0x11b   :  { %v728_v39 = vpack.c.bf16 %v720_v36, %v720_v36  ;;  %v13192_v36 = vld [vmem:[%s18133_s2 + $0x334] ss:$8 sps:$4 sm:$0xff]   ;;  %v13190_v40 = vld [vmem:[%s18133_s2 + $0x330] ss:$8 sps:$4 sm:$0xff]   ;;  %v13241_v29 = vld [vmem:[%s18133_s2 + $0x100] ss:$8 sps:$4 sm:$0xff]  }
 0x11c   :  { %v793_v42 = vshll.u32 %v727_v37, 16  ;;  %v833_v8 = vshrl.u32 %v727_v37, 16  ;;  %v812_v37 = vshll.u32 %v725_v33, 16  ;;  %v13222_v9 = vld [vmem:[%s18133_s2 + $0x94] ss:$8 sps:$4 sm:$0xff]  }
 0x11d   :  { %v805_v47 = vshll.u32 %v728_v39, 16  ;;  %v836_v56 = vshrl.u32 %v728_v39, 16  ;;  %v817_v39 = vshll.u32 %v729_v34, 16  ;;  %v13228_v15 = vld [vmem:[%s18133_s2 + $0xb4] ss:$8 sps:$4 sm:$0xff]  }
 0x11e   :  { %v795_v52 = vrot.slane %v793_v42, 1  ;;  %v814_v44 = vrot.slane %v812_v37, 1  ;;  %v810_v42 = vshrl.u32 %v725_v33, 16  ;;  %v652_v27 = vld [vmem:[#allocation2 + $0x48] sm:$0xf] }
 0x11f   :  { %v807_v55 = vrot.slane %v805_v47, 1  ;;  %v819_v43 = vrot.slane %v817_v39, 1  ;;  %v13193_v47 = vld [vmem:[%s18133_s2] ss:$8 sps:$4 sm:$0xff]   ;;  %v13244_v33 = vld [vmem:[%s18133_s2 + $0x110] ss:$8 sps:$4 sm:$0xff]  }
 0x120   :  { %v796_v3 = vsel %vm784_vm4, %v791_v59, %v795_v52  ;;  %v835_v13 = vor.u32 %v833_v8, %v795_v52  ;;  %v815_v46 = vor.u32 %v814_v44, %v810_v42  ;;  %v844_v52 = vor.u32 %v842_v45, %v831_v10  ;;  %v13217_v8 = vld [vmem:[%s18133_s2 + $0x80] ss:$8 sps:$4 sm:$0xff]   ;;  %v13220_v10 = vld [vmem:[%s18133_s2 + $0x90] ss:$8 sps:$4 sm:$0xff]   ;;  %v13252_v39 = vld [vmem:[%s18133_s2 + $0x134] ss:$8 sps:$4 sm:$0xff]  }
 0x121   :  { %v808_v61 = vsel %vm784_vm4, %v803_v54, %v807_v55  ;;  %v838_v63 = vor.u32 %v836_v56, %v807_v55  ;;  %v13196_v54 = vld [vmem:[%s18133_s2 + $0x10] ss:$8 sps:$4 sm:$0xff]   ;;  %v13201_v55 = vld [vmem:[%s18133_s2 + $0x24] ss:$8 sps:$4 sm:$0xff]   ;;  %v839_v56 = vshrl.u32 %v729_v34, 16 }
 0x122   :  { %1149 = vmatprep.mubr.bf16.mxu0 %v808_v61  ;;  %v820_v51 = vsel %vm784_vm4, %v815_v46, %v819_v43  ;;  %v13202_v61 = vld [vmem:[%s18133_s2 + $0x30] ss:$8 sps:$4 sm:$0xff]   ;;  %v651_v34 = vld [vmem:[#allocation2 + $0x40] sm:$0xf]  ;;  %v13261_v45 = vld [vmem:[%s18133_s2 + $0x164] ss:$8 sps:$4 sm:$0xff]  }
 0x123   :  { %1150 = vmatmul.mubr.bf16.vlgmr.msra.gmra.mrb[12].mxu0 %v796_v3  ;;  %v841_v59 = vor.u32 %v839_v56, %v819_v43  ;;  %v13213_v3 = vld [vmem:[%s18133_s2 + $0x64] ss:$8 sps:$4 sm:$0xff]   ;;  %v13247_v37 = vld [vmem:[%s18133_s2 + $0x120] ss:$8 sps:$4 sm:$0xff]   ;;  %v13250_v44 = vld [vmem:[%s18133_s2 + $0x130] ss:$8 sps:$4 sm:$0xff]  }
 0x124   :  { %1169 = vmatpush1.bf16.msra.mxu0 %v13163_v58  ;;  %1159 = vmatprep.mubr.bf16.mxu0 %v838_v63  ;;  %v13204_v58 = vld [vmem:[%s18133_s2 + $0x34] ss:$8 sps:$4 sm:$0xff]   ;;  %v13207_v63 = vld [vmem:[%s18133_s2 + $0x44] ss:$8 sps:$4 sm:$0xff]   ;;  %v13253_v42 = vld [vmem:[%s18133_s2 + $0x140] ss:$8 sps:$4 sm:$0xff]  }
 0x125   :  { %1170 = vmatprep.subr.bf16.mxu0 %v13168_v0  ;;  %v13205_v0 = vld [vmem:[%s18133_s2 + $0x40] ss:$8 sps:$4 sm:$0xff]   ;;  %v13256_v43 = vld [vmem:[%s18133_s2 + $0x150] ss:$8 sps:$4 sm:$0xff]  }
 0x126   :  { %v13259_v46 = vld [vmem:[%s18133_s2 + $0x160] ss:$8 sps:$4 sm:$0xff]  }
 0x128   :  { %1171 = vmatpush1.bf16.msra.mxu0 %v13166_v5  ;;  %v13216_v5 = vld [vmem:[%s18133_s2 + $0x74] ss:$8 sps:$4 sm:$0xff]  }
 0x129   :  { %1172 = vmatprep.subr.bf16.mxu0 %v13171_v6  ;;  %v13214_v6 = vld [vmem:[%s18133_s2 + $0x70] ss:$8 sps:$4 sm:$0xff]  }
 0x12b   :  { %1160 = vmatmul.mubr.bf16.gmra.mrb[16].mxu0 %v835_v13  ;;  %v13223_v13 = vld [vmem:[%s18133_s2 + $0xa0] ss:$8 sps:$4 sm:$0xff]  }
 0x12c   :  { %1173 = vmatpush1.bf16.msra.mxu0 %v13169_v11  ;;  %10834 = vmatprep.mubr.msk.bf16.mxu0 %vm628_vm2, %v832_v17  ;;  %v13225_v11 = vld [vmem:[%s18133_s2 + $0xa4] ss:$8 sps:$4 sm:$0xff]  }
 0x12d   :  { %1174 = vmatprep.subr.bf16.mxu0 %v13174_v16  ;;  %v13226_v16 = vld [vmem:[%s18133_s2 + $0xb0] ss:$8 sps:$4 sm:$0xff]   ;;  %v13231_v17 = vld [vmem:[%s18133_s2 + $0xc4] ss:$8 sps:$4 sm:$0xff]  }
 0x130   :  { %1175 = vmatpush1.bf16.msra.mxu0 %v13172_v18  ;;  %v13229_v18 = vld [vmem:[%s18133_s2 + $0xc0] ss:$8 sps:$4 sm:$0xff]  }
 0x131   :  { %1176 = vmatprep.subr.bf16.mxu0 %v13177_v19  ;;  %v13234_v19 = vld [vmem:[%s18133_s2 + $0xd4] ss:$8 sps:$4 sm:$0xff]  }
 0x134   :  { %1177 = vmatpush1.bf16.msra.mxu0 %v13175_v21  ;;  %v13232_v21 = vld [vmem:[%s18133_s2 + $0xd0] ss:$8 sps:$4 sm:$0xff]  }
 0x135   :  { %1178 = vmatprep.subr.bf16.mxu0 %v13180_v22  ;;  %v13237_v22 = vld [vmem:[%s18133_s2 + $0xe4] ss:$8 sps:$4 sm:$0xff]  }
 0x138   :  { %1179 = vmatpush1.bf16.msra.mxu0 %v13178_v23  ;;  %v13235_v23 = vld [vmem:[%s18133_s2 + $0xe0] ss:$8 sps:$4 sm:$0xff]  }
 0x139   :  { %1180 = vmatprep.subr.bf16.mxu0 %v13183_v24  ;;  %v13240_v24 = vld [vmem:[%s18133_s2 + $0xf4] ss:$8 sps:$4 sm:$0xff]  }
 0x13c   :  { %1181 = vmatpush1.bf16.msra.mxu0 %v13181_v25  ;;  %v13238_v25 = vld [vmem:[%s18133_s2 + $0xf0] ss:$8 sps:$4 sm:$0xff]  }
 0x13d   :  { %1182 = vmatprep.subr.bf16.mxu0 %v13186_v26  ;;  %v13243_v26 = vld [vmem:[%s18133_s2 + $0x104] ss:$8 sps:$4 sm:$0xff]  }
 0x140   :  { %1183 = vmatpush1.bf16.msra.mxu0 %v13184_v31  ;;  %v13246_v31 = vld [vmem:[%s18133_s2 + $0x114] ss:$8 sps:$4 sm:$0xff]  }
 0x141   :  { %1184 = vmatprep.subr.bf16.mxu0 %v13189_v32  ;;  %v660_v32 = vpack.c.bf16 %v652_v27, %v652_v27 }
 0x144   :  { %1185 = vmatpush1.bf16.msra.mxu0 %v13187_v35  ;;  %v13249_v35 = vld [vmem:[%s18133_s2 + $0x124] ss:$8 sps:$4 sm:$0xff]  }
 0x145   :  { %1186 = vmatprep.subr.bf16.mxu0 %v13192_v36  ;;  %v646_v36 = vld [vmem:[#allocation2 + $0x18] sm:$0xff] }
 0x148   :  { %1187 = vmatpush1.bf16.msra.mxu0 %v13190_v40  ;;  %v659_v40 = vpack.c.bf16 %v651_v34, %v651_v34 }
 0x149   :  { %1485 = vmatprep.subr.bf16.mxu0 %v13195_v41  ;;  %v13255_v41 = vld [vmem:[%s18133_s2 + $0x144] ss:$8 sps:$4 sm:$0xff]  }
 0x14b   :  { %1201 = vmatmul.mubr.bf16.vlgmr.msra.gmra.mrb[12].mxu0 %v820_v51  ;;  %v1592_v51 = vld [vmem:[#allocation2 + $0x48] sm:$0x3f] }
 0x14c   :  { %10835 = vmatprep.mubr.msk.bf16.mxu0 %vm628_vm2, %v844_v52  ;;  %1486 = vmatpush1.bf16.msra.mxu0 %v13193_v47  ;;  %v13264_v47 = vld [vmem:[%s18133_s2 + $0x174] ss:$8 sps:$4 sm:$0xff]   ;;  %v13262_v52 = vld [vmem:[%s18133_s2 + $0x170] ss:$8 sps:$4 sm:$0xff]  }
 0x14d   :  { %1487 = vmatprep.subr.bf16.mxu0 %v13198_v48  ;;  %v1588_v48 = vld [vmem:[#allocation2 + $0x8] sm:$0xfc] }
 0x150   :  { %1488 = vmatpush1.bf16.msra.mxu0 %v13196_v54  ;;  %v13267_v54 = vld [vmem:[%s18133_s2 + $0x184] ss:$8 sps:$4 sm:$0xff]  }
 0x151   :  { %1489 = vmatprep.subr.bf16.mxu0 %v13201_v55  ;;  %v14978_v55 = vld [vmem:[#allocation2 + $0x28] sm:$0xff] }
 0x152   :  { %v1596_v56 = vpack.c.bf16 %v14978_v55, %v1588_v48 }
 0x153   :  { %1211 = vmatmul.mubr.bf16.gmra.mrb[20].mxu0 %v841_v59  ;;  %v13270_v59 = vld [vmem:[%s18133_s2 + $0x194] ss:$8 sps:$4 sm:$0xff]  }
 0x154   :  { %1490 = vmatpush1.bf16.msra.mxu0 %v13199_v57  ;;  %1517 = vmatprep.mubr.bf16.mxu0 %v14750_v14  ;;  %v13208_v14 = vld [vmem:[%s18133_s2 + $0x50] ss:$8 sps:$4 sm:$0xff]   ;;  %v1600_v57 = vpack.c.bf16 %v1592_v51, %v1592_v51 }
 0x155   :  { %1491 = vmatprep.subr.bf16.mxu0 %v13204_v58  ;;  %v13265_v58 = vld [vmem:[%s18133_s2 + $0x180] ss:$8 sps:$4 sm:$0xff]  }
 0x158   :  { %1492 = vmatpush1.bf16.msra.mxu0 %v13202_v61  ;;  %v1668_v61 = vrot.slane %v1596_v56, 1 }
 0x159   :  { %1493 = vmatprep.subr.bf16.mxu0 %v13207_v63  ;;  %v14987_v63 = vrot.slane %v1600_v57, 1 }
 0x15c   :  { %1494 = vmatpush1.bf16.msra.mxu0 %v13205_v0  ;;  %v13268_v0 = vld [vmem:[%s18133_s2 + $0x190] ss:$8 sps:$4 sm:$0xff]  }
 0x15d   :  { %1495 = vmatprep.subr.bf16.mxu0 %v13210_v1  ;;  %v13273_v1 = vld [vmem:[%s18133_s2 + $0x344] ss:$8 sps:$4 sm:$0xff]  }
 0x160   :  { %1496 = vmatpush1.bf16.msra.mxu0 %v13208_v14  ;;  %v654_v14 = vld [vmem:[#allocation2 + $0x58] sm:$0xf] }
 0x161   :  { %1497 = vmatprep.subr.bf16.mxu0 %v13213_v3  ;;  %v13271_v3 = vld [vmem:[%s18133_s2 + $0x340] ss:$8 sps:$4 sm:$0xff]  }
 0x164   :  { %1498 = vmatpush1.bf16.msra.mxu0 %v13211_v4  ;;  %v13276_v4 = vld [vmem:[%s18133_s2 + $0x354] ss:$8 sps:$4 sm:$0xff]  }
 0x165   :  { %1499 = vmatprep.subr.bf16.mxu0 %v13216_v5  ;;  %v662_v5 = vpack.c.bf16 %v654_v14, %v654_v14 }
 0x168   :  { %1500 = vmatpush1.bf16.msra.mxu0 %v13214_v6  ;;  %v13274_v6 = vld [vmem:[%s18133_s2 + $0x350] ss:$8 sps:$4 sm:$0xff]  }
 0x169   :  { %1501 = vmatprep.subr.bf16.mxu0 %v13219_v7  ;;  %v653_v7 = vld [vmem:[#allocation2 + $0x50] sm:$0xf] }
 0x16c   :  { %1502 = vmatpush1.bf16.msra.mxu0 %v13217_v8  ;;  %v13279_v8 = vld [vmem:[%s18133_s2 + $0x364] ss:$8 sps:$4 sm:$0xff]  }
 0x16d   :  { %1503 = vmatprep.subr.bf16.mxu0 %v13222_v9  ;;  %v13277_v9 = vld [vmem:[%s18133_s2 + $0x360] ss:$8 sps:$4 sm:$0xff]  }
 0x170   :  { %1504 = vmatpush1.bf16.msra.mxu0 %v13220_v10  ;;  %v661_v10 = vpack.c.bf16 %v653_v7, %v653_v7 }
 0x171   :  { %1505 = vmatprep.subr.bf16.mxu0 %v13225_v11  ;;  %v1670_v11 = vsel %vm1664_vm5, %v1668_v61, %v14987_v63 }
 0x174   :  { %1506 = vmatpush1.bf16.msra.mxu0 %v13223_v13  ;;  %v13280_v13 = vld [vmem:[%s18133_s2 + $0x370] ss:$8 sps:$4 sm:$0xff]  }
 0x175   :  { %1507 = vmatprep.subr.bf16.mxu0 %v13228_v15  ;;  %v13285_v15 = vld [vmem:[%s18133_s2 + $0x384] ss:$8 sps:$4 sm:$0xff]  }
 0x178   :  { %1508 = vmatpush1.bf16.msra.mxu0 %v13226_v16  ;;  %v13283_v16 = vld [vmem:[%s18133_s2 + $0x380] ss:$8 sps:$4 sm:$0xff]  }
 0x179   :  { %1509 = vmatprep.subr.bf16.mxu0 %v13231_v17  ;;  %v13288_v17 = vld [vmem:[%s18133_s2 + $0x394] ss:$8 sps:$4 sm:$0xff]  }
 0x17c   :  { %1510 = vmatpush1.bf16.msra.mxu0 %v13229_v18  ;;  %v13286_v18 = vld [vmem:[%s18133_s2 + $0x390] ss:$8 sps:$4 sm:$0xff]  }
 0x17d   :  { %1511 = vmatprep.subr.bf16.mxu0 %v13234_v19  ;;  %v13291_v19 = vld [vmem:[%s18133_s2 + $0x3a4] ss:$8 sps:$4 sm:$0xff]  }
 0x180   :  { %1512 = vmatpush1.bf16.msra.mxu0 %v13232_v21 }
 0x181   :  { %1513 = vmatprep.subr.bf16.mxu0 %v13237_v22 }
 0x184   :  { %1514 = vmatpush1.bf16.msra.mxu0 %v13235_v23 }
 0x185   :  { %1515 = vmatprep.subr.bf16.mxu0 %v13240_v24 }
 0x188   :  { %1516 = vmatpush1.bf16.msra.mxu0 %v13238_v25 }
 0x189   :  { %1536 = vmatprep.subr.bf16.mxu0 %v13243_v26 }
 0x18b   :  { %1518 = vmatmul.mubr.bf16.vlgmr.msra.gmra.mrb[12].mxu0 %v14748_v12  ;;  %v658_v12 = vpack.c.bf16 %v14756_v38, %v646_v36  ;;  %v13258_v38 = vld [vmem:[%s18133_s2 + $0x154] ss:$8 sps:$4 sm:$0xff]  }
 0x18c   :  { %1527 = vmatprep.mubr.bf16.mxu0 %v660_v32  ;;  %1537 = vmatpush1.bf16.msra.mxu0 %v13241_v29 }
 0x18d   :  { %1538 = vmatprep.subr.bf16.mxu0 %v13246_v31 }
 0x190   :  { %1539 = vmatpush1.bf16.msra.mxu0 %v13244_v33 }
 0x191   :  { %1540 = vmatprep.subr.bf16.mxu0 %v13249_v35 }
 0x193   :  { %1528 = vmatmul.mubr.bf16.gmra.mrb[24].mxu0 %v659_v40 }
 0x194   :  { %1541 = vmatpush1.bf16.msra.mxu0 %v13247_v37  ;;  %10888 = vmatprep.mubr.msk.bf16.mxu0 %vm628_vm2, %v658_v12 }
 0x195   :  { %1542 = vmatprep.subr.bf16.mxu0 %v13252_v39 }
 0x198   :  { %1543 = vmatpush1.bf16.msra.mxu0 %v13250_v44 }
 0x199   :  { %1544 = vmatprep.subr.bf16.mxu0 %v13255_v41 }
 0x19c   :  { %1545 = vmatpush1.bf16.msra.mxu0 %v13253_v42 }
 0x19d   :  { %1546 = vmatprep.subr.bf16.mxu0 %v13258_v38 }
 0x1a0   :  { %1547 = vmatpush1.bf16.msra.mxu0 %v13256_v43 }
 0x1a1   :  { %1548 = vmatprep.subr.bf16.mxu0 %v13261_v45 }
 0x1a4   :  { %1549 = vmatpush1.bf16.msra.mxu0 %v13259_v46 }
 0x1a5   :  { %1550 = vmatprep.subr.bf16.mxu0 %v13264_v47 }
 0x1a8   :  { %1551 = vmatpush1.bf16.msra.mxu0 %v13262_v52 }
 0x1a9   :  { %1552 = vmatprep.subr.bf16.mxu0 %v13267_v54 }
 0x1ac   :  { %1553 = vmatpush1.bf16.msra.mxu0 %v13265_v58 }
 0x1ad   :  { %1554 = vmatprep.subr.bf16.mxu0 %v13270_v59 }
 0x1b0   :  { %1555 = vmatpush1.bf16.msra.mxu0 %v13268_v0 }
 0x1b1   :  { %1949 = vmatprep.subr.bf16.mxu0 %v13273_v1 }
 0x1b3   :  { %1569 = vmatmul.mubr.bf16.vlgmr.msra.gmra.mrb[12].mxu0 %v14727_v50  ;;  %v13282_v50 = vld [vmem:[%s18133_s2 + $0x374] ss:$8 sps:$4 sm:$0xff]  }
 0x1b4   :  { %10889 = vmatprep.mubr.msk.bf16.mxu0 %vm628_vm2, %v662_v5  ;;  %1950 = vmatpush1.bf16.msra.mxu0 %v13271_v3 }
 0x1b5   :  { %1951 = vmatprep.subr.bf16.mxu0 %v13276_v4 }
 0x1b8   :  { %1952 = vmatpush1.bf16.msra.mxu0 %v13274_v6 }
 0x1b9   :  { %1953 = vmatprep.subr.bf16.mxu0 %v13279_v8 }
 0x1bb   :  { %1579 = vmatmul.mubr.bf16.gmra.mrb[28].mxu0 %v661_v10 }
 0x1bc   :  { %1954 = vmatpush1.bf16.msra.mxu0 %v13277_v9  ;;  %1981 = vmatprep.mubr.bf16.mxu0 %v1670_v11 }
 0x1bd   :  { %1955 = vmatprep.subr.bf16.mxu0 %v13282_v50 }
 0x1c0   :  { %1956 = vmatpush1.bf16.msra.mxu0 %v13280_v13 }
 0x1c1   :  { %1957 = vmatprep.subr.bf16.mxu0 %v13285_v15 }
 0x1c4   :  { %1958 = vmatpush1.bf16.msra.mxu0 %v13283_v16 }
 0x1c5   :  { %1959 = vmatprep.subr.bf16.mxu0 %v13288_v17 }
 0x1c6   :  { %11 = vsyncpa [#allocation6], 0  ;;  %v13289_v21 = vld [vmem:[%s18133_s2 + $0x3a0] ss:$8 sps:$4 sm:$0xff]   ;;  %v13294_v22 = vld [vmem:[%s18133_s2 + $0x3b4] ss:$8 sps:$4 sm:$0xff]  }
 0x1c7   :  { %v13292_v23 = vld [vmem:[%s18133_s2 + $0x3b0] ss:$8 sps:$4 sm:$0xff]   ;;  %v13297_v24 = vld [vmem:[%s18133_s2 + $0x3c4] ss:$8 sps:$4 sm:$0xff]   ;;  %v13295_v25 = vld [vmem:[%s18133_s2 + $0x3c0] ss:$8 sps:$4 sm:$0xff]  }
 0x1c8   :  { %1960 = vmatpush1.bf16.msra.mxu0 %v13286_v18  ;;  %v13300_v26 = vld [vmem:[%s18133_s2 + $0x3d4] ss:$8 sps:$4 sm:$0xff]   ;;  %v13298_v27 = vld [vmem:[%s18133_s2 + $0x3d0] ss:$8 sps:$4 sm:$0xff]   ;;  %v13303_v29 = vld [vmem:[%s18133_s2 + $0x3e4] ss:$8 sps:$4 sm:$0xff]  }
 0x1c9   :  { %1961 = vmatprep.subr.bf16.mxu0 %v13291_v19  ;;  %v13301_v31 = vld [vmem:[%s18133_s2 + $0x3e0] ss:$8 sps:$4 sm:$0xff]   ;;  %v13306_v32 = vld [vmem:[%s18133_s2 + $0x3f4] ss:$8 sps:$4 sm:$0xff]   ;;  %v13304_v33 = vld [vmem:[%s18133_s2 + $0x3f0] ss:$8 sps:$4 sm:$0xff]  }
 0x1ca   :  { %v13309_v34 = vld [vmem:[%s18133_s2 + $0x404] ss:$8 sps:$4 sm:$0xff]   ;;  %v13307_v35 = vld [vmem:[%s18133_s2 + $0x400] ss:$8 sps:$4 sm:$0xff]   ;;  %v13312_v36 = vld [vmem:[%s18133_s2 + $0x414] ss:$8 sps:$4 sm:$0xff]  }
 0x1cb   :  { %v13310_v37 = vld [vmem:[%s18133_s2 + $0x410] ss:$8 sps:$4 sm:$0xff]   ;;  %v13315_v39 = vld [vmem:[%s18133_s2 + $0x424] ss:$8 sps:$4 sm:$0xff]   ;;  %v13313_v12 = vld [vmem:[%s18133_s2 + $0x420] ss:$8 sps:$4 sm:$0xff]  }
 0x1cc   :  { %1962 = vmatpush1.bf16.msra.mxu0 %v13289_v21  ;;  %v1591_v40 = vld [vmem:[#allocation2 + $0x40] sm:$0x3f]  ;;  %v13318_v44 = vld [vmem:[%s18133_s2 + $0x434] ss:$8 sps:$4 sm:$0xff]   ;;  %v13316_v38 = vld [vmem:[%s18133_s2 + $0x430] ss:$8 sps:$4 sm:$0xff]  }
 0x1cd   :  { %1963 = vmatprep.subr.bf16.mxu0 %v13294_v22  ;;  %v1587_v41 = vld [vmem:[#allocation2] sm:$0xfc]  ;;  %v1599_v42 = vpack.c.bf16 %v1591_v40, %v1591_v40  ;;  %v1594_v52 = vld [vmem:[#allocation2 + $0x58] sm:$0x3f]  ;;  %v13324_v54 = vld [vmem:[%s18133_s2 + $0x454] ss:$8 sps:$4 sm:$0xff]  }
 0x1ce   :  { %v15092_v43 = vld [vmem:[#allocation2 + $0x20] sm:$0xff]  ;;  %v1602_v57 = vpack.c.bf16 %v1594_v52, %v1594_v52  ;;  %v13322_v58 = vld [vmem:[%s18133_s2 + $0x450] ss:$8 sps:$4 sm:$0xff]   ;;  %v1590_v59 = vld [vmem:[#allocation2 + $0x18] sm:$0xfc]  ;;  %vm3648_vm8 = vcmask 1044480  }
 0x1cf   :  { %v1595_v45 = vpack.c.bf16 %v15092_v43, %v1587_v41  ;;  %v13321_v46 = vld [vmem:[%s18133_s2 + $0x444] ss:$8 sps:$4 sm:$0xff]   ;;  %v1666_v47 = vrot.slane %v1599_v42, 1  ;;  %v13319_v51 = vld [vmem:[%s18133_s2 + $0x440] ss:$8 sps:$4 sm:$0xff]   ;;  %vm14423_vm9 = vmmov 0  }
 0x1d0   :  { %1964 = vmatpush1.bf16.msra.mxu0 %v13292_v23  ;;  %v13327_v61 = vld [vmem:[%s18133_s2 + $0x464] ss:$8 sps:$4 sm:$0xff]   ;;  %v15115_v14 = vrot.slane %v1602_v57, 1  ;;  %v13330_v4 = vld [vmem:[%s18133_s2 + $0x474] ss:$8 sps:$4 sm:$0xff]   ;;  %vm4346_vm10 = vcmask 1041408  }
 0x1d1   :  { %1965 = vmatprep.subr.bf16.mxu0 %v13297_v24  ;;  %v1665_v48 = vrot.slane %v1595_v45, 1  ;;  %v15112_v0 = vld [vmem:[#allocation2 + $0x38] sm:$0xff]  ;;  %v13328_v6 = vld [vmem:[%s18133_s2 + $0x470] ss:$8 sps:$4 sm:$0xff]   ;;  %v13336_v13 = vld [vmem:[%s18133_s2 + $0x494] ss:$8 sps:$4 sm:$0xff]  }
 0x1d2   :  { %v1598_v1 = vpack.c.bf16 %v15112_v0, %v1590_v59  ;;  %v13333_v7 = vld [vmem:[%s18133_s2 + $0x484] ss:$8 sps:$4 sm:$0xff]   ;;  %v13331_v10 = vld [vmem:[%s18133_s2 + $0x480] ss:$8 sps:$4 sm:$0xff]   ;;  %v13334_v15 = vld [vmem:[%s18133_s2 + $0x490] ss:$8 sps:$4 sm:$0xff]  }
 0x1d3   :  { %v1667_v56 = vsel %vm1664_vm5, %v1665_v48, %v1666_v47  ;;  %v13339_v16 = vld [vmem:[%s18133_s2 + $0x4a4] ss:$8 sps:$4 sm:$0xff]   ;;  %v13337_v17 = vld [vmem:[%s18133_s2 + $0x4a0] ss:$8 sps:$4 sm:$0xff]   ;;  %v13342_v18 = vld [vmem:[%s18133_s2 + $0x4b4] ss:$8 sps:$4 sm:$0xff]  }
 0x1d4   :  { %1966 = vmatpush1.bf16.msra.mxu0 %v13295_v25  ;;  %v1674_v3 = vrot.slane %v1598_v1, 1  ;;  %v13340_v19 = vld [vmem:[%s18133_s2 + $0x4b0] ss:$8 sps:$4 sm:$0xff]   ;;  %v13345_v21 = vld [vmem:[%s18133_s2 + $0x4c4] ss:$8 sps:$4 sm:$0xff]   ;;  %vm4342_vm11 = vcmask 162816  }
 0x1d5   :  { %1967 = vmatprep.subr.bf16.mxu0 %v13300_v26  ;;  %v1593_v22 = vld [vmem:[#allocation2 + $0x50] sm:$0x3f]  ;;  %v13343_v23 = vld [vmem:[%s18133_s2 + $0x4c0] ss:$8 sps:$4 sm:$0xff]   ;;  %v2062_v24 = vld [vmem:[#allocation2 + $0x48] sm:$0x7f] }
 0x1d6   :  { %v1676_v5 = vsel %vm1664_vm5, %v1674_v3, %v15115_v14  ;;  %v13348_v25 = vld [vmem:[%s18133_s2 + $0x4d4] ss:$8 sps:$4 sm:$0xff]   ;;  %v13352_v48 = vld [vmem:[%s18133_s2 + $0x4f0] ss:$8 sps:$4 sm:$0xff]   ;;  %v13355_v57 = vld [vmem:[%s18133_s2 + $0x500] ss:$8 sps:$4 sm:$0xff]  }
 0x1d7   :  { %v1589_v26 = vld [vmem:[#allocation2 + $0x10] sm:$0xfc]  ;;  %vm2126_vm6 = vsmask.f32 6400  ;;  %vm3122_vm7 = vsmask.f32 5376 }
 0x1d8   :  { %1968 = vmatpush1.bf16.msra.mxu0 %v13298_v27  ;;  %v1601_v27 = vpack.c.bf16 %v1593_v22, %v1593_v22  ;;  %v13354_v41 = vld [vmem:[%s18133_s2 + $0x4f4] ss:$8 sps:$4 sm:$0xff]   ;;  %v13358_v1 = vld [vmem:[%s18133_s2 + $0x510] ss:$8 sps:$4 sm:$0xff]   ;;  %v13379_v22 = vld [vmem:[%s18133_s2 + $0x580] ss:$8 sps:$4 sm:$0xff]  }
 0x1d9   :  { %1969 = vmatprep.subr.bf16.mxu0 %v13303_v29  ;;  %v2058_v29 = vld [vmem:[#allocation2 + $0x8] sm:$0xf8]  ;;  %vm4444_vm12 = vcmask 654336   ;;  %vm4446_vm13 = vcmask 648192   ;;  %vm18138_vm14 = vcmask 785408   ;;  %vm18140_vm15 = vcmask 1042432  }
 0x1da   :  { %v13360_v59 = vld [vmem:[%s18133_s2 + $0x514] ss:$8 sps:$4 sm:$0xff]   ;;  %s14424_s11 = smov [#allocation5]  }
 0x1db   :  { %s10663_s12 = sshll.u32 %s14424_s11, 4  ;;  %s10664_s12 = int_to_ptr.vmem [resolvable:$true] %s10663_s12 }
 0x1dc   :  { %1970 = vmatpush1.bf16.msra.mxu0 %v13301_v31  ;;  %v2070_v31 = vpack.c.bf16 %v2062_v24, %v2062_v24  ;;  %v13382_v24 = vld [vmem:[%s18133_s2 + $0x590] ss:$8 sps:$4 sm:$0xff]   ;;  %p14402_p1 = scmp.lt.s32.totalorder %s10664_s12, %s10664_s12 }
 0x1dd   :  { %1971 = vmatprep.subr.bf16.mxu0 %v13306_v32  ;;  %v13346_v32 = vld [vmem:[%s18133_s2 + $0x4d0] ss:$8 sps:$4 sm:$0xff]  }
 0x1de   :  { %v2156_v40 = vshll.u32 %v2070_v31, 16 }
 0x1e0   :  { %1972 = vmatpush1.bf16.msra.mxu0 %v13304_v33  ;;  %v15169_v33 = vld [vmem:[#allocation2 + $0x30] sm:$0xff] }
 0x1e1   :  { %1973 = vmatprep.subr.bf16.mxu0 %v13309_v34  ;;  %v1597_v34 = vpack.c.bf16 %v15169_v33, %v1589_v26  ;;  %v2061_v26 = vld [vmem:[#allocation2 + $0x40] sm:$0x7f] }
 0x1e4   :  { %1974 = vmatpush1.bf16.msra.mxu0 %v13307_v35  ;;  %v13351_v35 = vld [vmem:[%s18133_s2 + $0x4e4] ss:$8 sps:$4 sm:$0xff]  }
 0x1e5   :  { %1975 = vmatprep.subr.bf16.mxu0 %v13312_v36  ;;  %v2066_v36 = vpack.c.bf16 %v14978_v55, %v2058_v29  ;;  %v13390_v29 = vld [vmem:[%s18133_s2 + $0x5b4] ss:$8 sps:$4 sm:$0xff]  }
 0x1e7   :  { %v2145_v42 = vshrl.u32 %v2066_v36, 16 }
 0x1e8   :  { %1976 = vmatpush1.bf16.msra.mxu0 %v13310_v37  ;;  %v1672_v37 = vrot.slane %v1601_v27, 1  ;;  %v13385_v27 = vld [vmem:[%s18133_s2 + $0x5a0] ss:$8 sps:$4 sm:$0xff]  }
 0x1e9   :  { %1977 = vmatprep.subr.bf16.mxu0 %v13315_v39  ;;  %v2153_v39 = vshrl.u32 %v2070_v31, 16  ;;  %v2147_v52 = vrot.slane %v2145_v42, 1  ;;  %v2057_v31 = vld [vmem:[#allocation2] sm:$0xf8]  ;;  %v13396_v42 = vld [vmem:[%s18133_s2 + $0x5d4] ss:$8 sps:$4 sm:$0xff]  }
 0x1ec   :  { %1978 = vmatpush1.bf16.msra.mxu0 %v13313_v12  ;;  %v1671_v12 = vrot.slane %v1597_v34, 1  ;;  %v13388_v34 = vld [vmem:[%s18133_s2 + $0x5b0] ss:$8 sps:$4 sm:$0xff]  }
 0x1ed   :  { %1979 = vmatprep.subr.bf16.mxu0 %v13318_v44  ;;  %v13349_v44 = vld [vmem:[%s18133_s2 + $0x4e0] ss:$8 sps:$4 sm:$0xff]  }
 0x1ee   :  { %v1673_v45 = vsel %vm1664_vm5, %v1671_v12, %v1672_v37 }
 0x1f0   :  { %1980 = vmatpush1.bf16.msra.mxu0 %v13316_v38  ;;  %v2148_v38 = vshll.u32 %v2066_v36, 16  ;;  %v13393_v36 = vld [vmem:[%s18133_s2 + $0x5c4] ss:$8 sps:$4 sm:$0xff]  }
 0x1f1   :  { %2000 = vmatprep.subr.bf16.mxu0 %v13321_v46  ;;  %v2155_v46 = vrot.slane %v2153_v39, 1 }
 0x1f3   :  { %1982 = vmatmul.mubr.bf16.vlgmr.msra.gmra.mrb[12].mxu0 %v1667_v56 }
 0x1f4   :  { %1991 = vmatprep.mubr.bf16.mxu0 %v14987_v63  ;;  %2001 = vmatpush1.bf16.msra.mxu0 %v13319_v51  ;;  %v13325_v63 = vld [vmem:[%s18133_s2 + $0x460] ss:$8 sps:$4 sm:$0xff]   ;;  %v13357_v51 = vld [vmem:[%s18133_s2 + $0x504] ss:$8 sps:$4 sm:$0xff]  }
 0x1f5   :  { %2002 = vmatprep.subr.bf16.mxu0 %v13324_v54  ;;  %v2150_v54 = vrot.slane %v2148_v38, 2 }
 0x1f8   :  { %2003 = vmatpush1.bf16.msra.mxu0 %v13322_v58  ;;  %v2151_v58 = vor.u32 %v2150_v54, %v2147_v52  ;;  %v2060_v52 = vld [vmem:[#allocation2 + $0x18] sm:$0xf8] }
 0x1f9   :  { %2004 = vmatprep.subr.bf16.mxu0 %v13327_v61  ;;  %v13399_v54 = vld [vmem:[%s18133_s2 + $0x5e4] ss:$8 sps:$4 sm:$0xff]  }
 0x1fb   :  { %1992 = vmatmul.mubr.bf16.gmra.mrb[32].mxu0 %v1666_v47  ;;  %v2158_v47 = vrot.slane %v2156_v40, 2  ;;  %v13391_v40 = vld [vmem:[%s18133_s2 + $0x5c0] ss:$8 sps:$4 sm:$0xff]  }
 0x1fc   :  { %2005 = vmatpush1.bf16.msra.mxu0 %v13325_v63  ;;  %10994 = vmatprep.mubr.msk.bf16.mxu0 %vm628_vm2, %v1676_v5 }
 0x1fd   :  { %2006 = vmatprep.subr.bf16.mxu0 %v13330_v4  ;;  %v15191_v56 = vor.u32 %v2158_v47, %v2155_v46  ;;  %v13394_v47 = vld [vmem:[%s18133_s2 + $0x5d0] ss:$8 sps:$4 sm:$0xff]  }
 0x1fe   :  { %v15132_v8 = vpop.f32.mrb[16].mxu0 }
 0x1ff   :  { %v15134_v9 = vpop.f32.mrb[17].mxu0  ;;  %v2160_v61 = vsel %vm2126_vm6, %v2151_v58, %v15191_v56 }
 0x200   :  { %2007 = vmatpush1.bf16.msra.mxu0 %v13328_v6  ;;  %v1165_v50 = vpop.f32.mrb[18].mxu0 }
 0x201   :  { %v1166_v11 = vpop.f32.mrb[19].mxu0  ;;  %2008 = vmatprep.subr.bf16.mxu0 %v13333_v7  ;;  %v13361_v7 = vld [vmem:[%s18133_s2 + $0x520] ss:$8 sps:$4 sm:$0xff]  }
 0x202   :  { %v13367_v11 = vld [vmem:[%s18133_s2 + $0x540] ss:$8 sps:$4 sm:$0xff]  }
 0x204   :  { %2009 = vmatpush1.bf16.msra.mxu0 %v13331_v10  ;;  %v13366_v10 = vld [vmem:[%s18133_s2 + $0x534] ss:$8 sps:$4 sm:$0xff]  }
 0x205   :  { %2010 = vmatprep.subr.bf16.mxu0 %v13336_v13  ;;  %v13372_v13 = vld [vmem:[%s18133_s2 + $0x554] ss:$8 sps:$4 sm:$0xff]  }
 0x208   :  { %2011 = vmatpush1.bf16.msra.mxu0 %v13334_v15  ;;  %v13370_v15 = vld [vmem:[%s18133_s2 + $0x550] ss:$8 sps:$4 sm:$0xff]  }
 0x209   :  { %2012 = vmatprep.subr.bf16.mxu0 %v13339_v16  ;;  %v13375_v16 = vld [vmem:[%s18133_s2 + $0x564] ss:$8 sps:$4 sm:$0xff]  }
 0x20c   :  { %2013 = vmatpush1.bf16.msra.mxu0 %v13337_v17  ;;  %v13373_v17 = vld [vmem:[%s18133_s2 + $0x560] ss:$8 sps:$4 sm:$0xff]  }
 0x20d   :  { %2014 = vmatprep.subr.bf16.mxu0 %v13342_v18  ;;  %v13378_v18 = vld [vmem:[%s18133_s2 + $0x574] ss:$8 sps:$4 sm:$0xff]  }
 0x210   :  { %2015 = vmatpush1.bf16.msra.mxu0 %v13340_v19  ;;  %v13376_v19 = vld [vmem:[%s18133_s2 + $0x570] ss:$8 sps:$4 sm:$0xff]  }
 0x211   :  { %2016 = vmatprep.subr.bf16.mxu0 %v13345_v21  ;;  %v13381_v21 = vld [vmem:[%s18133_s2 + $0x584] ss:$8 sps:$4 sm:$0xff]  }
 0x214   :  { %2017 = vmatpush1.bf16.msra.mxu0 %v13343_v23  ;;  %v13384_v23 = vld [vmem:[%s18133_s2 + $0x594] ss:$8 sps:$4 sm:$0xff]  }
 0x215   :  { %2018 = vmatprep.subr.bf16.mxu0 %v13348_v25  ;;  %v13387_v25 = vld [vmem:[%s18133_s2 + $0x5a4] ss:$8 sps:$4 sm:$0xff]  }
 0x218   :  { %2019 = vmatpush1.bf16.msra.mxu0 %v13346_v32  ;;  %v2069_v32 = vpack.c.bf16 %v2061_v26, %v2061_v26 }
 0x219   :  { %2467 = vmatprep.subr.bf16.mxu0 %v13351_v35  ;;  %v2065_v35 = vpack.c.bf16 %v15092_v43, %v2057_v31  ;;  %v13414_v31 = vld [vmem:[%s18133_s2 + $0x634] ss:$8 sps:$4 sm:$0xff]  }
 0x21a   :  { %v2139_v39 = vshll.u32 %v2069_v32, 16 }
 0x21b   :  { %2033 = vmatmul.mubr.bf16.vlgmr.msra.gmra.mrb[12].mxu0 %v1673_v45  ;;  %v2128_v12 = vshrl.u32 %v2065_v35, 16 }
 0x21c   :  { %10995 = vmatprep.mubr.msk.bf16.mxu0 %vm628_vm2, %v15115_v14  ;;  %2468 = vmatpush1.bf16.msra.mxu0 %v13349_v44  ;;  %v13363_v14 = vld [vmem:[%s18133_s2 + $0x524] ss:$8 sps:$4 sm:$0xff]   ;;  %v2131_v44 = vshll.u32 %v2065_v35, 16  ;;  %v2141_v45 = vrot.slane %v2139_v39, 2  ;;  %v13420_v35 = vld [vmem:[%s18133_s2 + $0x654] ss:$8 sps:$4 sm:$0xff]  }
 0x21d   :  { %2469 = vmatprep.subr.bf16.mxu0 %v13354_v41  ;;  %v2064_v41 = vld [vmem:[#allocation2 + $0x58] sm:$0x7f]  ;;  %v13418_v39 = vld [vmem:[%s18133_s2 + $0x650] ss:$8 sps:$4 sm:$0xff]  }
 0x21e   :  { %v2072_v46 = vpack.c.bf16 %v2064_v41, %v2064_v41 }
 0x220   :  { %2470 = vmatpush1.bf16.msra.mxu0 %v13352_v48  ;;  %v2130_v48 = vrot.slane %v2128_v12, 1  ;;  %v13423_v12 = vld [vmem:[%s18133_s2 + $0x664] ss:$8 sps:$4 sm:$0xff]  }
 0x221   :  { %2471 = vmatprep.subr.bf16.mxu0 %v13357_v51  ;;  %v2133_v51 = vrot.slane %v2131_v44, 2 }
 0x223   :  { %2043 = vmatmul.mubr.bf16.gmra.mrb[36].mxu0 %v1672_v37  ;;  %v2136_v37 = vshrl.u32 %v2069_v32, 16  ;;  %v2063_v32 = vld [vmem:[#allocation2 + $0x50] sm:$0x7f] }
 0x224   :  { %2472 = vmatpush1.bf16.msra.mxu0 %v13355_v57  ;;  %2499 = vmatprep.mubr.bf16.mxu0 %v2160_v61  ;;  %v2068_v57 = vpack.c.bf16 %v15112_v0, %v2060_v52  ;;  %v2190_v61 = vshll.u32 %v2072_v46, 16 }
 0x225   :  { %2473 = vmatprep.subr.bf16.mxu0 %v13360_v59  ;;  %v2138_v38 = vrot.slane %v2136_v37, 1  ;;  %v2187_v59 = vshrl.u32 %v2072_v46, 16  ;;  %v2071_v37 = vpack.c.bf16 %v2063_v32, %v2063_v32  ;;  %v13426_v46 = vld [vmem:[%s18133_s2 + $0x674] ss:$8 sps:$4 sm:$0xff]  }
 0x226   :  { %v1212_v63 = vpop.f32.mrb[20].mxu0  ;;  %v13456_v32 = vld [vmem:[%s18133_s2 + $0x714] ss:$8 sps:$4 sm:$0xff]  }
 0x227   :  { %v15208_v3 = vadd.f32 %v1212_v63, %v15132_v8  ;;  %v1214_v4 = vpop.f32.mrb[21].mxu0  ;;  %v13364_v8 = vld [vmem:[%s18133_s2 + $0x530] ss:$8 sps:$4 sm:$0xff]   ;;  %v2142_v58 = vor.u32 %v2141_v45, %v2138_v38  ;;  %v13402_v63 = vld [vmem:[%s18133_s2 + $0x5f4] ss:$8 sps:$4 sm:$0xff]   ;;  %v2170_v44 = vshrl.u32 %v2071_v37, 16 }
 0x228   :  { %v15211_v5 = vadd.f32 %v1214_v4, %v15134_v9  ;;  %v1216_v6 = vpop.f32.mrb[22].mxu0  ;;  %2474 = vmatpush1.bf16.msra.mxu0 %v13358_v1  ;;  %v13369_v9 = vld [vmem:[%s18133_s2 + $0x544] ss:$8 sps:$4 sm:$0xff]   ;;  %v2134_v1 = vor.u32 %v2133_v51, %v2130_v48  ;;  %v2179_v4 = vshrl.u32 %v2068_v57, 16  ;;  %v2173_v41 = vshll.u32 %v2071_v37, 16 }
 0x229   :  { %v1217_v50 = vpop.f32.mrb[23].mxu0  ;;  %2475 = vmatprep.subr.bf16.mxu0 %v13363_v14  ;;  %v13397_v14 = vld [vmem:[%s18133_s2 + $0x5e0] ss:$8 sps:$4 sm:$0xff]   ;;  %v2182_v6 = vshll.u32 %v2068_v57, 16  ;;  %v13424_v51 = vld [vmem:[%s18133_s2 + $0x670] ss:$8 sps:$4 sm:$0xff]  }
 0x22a   :  { %v2189_v50 = vrot.slane %v2187_v59, 1  ;;  %v2175_v48 = vrot.slane %v2173_v41, 2  ;;  %v13429_v57 = vld [vmem:[%s18133_s2 + $0x684] ss:$8 sps:$4 sm:$0xff]   ;;  %v13462_v37 = vld [vmem:[%s18133_s2 + $0x734] ss:$8 sps:$4 sm:$0xff]  }
 0x22b   :  { %v13466_v41 = vld [vmem:[%s18133_s2 + $0x750] ss:$8 sps:$4 sm:$0xff]  }
 0x22c   :  { %2476 = vmatpush1.bf16.msra.mxu0 %v13361_v7  ;;  %v2143_v7 = vsel %vm2126_vm6, %v2134_v1, %v2142_v58  ;;  %v15364_v1 = vld [vmem:[#allocation2 + $0x48] sm:$0xff] }
 0x22d   :  { %2477 = vmatprep.subr.bf16.mxu0 %v13366_v10  ;;  %v2192_v10 = vrot.slane %v2190_v61, 2  ;;  %v13427_v61 = vld [vmem:[%s18133_s2 + $0x680] ss:$8 sps:$4 sm:$0xff]  }
 0x230   :  { %2478 = vmatpush1.bf16.msra.mxu0 %v13364_v8  ;;  %v13400_v8 = vld [vmem:[%s18133_s2 + $0x5f0] ss:$8 sps:$4 sm:$0xff]  }
 0x231   :  { %2479 = vmatprep.subr.bf16.mxu0 %v13369_v9  ;;  %v13405_v9 = vld [vmem:[%s18133_s2 + $0x604] ss:$8 sps:$4 sm:$0xff]  }
 0x234   :  { %2480 = vmatpush1.bf16.msra.mxu0 %v13367_v11  ;;  %v2181_v11 = vrot.slane %v2179_v4, 1  ;;  %v2576_v4 = vld [vmem:[#allocation2 + $0x8] sm:$0xf0] }
 0x235   :  { %2481 = vmatprep.subr.bf16.mxu0 %v13372_v13  ;;  %v2184_v13 = vrot.slane %v2182_v6, 2  ;;  %v2588_v6 = vpack.c.bf16 %v15364_v1, %v15364_v1 }
 0x238   :  { %2482 = vmatpush1.bf16.msra.mxu0 %v13370_v15  ;;  %v15301_v15 = vor.u32 %v2192_v10, %v2189_v50  ;;  %v13435_v50 = vld [vmem:[%s18133_s2 + $0x6a4] ss:$8 sps:$4 sm:$0xff]   ;;  %v2584_v10 = vpack.c.bf16 %v14978_v55, %v2576_v4  ;;  %v13436_v55 = vld [vmem:[%s18133_s2 + $0x6b0] ss:$8 sps:$4 sm:$0xff]  }
 0x239   :  { %2483 = vmatprep.subr.bf16.mxu0 %v13375_v16  ;;  %v13403_v16 = vld [vmem:[%s18133_s2 + $0x600] ss:$8 sps:$4 sm:$0xff]   ;;  %v13478_v4 = vld [vmem:[%s18133_s2 + $0x790] ss:$8 sps:$4 sm:$0xff]  }
 0x23c   :  { %2484 = vmatpush1.bf16.msra.mxu0 %v13373_v17  ;;  %v13408_v17 = vld [vmem:[%s18133_s2 + $0x614] ss:$8 sps:$4 sm:$0xff]  }
 0x23d   :  { %2485 = vmatprep.subr.bf16.mxu0 %v13378_v18 }
 0x240   :  { %2486 = vmatpush1.bf16.msra.mxu0 %v13376_v19  ;;  %v13406_v19 = vld [vmem:[%s18133_s2 + $0x610] ss:$8 sps:$4 sm:$0xff]  }
 0x241   :  { %2487 = vmatprep.subr.bf16.mxu0 %v13381_v21  ;;  %v13411_v21 = vld [vmem:[%s18133_s2 + $0x624] ss:$8 sps:$4 sm:$0xff]  }
 0x244   :  { %2488 = vmatpush1.bf16.msra.mxu0 %v13379_v22 }
 0x245   :  { %2489 = vmatprep.subr.bf16.mxu0 %v13384_v23 }
 0x248   :  { %2490 = vmatpush1.bf16.msra.mxu0 %v13382_v24 }
 0x249   :  { %2491 = vmatprep.subr.bf16.mxu0 %v13387_v25 }
 0x24c   :  { %2492 = vmatpush1.bf16.msra.mxu0 %v13385_v27  ;;  %v13409_v27 = vld [vmem:[%s18133_s2 + $0x620] ss:$8 sps:$4 sm:$0xff]  }
 0x24d   :  { %2493 = vmatprep.subr.bf16.mxu0 %v13390_v29 }
 0x250   :  { %2494 = vmatpush1.bf16.msra.mxu0 %v13388_v34  ;;  %v13415_v34 = vld [vmem:[%s18133_s2 + $0x640] ss:$8 sps:$4 sm:$0xff]  }
 0x251   :  { %2495 = vmatprep.subr.bf16.mxu0 %v13393_v36  ;;  %v2059_v36 = vld [vmem:[#allocation2 + $0x10] sm:$0xf8] }
 0x254   :  { %2496 = vmatpush1.bf16.msra.mxu0 %v13391_v40  ;;  %v2067_v40 = vpack.c.bf16 %v15169_v33, %v2059_v36  ;;  %v13457_v36 = vld [vmem:[%s18133_s2 + $0x720] ss:$8 sps:$4 sm:$0xff]  }
 0x255   :  { %2497 = vmatprep.subr.bf16.mxu0 %v13396_v42  ;;  %v13421_v42 = vld [vmem:[%s18133_s2 + $0x660] ss:$8 sps:$4 sm:$0xff]  }
 0x256   :  { %v2162_v38 = vshrl.u32 %v2067_v40, 16  ;;  %v2165_v45 = vshll.u32 %v2067_v40, 16  ;;  %v13465_v40 = vld [vmem:[%s18133_s2 + $0x744] ss:$8 sps:$4 sm:$0xff]  }
 0x258   :  { %2498 = vmatpush1.bf16.msra.mxu0 %v13394_v47  ;;  %v2172_v47 = vrot.slane %v2170_v44, 1  ;;  %v2164_v52 = vrot.slane %v2162_v38, 1  ;;  %v13468_v44 = vld [vmem:[%s18133_s2 + $0x754] ss:$8 sps:$4 sm:$0xff]   ;;  %v15463_v38 = vld [vmem:[#allocation2 + $0x40] sm:$0xff] }
 0x259   :  { %2518 = vmatprep.subr.bf16.mxu0 %v13399_v54  ;;  %v2167_v54 = vrot.slane %v2165_v45, 2  ;;  %v13469_v45 = vld [vmem:[%s18133_s2 + $0x760] ss:$8 sps:$4 sm:$0xff]  }
 0x25b   :  { %2500 = vmatmul.mubr.bf16.vlgmr.msra.gmra.mrb[12].mxu0 %v2143_v7  ;;  %v2168_v59 = vor.u32 %v2167_v54, %v2164_v52  ;;  %v13430_v7 = vld [vmem:[%s18133_s2 + $0x690] ss:$8 sps:$4 sm:$0xff]   ;;  %v13477_v54 = vld [vmem:[%s18133_s2 + $0x784] ss:$8 sps:$4 sm:$0xff]  }
 0x25c   :  { %2509 = vmatprep.mubr.bf16.mxu0 %v15191_v56  ;;  %2519 = vmatpush1.bf16.msra.mxu0 %v13397_v14  ;;  %v2185_v56 = vor.u32 %v2184_v13, %v2181_v11  ;;  %v13432_v14 = vld [vmem:[%s18133_s2 + $0x694] ss:$8 sps:$4 sm:$0xff]   ;;  %v2656_v11 = vrot.slane %v2584_v10, 2 }
 0x25d   :  { %2520 = vmatprep.subr.bf16.mxu0 %v13402_v63  ;;  %v13438_v13 = vld [vmem:[%s18133_s2 + $0x6b4] ss:$8 sps:$4 sm:$0xff]  }
 0x25e   :  { %v2194_v18 = vsel %vm2126_vm6, %v2185_v56, %v15301_v15 }
 0x260   :  { %2521 = vmatpush1.bf16.msra.mxu0 %v13400_v8  ;;  %v15381_v8 = vrot.slane %v2588_v6, 2  ;;  %v2578_v6 = vld [vmem:[#allocation2 + $0x18] sm:$0xf0] }
 0x261   :  { %2522 = vmatprep.subr.bf16.mxu0 %v13405_v9  ;;  %v13433_v9 = vld [vmem:[%s18133_s2 + $0x6a0] ss:$8 sps:$4 sm:$0xff]  }
 0x263   :  { %2510 = vmatmul.mubr.bf16.gmra.mrb[40].mxu0 %v2142_v58  ;;  %v2176_v58 = vor.u32 %v2175_v48, %v2172_v47  ;;  %v2575_v47 = vld [vmem:[#allocation2] sm:$0xf0]  ;;  %v2587_v48 = vpack.c.bf16 %v15463_v38, %v15463_v38 }
 0x264   :  { %2523 = vmatpush1.bf16.msra.mxu0 %v13403_v16  ;;  %11100 = vmatprep.mubr.msk.bf16.mxu0 %vm628_vm2, %v2194_v18  ;;  %v13441_v16 = vld [vmem:[%s18133_s2 + $0x6c4] ss:$8 sps:$4 sm:$0xff]   ;;  %v2583_v52 = vpack.c.bf16 %v15092_v43, %v2575_v47 }
 0x265   :  { %2524 = vmatprep.subr.bf16.mxu0 %v13408_v17  ;;  %v2177_v63 = vsel %vm2126_vm6, %v2168_v59, %v2176_v58  ;;  %v13475_v59 = vld [vmem:[%s18133_s2 + $0x780] ss:$8 sps:$4 sm:$0xff]  }
 0x266   :  { %v1529_v22 = vpop.f32.mrb[24].mxu0 }
 0x267   :  { %v15319_v23 = vadd.f32 %v1529_v22, %v15208_v3  ;;  %v1531_v24 = vpop.f32.mrb[25].mxu0  ;;  %v13412_v3 = vld [vmem:[%s18133_s2 + $0x630] ss:$8 sps:$4 sm:$0xff]   ;;  %v13439_v22 = vld [vmem:[%s18133_s2 + $0x6c0] ss:$8 sps:$4 sm:$0xff]  }
 0x268   :  { %v15322_v25 = vadd.f32 %v1531_v24, %v15211_v5  ;;  %v1533_v26 = vpop.f32.mrb[26].mxu0  ;;  %2525 = vmatpush1.bf16.msra.mxu0 %v13406_v19  ;;  %v13417_v5 = vld [vmem:[%s18133_s2 + $0x644] ss:$8 sps:$4 sm:$0xff]  }
 0x269   :  { %v1534_v29 = vpop.f32.mrb[27].mxu0  ;;  %2526 = vmatprep.subr.bf16.mxu0 %v13411_v21  ;;  %v13444_v26 = vld [vmem:[%s18133_s2 + $0x6d4] ss:$8 sps:$4 sm:$0xff]  }
 0x26a   :  { %v13450_v29 = vld [vmem:[%s18133_s2 + $0x6f4] ss:$8 sps:$4 sm:$0xff]  }
 0x26c   :  { %2527 = vmatpush1.bf16.msra.mxu0 %v13409_v27  ;;  %v13445_v27 = vld [vmem:[%s18133_s2 + $0x6e0] ss:$8 sps:$4 sm:$0xff]  }
 0x26d   :  { %2528 = vmatprep.subr.bf16.mxu0 %v13414_v31  ;;  %v13448_v31 = vld [vmem:[%s18133_s2 + $0x6f0] ss:$8 sps:$4 sm:$0xff]  }
 0x270   :  { %2529 = vmatpush1.bf16.msra.mxu0 %v13412_v3  ;;  %v13453_v3 = vld [vmem:[%s18133_s2 + $0x704] ss:$8 sps:$4 sm:$0xff]  }
 0x271   :  { %2530 = vmatprep.subr.bf16.mxu0 %v13417_v5  ;;  %v13451_v5 = vld [vmem:[%s18133_s2 + $0x700] ss:$8 sps:$4 sm:$0xff]  }
 0x274   :  { %2531 = vmatpush1.bf16.msra.mxu0 %v13415_v34  ;;  %v13454_v34 = vld [vmem:[%s18133_s2 + $0x710] ss:$8 sps:$4 sm:$0xff]  }
 0x275   :  { %2532 = vmatprep.subr.bf16.mxu0 %v13420_v35  ;;  %v13459_v35 = vld [vmem:[%s18133_s2 + $0x724] ss:$8 sps:$4 sm:$0xff]  }
 0x278   :  { %2533 = vmatpush1.bf16.msra.mxu0 %v13418_v39  ;;  %v13460_v39 = vld [vmem:[%s18133_s2 + $0x730] ss:$8 sps:$4 sm:$0xff]  }
 0x279   :  { %2534 = vmatprep.subr.bf16.mxu0 %v13423_v12  ;;  %v13463_v12 = vld [vmem:[%s18133_s2 + $0x740] ss:$8 sps:$4 sm:$0xff]  }
 0x27c   :  { %2535 = vmatpush1.bf16.msra.mxu0 %v13421_v42  ;;  %v13471_v42 = vld [vmem:[%s18133_s2 + $0x764] ss:$8 sps:$4 sm:$0xff]  }
 0x27d   :  { %2536 = vmatprep.subr.bf16.mxu0 %v13426_v46  ;;  %v13474_v46 = vld [vmem:[%s18133_s2 + $0x774] ss:$8 sps:$4 sm:$0xff]  }
 0x280   :  { %2537 = vmatpush1.bf16.msra.mxu0 %v13424_v51  ;;  %v13472_v51 = vld [vmem:[%s18133_s2 + $0x770] ss:$8 sps:$4 sm:$0xff]  }
 0x281   :  { %2937 = vmatprep.subr.bf16.mxu0 %v13429_v57  ;;  %v2654_v57 = vrot.slane %v2587_v48, 2  ;;  %v13505_v48 = vld [vmem:[%s18133_s2 + $0x820] ss:$8 sps:$4 sm:$0xff]  }
 0x283   :  { %2551 = vmatmul.mubr.bf16.vlgmr.msra.gmra.mrb[12].mxu0 %v2177_v63 }
 0x284   :  { %11101 = vmatprep.mubr.msk.bf16.mxu0 %vm628_vm2, %v15301_v15  ;;  %2938 = vmatpush1.bf16.msra.mxu0 %v13427_v61  ;;  %v2658_v15 = vsel %vm102_vm0, %v2656_v11, %v15381_v8  ;;  %v15483_v61 = vld [vmem:[#allocation2 + $0x58] sm:$0xff]  ;;  %v13486_v11 = vld [vmem:[%s18133_s2 + $0x7b4] ss:$8 sps:$4 sm:$0xff]  }
 0x285   :  { %2939 = vmatprep.subr.bf16.mxu0 %v13432_v14  ;;  %v13480_v14 = vld [vmem:[%s18133_s2 + $0x794] ss:$8 sps:$4 sm:$0xff]   ;;  %v2590_v63 = vpack.c.bf16 %v15483_v61, %v15483_v61 }
 0x287   :  { %v15499_v10 = vrot.slane %v2590_v63, 2 }
 0x288   :  { %2940 = vmatpush1.bf16.msra.mxu0 %v13430_v7  ;;  %v13483_v7 = vld [vmem:[%s18133_s2 + $0x7a4] ss:$8 sps:$4 sm:$0xff]  }
 0x289   :  { %2941 = vmatprep.subr.bf16.mxu0 %v13435_v50  ;;  %v2586_v50 = vpack.c.bf16 %v15112_v0, %v2578_v6  ;;  %v13484_v0 = vld [vmem:[%s18133_s2 + $0x7b0] ss:$8 sps:$4 sm:$0xff]   ;;  %v13511_v6 = vld [vmem:[%s18133_s2 + $0x840] ss:$8 sps:$4 sm:$0xff]  }
 0x28b   :  { %2561 = vmatmul.mubr.bf16.gmra.mrb[44].mxu0 %v2176_v58  ;;  %v2653_v58 = vrot.slane %v2583_v52, 2 }
 0x28c   :  { %2942 = vmatpush1.bf16.msra.mxu0 %v13433_v9  ;;  %2969 = vmatprep.mubr.bf16.mxu0 %v2658_v15  ;;  %v2662_v9 = vrot.slane %v2586_v50, 2  ;;  %v13489_v15 = vld [vmem:[%s18133_s2 + $0x7c4] ss:$8 sps:$4 sm:$0xff]   ;;  %v13516_v50 = vld [vmem:[%s18133_s2 + $0x854] ss:$8 sps:$4 sm:$0xff]  }
 0x28d   :  { %2943 = vmatprep.subr.bf16.mxu0 %v13438_v13  ;;  %v2655_v43 = vsel %vm102_vm0, %v2653_v58, %v2654_v57 }
 0x28e   :  { %v1580_v56 = vpop.f32.mrb[28].mxu0  ;;  %v2664_v13 = vsel %vm102_vm0, %v2662_v9, %v15499_v10  ;;  %v13519_v9 = vld [vmem:[%s18133_s2 + $0x864] ss:$8 sps:$4 sm:$0xff]  }
 0x28f   :  { %v15398_v17 = vadd.f32 %v1580_v56, %v15319_v23  ;;  %v1582_v18 = vpop.f32.mrb[29].mxu0  ;;  %v13442_v23 = vld [vmem:[%s18133_s2 + $0x6d0] ss:$8 sps:$4 sm:$0xff]  }
 0x290   :  { %v15401_v19 = vadd.f32 %v1582_v18, %v15322_v25  ;;  %v1584_v21 = vpop.f32.mrb[30].mxu0  ;;  %2944 = vmatpush1.bf16.msra.mxu0 %v13436_v55  ;;  %v13447_v25 = vld [vmem:[%s18133_s2 + $0x6e4] ss:$8 sps:$4 sm:$0xff]   ;;  %v13487_v18 = vld [vmem:[%s18133_s2 + $0x7c0] ss:$8 sps:$4 sm:$0xff]  }
 0x291   :  { %v1585_v24 = vpop.f32.mrb[31].mxu0  ;;  %2945 = vmatprep.subr.bf16.mxu0 %v13441_v16 }
 0x292   :  { %v13490_v24 = vld [vmem:[%s18133_s2 + $0x7d0] ss:$8 sps:$4 sm:$0xff]  }
 0x294   :  { %2946 = vmatpush1.bf16.msra.mxu0 %v13439_v22  ;;  %v13492_v22 = vld [vmem:[%s18133_s2 + $0x7d4] ss:$8 sps:$4 sm:$0xff]  }
 0x295   :  { %2947 = vmatprep.subr.bf16.mxu0 %v13444_v26  ;;  %v13495_v26 = vld [vmem:[%s18133_s2 + $0x7e4] ss:$8 sps:$4 sm:$0xff]  }
 0x298   :  { %2948 = vmatpush1.bf16.msra.mxu0 %v13442_v23  ;;  %v13493_v23 = vld [vmem:[%s18133_s2 + $0x7e0] ss:$8 sps:$4 sm:$0xff]  }
 0x299   :  { %2949 = vmatprep.subr.bf16.mxu0 %v13447_v25  ;;  %v13498_v25 = vld [vmem:[%s18133_s2 + $0x7f4] ss:$8 sps:$4 sm:$0xff]  }
 0x29c   :  { %2950 = vmatpush1.bf16.msra.mxu0 %v13445_v27  ;;  %v13496_v27 = vld [vmem:[%s18133_s2 + $0x7f0] ss:$8 sps:$4 sm:$0xff]  }
 0x29d   :  { %2951 = vmatprep.subr.bf16.mxu0 %v13450_v29  ;;  %v13501_v29 = vld [vmem:[%s18133_s2 + $0x804] ss:$8 sps:$4 sm:$0xff]  }
 0x2a0   :  { %2952 = vmatpush1.bf16.msra.mxu0 %v13448_v31  ;;  %v15544_v31 = vld [vmem:[#allocation2 + $0x50] sm:$0xff] }
 0x2a1   :  { %2953 = vmatprep.subr.bf16.mxu0 %v13453_v3  ;;  %v13499_v3 = vld [vmem:[%s18133_s2 + $0x800] ss:$8 sps:$4 sm:$0xff]  }
 0x2a4   :  { %2954 = vmatpush1.bf16.msra.mxu0 %v13451_v5  ;;  %v3058_v5 = vld [vmem:[#allocation2 + $0x68] sm:$0x1] }
 0x2a5   :  { %2955 = vmatprep.subr.bf16.mxu0 %v13456_v32  ;;  %v13504_v32 = vld [vmem:[%s18133_s2 + $0x814] ss:$8 sps:$4 sm:$0xff]  }
 0x2a8   :  { %2956 = vmatpush1.bf16.msra.mxu0 %v13454_v34  ;;  %v2577_v34 = vld [vmem:[#allocation2 + $0x10] sm:$0xf0] }
 0x2a9   :  { %2957 = vmatprep.subr.bf16.mxu0 %v13459_v35  ;;  %v2589_v35 = vpack.c.bf16 %v15544_v31, %v15544_v31 }
 0x2ac   :  { %2958 = vmatpush1.bf16.msra.mxu0 %v13457_v36  ;;  %v15554_v36 = vld [vmem:[#allocation2 + $0x28] sm:$0xff] }
 0x2ad   :  { %2959 = vmatprep.subr.bf16.mxu0 %v13462_v37  ;;  %v3066_v37 = vpack.c.bf16 %v3058_v5, %v15364_v1  ;;  %v13537_v5 = vld [vmem:[%s18133_s2 + $0x8c4] ss:$8 sps:$4 sm:$0xff]  }
 0x2b0   :  { %2960 = vmatpush1.bf16.msra.mxu0 %v13460_v39  ;;  %v13502_v39 = vld [vmem:[%s18133_s2 + $0x810] ss:$8 sps:$4 sm:$0xff]  }
 0x2b1   :  { %2961 = vmatprep.subr.bf16.mxu0 %v13465_v40  ;;  %v2585_v40 = vpack.c.bf16 %v15169_v33, %v2577_v34  ;;  %v13510_v33 = vld [vmem:[%s18133_s2 + $0x834] ss:$8 sps:$4 sm:$0xff]  }
 0x2b2   :  { %v13540_v34 = vld [vmem:[%s18133_s2 + $0x8d4] ss:$8 sps:$4 sm:$0xff]  }
 0x2b3   :  { %v2659_v47 = vrot.slane %v2585_v40, 2  ;;  %v13541_v40 = vld [vmem:[%s18133_s2 + $0x8e0] ss:$8 sps:$4 sm:$0xff]  }
 0x2b4   :  { %2962 = vmatpush1.bf16.msra.mxu0 %v13463_v12  ;;  %v3046_v12 = vld [vmem:[#allocation2 + $0x8] sm:$0xe0] }
 0x2b5   :  { %2963 = vmatprep.subr.bf16.mxu0 %v13468_v44  ;;  %v13507_v44 = vld [vmem:[%s18133_s2 + $0x824] ss:$8 sps:$4 sm:$0xff]  }
 0x2b8   :  { %2964 = vmatpush1.bf16.msra.mxu0 %v13466_v41  ;;  %v3062_v41 = vpack.c.bf16 %v15554_v36, %v3046_v12  ;;  %v13546_v12 = vld [vmem:[%s18133_s2 + $0x8f4] ss:$8 sps:$4 sm:$0xff]  }
 0x2b9   :  { %2965 = vmatprep.subr.bf16.mxu0 %v13471_v42  ;;  %v2660_v42 = vrot.slane %v2589_v35, 2  ;;  %v13538_v35 = vld [vmem:[%s18133_s2 + $0x8d0] ss:$8 sps:$4 sm:$0xff]  }
 0x2ba   :  { %v3144_v52 = vshll.u32 %v3062_v41, 16 }
 0x2bc   :  { %2966 = vmatpush1.bf16.msra.mxu0 %v13469_v45  ;;  %v3149_v45 = vshrl.u32 %v3066_v37, 16  ;;  %v3146_v63 = vrot.slane %v3144_v52, 3 }
 0x2bd   :  { %2967 = vmatprep.subr.bf16.mxu0 %v13474_v46  ;;  %v3152_v46 = vshll.u32 %v3066_v37, 16  ;;  %v13543_v37 = vld [vmem:[%s18133_s2 + $0x8e4] ss:$8 sps:$4 sm:$0xff]  }
 0x2bf   :  { %v3154_v58 = vrot.slane %v3152_v46, 3 }
 0x2c0   :  { %2968 = vmatpush1.bf16.msra.mxu0 %v13472_v51  ;;  %v3141_v51 = vshrl.u32 %v3062_v41, 16 }
 0x2c1   :  { %2988 = vmatprep.subr.bf16.mxu0 %v13477_v54  ;;  %v2661_v54 = vsel %vm102_vm0, %v2659_v47, %v2660_v42  ;;  %v13549_v47 = vld [vmem:[%s18133_s2 + $0x904] ss:$8 sps:$4 sm:$0xff]  }
 0x2c3   :  { %2970 = vmatmul.mubr.bf16.vlgmr.msra.gmra.mrb[12].mxu0 %v2655_v43  ;;  %v3143_v43 = vrot.slane %v3141_v51, 2  ;;  %v13547_v51 = vld [vmem:[%s18133_s2 + $0x900] ss:$8 sps:$4 sm:$0xff]  }
 0x2c4   :  { %2979 = vmatprep.mubr.bf16.mxu0 %v15381_v8  ;;  %2989 = vmatpush1.bf16.msra.mxu0 %v13475_v59  ;;  %v13481_v8 = vld [vmem:[%s18133_s2 + $0x7a0] ss:$8 sps:$4 sm:$0xff]   ;;  %v13508_v59 = vld [vmem:[%s18133_s2 + $0x830] ss:$8 sps:$4 sm:$0xff]  }
 0x2c5   :  { %2990 = vmatprep.subr.bf16.mxu0 %v13480_v14  ;;  %v13513_v14 = vld [vmem:[%s18133_s2 + $0x844] ss:$8 sps:$4 sm:$0xff]  }
 0x2c8   :  { %2991 = vmatpush1.bf16.msra.mxu0 %v13478_v4 }
 0x2c9   :  { %2992 = vmatprep.subr.bf16.mxu0 %v13483_v7  ;;  %v3147_v7 = vor.u32 %v3146_v63, %v3143_v43  ;;  %v15674_v43 = vld [vmem:[#allocation2 + $0x38] sm:$0xff] }
 0x2cb   :  { %2980 = vmatmul.mubr.bf16.gmra.mrb[48].mxu0 %v2654_v57  ;;  %v3151_v57 = vrot.slane %v3149_v45, 2  ;;  %v13544_v45 = vld [vmem:[%s18133_s2 + $0x8f0] ss:$8 sps:$4 sm:$0xff]  }
 0x2cc   :  { %2993 = vmatpush1.bf16.msra.mxu0 %v13481_v8  ;;  %11206 = vmatprep.mubr.msk.bf16.mxu0 %vm628_vm2, %v2664_v13  ;;  %v13514_v8 = vld [vmem:[%s18133_s2 + $0x850] ss:$8 sps:$4 sm:$0xff]  }
 0x2cd   :  { %2994 = vmatprep.subr.bf16.mxu0 %v13486_v11  ;;  %v15580_v4 = vor.u32 %v3154_v58, %v3151_v57  ;;  %v3060_v57 = vld [vmem:[#allocation2 + $0x78] sm:$0x1]  ;;  %v13552_v58 = vld [vmem:[%s18133_s2 + $0x914] ss:$8 sps:$4 sm:$0xff]  }
 0x2ce   :  { %v15516_v55 = vpop.f32.mrb[32].mxu0  ;;  %v3068_v63 = vpack.c.bf16 %v3060_v57, %v15483_v61  ;;  %v13574_v57 = vld [vmem:[%s18133_s2 + $0x990] ss:$8 sps:$4 sm:$0xff]  }
 0x2cf   :  { %v15518_v16 = vpop.f32.mrb[33].mxu0 }
 0x2d0   :  { %v1997_v56 = vpop.f32.mrb[34].mxu0  ;;  %2995 = vmatpush1.bf16.msra.mxu0 %v13484_v0 }
 0x2d1   :  { %v1998_v21 = vpop.f32.mrb[35].mxu0  ;;  %2996 = vmatprep.subr.bf16.mxu0 %v13489_v15 }
 0x2d4   :  { %2997 = vmatpush1.bf16.msra.mxu0 %v13487_v18  ;;  %v13517_v18 = vld [vmem:[%s18133_s2 + $0x860] ss:$8 sps:$4 sm:$0xff]  }
 0x2d5   :  { %2998 = vmatprep.subr.bf16.mxu0 %v13492_v22 }
 0x2d8   :  { %2999 = vmatpush1.bf16.msra.mxu0 %v13490_v24  ;;  %v13522_v24 = vld [vmem:[%s18133_s2 + $0x874] ss:$8 sps:$4 sm:$0xff]  }
 0x2d9   :  { %3000 = vmatprep.subr.bf16.mxu0 %v13495_v26  ;;  %v13523_v26 = vld [vmem:[%s18133_s2 + $0x880] ss:$8 sps:$4 sm:$0xff]  }
 0x2dc   :  { %3001 = vmatpush1.bf16.msra.mxu0 %v13493_v23  ;;  %v13526_v23 = vld [vmem:[%s18133_s2 + $0x890] ss:$8 sps:$4 sm:$0xff]  }
 0x2dd   :  { %3002 = vmatprep.subr.bf16.mxu0 %v13498_v25  ;;  %v13531_v25 = vld [vmem:[%s18133_s2 + $0x8a4] ss:$8 sps:$4 sm:$0xff]  }
 0x2e0   :  { %3003 = vmatpush1.bf16.msra.mxu0 %v13496_v27  ;;  %v13529_v27 = vld [vmem:[%s18133_s2 + $0x8a0] ss:$8 sps:$4 sm:$0xff]  }
 0x2e1   :  { %3004 = vmatprep.subr.bf16.mxu0 %v13501_v29  ;;  %v13534_v29 = vld [vmem:[%s18133_s2 + $0x8b4] ss:$8 sps:$4 sm:$0xff]  }
 0x2e4   :  { %3005 = vmatpush1.bf16.msra.mxu0 %v13499_v3  ;;  %v13532_v3 = vld [vmem:[%s18133_s2 + $0x8b0] ss:$8 sps:$4 sm:$0xff]  }
 0x2e5   :  { %3006 = vmatprep.subr.bf16.mxu0 %v13504_v32  ;;  %v13535_v32 = vld [vmem:[%s18133_s2 + $0x8c0] ss:$8 sps:$4 sm:$0xff]  }
 0x2e8   :  { %3007 = vmatpush1.bf16.msra.mxu0 %v13502_v39  ;;  %v3057_v39 = vld [vmem:[#allocation2 + $0x60] sm:$0x1] }
 0x2e9   :  { %3463 = vmatprep.subr.bf16.mxu0 %v13507_v44  ;;  %v15658_v44 = vld [vmem:[#allocation2 + $0x20] sm:$0xff]  ;;  %v3065_v41 = vpack.c.bf16 %v3057_v39, %v15463_v38 }
 0x2eb   :  { %3021 = vmatmul.mubr.bf16.vlgmr.msra.gmra.mrb[12].mxu0 %v2661_v54 }
 0x2ec   :  { %11207 = vmatprep.mubr.msk.bf16.mxu0 %vm628_vm2, %v15499_v10  ;;  %3464 = vmatpush1.bf16.msra.mxu0 %v13505_v48  ;;  %v3156_v10 = vsel %vm3122_vm7, %v3147_v7, %v15580_v4  ;;  %v3132_v48 = vshrl.u32 %v3065_v41, 16 }
 0x2ed   :  { %3465 = vmatprep.subr.bf16.mxu0 %v13510_v33  ;;  %v3135_v33 = vshll.u32 %v3065_v41, 16 }
 0x2f0   :  { %3466 = vmatpush1.bf16.msra.mxu0 %v13508_v59  ;;  %v3134_v59 = vrot.slane %v3132_v48, 2  ;;  %v13571_v48 = vld [vmem:[%s18133_s2 + $0x980] ss:$8 sps:$4 sm:$0xff]  }
 0x2f1   :  { %3467 = vmatprep.subr.bf16.mxu0 %v13513_v14  ;;  %v3137_v14 = vrot.slane %v3135_v33, 3  ;;  %v13576_v33 = vld [vmem:[%s18133_s2 + $0x994] ss:$8 sps:$4 sm:$0xff]  }
 0x2f3   :  { %3031 = vmatmul.mubr.bf16.gmra.mrb[52].mxu0 %v2660_v42  ;;  %v3045_v42 = vld [vmem:[#allocation2] sm:$0xe0] }
 0x2f4   :  { %3468 = vmatpush1.bf16.msra.mxu0 %v13511_v6  ;;  %3495 = vmatprep.mubr.bf16.mxu0 %v3156_v10  ;;  %v3061_v46 = vpack.c.bf16 %v15658_v44, %v3045_v42  ;;  %v13550_v6 = vld [vmem:[%s18133_s2 + $0x910] ss:$8 sps:$4 sm:$0xff]   ;;  %v3048_v10 = vld [vmem:[#allocation2 + $0x18] sm:$0xe0]  ;;  %v13570_v42 = vld [vmem:[%s18133_s2 + $0x974] ss:$8 sps:$4 sm:$0xff]  }
 0x2f5   :  { %3469 = vmatprep.subr.bf16.mxu0 %v13516_v50 }
 0x2f6   :  { %v2044_v11 = vpop.f32.mrb[36].mxu0  ;;  %v3124_v52 = vshrl.u32 %v3061_v46, 16  ;;  %v3127_v54 = vshll.u32 %v3061_v46, 16  ;;  %v13573_v46 = vld [vmem:[%s18133_s2 + $0x984] ss:$8 sps:$4 sm:$0xff]  }
 0x2f7   :  { %v2045_v13 = vadd.f32 %v2044_v11, %v15516_v55  ;;  %v2046_v0 = vpop.f32.mrb[37].mxu0  ;;  %v3138_v11 = vor.u32 %v3137_v14, %v3134_v59  ;;  %v13579_v59 = vld [vmem:[%s18133_s2 + $0x9a4] ss:$8 sps:$4 sm:$0xff]  }
 0x2f8   :  { %v2047_v15 = vadd.f32 %v2046_v0, %v15518_v16  ;;  %v2048_v56 = vpop.f32.mrb[38].mxu0  ;;  %3470 = vmatpush1.bf16.msra.mxu0 %v13514_v8  ;;  %v13520_v16 = vld [vmem:[%s18133_s2 + $0x870] ss:$8 sps:$4 sm:$0xff]   ;;  %v3126_v7 = vrot.slane %v3124_v52, 2  ;;  %v3129_v50 = vrot.slane %v3127_v54, 3  ;;  %v3186_v0 = vshll.u32 %v3068_v63, 16 }
 0x2f9   :  { %v15602_v21 = vadd.f32 %v2045_v13, %v15398_v17  ;;  %v2049_v22 = vpop.f32.mrb[39].mxu0  ;;  %3471 = vmatprep.subr.bf16.mxu0 %v13519_v9  ;;  %v13525_v17 = vld [vmem:[%s18133_s2 + $0x884] ss:$8 sps:$4 sm:$0xff]   ;;  %v3064_v9 = vpack.c.bf16 %v15674_v43, %v3048_v10  ;;  %v3183_v13 = vshrl.u32 %v3068_v63, 16  ;;  %v13553_v56 = vld [vmem:[%s18133_s2 + $0x920] ss:$8 sps:$4 sm:$0xff]  }
 0x2fa   :  { %v15608_v55 = vadd.f32 %v2047_v15, %v15401_v19  ;;  %v13528_v19 = vld [vmem:[%s18133_s2 + $0x894] ss:$8 sps:$4 sm:$0xff]   ;;  %v13555_v8 = vld [vmem:[%s18133_s2 + $0x924] ss:$8 sps:$4 sm:$0xff]   ;;  %v3130_v15 = vor.u32 %v3129_v50, %v3126_v7 }
 0x2fb   :  { %v3175_v22 = vshrl.u32 %v3064_v9, 16  ;;  %v3047_v54 = vld [vmem:[#allocation2 + $0x10] sm:$0xe0] }
 0x2fc   :  { %3472 = vmatpush1.bf16.msra.mxu0 %v13517_v18  ;;  %v13558_v18 = vld [vmem:[%s18133_s2 + $0x934] ss:$8 sps:$4 sm:$0xff]  }
 0x2fd   :  { %3473 = vmatprep.subr.bf16.mxu0 %v13522_v24  ;;  %v3178_v24 = vshll.u32 %v3064_v9, 16  ;;  %v13582_v10 = vld [vmem:[%s18133_s2 + $0x9b4] ss:$8 sps:$4 sm:$0xff]  }
 0x300   :  { %3474 = vmatpush1.bf16.msra.mxu0 %v13520_v16  ;;  %v3139_v16 = vsel %vm3122_vm7, %v3130_v15, %v3138_v11  ;;  %v13585_v15 = vld [vmem:[%s18133_s2 + $0x9c4] ss:$8 sps:$4 sm:$0xff]  }
 0x301   :  { %3475 = vmatprep.subr.bf16.mxu0 %v13525_v17  ;;  %v3185_v17 = vrot.slane %v3183_v13, 2 }
 0x304   :  { %3476 = vmatpush1.bf16.msra.mxu0 %v13523_v26  ;;  %v3188_v26 = vrot.slane %v3186_v0, 3 }
 0x305   :  { %3477 = vmatprep.subr.bf16.mxu0 %v13528_v19  ;;  %v13556_v19 = vld [vmem:[%s18133_s2 + $0x930] ss:$8 sps:$4 sm:$0xff]  }
 0x308   :  { %3478 = vmatpush1.bf16.msra.mxu0 %v13526_v23  ;;  %v13561_v23 = vld [vmem:[%s18133_s2 + $0x944] ss:$8 sps:$4 sm:$0xff]  }
 0x309   :  { %3479 = vmatprep.subr.bf16.mxu0 %v13531_v25  ;;  %v3177_v25 = vrot.slane %v3175_v22, 2  ;;  %v13583_v22 = vld [vmem:[%s18133_s2 + $0x9c0] ss:$8 sps:$4 sm:$0xff]  }
 0x30c   :  { %3480 = vmatpush1.bf16.msra.mxu0 %v13529_v27  ;;  %v3180_v27 = vrot.slane %v3178_v24, 3  ;;  %v3576_v24 = vld [vmem:[#allocation2 + $0x68] sm:$0x3] }
 0x30d   :  { %3481 = vmatprep.subr.bf16.mxu0 %v13534_v29  ;;  %v15698_v29 = vor.u32 %v3188_v26, %v3185_v17  ;;  %v3584_v26 = vpack.c.bf16 %v3576_v24, %v15364_v1  ;;  %v13589_v1 = vld [vmem:[%s18133_s2 + $0x9e0] ss:$8 sps:$4 sm:$0xff]   ;;  %v13633_v24 = vld [vmem:[%s18133_s2 + $0xac4] ss:$8 sps:$4 sm:$0xff]  }
 0x310   :  { %3482 = vmatpush1.bf16.msra.mxu0 %v13532_v3  ;;  %v13559_v3 = vld [vmem:[%s18133_s2 + $0x940] ss:$8 sps:$4 sm:$0xff]  }
 0x311   :  { %3483 = vmatprep.subr.bf16.mxu0 %v13537_v5  ;;  %v13564_v5 = vld [vmem:[%s18133_s2 + $0x954] ss:$8 sps:$4 sm:$0xff]  }
 0x314   :  { %3484 = vmatpush1.bf16.msra.mxu0 %v13535_v32 }
 0x315   :  { %3485 = vmatprep.subr.bf16.mxu0 %v13540_v34  ;;  %v13562_v34 = vld [vmem:[%s18133_s2 + $0x950] ss:$8 sps:$4 sm:$0xff]  }
 0x318   :  { %3486 = vmatpush1.bf16.msra.mxu0 %v13538_v35  ;;  %v13567_v35 = vld [vmem:[%s18133_s2 + $0x964] ss:$8 sps:$4 sm:$0xff]  }
 0x319   :  { %3487 = vmatprep.subr.bf16.mxu0 %v13543_v37 }
 0x31c   :  { %3488 = vmatpush1.bf16.msra.mxu0 %v13541_v40 }
 0x31d   :  { %3489 = vmatprep.subr.bf16.mxu0 %v13546_v12  ;;  %v13565_v12 = vld [vmem:[%s18133_s2 + $0x960] ss:$8 sps:$4 sm:$0xff]  }
 0x320   :  { %3490 = vmatpush1.bf16.msra.mxu0 %v13544_v45  ;;  %v13568_v45 = vld [vmem:[%s18133_s2 + $0x970] ss:$8 sps:$4 sm:$0xff]  }
 0x321   :  { %3491 = vmatprep.subr.bf16.mxu0 %v13549_v47  ;;  %v3059_v47 = vld [vmem:[#allocation2 + $0x70] sm:$0x1] }
 0x322   :  { %v3067_v52 = vpack.c.bf16 %v3059_v47, %v15544_v31  ;;  %v13600_v47 = vld [vmem:[%s18133_s2 + $0xa14] ss:$8 sps:$4 sm:$0xff]  }
 0x324   :  { %3492 = vmatpush1.bf16.msra.mxu0 %v13547_v51  ;;  %v15737_v51 = vld [vmem:[#allocation2 + $0x30] sm:$0xff]  ;;  %v3166_v14 = vshrl.u32 %v3067_v52, 16  ;;  %v3169_v63 = vshll.u32 %v3067_v52, 16  ;;  %v13609_v52 = vld [vmem:[%s18133_s2 + $0xa44] ss:$8 sps:$4 sm:$0xff]  }
 0x325   :  { %3493 = vmatprep.subr.bf16.mxu0 %v13552_v58  ;;  %v3063_v58 = vpack.c.bf16 %v15737_v51, %v3047_v54  ;;  %v13607_v54 = vld [vmem:[%s18133_s2 + $0xa40] ss:$8 sps:$4 sm:$0xff]  }
 0x326   :  { %v3171_v9 = vrot.slane %v3169_v63, 3  ;;  %v13618_v63 = vld [vmem:[%s18133_s2 + $0xa74] ss:$8 sps:$4 sm:$0xff]  }
 0x327   :  { %v3158_v7 = vshrl.u32 %v3063_v58, 16  ;;  %v3161_v50 = vshll.u32 %v3063_v58, 16  ;;  %v13610_v58 = vld [vmem:[%s18133_s2 + $0xa50] ss:$8 sps:$4 sm:$0xff]  }
 0x328   :  { %3494 = vmatpush1.bf16.msra.mxu0 %v13550_v6  ;;  %v13577_v6 = vld [vmem:[%s18133_s2 + $0x9a0] ss:$8 sps:$4 sm:$0xff]  }
 0x329   :  { %3514 = vmatprep.subr.bf16.mxu0 %v13555_v8  ;;  %v3168_v8 = vrot.slane %v3166_v14, 2  ;;  %v3160_v13 = vrot.slane %v3158_v7, 2  ;;  %v3163_v0 = vrot.slane %v3161_v50, 3  ;;  %v13613_v14 = vld [vmem:[%s18133_s2 + $0xa60] ss:$8 sps:$4 sm:$0xff]  }
 0x32a   :  { %v13621_v7 = vld [vmem:[%s18133_s2 + $0xa84] ss:$8 sps:$4 sm:$0xff]   ;;  %v13619_v50 = vld [vmem:[%s18133_s2 + $0xa80] ss:$8 sps:$4 sm:$0xff]  }
 0x32b   :  { %3496 = vmatmul.mubr.bf16.vlgmr.msra.gmra.mrb[12].mxu0 %v3139_v16  ;;  %v13588_v16 = vld [vmem:[%s18133_s2 + $0x9d4] ss:$8 sps:$4 sm:$0xff]  }
 0x32c   :  { %3505 = vmatprep.mubr.bf16.mxu0 %v15580_v4  ;;  %3515 = vmatpush1.bf16.msra.mxu0 %v13553_v56  ;;  %v3181_v4 = vor.u32 %v3180_v27, %v3177_v25  ;;  %v3172_v56 = vor.u32 %v3171_v9, %v3168_v8  ;;  %v13591_v25 = vld [vmem:[%s18133_s2 + $0x9e4] ss:$8 sps:$4 sm:$0xff]   ;;  %v13622_v8 = vld [vmem:[%s18133_s2 + $0xa90] ss:$8 sps:$4 sm:$0xff]  }
 0x32d   :  { %3516 = vmatprep.subr.bf16.mxu0 %v13558_v18  ;;  %v3164_v18 = vor.u32 %v3163_v0, %v3160_v13  ;;  %v13627_v9 = vld [vmem:[%s18133_s2 + $0xaa4] ss:$8 sps:$4 sm:$0xff]   ;;  %v13625_v13 = vld [vmem:[%s18133_s2 + $0xaa0] ss:$8 sps:$4 sm:$0xff]   ;;  %v13630_v0 = vld [vmem:[%s18133_s2 + $0xab4] ss:$8 sps:$4 sm:$0xff]  }
 0x32e   :  { %v3190_v32 = vsel %vm3122_vm7, %v3181_v4, %v15698_v29  ;;  %v13594_v4 = vld [vmem:[%s18133_s2 + $0x9f4] ss:$8 sps:$4 sm:$0xff]  }
 0x32f   :  { %v3173_v17 = vsel %vm3122_vm7, %v3164_v18, %v3172_v56  ;;  %v13628_v18 = vld [vmem:[%s18133_s2 + $0xab0] ss:$8 sps:$4 sm:$0xff]  }
 0x330   :  { %3517 = vmatpush1.bf16.msra.mxu0 %v13556_v19  ;;  %v13586_v19 = vld [vmem:[%s18133_s2 + $0x9d0] ss:$8 sps:$4 sm:$0xff]  }
 0x331   :  { %3518 = vmatprep.subr.bf16.mxu0 %v13561_v23  ;;  %v3572_v23 = vld [vmem:[#allocation2 + $0x8] sm:$0xc0] }
 0x332   :  { %v3580_v27 = vpack.c.bf16 %v15554_v36, %v3572_v23  ;;  %v13592_v36 = vld [vmem:[%s18133_s2 + $0x9f0] ss:$8 sps:$4 sm:$0xff]  }
 0x333   :  { %3506 = vmatmul.mubr.bf16.gmra.mrb[56].mxu0 %v3138_v11  ;;  %v13580_v11 = vld [vmem:[%s18133_s2 + $0x9b0] ss:$8 sps:$4 sm:$0xff]  }
 0x334   :  { %3519 = vmatpush1.bf16.msra.mxu0 %v13559_v3  ;;  %11312 = vmatprep.mubr.msk.bf16.mxu0 %vm628_vm2, %v3190_v32  ;;  %v15776_v3 = vrot.slane %v3584_v26, 3  ;;  %v13597_v32 = vld [vmem:[%s18133_s2 + $0xa04] ss:$8 sps:$4 sm:$0xff]   ;;  %v3578_v26 = vld [vmem:[#allocation2 + $0x78] sm:$0x3] }
 0x335   :  { %3520 = vmatprep.subr.bf16.mxu0 %v13564_v5  ;;  %v3586_v23 = vpack.c.bf16 %v3578_v26, %v15483_v61  ;;  %v13637_v61 = vld [vmem:[%s18133_s2 + $0xae0] ss:$8 sps:$4 sm:$0xff]   ;;  %v13672_v26 = vld [vmem:[%s18135_s4 + $0x78] sm:$0xff]  }
 0x336   :  { %v15715_v37 = vpop.f32.mrb[40].mxu0 }
 0x337   :  { %v15717_v39 = vpop.f32.mrb[41].mxu0 }
 0x338   :  { %v2515_v40 = vpop.f32.mrb[42].mxu0  ;;  %3521 = vmatpush1.bf16.msra.mxu0 %v13562_v34 }
 0x339   :  { %v2516_v41 = vpop.f32.mrb[43].mxu0  ;;  %3522 = vmatprep.subr.bf16.mxu0 %v13567_v35 }
 0x33c   :  { %3523 = vmatpush1.bf16.msra.mxu0 %v13565_v12 }
 0x33d   :  { %3524 = vmatprep.subr.bf16.mxu0 %v13570_v42  ;;  %v13595_v42 = vld [vmem:[%s18133_s2 + $0xa00] ss:$8 sps:$4 sm:$0xff]  }
 0x340   :  { %3525 = vmatpush1.bf16.msra.mxu0 %v13568_v45 }
 0x341   :  { %3526 = vmatprep.subr.bf16.mxu0 %v13573_v46 }
 0x344   :  { %3527 = vmatpush1.bf16.msra.mxu0 %v13571_v48  ;;  %v13601_v48 = vld [vmem:[%s18133_s2 + $0xa20] ss:$8 sps:$4 sm:$0xff]  }
 0x345   :  { %3528 = vmatprep.subr.bf16.mxu0 %v13576_v33  ;;  %v13604_v33 = vld [vmem:[%s18133_s2 + $0xa30] ss:$8 sps:$4 sm:$0xff]  }
 0x348   :  { %3529 = vmatpush1.bf16.msra.mxu0 %v13574_v57  ;;  %v13612_v57 = vld [vmem:[%s18133_s2 + $0xa54] ss:$8 sps:$4 sm:$0xff]  }
 0x349   :  { %3530 = vmatprep.subr.bf16.mxu0 %v13579_v59  ;;  %v13615_v59 = vld [vmem:[%s18133_s2 + $0xa64] ss:$8 sps:$4 sm:$0xff]  }
 0x34c   :  { %3531 = vmatpush1.bf16.msra.mxu0 %v13577_v6  ;;  %v13616_v6 = vld [vmem:[%s18133_s2 + $0xa70] ss:$8 sps:$4 sm:$0xff]  }
 0x34d   :  { %3532 = vmatprep.subr.bf16.mxu0 %v13582_v10  ;;  %v13624_v10 = vld [vmem:[%s18133_s2 + $0xa94] ss:$8 sps:$4 sm:$0xff]  }
 0x350   :  { %3533 = vmatpush1.bf16.msra.mxu0 %v13580_v11  ;;  %v3575_v11 = vld [vmem:[#allocation2 + $0x60] sm:$0x3] }
 0x351   :  { %3933 = vmatprep.subr.bf16.mxu0 %v13585_v15  ;;  %v3583_v15 = vpack.c.bf16 %v3575_v11, %v15463_v38  ;;  %v13631_v38 = vld [vmem:[%s18133_s2 + $0xac0] ss:$8 sps:$4 sm:$0xff]  }
 0x353   :  { %3547 = vmatmul.mubr.bf16.vlgmr.msra.gmra.mrb[12].mxu0 %v3173_v17 }
 0x354   :  { %11313 = vmatprep.mubr.msk.bf16.mxu0 %vm628_vm2, %v15698_v29  ;;  %3934 = vmatpush1.bf16.msra.mxu0 %v13583_v22  ;;  %v3652_v29 = vrot.slane %v3580_v27, 3  ;;  %v3574_v27 = vld [vmem:[#allocation2 + $0x18] sm:$0xc0] }
 0x355   :  { %3935 = vmatprep.subr.bf16.mxu0 %v13588_v16  ;;  %v3650_v16 = vrot.slane %v3583_v15, 3  ;;  %v13662_v15 = vld [vmem:[%s18135_s4 + $0x50] sm:$0xff]  }
 0x356   :  { %v3654_v5 = vsel %vm3648_vm8, %v3652_v29, %v15776_v3  ;;  %v3582_v29 = vpack.c.bf16 %v15674_v43, %v3574_v27  ;;  %v13640_v43 = vld [vmem:[%s18133_s2 + $0xaf0] ss:$8 sps:$4 sm:$0xff]   ;;  %4283 = vmatpush1.bf16.msra.mxu1 %v13662_v15 }
 0x357   :  { %4284 = vmatprep.subr.bf16.mxu1 %v14421_v2 }
 0x358   :  { %3936 = vmatpush1.bf16.msra.mxu0 %v13586_v19  ;;  %v13636_v19 = vld [vmem:[%s18133_s2 + $0xad4] ss:$8 sps:$4 sm:$0xff]  }
 0x359   :  { %3937 = vmatprep.subr.bf16.mxu0 %v13591_v25  ;;  %v13634_v25 = vld [vmem:[%s18133_s2 + $0xad0] ss:$8 sps:$4 sm:$0xff]  }
 0x35b   :  { %3557 = vmatmul.mubr.bf16.gmra.mrb[60].mxu0 %v3172_v56  ;;  %v3571_v56 = vld [vmem:[#allocation2] sm:$0xc0] }
 0x35c   :  { %3938 = vmatpush1.bf16.msra.mxu0 %v13589_v1  ;;  %3965 = vmatprep.mubr.bf16.mxu0 %v3654_v5  ;;  %v3579_v22 = vpack.c.bf16 %v15658_v44, %v3571_v56  ;;  %v13639_v1 = vld [vmem:[%s18133_s2 + $0xae4] ss:$8 sps:$4 sm:$0xff]   ;;  %v13642_v5 = vld [vmem:[%s18133_s2 + $0xaf4] ss:$8 sps:$4 sm:$0xff]  }
 0x35d   :  { %3939 = vmatprep.subr.bf16.mxu0 %v13594_v4  ;;  %v3659_v4 = vrot.slane %v3586_v23, 3  ;;  %v13663_v56 = vld [vmem:[%s18135_s4 + $0x8] sm:$0xff]   ;;  %v13673_v23 = vld [vmem:[%s18135_s4 + $0x30] sm:$0xff]  }
 0x35e   :  { %v2562_v34 = vpop.f32.mrb[44].mxu0  ;;  %v3649_v17 = vrot.slane %v3579_v22, 3  ;;  %v13667_v22 = vld [vmem:[%s18135_s4 + $0x18] sm:$0xff]  }
 0x35f   :  { %v2563_v35 = vadd.f32 %v2562_v34, %v15715_v37  ;;  %v2564_v40 = vpop.f32.mrb[45].mxu0 }
 0x360   :  { %v2565_v12 = vadd.f32 %v2564_v40, %v15717_v39  ;;  %v2566_v41 = vpop.f32.mrb[46].mxu0  ;;  %3940 = vmatpush1.bf16.msra.mxu0 %v13592_v36  ;;  %v13598_v39 = vld [vmem:[%s18133_s2 + $0xa10] ss:$8 sps:$4 sm:$0xff]   ;;  %v3651_v44 = vsel %vm3648_vm8, %v3649_v17, %v3650_v16 }
 0x361   :  { %v15798_v45 = vadd.f32 %v2563_v35, %v15602_v21  ;;  %v2567_v46 = vpop.f32.mrb[47].mxu0  ;;  %3941 = vmatprep.subr.bf16.mxu0 %v13597_v32  ;;  %v13603_v21 = vld [vmem:[%s18133_s2 + $0xa24] ss:$8 sps:$4 sm:$0xff]   ;;  %v13670_v17 = vld [vmem:[%s18135_s4 + $0x70] sm:$0xff]  }
 0x362   :  { %v15804_v37 = vadd.f32 %v2565_v12, %v15608_v55  ;;  %v13606_v55 = vld [vmem:[%s18133_s2 + $0xa34] ss:$8 sps:$4 sm:$0xff]   ;;  %v13645_v32 = vld [vmem:[%s18133_s2 + $0xb04] ss:$8 sps:$4 sm:$0xff]   ;;  %v13643_v12 = vld [vmem:[%s18133_s2 + $0xb00] ss:$8 sps:$4 sm:$0xff]  }
 0x363   :  { %v13646_v46 = vld [vmem:[%s18133_s2 + $0xb10] ss:$8 sps:$4 sm:$0xff]  }
 0x364   :  { %3942 = vmatpush1.bf16.msra.mxu0 %v13595_v42  ;;  %v13648_v42 = vld [vmem:[%s18133_s2 + $0xb14] ss:$8 sps:$4 sm:$0xff]  }
 0x365   :  { %3943 = vmatprep.subr.bf16.mxu0 %v13600_v47  ;;  %v13651_v47 = vld [vmem:[%s18133_s2 + $0xb24] ss:$8 sps:$4 sm:$0xff]  }
 0x368   :  { %3944 = vmatpush1.bf16.msra.mxu0 %v13598_v39  ;;  %v13649_v39 = vld [vmem:[%s18133_s2 + $0xb20] ss:$8 sps:$4 sm:$0xff]  }
 0x369   :  { %3945 = vmatprep.subr.bf16.mxu0 %v13603_v21  ;;  %v13654_v21 = vld [vmem:[%s18133_s2 + $0xb34] ss:$8 sps:$4 sm:$0xff]  }
 0x36c   :  { %3946 = vmatpush1.bf16.msra.mxu0 %v13601_v48  ;;  %v13652_v48 = vld [vmem:[%s18133_s2 + $0xb30] ss:$8 sps:$4 sm:$0xff]  }
 0x36d   :  { %3947 = vmatprep.subr.bf16.mxu0 %v13606_v55  ;;  %v13657_v55 = vld [vmem:[%s18133_s2 + $0xb44] ss:$8 sps:$4 sm:$0xff]  }
 0x370   :  { %3948 = vmatpush1.bf16.msra.mxu0 %v13604_v33  ;;  %v3577_v33 = vld [vmem:[#allocation2 + $0x70] sm:$0x3] }
 0x371   :  { %3949 = vmatprep.subr.bf16.mxu0 %v13609_v52  ;;  %v13655_v52 = vld [vmem:[%s18133_s2 + $0xb40] ss:$8 sps:$4 sm:$0xff]  }
 0x374   :  { %3950 = vmatpush1.bf16.msra.mxu0 %v13607_v54  ;;  %v13660_v54 = vld [vmem:[%s18133_s2 + $0xb54] ss:$8 sps:$4 sm:$0xff]  }
 0x375   :  { %3951 = vmatprep.subr.bf16.mxu0 %v13612_v57  ;;  %v3585_v57 = vpack.c.bf16 %v3577_v33, %v15544_v31 }
 0x378   :  { %3952 = vmatpush1.bf16.msra.mxu0 %v13610_v58  ;;  %v3573_v58 = vld [vmem:[#allocation2 + $0x10] sm:$0xc0] }
 0x379   :  { %3953 = vmatprep.subr.bf16.mxu0 %v13615_v59  ;;  %v13658_v59 = vld [vmem:[%s18133_s2 + $0xb50] ss:$8 sps:$4 sm:$0xff]  }
 0x37c   :  { %3954 = vmatpush1.bf16.msra.mxu0 %v13613_v14  ;;  %v3581_v14 = vpack.c.bf16 %v15737_v51, %v3573_v58 }
 0x37d   :  { %3955 = vmatprep.subr.bf16.mxu0 %v13618_v63  ;;  %v3656_v63 = vrot.slane %v3585_v57, 3 }
 0x380   :  { %3956 = vmatpush1.bf16.msra.mxu0 %v13616_v6  ;;  %v3655_v6 = vrot.slane %v3581_v14, 3 }
 0x381   :  { %3957 = vmatprep.subr.bf16.mxu0 %v13621_v7 }
 0x382   :  { %v3657_v7 = vsel %vm3648_vm8, %v3655_v6, %v3656_v63 }
 0x384   :  { %3958 = vmatpush1.bf16.msra.mxu0 %v13619_v50 }
 0x385   :  { %3959 = vmatprep.subr.bf16.mxu0 %v13624_v10 }
 0x388   :  { %3960 = vmatpush1.bf16.msra.mxu0 %v13622_v8 }
 0x389   :  { %3961 = vmatprep.subr.bf16.mxu0 %v13627_v9 }
 0x38c   :  { %3962 = vmatpush1.bf16.msra.mxu0 %v13625_v13 }
 0x38d   :  { %3963 = vmatprep.subr.bf16.mxu0 %v13630_v0  ;;  %v13661_v0 = vld [vmem:[%s18135_s4] sm:$0xff]  }
 0x390   :  { %3964 = vmatpush1.bf16.msra.mxu0 %v13628_v18  ;;  %v13666_v18 = vld [vmem:[%s18135_s4 + $0x60] sm:$0xff]  }
 0x391   :  { %3984 = vmatprep.subr.bf16.mxu0 %v13633_v24  ;;  %v13668_v24 = vld [vmem:[%s18135_s4 + $0x68] sm:$0xff]  }
 0x393   :  { %3966 = vmatmul.mubr.bf16.vlgmr.msra.gmra.mrb[12].mxu0 %v3651_v44 }
 0x394   :  { %3975 = vmatprep.mubr.bf16.mxu0 %v15776_v3  ;;  %3985 = vmatpush1.bf16.msra.mxu0 %v13631_v38  ;;  %v3658_v3 = vrot.slane %v3582_v29, 3  ;;  %v13671_v38 = vld [vmem:[%s18135_s4 + $0x28] sm:$0xff]   ;;  %v13675_v29 = vld [vmem:[%s18135_s4 + $0x38] sm:$0xff]  }
 0x395   :  { %3986 = vmatprep.subr.bf16.mxu0 %v13636_v19 }
 0x396   :  { %v3660_v36 = vsel %vm3648_vm8, %v3658_v3, %v3659_v4  ;;  %v13678_v3 = vld [vmem:[%s18135_s4 + $0x90] sm:$0xff]  }
 0x398   :  { %3987 = vmatpush1.bf16.msra.mxu0 %v13634_v25  ;;  %v13674_v25 = vld [vmem:[%s18135_s4 + $0x80] sm:$0xff]  }
 0x399   :  { %3988 = vmatprep.subr.bf16.mxu0 %v13639_v1 }
 0x39b   :  { %3976 = vmatmul.mubr.bf16.gmra.mrb[64].mxu0 %v3650_v16  ;;  %v13669_v16 = vld [vmem:[%s18135_s4 + $0x20] sm:$0xff]  }
 0x39c   :  { %3989 = vmatpush1.bf16.msra.mxu0 %v13637_v61  ;;  %11418 = vmatprep.mubr.msk.bf16.mxu0 %vm628_vm2, %v3660_v36  ;;  %v13677_v61 = vld [vmem:[%s18135_s4 + $0x40] sm:$0xff]   ;;  %v13680_v36 = vld [vmem:[%s18135_s4 + $0x98] sm:$0xff]  }
 0x39d   :  { %3990 = vmatprep.subr.bf16.mxu0 %v13642_v5  ;;  %v13679_v5 = vld [vmem:[%s18135_s4 + $0x48] sm:$0xff]  }
 0x39e   :  { %v2981_v34 = vpop.f32.mrb[48].mxu0 }
 0x39f   :  { %v2983_v35 = vpop.f32.mrb[49].mxu0 }
 0x3a0   :  { %v2985_v40 = vpop.f32.mrb[50].mxu0  ;;  %3991 = vmatpush1.bf16.msra.mxu0 %v13640_v43 }
 0x3a1   :  { %v2986_v41 = vpop.f32.mrb[51].mxu0  ;;  %3992 = vmatprep.subr.bf16.mxu0 %v13645_v32 }
 0x3a4   :  { %3993 = vmatpush1.bf16.msra.mxu0 %v13643_v12 }
 0x3a5   :  { %3994 = vmatprep.subr.bf16.mxu0 %v13648_v42 }
 0x3a8   :  { %3995 = vmatpush1.bf16.msra.mxu0 %v13646_v46 }
 0x3a9   :  { %3996 = vmatprep.subr.bf16.mxu0 %v13651_v47 }
 0x3ac   :  { %3997 = vmatpush1.bf16.msra.mxu0 %v13649_v39 }
 0x3ad   :  { %3998 = vmatprep.subr.bf16.mxu0 %v13654_v21 }
 0x3b0   :  { %3999 = vmatpush1.bf16.msra.mxu0 %v13652_v48  ;;  %v10671_v48 = vld [vmem:[%s18136_s5 + $0x1] ss:$4 sm:$0x3] }
 0x3b1   :  { %4000 = vmatprep.subr.bf16.mxu0 %v13657_v55  ;;  %v16034_v55 = vrot.slane %v10671_v48, %v575_v49  ;;  %v16038_v33 = vrot.slane %v10671_v48, %v579_v53  ;;  %v13686_v48 = vld [vmem:[%s18134_s3 + $0x40] sm:$0xff]  }
 0x3b4   :  { %4001 = vmatpush1.bf16.msra.mxu0 %v13655_v52 }
 0x3b5   :  { %4002 = vmatprep.subr.bf16.mxu0 %v13660_v54 }
 0x3b8   :  { %4003 = vmatpush1.bf16.msra.mxu0 %v13658_v59 }
 0x3b9   :  { %4154 = vmatprep.subr.bf16.mxu0 %v14421_v2 }
 0x3bb   :  { %4017 = vmatmul.mubr.bf16.vlgmr.msra.gmra.mrb[12].mxu0 %v3657_v7 }
 0x3bc   :  { %11419 = vmatprep.mubr.msk.bf16.mxu0 %vm628_vm2, %v3659_v4  ;;  %4155 = vmatpush1.bf16.msra.mxu0 %v13661_v0  ;;  %v13676_v4 = vld [vmem:[%s18135_s4 + $0x88] sm:$0xff]  }
 0x3bd   :  { %4156 = vmatprep.subr.bf16.mxu0 %v14421_v2 }
 0x3c0   :  { %4157 = vmatpush1.bf16.msra.mxu0 %v13663_v56 }
 0x3c1   :  { %4158 = vmatprep.subr.bf16.mxu0 %v14421_v2 }
 0x3c3   :  { %4027 = vmatmul.mubr.bf16.gmra.mrb[68].mxu0 %v3656_v63 }
 0x3c6   :  { %v3032_v31 = vpop.f32.mrb[52].mxu0 }
 0x3c7   :  { %v3033_v50 = vadd.f32 %v3032_v31, %v2981_v34  ;;  %v3034_v10 = vpop.f32.mrb[53].mxu0 }
 0x3c8   :  { %v3035_v8 = vadd.f32 %v3034_v10, %v2983_v35  ;;  %v3036_v9 = vpop.f32.mrb[54].mxu0 }
 0x3c9   :  { %v15943_v11 = vadd.f32 %v3033_v50, %v15798_v45  ;;  %v3037_v51 = vpop.f32.mrb[55].mxu0  ;;  %v13664_v45 = vld [vmem:[%s18135_s4 + $0x58] sm:$0xff]  }
 0x3ca   :  { %v15946_v13 = vadd.f32 %v3035_v8, %v15804_v37  ;;  %4285 = vmatpush1.bf16.msra.mxu1 %v13664_v45  ;;  %v13665_v37 = vld [vmem:[%s18135_s4 + $0x10] sm:$0xff]  }
 0x3cb   :  { %4286 = vmatprep.subr.bf16.mxu1 %v14421_v2  ;;  %4159 = vmatpush1.bf16.msra.mxu0 %v13665_v37 }
 0x3cc   :  { %4160 = vmatprep.subr.bf16.mxu0 %v14421_v2 }
 0x3ce   :  { %4287 = vmatpush1.bf16.msra.mxu1 %v13666_v18 }
 0x3cf   :  { %4288 = vmatprep.subr.bf16.mxu1 %v14421_v2  ;;  %4161 = vmatpush1.bf16.msra.mxu0 %v13667_v22 }
 0x3d0   :  { %4162 = vmatprep.subr.bf16.mxu0 %v14421_v2 }
 0x3d2   :  { %4289 = vmatpush1.bf16.msra.mxu1 %v13668_v24 }
 0x3d3   :  { %4290 = vmatprep.subr.bf16.mxu1 %v14421_v2  ;;  %4163 = vmatpush1.bf16.msra.mxu0 %v13669_v16  ;;  %v14422_v16 = vmov 0.0  }
 0x3d4   :  { %4164 = vmatprep.subr.bf16.mxu0 %v14421_v2 }
 0x3d6   :  { %4291 = vmatpush1.bf16.msra.mxu1 %v13670_v17 }
 0x3d7   :  { %4292 = vmatprep.subr.bf16.mxu1 %v14421_v2  ;;  %4165 = vmatpush1.bf16.msra.mxu0 %v13671_v38 }
 0x3d8   :  { %4166 = vmatprep.subr.bf16.mxu0 %v14421_v2 }
 0x3da   :  { %4293 = vmatpush1.bf16.msra.mxu1 %v13672_v26 }
 0x3db   :  { %4294 = vmatprep.subr.bf16.mxu1 %v14421_v2  ;;  %4167 = vmatpush1.bf16.msra.mxu0 %v13673_v23 }
 0x3dc   :  { %4168 = vmatprep.subr.bf16.mxu0 %v14421_v2 }
 0x3de   :  { %4295 = vmatpush1.bf16.msra.mxu1 %v13674_v25 }
 0x3df   :  { %4296 = vmatprep.subr.bf16.mxu1 %v14421_v2  ;;  %4169 = vmatpush1.bf16.msra.mxu0 %v13675_v29 }
 0x3e0   :  { %4170 = vmatprep.subr.bf16.mxu0 %v14421_v2 }
 0x3e2   :  { %4297 = vmatpush1.bf16.msra.mxu1 %v13676_v4 }
 0x3e3   :  { %4298 = vmatprep.subr.bf16.mxu1 %v14421_v2  ;;  %4171 = vmatpush1.bf16.msra.mxu0 %v13677_v61 }
 0x3e4   :  { %4172 = vmatprep.subr.bf16.mxu0 %v14421_v2 }
 0x3e6   :  { %4299 = vmatpush1.bf16.msra.mxu1 %v13678_v3 }
 0x3e7   :  { %4300 = vmatprep.subr.bf16.mxu1 %v14421_v2  ;;  %4173 = vmatpush1.bf16.msra.mxu0 %v13679_v5 }
 0x3e8   :  { %9452 = vmatprep.subr.bf16.mxu0 %v14421_v2 }
 0x3ea   :  { %4301 = vmatpush1.bf16.msra.mxu1 %v13680_v36 }
 0x3eb   :  { %12565 = vmatprep.subr.bf16.mxu1 %v14422_v16 }
 0x406   :  { %v3507_v19 = vpop.f32.mrb[56].mxu0 }
 0x407   :  { %v3509_v44 = vpop.f32.mrb[57].mxu0 }
 0x408   :  { %v3511_v27 = vpop.f32.mrb[58].mxu0 }
 0x409   :  { %v3512_v1 = vpop.f32.mrb[59].mxu0 }
 0x42e   :  { %v3558_v43 = vpop.f32.mrb[60].mxu0 }
 0x42f   :  { %v3559_v32 = vadd.f32 %v3558_v43, %v3507_v19  ;;  %v3560_v34 = vpop.f32.mrb[61].mxu0 }
 0x430   :  { %v3561_v35 = vadd.f32 %v3560_v34, %v3509_v44  ;;  %v3562_v40 = vpop.f32.mrb[62].mxu0 }
 0x431   :  { %v3569_v12 = vadd.f32 %v3559_v32, %v15943_v11  ;;  %v3563_v41 = vpop.f32.mrb[63].mxu0 }
 0x432   :  { %v3570_v42 = vadd.f32 %v3561_v35, %v15946_v13 }
 0x46e   :  { %v3977_v46 = vpop.f32.mrb[64].mxu0 }
 0x46f   :  { %v3979_v47 = vpop.f32.mrb[65].mxu0 }
 0x470   :  { %v3981_v39 = vpop.f32.mrb[66].mxu0 }
 0x471   :  { %v3982_v21 = vpop.f32.mrb[67].mxu0  ;;  %v13684_v39 = vld [vmem:[%s18134_s3 + $0x30] sm:$0xff]  }
 0x472   :  { %v13685_v21 = vld [vmem:[%s18134_s3 + $0x38] sm:$0xff]  }
 0x48e   :  { %v4018_v52 = vpop.f32.mrb[12].mxu0 }
 0x48f   :  { %v4052_v54 = vadd.f32 %v16034_v55, %v4018_v52  ;;  %v4020_v57 = vpop.f32.mrb[13].mxu0  ;;  %v13687_v52 = vld [vmem:[%s18134_s3 + $0x48] sm:$0xff]  }
 0x490   :  { %v4053_v58 = vadd.f32 %v16038_v33, %v4020_v57  ;;  %v4022_v59 = vpop.f32.mrb[14].mxu0 }
 0x491   :  { %v4054_v14 = vadd.f32 %v16034_v55, %v4022_v59  ;;  %v4024_v63 = vpop.f32.mrb[15].mxu0  ;;  %v4058_v7 = vmax.f32 %v4052_v54, 0.0 }
 0x492   :  { %v4055_v6 = vadd.f32 %v16038_v33, %v4024_v63  ;;  %v4059_v49 = vmax.f32 %v4053_v58, 0.0 }
 0x493   :  { %v4060_v31 = vmax.f32 %v4054_v14, 0.0 }
 0x494   :  { %v4061_v50 = vmax.f32 %v4055_v6, 0.0 }
 0x495   :  { %v4064_v10 = vpack.c.bf16 %v4060_v31, %v4058_v7 }
 0x496   :  { %v4065_v20 = vpack.c.bf16 %v4061_v50, %v4059_v49  ;;  %v4028_v53 = vpop.f32.mrb[68].mxu0 }
 0x497   :  { %v4029_v8 = vadd.f32 %v4028_v53, %v3977_v46  ;;  %v4030_v9 = vpop.f32.mrb[69].mxu0  ;;  %v13682_v46 = vld [vmem:[%s18135_s4 + $0x108] sm:$0x1f]  }
 0x498   :  { %v4031_v11 = vadd.f32 %v4030_v9, %v3979_v47  ;;  %v4032_v51 = vpop.f32.mrb[70].mxu0  ;;  %11430 = vmatprep.mubr.msk.bf16.mxu0 %vm628_vm2, %v4065_v20  ;;  %11442 = vmatprep.mubr.msk.bf16.mxu1 %vm628_vm2, %v4065_v20  ;;  %v13683_v47 = vld [vmem:[%s18134_s3 + $0x28] sm:$0xff]   ;;  %v13691_v9 = vld [vmem:[%s18134_s3 + $0x18] sm:$0xff]  }
 0x499   :  { %v4039_v13 = vadd.f32 %v4029_v8, %v3569_v12  ;;  %v4033_v0 = vpop.f32.mrb[71].mxu0  ;;  %4187 = vmatmul.mubr.bf16.vlgmr.msra.gmra.mrb[72].mxu0 %v4064_v10  ;;  %4315 = vmatmul.mubr.bf16.vlgmr.msra.gmra.mrb[8].mxu1 %v4064_v10  ;;  %v13688_v10 = vld [vmem:[%s18134_s3] sm:$0xff]   ;;  %v13689_v53 = vld [vmem:[%s18134_s3 + $0x8] sm:$0xff]   ;;  %v13690_v8 = vld [vmem:[%s18134_s3 + $0x10] sm:$0xff]  }
 0x49a   :  { %v4040_v15 = vadd.f32 %v4031_v11, %v3570_v42  ;;  %v13681_v42 = vld [vmem:[%s18135_s4 + $0x100] sm:$0x1f]  }
 0x49b   :  { %v4056_v56 = vadd.f32 %v16034_v55, %v4039_v13  ;;  %v13692_v11 = vld [vmem:[%s18134_s3 + $0x20] sm:$0xff]   ;;  %v13693_v13 = vld [vmem:[%s18134_s3 + $0x50] sm:$0xff]  }
 0x49c   :  { %v4057_v45 = vadd.f32 %v16038_v33, %v4040_v15  ;;  %v13694_v15 = vld [vmem:[%s18134_s3 + $0x58] sm:$0xff]  }
 0x49d   :  { %v4062_v37 = vmax.f32 %v4056_v56, 0.0  ;;  %v13695_v56 = vld [vmem:[%s18134_s3 + $0x60] sm:$0xff]  }
 0x49e   :  { %v4063_v18 = vmax.f32 %v4057_v45, 0.0  ;;  %v13696_v45 = vld [vmem:[%s18134_s3 + $0x68] sm:$0xff]  }
 0x49f   :  { %v4066_v24 = vpack.c.bf16 %v4062_v37, %v4062_v37  ;;  %v13697_v37 = vld [vmem:[%s18134_s3 + $0x70] sm:$0xff]  }
 0x4a0   :  { %v4067_v22 = vpack.c.bf16 %v4063_v18, %v4063_v18 }
 0x4a2   :  { %11431 = vmatprep.mubr.msk.bf16.mxu0 %vm628_vm2, %v4067_v22  ;;  %11443 = vmatprep.mubr.msk.bf16.mxu1 %vm628_vm2, %v4067_v22  ;;  %v13698_v22 = vld [vmem:[%s18134_s3 + $0x78] sm:$0xff]  }
 0x4a3   :  { %4195 = vmatmul.mubr.bf16.gmra.mrb[76].mxu0 %v4066_v24  ;;  %4323 = vmatmul.mubr.bf16.gmra.mrb[12].mxu1 %v4066_v24 }
 0x4a4   :  { %12569 = vmatprep.mubr.msk.bf16.mxu1 %vm14423_vm9, %v14422_v16 }
 0x56c   :  { %v4188_v17 = vpop.f32.mrb[72].mxu0  ;;  %v4316_v38 = vpop.f32.mrb[8].mxu1 }
 0x56d   :  { %v4330_v26 = vmax.f32 %v4188_v17, %v4316_v38  ;;  %v4190_v19 = vpop.f32.mrb[73].mxu0  ;;  %v4318_v44 = vpop.f32.mrb[9].mxu1  ;;  %v13699_v17 = vld [vmem:[%s18134_s3 + $0x80] sm:$0xff]   ;;  %v13700_v38 = vld [vmem:[%s18134_s3 + $0x88] sm:$0xff]  }
 0x56e   :  { %v4191_v23 = vpop.f32.mrb[74].mxu0  ;;  %v4319_v25 = vpop.f32.mrb[10].mxu1  ;;  %v13702_v19 = vld [vmem:[%s18134_s3 + $0x98] sm:$0xff]  }
 0x56f   :  { %v4331_v27 = vmax.f32 %v4191_v23, %v4319_v25  ;;  %v4193_v1 = vpop.f32.mrb[75].mxu0  ;;  %v4321_v29 = vpop.f32.mrb[11].mxu1  ;;  %v13703_v23 = vld [vmem:[%s18134_s3 + $0xa0] sm:$0xff]  }
 0x570   :  { %v13705_v1 = vld [vmem:[%s18134_s3 + $0xb0] sm:$0xff]   ;;  %v13706_v29 = vld [vmem:[%s18134_s3 + $0xb8] sm:$0xff]  }
 0x571   :  { %v4333_v4 = vpack.c.bf16 %v4331_v27, %v4330_v26  ;;  %v13701_v26 = vld [vmem:[%s18134_s3 + $0x90] sm:$0xff]   ;;  %v13704_v27 = vld [vmem:[%s18134_s3 + $0xa8] sm:$0xff]  }
 0x573   :  { %12566 = vmatpush3.bf16.msra.mxu1 %v4333_v4 }
 0x574   :  { %12567 = vmatprep.subr.bf16.mxu1 %v14422_v16 }
 0x576   :  { %v4196_v61 = vpop.f32.mrb[76].mxu0  ;;  %v4324_v3 = vpop.f32.mrb[12].mxu1 }
 0x577   :  { %v4332_v5 = vmax.f32 %v4196_v61, %v4324_v3  ;;  %v4198_v36 = vpop.f32.mrb[77].mxu0  ;;  %v4326_v43 = vpop.f32.mrb[13].mxu1 }
 0x578   :  { %v4199_v32 = vpop.f32.mrb[78].mxu0  ;;  %v4327_v34 = vpop.f32.mrb[14].mxu1  ;;  %v13709_v36 = vld [vmem:[%s18135_s4 + $0xa8] sm:$0xff]   ;;  %v13710_v43 = vld [vmem:[%s18135_s4 + $0xb0] sm:$0xff]  }
 0x579   :  { %v4334_v35 = vpack.c.bf16 %v4332_v5, %v4332_v5  ;;  %v4200_v40 = vpop.f32.mrb[79].mxu0  ;;  %v4328_v12 = vpop.f32.mrb[15].mxu1  ;;  %v13708_v5 = vld [vmem:[%s18135_s4 + $0xa0] sm:$0xff]   ;;  %v13711_v32 = vld [vmem:[%s18135_s4 + $0xb8] sm:$0xff]  }
 0x57a   :  { %v13712_v34 = vld [vmem:[%s18135_s4 + $0xc0] sm:$0xff]  }
 0x57b   :  { %v4348_v41 = vsel %vm4346_vm10, %v4334_v35, 0  ;;  %v13713_v35 = vld [vmem:[%s18135_s4 + $0xc8] sm:$0xff]  }
 0x57c   :  { %12568 = vmatpush3.bf16.msra.mxu1 %v4348_v41 }
 0x57d   :  { %12573 = vmatprep.subr.bf16.mxu1 %v14422_v16 }
 0x57f   :  { %12570 = vmatmul.mubr.msk.bf16.vlgmr.msra.gmra.mrb[16].mxu1 %vm4342_vm11, %v13681_v42 }
 0x580   :  { %12574 = vmatpush3.bf16.msra.mxu1 %v4333_v4  ;;  %12577 = vmatprep.mubr.msk.bf16.mxu1 %vm14423_vm9, %v14422_v16  ;;  %v13707_v4 = vld [vmem:[%s18134_s3 + $0xc0] sm:$0xff]  }
 0x581   :  { %12575 = vmatprep.subr.bf16.mxu1 %v14422_v16 }
 0x584   :  { %12576 = vmatpush3.bf16.msra.mxu1 %v4348_v41 }
 0x585   :  { %12581 = vmatprep.subr.bf16.mxu1 %v14422_v16 }
 0x587   :  { %12578 = vmatmul.mubr.msk.bf16.vlgmr.msra.gmra.mrb[20].mxu1 %vm4342_vm11, %v13682_v46 }
 0x588   :  { %12591 = vmatprep.mubr.msk.bf16.mxu1 %vm14423_vm9, %v14422_v16  ;;  %12582 = vmatpush3.bf16.msra.mxu1 %v13683_v47 }
 0x589   :  { %12583 = vmatprep.subr.bf16.mxu1 %v14422_v16 }
 0x58c   :  { %12584 = vmatpush3.bf16.msra.mxu1 %v13684_v39 }
 0x58d   :  { %12585 = vmatprep.subr.bf16.mxu1 %v14422_v16 }
 0x590   :  { %12586 = vmatpush3.bf16.msra.mxu1 %v13685_v21 }
 0x591   :  { %12587 = vmatprep.subr.bf16.mxu1 %v14422_v16 }
 0x594   :  { %12588 = vmatpush3.bf16.msra.mxu1 %v13686_v48 }
 0x595   :  { %12589 = vmatprep.subr.bf16.mxu1 %v14422_v16 }
 0x598   :  { %12590 = vmatpush3.bf16.msra.mxu1 %v13687_v52 }
 0x599   :  { %12595 = vmatprep.subr.bf16.mxu1 %v14422_v16 }
 0x652   :  { %v4384_v54 = vpop.f32.mrb[16].mxu1 }
 0x653   :  { %v12571_v57 = vpop.f32.mrb[17].mxu1 }
 0x654   :  { %v4387_v58 = vpop.f32.mrb[18].mxu1 }
 0x655   :  { %v12572_v59 = vpop.f32.mrb[19].mxu1 }
 0x65a   :  { %v4435_v14 = vpop.f32.mrb[20].mxu1 }
 0x65b   :  { %v4442_v63 = vmax.f32 %v4384_v54, %v4435_v14  ;;  %v12579_v6 = vpop.f32.mrb[21].mxu1 }
 0x65c   :  { %v4438_v7 = vpop.f32.mrb[22].mxu1 }
 0x65d   :  { %4445 = vst.msk [vmem:[#allocation3] sm:$0xff] %vm4444_vm12, %v4442_v63  ;;  %v4443_v31 = vmax.f32 %v4387_v58, %v4438_v7  ;;  %v12580_v49 = vpop.f32.mrb[23].mxu1 }
 0x65e   :  { %v11518_v49 = vld [vmem:[%s18136_s5 + $0x2] ss:$0 sm:$0xff] }
 0x65f   :  { %4447 = vst.msk [vmem:[#allocation3 + $0x8] sm:$0x3] %vm4446_vm13, %v4443_v31 }
 0x664   :  { %v4460_v50 = vld [vmem:[#allocation3 + $0x1] sm:$0x3f] }
 0x665   :  { %v4461_v20 = vpack.c.bf16 %v4460_v50, %v4460_v50  ;;  %v4448_v51 = vld [vmem:[#allocation3] sm:$0x3f] }
 0x666   :  { %v4449_v0 = vpack.c.bf16 %v4448_v51, %v4448_v51  ;;  %v4619_v18 = vld [vmem:[#allocation3 + $0x2] sm:$0x3f] }
 0x667   :  { %12592 = vmatmul.mubr.msk.bf16.vlgmr.msra.gmra.mrb[24].mxu1 %vm4444_vm12, %v4461_v20  ;;  %v4620_v24 = vpack.c.bf16 %v4619_v18, %v4619_v18  ;;  %v4706_v44 = vld [vmem:[#allocation3 + $0x3] sm:$0x3f] }
 0x668   :  { %12596 = vmatpush3.bf16.msra.mxu1 %v13688_v10  ;;  %12605 = vmatprep.mubr.msk.bf16.mxu1 %vm14423_vm9, %v14422_v16  ;;  %v4707_v25 = vpack.c.bf16 %v4706_v44, %v4706_v44  ;;  %v4793_v61 = vld [vmem:[#allocation3 + $0x4] sm:$0x3f] }
 0x669   :  { %12597 = vmatprep.subr.bf16.mxu1 %v14422_v16  ;;  %v4794_v3 = vpack.c.bf16 %v4793_v61, %v4793_v61  ;;  %v13722_v61 = vld [vmem:[%s18135_s4 + $0x130] sm:$0xff]  }
 0x66c   :  { %12598 = vmatpush3.bf16.msra.mxu1 %v13689_v53 }
 0x66d   :  { %12599 = vmatprep.subr.bf16.mxu1 %v14422_v16 }
 0x670   :  { %12600 = vmatpush3.bf16.msra.mxu1 %v13690_v8 }
 0x671   :  { %12601 = vmatprep.subr.bf16.mxu1 %v14422_v16 }
 0x674   :  { %12602 = vmatpush3.bf16.msra.mxu1 %v13691_v9 }
 0x675   :  { %12603 = vmatprep.subr.bf16.mxu1 %v14422_v16 }
 0x678   :  { %12604 = vmatpush3.bf16.msra.mxu1 %v13692_v11  ;;  %v13714_v11 = vld [vmem:[%s18135_s4 + $0xd0] sm:$0xff]  }
 0x679   :  { %12609 = vmatprep.subr.bf16.mxu1 %v14422_v16 }
 0x67b   :  { %12606 = vmatmul.mubr.msk.bf16.vlgmr.msra.gmra.mrb[28].mxu1 %vm4444_vm12, %v4449_v0  ;;  %v13716_v0 = vld [vmem:[%s18135_s4 + $0xe0] sm:$0xff]  }
 0x67c   :  { %12610 = vmatpush3.bf16.msra.mxu1 %v13693_v13  ;;  %12619 = vmatprep.mubr.msk.bf16.mxu1 %vm14423_vm9, %v14422_v16  ;;  %v13715_v13 = vld [vmem:[%s18135_s4 + $0xd8] sm:$0xff]  }
 0x67d   :  { %12611 = vmatprep.subr.bf16.mxu1 %v14422_v16 }
 0x680   :  { %12612 = vmatpush3.bf16.msra.mxu1 %v13694_v15  ;;  %v13717_v15 = vld [vmem:[%s18135_s4 + $0xe8] sm:$0xff]  }
 0x681   :  { %12613 = vmatprep.subr.bf16.mxu1 %v14422_v16 }
 0x684   :  { %12614 = vmatpush3.bf16.msra.mxu1 %v13695_v56  ;;  %v13718_v56 = vld [vmem:[%s18135_s4 + $0xf0] sm:$0xff]  }
 0x685   :  { %12615 = vmatprep.subr.bf16.mxu1 %v14422_v16 }
 0x688   :  { %12616 = vmatpush3.bf16.msra.mxu1 %v13696_v45  ;;  %v13719_v45 = vld [vmem:[%s18135_s4 + $0xf8] sm:$0xff]  }
 0x689   :  { %12617 = vmatprep.subr.bf16.mxu1 %v14422_v16 }
 0x68c   :  { %12618 = vmatpush3.bf16.msra.mxu1 %v13697_v37 }
 0x68d   :  { %12623 = vmatprep.subr.bf16.mxu1 %v14422_v16 }
 0x68f   :  { %12620 = vmatmul.mubr.msk.bf16.vlgmr.msra.gmra.mrb[32].mxu1 %vm4444_vm12, %v4620_v24 }
 0x690   :  { %12624 = vmatpush3.bf16.msra.mxu1 %v13698_v22  ;;  %12633 = vmatprep.mubr.msk.bf16.mxu1 %vm14423_vm9, %v14422_v16 }
 0x691   :  { %12625 = vmatprep.subr.bf16.mxu1 %v14422_v16 }
 0x694   :  { %12626 = vmatpush3.bf16.msra.mxu1 %v13699_v17 }
 0x695   :  { %12627 = vmatprep.subr.bf16.mxu1 %v14422_v16 }
 0x698   :  { %12628 = vmatpush3.bf16.msra.mxu1 %v13700_v38 }
 0x699   :  { %12629 = vmatprep.subr.bf16.mxu1 %v14422_v16 }
 0x69c   :  { %12630 = vmatpush3.bf16.msra.mxu1 %v13701_v26 }
 0x69d   :  { %12631 = vmatprep.subr.bf16.mxu1 %v14422_v16 }
 0x6a0   :  { %12632 = vmatpush3.bf16.msra.mxu1 %v13702_v19 }
 0x6a1   :  { %12637 = vmatprep.subr.bf16.mxu1 %v14422_v16 }
 0x6a3   :  { %12634 = vmatmul.mubr.msk.bf16.vlgmr.msra.gmra.mrb[36].mxu1 %vm4444_vm12, %v4707_v25 }
 0x6a4   :  { %12638 = vmatpush3.bf16.msra.mxu1 %v13703_v23  ;;  %12647 = vmatprep.mubr.msk.bf16.mxu1 %vm14423_vm9, %v14422_v16 }
 0x6a5   :  { %12639 = vmatprep.subr.bf16.mxu1 %v14422_v16 }
 0x6a8   :  { %12640 = vmatpush3.bf16.msra.mxu1 %v13704_v27  ;;  %v5068_v27 = vld [vmem:[%s18135_s4 + $0x110] sm:$0x3] }
 0x6a9   :  { %12641 = vmatprep.subr.bf16.mxu1 %v14422_v16 }
 0x6ac   :  { %12642 = vmatpush3.bf16.msra.mxu1 %v13705_v1  ;;  %v5117_v1 = vld [vmem:[%s18135_s4 + $0x118] sm:$0x3] }
 0x6ad   :  { %12643 = vmatprep.subr.bf16.mxu1 %v14422_v16 }
 0x6b0   :  { %12644 = vmatpush3.bf16.msra.mxu1 %v13706_v29  ;;  %v13720_v29 = vld [vmem:[%s18135_s4 + $0x120] sm:$0xff]  }
 0x6b1   :  { %12645 = vmatprep.subr.bf16.mxu1 %v14422_v16 }
 0x6b4   :  { %12646 = vmatpush3.bf16.msra.mxu1 %v13707_v4  ;;  %v13721_v4 = vld [vmem:[%s18135_s4 + $0x128] sm:$0xff]  }
 0x6b5   :  { %12651 = vmatprep.subr.bf16.mxu1 %v14422_v16 }
 0x6b7   :  { %12648 = vmatmul.mubr.msk.bf16.vlgmr.msra.gmra.mrb[40].mxu1 %vm4444_vm12, %v4794_v3 }
 0x6b8   :  { %12663 = vmatprep.mubr.msk.bf16.mxu1 %vm14423_vm9, %v14422_v16  ;;  %12652 = vmatpush3.bf16.msra.mxu1 %v13708_v5 }
 0x6b9   :  { %12653 = vmatprep.subr.bf16.mxu1 %v14422_v16 }
 0x6bc   :  { %12654 = vmatpush3.bf16.msra.mxu1 %v13709_v36 }
 0x6bd   :  { %12655 = vmatprep.subr.bf16.mxu1 %v14422_v16 }
 0x6c0   :  { %12656 = vmatpush3.bf16.msra.mxu1 %v13710_v43 }
 0x6c1   :  { %12657 = vmatprep.subr.bf16.mxu1 %v14422_v16 }
 0x6c4   :  { %12658 = vmatpush3.bf16.msra.mxu1 %v13711_v32 }
 0x6c5   :  { %12659 = vmatprep.subr.bf16.mxu1 %v14422_v16 }
 0x6c8   :  { %12660 = vmatpush3.bf16.msra.mxu1 %v13712_v34 }
 0x6c9   :  { %12661 = vmatprep.subr.bf16.mxu1 %v14422_v16 }
 0x6cc   :  { %12662 = vmatpush3.bf16.msra.mxu1 %v13713_v35 }
 0x6cd   :  { %12667 = vmatprep.subr.bf16.mxu1 %v14422_v16 }
 0x73a   :  { %v4540_v40 = vpop.f32.mrb[24].mxu1 }
 0x73b   :  { %v12593_v12 = vpop.f32.mrb[25].mxu1 }
 0x73c   :  { %v4543_v41 = vpop.f32.mrb[26].mxu1 }
 0x73d   :  { %v12594_v42 = vpop.f32.mrb[27].mxu1 }
 0x73e   :  { %v13723_v42 = vld [vmem:[%s18135_s4 + $0x138] sm:$0xff]  }
 0x74e   :  { %v4613_v46 = vpop.f32.mrb[28].mxu1 }
 0x74f   :  { %v4614_v47 = vadd.f32 %v4613_v46, %v4540_v40  ;;  %v12607_v39 = vpop.f32.mrb[29].mxu1 }
 0x750   :  { %v4616_v21 = vpop.f32.mrb[30].mxu1  ;;  %v13725_v39 = vld [vmem:[%s18135_s4 + $0x148] sm:$0xff]  }
 0x751   :  { %v12608_v48 = vpop.f32.mrb[31].mxu1 }
 0x752   :  { %v13726_v48 = vld [vmem:[%s18135_s4 + $0x150] sm:$0xff]  }
 0x762   :  { %v4699_v52 = vpop.f32.mrb[32].mxu1 }
 0x763   :  { %v4705_v54 = vadd.f32 %v4699_v52, %v4614_v47  ;;  %v12621_v57 = vpop.f32.mrb[33].mxu1  ;;  %v13724_v47 = vld [vmem:[%s18135_s4 + $0x140] sm:$0xff]  }
 0x764   :  { %v4702_v58 = vpop.f32.mrb[34].mxu1  ;;  %v13728_v57 = vld [vmem:[%s18135_s4 + $0x160] sm:$0xff]  }
 0x765   :  { %v12622_v59 = vpop.f32.mrb[35].mxu1  ;;  %v13731_v58 = vld [vmem:[%s18132_s1 + $0x44] ss:$16 sps:$4 sm:$0xff]  }
 0x776   :  { %v4786_v14 = vpop.f32.mrb[36].mxu1 }
 0x777   :  { %v4792_v63 = vadd.f32 %v4786_v14, %v4705_v54  ;;  %v12635_v6 = vpop.f32.mrb[37].mxu1  ;;  %v13727_v54 = vld [vmem:[%s18135_s4 + $0x158] sm:$0xff]   ;;  %v13729_v14 = vld [vmem:[%s18132_s1 + $0x40] ss:$16 sps:$4 sm:$0xff]  }
 0x778   :  { %v4789_v7 = vpop.f32.mrb[38].mxu1  ;;  %v13732_v6 = vld [vmem:[%s18132_s1 + $0x64] ss:$16 sps:$4 sm:$0x3f]  }
 0x779   :  { %v12636_v31 = vpop.f32.mrb[39].mxu1  ;;  %v13734_v7 = vld [vmem:[%s18132_s1 + $0x60] ss:$16 sps:$4 sm:$0x3f]  }
 0x77a   :  { %v11551_v31 = vld [vmem:[%s18131_s0 + $0x21] sm:$0xff] }
 0x78a   :  { %v4873_v50 = vpop.f32.mrb[40].mxu1 }
 0x78b   :  { %v4879_v10 = vadd.f32 %v4873_v50, %v4792_v63  ;;  %v12649_v20 = vpop.f32.mrb[41].mxu1  ;;  %v5449_v50 = vsel %vm102_vm0, %v13734_v7, 0  ;;  %v13780_v7 = vld [vmem:[%s18133_s2 + $0x1f0] ss:$8 sps:$4 sm:$0xff]  }
 0x78c   :  { %v4876_v53 = vpop.f32.mrb[42].mxu1 }
 0x78d   :  { %v4884_v8 = vadd.f32 %v11518_v49, %v4879_v10  ;;  %v12650_v9 = vpop.f32.mrb[43].mxu1  ;;  %v11552_v49 = vld [vmem:[%s18131_s0 + $0x29] sm:$0xff] }
 0x78e   :  { %v13737_v10 = vld [vmem:[%s18132_s1 + $0x4c] ss:$16 sps:$4 sm:$0xff]   ;;  %v5396_v20 = vpack.c.bf16 %v11552_v49, %v11551_v31  ;;  %v13735_v53 = vld [vmem:[%s18132_s1 + $0x48] ss:$16 sps:$4 sm:$0xff]  }
 0x78f   :  { %v4885_v51 = vpack.c.bf16 %v4884_v8, %v4884_v8  ;;  %v13738_v8 = vld [vmem:[%s18132_s1 + $0x6c] ss:$16 sps:$4 sm:$0x3f]   ;;  %v13740_v9 = vld [vmem:[%s18132_s1 + $0x68] ss:$16 sps:$4 sm:$0x3f]  }
 0x790   :  { %v13785_v31 = vld [vmem:[%s18133_s2 + $0x204] ss:$8 sps:$4 sm:$0xff]   ;;  %v13783_v49 = vld [vmem:[%s18133_s2 + $0x200] ss:$8 sps:$4 sm:$0xff]  }
 0x791   :  { %12664 = vmatmul.mubr.msk.bf16.vlgmr.msra.gmra.mrb[44].mxu1 %vm18138_vm14, %v4885_v51 }
 0x792   :  { %12668 = vmatpush3.bf16.msra.mxu1 %v13714_v11  ;;  %12679 = vmatprep.mubr.msk.bf16.mxu1 %vm14423_vm9, %v14422_v16  ;;  %v11553_v11 = vld [vmem:[%s18131_s0 + $0x31] sm:$0xff] }
 0x793   :  { %12669 = vmatprep.subr.bf16.mxu1 %v14422_v16 }
 0x796   :  { %12670 = vmatpush3.bf16.msra.mxu1 %v13715_v13  ;;  %v5455_v13 = vsel %vm102_vm0, %v13740_v9, 0  ;;  %v13794_v9 = vld [vmem:[%s18133_s2 + $0x234] ss:$8 sps:$4 sm:$0xff]  }
 0x797   :  { %12671 = vmatprep.subr.bf16.mxu1 %v14422_v16 }
 0x79a   :  { %12672 = vmatpush3.bf16.msra.mxu1 %v13716_v0  ;;  %v13743_v0 = vld [vmem:[%s18132_s1 + $0x4] ss:$16 sps:$4 sm:$0xff]  }
 0x79b   :  { %12673 = vmatprep.subr.bf16.mxu1 %v14422_v16 }
 0x79e   :  { %12674 = vmatpush3.bf16.msra.mxu1 %v13717_v15 }
 0x79f   :  { %12675 = vmatprep.subr.bf16.mxu1 %v14422_v16 }
 0x7a2   :  { %12676 = vmatpush3.bf16.msra.mxu1 %v13718_v56  ;;  %v13741_v56 = vld [vmem:[%s18132_s1] ss:$16 sps:$4 sm:$0xff]  }
 0x7a3   :  { %12677 = vmatprep.subr.bf16.mxu1 %v14422_v16 }
 0x7a6   :  { %12678 = vmatpush3.bf16.msra.mxu1 %v13719_v45  ;;  %v13744_v45 = vld [vmem:[%s18132_s1 + $0x24] ss:$16 sps:$4 sm:$0x3f]  }
 0x7a7   :  { %12683 = vmatprep.subr.bf16.mxu1 %v14422_v16 }
 0x7a9   :  { %12680 = vmatmul.mubr.msk.bf16.vlgmr.msra.gmra.mrb[48].mxu1 %vm18138_vm14, %v4885_v51  ;;  %vm18139_vm14 = vcmask 48128   ;;  %v11554_v51 = vld [vmem:[%s18131_s0 + $0x39] sm:$0x3] }
 0x7aa   :  { %12685 = vmatprep.mubr.msk.bf16.mxu1 %vm14423_vm9, %v14422_v16  ;;  %v5397_v15 = vpack.c.bf16 %v11554_v51, %v11553_v11  ;;  %v13797_v11 = vld [vmem:[%s18133_s2 + $0x244] ss:$8 sps:$4 sm:$0xff]   ;;  %v13795_v51 = vld [vmem:[%s18133_s2 + $0x240] ss:$8 sps:$4 sm:$0xff]  }
 0x864   :  { %v4972_v37 = vpop.f32.mrb[44].mxu1 }
 0x865   :  { %v12665_v18 = vpop.f32.mrb[45].mxu1 }
 0x866   :  { %v4975_v22 = vpop.f32.mrb[46].mxu1 }
 0x867   :  { %v12666_v24 = vpop.f32.mrb[47].mxu1  ;;  %v13749_v22 = vld [vmem:[%s18132_s1 + $0xc] ss:$16 sps:$4 sm:$0xff]  }
 0x868   :  { %v11547_v24 = vld [vmem:[%s18131_s0 + $0x20] sm:$0xff] }
 0x87c   :  { %v5060_v17 = vpop.f32.mrb[48].mxu1 }
 0x87d   :  { %v5066_v38 = vmax.f32 %v4972_v37, %v5060_v17  ;;  %v12681_v26 = vpop.f32.mrb[49].mxu1  ;;  %v13746_v37 = vld [vmem:[%s18132_s1 + $0x20] ss:$16 sps:$4 sm:$0x3f]   ;;  %v11548_v17 = vld [vmem:[%s18131_s0 + $0x28] sm:$0xff] }
 0x87e   :  { %v5063_v19 = vpop.f32.mrb[50].mxu1  ;;  %v5609_v18 = vsel %vm102_vm0, %v13746_v37, 0  ;;  %v13747_v26 = vld [vmem:[%s18132_s1 + $0x8] ss:$16 sps:$4 sm:$0xff]   ;;  %v13806_v37 = vld [vmem:[%s18133_s2 + $0x274] ss:$8 sps:$4 sm:$0xff]  }
 0x87f   :  { %v5067_v44 = vpack.c.bf16 %v5066_v38, %v5066_v38  ;;  %v12682_v23 = vpop.f32.mrb[51].mxu1  ;;  %v5382_v38 = vpack.c.bf16 %v11548_v17, %v11547_v24  ;;  %v13750_v19 = vld [vmem:[%s18132_s1 + $0x2c] ss:$16 sps:$4 sm:$0x3f]   ;;  %v13810_v24 = vld [vmem:[%s18133_s2 + $0x290] ss:$8 sps:$4 sm:$0xff]  }
 0x880   :  { %v11549_v23 = vld [vmem:[%s18131_s0 + $0x30] sm:$0xff] }
 0x881   :  { %v5075_v25 = vsel %vm18140_vm15, %v5067_v44, 0  ;;  %vm5190_vm15 = vcmask 392192   ;;  %v13752_v44 = vld [vmem:[%s18132_s1 + $0x28] ss:$16 sps:$4 sm:$0x3f]  }
 0x882   :  { %12684 = vmatpush3.bf16.msra.mxu1 %v5075_v25  ;;  %v13812_v17 = vld [vmem:[%s18133_s2 + $0x294] ss:$8 sps:$4 sm:$0xff]  }
 0x883   :  { %12689 = vmatprep.subr.bf16.mxu1 %v14422_v16 }
 0x885   :  { %12686 = vmatmul.mubr.msk.bf16.vlgmr.msra.gmra.mrb[52].mxu1 %vm18139_vm14, %v5068_v27  ;;  %v5615_v27 = vsel %vm102_vm0, %v13752_v44, 0 }
 0x886   :  { %12690 = vmatpush3.bf16.msra.mxu1 %v5075_v25  ;;  %12691 = vmatprep.mubr.msk.bf16.mxu1 %vm14423_vm9, %v14422_v16  ;;  %v11550_v25 = vld [vmem:[%s18131_s0 + $0x38] sm:$0x3] }
 0x887   :  { %12695 = vmatprep.subr.bf16.mxu1 %v14422_v16 }
 0x88d   :  { %12692 = vmatmul.mubr.msk.bf16.vlgmr.msra.gmra.mrb[56].mxu1 %vm18139_vm14, %v5117_v1  ;;  %vm5162_vm14 = vcmask 387072   ;;  %v13755_v1 = vld [vmem:[%s18132_s1 + $0x84] ss:$16 sps:$4 sm:$0xff]  }
 0x88e   :  { %12701 = vmatprep.mubr.msk.bf16.mxu1 %vm14423_vm9, %v14422_v16  ;;  %12696 = vmatpush3.bf16.msra.mxu1 %v13720_v29  ;;  %v5383_v29 = vpack.c.bf16 %v11550_v25, %v11549_v23 }
 0x88f   :  { %12697 = vmatprep.subr.bf16.mxu1 %v14422_v16 }
 0x892   :  { %12698 = vmatpush3.bf16.msra.mxu1 %v13721_v4  ;;  %v13753_v4 = vld [vmem:[%s18132_s1 + $0x80] ss:$16 sps:$4 sm:$0xff]  }
 0x893   :  { %12699 = vmatprep.subr.bf16.mxu1 %v14422_v16 }
 0x896   :  { %12700 = vmatpush3.bf16.msra.mxu1 %v13722_v61  ;;  %v13756_v61 = vld [vmem:[%s18132_s1 + $0xa4] ss:$16 sps:$4 sm:$0x3f]  }
 0x897   :  { %12705 = vmatprep.subr.bf16.mxu1 %v14422_v16 }
 0x958   :  { %v5111_v3 = vpop.f32.mrb[52].mxu1 }
 0x959   :  { %v12687_v5 = vpop.f32.mrb[53].mxu1 }
 0x95a   :  { %v5114_v36 = vpop.f32.mrb[54].mxu1 }
 0x95b   :  { %v12688_v43 = vpop.f32.mrb[55].mxu1  ;;  %v13761_v36 = vld [vmem:[%s18132_s1 + $0x8c] ss:$16 sps:$4 sm:$0xff]  }
 0x95c   :  { %v11591_v43 = vld [vmem:[%s18131_s0 + $0x22] sm:$0xff] }
 0x960   :  { %v5155_v32 = vpop.f32.mrb[56].mxu1 }
 0x961   :  { %v5161_v34 = vmax.f32 %v5111_v3, %v5155_v32  ;;  %v12693_v35 = vpop.f32.mrb[57].mxu1  ;;  %v13758_v3 = vld [vmem:[%s18132_s1 + $0xa0] ss:$16 sps:$4 sm:$0x3f]  }
 0x962   :  { %v5158_v40 = vpop.f32.mrb[58].mxu1  ;;  %v5783_v5 = vsel %vm102_vm0, %v13758_v3, 0  ;;  %v11592_v32 = vld [vmem:[%s18131_s0 + $0x2a] sm:$0xff] }
 0x963   :  { %5163 = vst.msk [vmem:[#allocation4] sm:$0x7] %vm5162_vm14, %v5161_v34  ;;  %v12694_v12 = vpop.f32.mrb[59].mxu1  ;;  %v5730_v34 = vpack.c.bf16 %v11592_v32, %v11591_v43  ;;  %v13759_v35 = vld [vmem:[%s18132_s1 + $0x88] ss:$16 sps:$4 sm:$0xff]  }
 0x964   :  { %v13762_v40 = vld [vmem:[%s18132_s1 + $0xac] ss:$16 sps:$4 sm:$0x3f]   ;;  %v13764_v12 = vld [vmem:[%s18132_s1 + $0xa8] ss:$16 sps:$4 sm:$0x3f]  }
 0x96a   :  { %v5164_v41 = vld [vmem:[#allocation4] sm:$0x1]  ;;  %v5235_v21 = vld [vmem:[#allocation4 + $0x1] sm:$0x1]  ;;  %v5305_v59 = vld [vmem:[#allocation4 + $0x2] sm:$0x1] }
 0x96b   :  { %v5165_v46 = vpack.c.bf16 %v5164_v41, %v5164_v41  ;;  %v5236_v52 = vpack.c.bf16 %v5235_v21, %v5235_v21  ;;  %v5306_v63 = vpack.c.bf16 %v5305_v59, %v5305_v59  ;;  %v11593_v41 = vld [vmem:[%s18131_s0 + $0x32] sm:$0xff]  ;;  %v13767_v21 = vld [vmem:[%s18133_s2 + $0x1a4] ss:$8 sps:$4 sm:$0xff]  }
 0x96c   :  { %v13774_v59 = vld [vmem:[%s18133_s2 + $0x1d0] ss:$8 sps:$4 sm:$0xff]  }
 0x96d   :  { %12702 = vmatmul.mubr.msk.bf16.vlgmr.msra.gmra.mrb[60].mxu1 %vm5190_vm15, %v5165_v46  ;;  %v5789_v46 = vsel %vm102_vm0, %v13764_v12, 0 }
 0x96e   :  { %12706 = vmatpush3.bf16.msra.mxu1 %v13723_v42  ;;  %12711 = vmatprep.mubr.msk.bf16.mxu1 %vm14423_vm9, %v14422_v16  ;;  %v11594_v42 = vld [vmem:[%s18131_s0 + $0x3a] sm:$0x3] }
 0x96f   :  { %12707 = vmatprep.subr.bf16.mxu1 %v14422_v16 }
 0x972   :  { %12708 = vmatpush3.bf16.msra.mxu1 %v13724_v47  ;;  %v5731_v47 = vpack.c.bf16 %v11594_v42, %v11593_v41 }
 0x973   :  { %12709 = vmatprep.subr.bf16.mxu1 %v14422_v16 }
 0x976   :  { %12710 = vmatpush3.bf16.msra.mxu1 %v13725_v39  ;;  %v13765_v39 = vld [vmem:[%s18133_s2 + $0x1a0] ss:$8 sps:$4 sm:$0xff]  }
 0x977   :  { %12715 = vmatprep.subr.bf16.mxu1 %v14422_v16 }
 0x979   :  { %12712 = vmatmul.mubr.msk.bf16.vlgmr.msra.gmra.mrb[60].mxu1 %vm5190_vm15, %v5236_v52  ;;  %v13768_v52 = vld [vmem:[%s18133_s2 + $0x1b0] ss:$8 sps:$4 sm:$0xff]  }
 0x97a   :  { %12716 = vmatpush3.bf16.msra.mxu1 %v13726_v48  ;;  %12721 = vmatprep.mubr.msk.bf16.mxu1 %vm14423_vm9, %v14422_v16  ;;  %v13770_v48 = vld [vmem:[%s18133_s2 + $0x1b4] ss:$8 sps:$4 sm:$0xff]  }
 0x97b   :  { %12717 = vmatprep.subr.bf16.mxu1 %v14422_v16 }
 0x97e   :  { %12718 = vmatpush3.bf16.msra.mxu1 %v13727_v54  ;;  %v13773_v54 = vld [vmem:[%s18133_s2 + $0x1c4] ss:$8 sps:$4 sm:$0xff]  }
 0x97f   :  { %12719 = vmatprep.subr.bf16.mxu1 %v14422_v16 }
 0x982   :  { %12720 = vmatpush3.bf16.msra.mxu1 %v13728_v57  ;;  %v13771_v57 = vld [vmem:[%s18133_s2 + $0x1c0] ss:$8 sps:$4 sm:$0xff]  }
 0x983   :  { %5460 = vmatprep.subr.bf16.mxu1 %v13731_v58  ;;  %v13776_v58 = vld [vmem:[%s18133_s2 + $0x1d4] ss:$8 sps:$4 sm:$0xff]  }
 0x985   :  { %12722 = vmatmul.mubr.msk.bf16.vlgmr.msra.gmra.mrb[60].mxu1 %vm5190_vm15, %v5306_v63  ;;  %v13777_v63 = vld [vmem:[%s18133_s2 + $0x1e0] ss:$8 sps:$4 sm:$0xff]  }
 0x986   :  { %5461 = vmatpush1.bf16.msra.mxu1 %v13729_v14  ;;  %5492 = vmatprep.mubr.bf16.mxu1 %v14421_v2  ;;  %v13779_v14 = vld [vmem:[%s18133_s2 + $0x1e4] ss:$8 sps:$4 sm:$0xff]  }
 0x987   :  { %11571 = vmatprep.subr.msk.bf16.mxu1 %vm102_vm0, %v13732_v6  ;;  %v13782_v6 = vld [vmem:[%s18133_s2 + $0x1f4] ss:$8 sps:$4 sm:$0xff]  }
 0x98a   :  { %5463 = vmatpush1.bf16.msra.mxu1 %v5449_v50  ;;  %v13788_v50 = vld [vmem:[%s18133_s2 + $0x214] ss:$8 sps:$4 sm:$0xff]  }
 0x98b   :  { %5513 = vmatprep.subr.bf16.mxu1 %v13737_v10  ;;  %v13786_v10 = vld [vmem:[%s18133_s2 + $0x210] ss:$8 sps:$4 sm:$0xff]  }
 0x98d   :  { %11572 = vmatmul.mubr.msk.bf16.vlgmr.msra.gmra.mrb[64].mxu1 %vm95_vm1, %v5396_v20 }
 0x98e   :  { %5514 = vmatpush1.bf16.msra.mxu1 %v13735_v53  ;;  %5502 = vmatprep.mubr.bf16.mxu1 %v14421_v2  ;;  %v13789_v53 = vld [vmem:[%s18133_s2 + $0x220] ss:$8 sps:$4 sm:$0xff]  }
 0x98f   :  { %11574 = vmatprep.subr.msk.bf16.mxu1 %vm102_vm0, %v13738_v8  ;;  %v13792_v8 = vld [vmem:[%s18133_s2 + $0x230] ss:$8 sps:$4 sm:$0xff]  }
 0x992   :  { %5516 = vmatpush1.bf16.msra.mxu1 %v5455_v13  ;;  %v13798_v13 = vld [vmem:[%s18133_s2 + $0x250] ss:$8 sps:$4 sm:$0xff]  }
 0x993   :  { %5620 = vmatprep.subr.bf16.mxu1 %v13743_v0  ;;  %v13800_v0 = vld [vmem:[%s18133_s2 + $0x254] ss:$8 sps:$4 sm:$0xff]  }
 0x995   :  { %11573 = vmatmul.mubr.msk.bf16.gmra.mrb[68].mxu1 %vm95_vm1, %v5397_v15 }
 0x996   :  { %5545 = vmatprep.mubr.bf16.mxu1 %v14421_v2 }
 0x99d   :  { %11575 = vmatmul.mubr.msk.bf16.vlgmr.msra.gmra.mrb[72].mxu1 %vm95_vm1, %v5396_v20  ;;  %v13791_v20 = vld [vmem:[%s18133_s2 + $0x224] ss:$8 sps:$4 sm:$0xff]  }
 0x99e   :  { %5621 = vmatpush1.bf16.msra.mxu1 %v13741_v56  ;;  %5555 = vmatprep.mubr.bf16.mxu1 %v14421_v2  ;;  %v13801_v56 = vld [vmem:[%s18133_s2 + $0x260] ss:$8 sps:$4 sm:$0xff]  }
 0x99f   :  { %11585 = vmatprep.subr.msk.bf16.mxu1 %vm102_vm0, %v13744_v45  ;;  %v13804_v45 = vld [vmem:[%s18133_s2 + $0x270] ss:$8 sps:$4 sm:$0xff]  }
 0x9a2   :  { %5623 = vmatpush1.bf16.msra.mxu1 %v5609_v18  ;;  %v13809_v18 = vld [vmem:[%s18133_s2 + $0x284] ss:$8 sps:$4 sm:$0xff]  }
 0x9a3   :  { %5673 = vmatprep.subr.bf16.mxu1 %v13749_v22  ;;  %v13807_v22 = vld [vmem:[%s18133_s2 + $0x280] ss:$8 sps:$4 sm:$0xff]  }
 0x9a5   :  { %11576 = vmatmul.mubr.msk.bf16.gmra.mrb[76].mxu1 %vm95_vm1, %v5397_v15  ;;  %v13803_v15 = vld [vmem:[%s18133_s2 + $0x264] ss:$8 sps:$4 sm:$0xff]  }
 0x9a6   :  { %5652 = vmatprep.mubr.bf16.mxu1 %v14421_v2 }
 0x9ad   :  { %11586 = vmatmul.mubr.msk.bf16.vlgmr.msra.gmra.mrb[64].mxu1 %vm95_vm1, %v5382_v38 }
 0x9ae   :  { %5674 = vmatpush1.bf16.msra.mxu1 %v13747_v26  ;;  %5662 = vmatprep.mubr.bf16.mxu1 %v14421_v2  ;;  %v29_v26 = vld [vmem:[%s18136_s5 + $0x3] sm:$0x1] }
 0x9af   :  { %11588 = vmatprep.subr.msk.bf16.mxu1 %vm102_vm0, %v13750_v19 }
 0x9b2   :  { %5676 = vmatpush1.bf16.msra.mxu1 %v5615_v27 }
 0x9b3   :  { %5794 = vmatprep.subr.bf16.mxu1 %v13755_v1 }
 0x9b5   :  { %11587 = vmatmul.mubr.msk.bf16.gmra.mrb[68].mxu1 %vm95_vm1, %v5383_v29 }
 0x9b6   :  { %5705 = vmatprep.mubr.bf16.mxu1 %v14421_v2 }
 0x9bd   :  { %11589 = vmatmul.mubr.msk.bf16.vlgmr.msra.gmra.mrb[72].mxu1 %vm95_vm1, %v5382_v38  ;;  %v13815_v38 = vld [vmem:[%s18133_s2 + $0x2a4] ss:$8 sps:$4 sm:$0xff]  }
 0x9be   :  { %5795 = vmatpush1.bf16.msra.mxu1 %v13753_v4  ;;  %5715 = vmatprep.mubr.bf16.mxu1 %v14421_v2 }
 0x9bf   :  { %11611 = vmatprep.subr.msk.bf16.mxu1 %vm102_vm0, %v13756_v61 }
 0x9c2   :  { %5797 = vmatpush1.bf16.msra.mxu1 %v5783_v5 }
 0x9c3   :  { %5847 = vmatprep.subr.bf16.mxu1 %v13761_v36 }
 0x9c5   :  { %11590 = vmatmul.mubr.msk.bf16.gmra.mrb[76].mxu1 %vm95_vm1, %v5383_v29 }
 0x9c6   :  { %5826 = vmatprep.mubr.bf16.mxu1 %v14421_v2 }
 0x9cd   :  { %11612 = vmatmul.mubr.msk.bf16.vlgmr.msra.gmra.mrb[64].mxu1 %vm95_vm1, %v5730_v34 }
 0x9ce   :  { %5836 = vmatprep.mubr.bf16.mxu1 %v14421_v2  ;;  %5848 = vmatpush1.bf16.msra.mxu1 %v13759_v35 }
 0x9cf   :  { %11614 = vmatprep.subr.msk.bf16.mxu1 %vm102_vm0, %v13762_v40 }
 0x9d2   :  { %5850 = vmatpush1.bf16.msra.mxu1 %v5789_v46 }
 0x9d3   :  { %6436 = vmatprep.subr.bf16.mxu1 %v13767_v21 }
 0x9d5   :  { %11613 = vmatmul.mubr.msk.bf16.gmra.mrb[68].mxu1 %vm95_vm1, %v5731_v47 }
 0x9d6   :  { %5879 = vmatprep.mubr.bf16.mxu1 %v14421_v2 }
 0x9dd   :  { %11615 = vmatmul.mubr.msk.bf16.vlgmr.msra.gmra.mrb[72].mxu1 %vm95_vm1, %v5730_v34 }
 0x9de   :  { %5889 = vmatprep.mubr.bf16.mxu1 %v14421_v2  ;;  %6437 = vmatpush1.bf16.msra.mxu1 %v13765_v39 }
 0x9df   :  { %6438 = vmatprep.subr.bf16.mxu1 %v13770_v48 }
 0x9e2   :  { %6439 = vmatpush1.bf16.msra.mxu1 %v13768_v52 }
 0x9e3   :  { %6440 = vmatprep.subr.bf16.mxu1 %v13773_v54 }
 0x9e5   :  { %11616 = vmatmul.mubr.msk.bf16.gmra.mrb[76].mxu1 %vm95_vm1, %v5731_v47  ;;  %vm5375_vm1 = vcmask 73728  }
 0x9e6   :  { %6441 = vmatpush1.bf16.msra.mxu1 %v13771_v57 }
 0x9e7   :  { %6442 = vmatprep.subr.bf16.mxu1 %v13776_v58 }
 0x9ea   :  { %6443 = vmatpush1.bf16.msra.mxu1 %v13774_v59 }
 0x9eb   :  { %6444 = vmatprep.subr.bf16.mxu1 %v13779_v14 }
 0x9ee   :  { %6445 = vmatpush1.bf16.msra.mxu1 %v13777_v63 }
 0x9ef   :  { %6446 = vmatprep.subr.bf16.mxu1 %v13782_v6 }
 0x9f2   :  { %6447 = vmatpush1.bf16.msra.mxu1 %v13780_v7 }
 0x9f3   :  { %6448 = vmatprep.subr.bf16.mxu1 %v13785_v31 }
 0x9f6   :  { %6449 = vmatpush1.bf16.msra.mxu1 %v13783_v49 }
 0x9f7   :  { %6450 = vmatprep.subr.bf16.mxu1 %v13788_v50 }
 0x9fa   :  { %6451 = vmatpush1.bf16.msra.mxu1 %v13786_v10 }
 0x9fb   :  { %6452 = vmatprep.subr.bf16.mxu1 %v13791_v20 }
 0x9fe   :  { %6453 = vmatpush1.bf16.msra.mxu1 %v13789_v53 }
 0x9ff   :  { %6454 = vmatprep.subr.bf16.mxu1 %v13794_v9 }
 0xa02   :  { %6455 = vmatpush1.bf16.msra.mxu1 %v13792_v8 }
 0xa03   :  { %6456 = vmatprep.subr.bf16.mxu1 %v13797_v11 }
 0xa06   :  { %6457 = vmatpush1.bf16.msra.mxu1 %v13795_v51 }
 0xa07   :  { %6458 = vmatprep.subr.bf16.mxu1 %v13800_v0 }
 0xa0a   :  { %6459 = vmatpush1.bf16.msra.mxu1 %v13798_v13 }
 0xa0b   :  { %6460 = vmatprep.subr.bf16.mxu1 %v13803_v15 }
 0xa0e   :  { %6461 = vmatpush1.bf16.msra.mxu1 %v13801_v56 }
 0xa0f   :  { %6462 = vmatprep.subr.bf16.mxu1 %v13806_v37 }
 0xa12   :  { %6463 = vmatpush1.bf16.msra.mxu1 %v13804_v45 }
 0xa13   :  { %6464 = vmatprep.subr.bf16.mxu1 %v13809_v18 }
 0xa16   :  { %6465 = vmatpush1.bf16.msra.mxu1 %v13807_v22 }
 0xa17   :  { %6466 = vmatprep.subr.bf16.mxu1 %v13812_v17 }
 0xa1a   :  { %6467 = vmatpush1.bf16.msra.mxu1 %v13810_v24 }
 0xa1b   :  { %6487 = vmatprep.subr.bf16.mxu1 %v13815_v38 }
 0xa58   :  { %v5368_v19 = vpop.f32.mrb[60].mxu1 }
 0xa59   :  { %v12893_v44 = vadd.f32 %v5368_v19, %v29_v26  ;;  %v12723_v23 = vpop.f32.mrb[61].mxu1 }
 0xa5a   :  { %v5371_v25 = vpop.f32.mrb[62].mxu1 }
 0xa5b   :  { %5376 = vst.msk [vmem:[#allocation5] sm:$0x1] %vm5375_vm1, %v12893_v44  ;;  %v12724_v27 = vpop.f32.mrb[63].mxu1 }
 0xaa0   :  { %v5828_v1 = vpop.f32.mrb[64].mxu1 }
 0xaa1   :  { %v5916_v29 = vadd.f32 %v5828_v1, %v14736_v60  ;;  %v5830_v4 = vpop.f32.mrb[65].mxu1 }
 0xaa2   :  { %v5917_v61 = vadd.f32 %v5830_v4, %v14741_v62  ;;  %v5832_v3 = vpop.f32.mrb[66].mxu1 }
 0xaa3   :  { %v5932_v5 = vmax.f32 %v5916_v29, 0.0  ;;  %v5920_v36 = vadd.f32 %v5832_v3, %v14736_v60  ;;  %v5834_v43 = vpop.f32.mrb[67].mxu1 }
 0xaa4   :  { %v5933_v32 = vmax.f32 %v5917_v61, 0.0  ;;  %v5921_v34 = vadd.f32 %v5834_v43, %v14741_v62 }
 0xaa5   :  { %5948 = vst [vmem:[#allocation2] sm:$0xff] %v5932_v5  ;;  %v16553_v35 = vmax.f32 %v5920_v36, 0.0 }
 0xaa6   :  { %5949 = vst [vmem:[#allocation2 + $0x8] sm:$0xff] %v5933_v32  ;;  %v16555_v40 = vmax.f32 %v5921_v34, 0.0  ;;  %v13813_v34 = vld [vmem:[%s18133_s2 + $0x2a0] ss:$8 sps:$4 sm:$0xff]  }
 0xaa7   :  { %5952 = vst [vmem:[#allocation2 + $0x20] sm:$0xff] %v16553_v35  ;;  %v16559_v12 = vpack.c.bf16 %v16553_v35, %v5932_v5 }
 0xaa8   :  { %5953 = vst [vmem:[#allocation2 + $0x28] sm:$0xff] %v16555_v40  ;;  %v5838_v41 = vpop.f32.mrb[68].mxu1  ;;  %v16563_v42 = vpack.c.bf16 %v16555_v40, %v5933_v32 }
 0xaa9   :  { %v5924_v46 = vadd.f32 %v5838_v41, %v14736_v60  ;;  %v5840_v47 = vpop.f32.mrb[69].mxu1 }
 0xaaa   :  { %v5925_v39 = vadd.f32 %v5840_v47, %v14741_v62  ;;  %v5842_v21 = vpop.f32.mrb[70].mxu1 }
 0xaab   :  { %v5940_v48 = vmax.f32 %v5924_v46, 0.0  ;;  %v5928_v52 = vadd.f32 %v5842_v21, %v14736_v60  ;;  %v5844_v54 = vpop.f32.mrb[71].mxu1 }
 0xaac   :  { %v5941_v57 = vmax.f32 %v5925_v39, 0.0  ;;  %v5929_v58 = vadd.f32 %v5844_v54, %v14741_v62  ;;  %v6036_v59 = vld [vmem:[#allocation2] sm:$0xfe] }
 0xaad   :  { %5956 = vst [vmem:[#allocation2 + $0x40] sm:$0xff] %v5940_v48  ;;  %v5944_v14 = vmax.f32 %v5928_v52, 0.0  ;;  %v6037_v63 = vld [vmem:[#allocation2 + $0x8] sm:$0xfe]  ;;  %v6044_v31 = vpack.c.bf16 %v16553_v35, %v6036_v59  ;;  %v13821_v59 = vld [vmem:[%s18133_s2 + $0x2c4] ss:$8 sps:$4 sm:$0xff]  }
 0xaae   :  { %5957 = vst [vmem:[#allocation2 + $0x48] sm:$0xff] %v5941_v57  ;;  %v5945_v6 = vmax.f32 %v5929_v58, 0.0  ;;  %v6045_v7 = vpack.c.bf16 %v16555_v40, %v6037_v63  ;;  %v13818_v48 = vld [vmem:[%s18133_s2 + $0x2b4] ss:$8 sps:$4 sm:$0xff]  }
 0xaaf   :  { %5960 = vst [vmem:[#allocation2 + $0x60] sm:$0x3] %v5944_v14  ;;  %v6107_v11 = vshll.u32 %v6044_v31, 16  ;;  %v6105_v27 = vshrl.u32 %v6044_v31, 16 }
 0xab0   :  { %5961 = vst [vmem:[#allocation2 + $0x68] sm:$0x3] %v5945_v6  ;;  %v5881_v49 = vpop.f32.mrb[72].mxu1  ;;  %v6119_v62 = vshll.u32 %v6045_v7, 16  ;;  %v6117_v19 = vshrl.u32 %v6045_v7, 16 }
 0xab1   :  { %v5918_v50 = vadd.f32 %v5881_v49, %v14712_v28  ;;  %v5883_v60 = vpop.f32.mrb[73].mxu1  ;;  %v6109_v24 = vrot.slane %v6107_v11, 1  ;;  %v13819_v7 = vld [vmem:[%s18133_s2 + $0x2c0] ss:$8 sps:$4 sm:$0xff]   ;;  %v13824_v49 = vld [vmem:[%s18133_s2 + $0x2d4] ss:$8 sps:$4 sm:$0xff]  }
 0xab2   :  { %v5919_v10 = vadd.f32 %v5883_v60, %v14714_v30  ;;  %v5885_v20 = vpop.f32.mrb[74].mxu1  ;;  %v6121_v22 = vrot.slane %v6119_v62, 1  ;;  %v13827_v62 = vld [vmem:[%s18133_s2 + $0x2e4] ss:$8 sps:$4 sm:$0xff]  }
 0xab3   :  { %v5934_v53 = vmax.f32 %v5918_v50, 0.0  ;;  %v5922_v8 = vadd.f32 %v5885_v20, %v14712_v28  ;;  %v5887_v9 = vpop.f32.mrb[75].mxu1  ;;  %v6110_v41 = vor.u32 %v6109_v24, %v6105_v27  ;;  %v13822_v20 = vld [vmem:[%s18133_s2 + $0x2d0] ss:$8 sps:$4 sm:$0xff]  }
 0xab4   :  { %v5935_v51 = vmax.f32 %v5919_v10, 0.0  ;;  %v5923_v13 = vadd.f32 %v5887_v9, %v14714_v30  ;;  %v6040_v0 = vld [vmem:[#allocation2 + $0x40] sm:$0x1f]  ;;  %v6122_v61 = vor.u32 %v6121_v22, %v6117_v19  ;;  %v13836_v22 = vld [vmem:[%s18133_s2 + $0x314] ss:$8 sps:$4 sm:$0xff]  }
 0xab5   :  { %5950 = vst [vmem:[#allocation2 + $0x10] sm:$0xff] %v5934_v53  ;;  %v16575_v15 = vmax.f32 %v5922_v8, 0.0  ;;  %v6041_v56 = vld [vmem:[#allocation2 + $0x48] sm:$0x1f]  ;;  %v6048_v45 = vpack.c.bf16 %v6040_v0, %v6040_v0 }
 0xab6   :  { %5951 = vst.msk [vmem:[#allocation2 + $0x18] sm:$0xff] %vm628_vm2, %v5935_v51  ;;  %v5939_v37 = vmax.f32 %v5923_v13, 0.0  ;;  %v6049_v18 = vpack.c.bf16 %v6041_v56, %v6041_v56  ;;  %v13825_v51 = vld [vmem:[%s18133_s2 + $0x2e0] ss:$8 sps:$4 sm:$0xff]   ;;  %v13830_v0 = vld [vmem:[%s18133_s2 + $0x2f4] ss:$8 sps:$4 sm:$0xff]  }
 0xab7   :  { %5954 = vst [vmem:[#allocation2 + $0x30] sm:$0xff] %v16575_v15  ;;  %v6112_v17 = vshll.u32 %v6048_v45, 16  ;;  %v16580_v38 = vpack.c.bf16 %v16575_v15, %v5934_v53  ;;  %v6152_v63 = vshrl.u32 %v6048_v45, 16  ;;  %v13828_v56 = vld [vmem:[%s18133_s2 + $0x2f0] ss:$8 sps:$4 sm:$0xff]  }
 0xab8   :  { %5955 = vst.msk [vmem:[#allocation2 + $0x38] sm:$0xff] %vm628_vm2, %v5939_v37  ;;  %v5891_v26 = vpop.f32.mrb[76].mxu1  ;;  %v6124_v44 = vshll.u32 %v6049_v18, 16  ;;  %v6155_v5 = vshrl.u32 %v6049_v18, 16  ;;  %v13833_v45 = vld [vmem:[%s18133_s2 + $0x304] ss:$8 sps:$4 sm:$0xff]  }
 0xab9   :  { %v5926_v23 = vadd.f32 %v5891_v26, %v14712_v28  ;;  %v5893_v25 = vpop.f32.mrb[77].mxu1  ;;  %v6114_v1 = vrot.slane %v6112_v17, 1  ;;  %v13831_v18 = vld [vmem:[%s18133_s2 + $0x300] ss:$8 sps:$4 sm:$0xff]   ;;  %v13834_v26 = vld [vmem:[%s18133_s2 + $0x310] ss:$8 sps:$4 sm:$0xff]  }
 0xaba   :  { %v5927_v29 = vadd.f32 %v5893_v25, %v14714_v30  ;;  %v5895_v4 = vpop.f32.mrb[78].mxu1  ;;  %v6126_v3 = vrot.slane %v6124_v44, 1  ;;  %v13839_v44 = vld [vmem:[%s18133_s2 + $0x324] ss:$8 sps:$4 sm:$0xff]   ;;  %v13837_v25 = vld [vmem:[%s18133_s2 + $0x320] ss:$8 sps:$4 sm:$0xff]  }
 0xabb   :  { %v5942_v36 = vmax.f32 %v5926_v23, 0.0  ;;  %v5930_v43 = vadd.f32 %v5895_v4, %v14712_v28  ;;  %v5897_v32 = vpop.f32.mrb[79].mxu1  ;;  %v6115_v28 = vsel %vm784_vm4, %v6110_v41, %v6114_v1  ;;  %v6154_v31 = vor.u32 %v6152_v63, %v6114_v1  ;;  %v13842_v1 = vld [vmem:[%s18133_s2 + $0x334] ss:$8 sps:$4 sm:$0xff]  }
 0xabc   :  { %v5943_v46 = vmax.f32 %v5927_v29, 0.0  ;;  %v5931_v47 = vadd.f32 %v5897_v32, %v14714_v30  ;;  %v6127_v39 = vsel %vm784_vm4, %v6122_v61, %v6126_v3  ;;  %v6157_v21 = vor.u32 %v6155_v5, %v6126_v3  ;;  %v13816_v30 = vld [vmem:[%s18133_s2 + $0x2b0] ss:$8 sps:$4 sm:$0xff]   ;;  %v8883_v32 = vld [vmem:[#allocation2 + $0x8] sm:$0xc0] }
 0xabd   :  { %5958 = vst [vmem:[#allocation2 + $0x50] sm:$0xff] %v5942_v36  ;;  %v5946_v52 = vmax.f32 %v5930_v43, 0.0  ;;  %6468 = vmatprep.mubr.bf16.mxu1 %v6127_v39  ;;  %v6039_v58 = vld [vmem:[#allocation2 + $0x18] sm:$0xfe]  ;;  %v6038_v37 = vld [vmem:[#allocation2 + $0x10] sm:$0xfe] }
 0xabe   :  { %5959 = vst.msk [vmem:[#allocation2 + $0x58] sm:$0xff] %vm628_vm2, %v5943_v46  ;;  %v5947_v54 = vmax.f32 %v5931_v47, 0.0  ;;  %6469 = vmatmul.mubr.bf16.vlgmr.msra.gmra.mrb[80].mxu1 %v6115_v28  ;;  %v6046_v17 = vpack.c.bf16 %v16575_v15, %v6038_v37  ;;  %v8363_v4 = vld [vmem:[#allocation2 + $0x28] sm:$0xff]  ;;  %v8362_v43 = vld [vmem:[#allocation2 + $0x20] sm:$0xff] }
 0xabf   :  { %5962 = vst [vmem:[#allocation2 + $0x70] sm:$0x3] %v5946_v52  ;;  %6488 = vmatpush1.bf16.msra.mxu1 %v13813_v34  ;;  %6478 = vmatprep.mubr.bf16.mxu1 %v6157_v21  ;;  %v16599_v57 = vld [vmem:[#allocation2 + $0x38] sm:$0xff]  ;;  %v13840_v61 = vld [vmem:[%s18133_s2 + $0x330] ss:$8 sps:$4 sm:$0xff]   ;;  %v8891_v46 = vpack.c.bf16 %v8363_v4, %v8883_v32 }
 0xac0   :  { %5963 = vst.msk [vmem:[#allocation2 + $0x78] sm:$0x3] %vm641_vm3, %v5947_v54  ;;  %6489 = vmatprep.subr.bf16.mxu1 %v13818_v48  ;;  %v6047_v14 = vpack.c.bf16 %v16599_v57, %v6039_v58  ;;  %v6131_v23 = vshll.u32 %v6046_v17, 16  ;;  %v8887_v3 = vld [vmem:[#allocation2 + $0x68] sm:$0x3]  ;;  %v6129_v5 = vshrl.u32 %v6046_v17, 16 }
 0xac1   :  { %v13845_v34 = vld [vmem:[%s18133_s2 + $0x4] ss:$8 sps:$4 sm:$0xff]   ;;  %v16663_v41 = vld [vmem:[#allocation2 + $0x48] sm:$0xff]  ;;  %v8886_v47 = vld [vmem:[#allocation2 + $0x60] sm:$0x3]  ;;  %vm18143_vm3 = vcmask 1042432  }
 0xac2   :  { %v6143_v6 = vshll.u32 %v6047_v14, 16  ;;  %v6141_v53 = vshrl.u32 %v6047_v14, 16  ;;  %v6133_v29 = vrot.slane %v6131_v23, 1  ;;  %v13843_v21 = vld [vmem:[%s18133_s2] ss:$8 sps:$4 sm:$0xff]   ;;  %v8895_v52 = vpack.c.bf16 %v8887_v3, %v16663_v41  ;;  %v8364_v58 = vld [vmem:[#allocation2 + $0x30] sm:$0xff] }
 0xac3   :  { %6490 = vmatpush1.bf16.msra.mxu1 %v13816_v30  ;;  %v8365_v48 = vld [vmem:[#allocation2 + $0x38] sm:$0xff]  ;;  %v8882_v28 = vld [vmem:[#allocation2] sm:$0xc0]  ;;  %v13860_v3 = vld [vmem:[%s18133_s2 + $0x54] ss:$8 sps:$4 sm:$0xff]  }
 0xac4   :  { %6491 = vmatprep.subr.bf16.mxu1 %v13821_v59  ;;  %v6145_v10 = vrot.slane %v6143_v6, 1  ;;  %v6042_v24 = vld [vmem:[#allocation2 + $0x50] sm:$0x1f]  ;;  %v6134_v39 = vor.u32 %v6133_v29, %v6129_v5  ;;  %v7894_v30 = vld [vmem:[#allocation2 + $0x40] sm:$0xff]  ;;  %v8890_v59 = vpack.c.bf16 %v8362_v43, %v8882_v28 }
 0xac5   :  { %v6043_v50 = vld [vmem:[#allocation2 + $0x58] sm:$0x1f]  ;;  %v16645_v19 = vpack.c.bf16 %v6042_v24, %v6042_v24  ;;  %v13848_v6 = vld [vmem:[%s18133_s2 + $0x14] ss:$8 sps:$4 sm:$0xff]   ;;  %v13864_v32 = vld [vmem:[%s18133_s2 + $0x70] ss:$8 sps:$4 sm:$0xff]  }
 0xac6   :  { %6479 = vmatmul.mubr.bf16.gmra.mrb[84].mxu1 %v6154_v31  ;;  %v16612_v60 = vpack.c.bf16 %v6043_v50, %v6043_v50  ;;  %v6146_v9 = vor.u32 %v6145_v10, %v6141_v53  ;;  %v8885_v31 = vld [vmem:[#allocation2 + $0x18] sm:$0xc0]  ;;  %v8884_v53 = vld [vmem:[#allocation2 + $0x10] sm:$0xc0]  ;;  %v13876_v28 = vld [vmem:[%s18133_s2 + $0xb0] ss:$8 sps:$4 sm:$0xff]  }
 0xac7   :  { %6492 = vmatpush1.bf16.msra.mxu1 %v13819_v7  ;;  %v6136_v27 = vshll.u32 %v16645_v19, 16  ;;  %v8889_v14 = vld [vmem:[#allocation2 + $0x78] sm:$0x3]  ;;  %v8894_v7 = vpack.c.bf16 %v8886_v47, %v7894_v30  ;;  %v13851_v24 = vld [vmem:[%s18133_s2 + $0x24] ss:$8 sps:$4 sm:$0xff]   ;;  %v6158_v23 = vshrl.u32 %v16645_v19, 16 }
 0xac8   :  { %6493 = vmatprep.subr.bf16.mxu1 %v13824_v49  ;;  %v6148_v8 = vshll.u32 %v16612_v60, 16  ;;  %v6161_v54 = vshrl.u32 %v16612_v60, 16  ;;  %v8888_v49 = vld [vmem:[#allocation2 + $0x70] sm:$0x3]  ;;  %v7897_v10 = vld [vmem:[#allocation2 + $0x58] sm:$0xff]  ;;  %v8893_v60 = vpack.c.bf16 %v8365_v48, %v8885_v31 }
 0xac9   :  { %v6138_v36 = vrot.slane %v6136_v27, 1  ;;  %v13849_v27 = vld [vmem:[%s18133_s2 + $0x20] ss:$8 sps:$4 sm:$0xff]   ;;  %v13854_v29 = vld [vmem:[%s18133_s2 + $0x34] ss:$8 sps:$4 sm:$0xff]  }
 0xaca   :  { %v6150_v11 = vrot.slane %v6148_v8, 1  ;;  %v7896_v8 = vld [vmem:[#allocation2 + $0x50] sm:$0xff]  ;;  %v13857_v4 = vld [vmem:[%s18133_s2 + $0x44] ss:$8 sps:$4 sm:$0xff]   ;;  %v13873_v48 = vld [vmem:[%s18133_s2 + $0xa0] ss:$8 sps:$4 sm:$0xff]  }
 0xacb   :  { %6494 = vmatpush1.bf16.msra.mxu1 %v13822_v20  ;;  %v6139_v63 = vsel %vm784_vm4, %v6134_v39, %v6138_v36  ;;  %v8961_v20 = vrot.slane %v8891_v46, 3  ;;  %v13852_v19 = vld [vmem:[%s18133_s2 + $0x30] ss:$8 sps:$4 sm:$0xff]   ;;  %v13863_v5 = vld [vmem:[%s18133_s2 + $0x64] ss:$8 sps:$4 sm:$0xff]  }
 0xacc   :  { %6495 = vmatprep.subr.bf16.mxu1 %v13827_v62  ;;  %v6151_v13 = vsel %vm784_vm4, %v6146_v9, %v6150_v11  ;;  %v6163_v50 = vor.u32 %v6161_v54, %v6150_v11  ;;  %v16674_v62 = vrot.slane %v8895_v52, 3  ;;  %v8958_v9 = vrot.slane %v8890_v59, 3  ;;  %v13846_v11 = vld [vmem:[%s18133_s2 + $0x10] ss:$8 sps:$4 sm:$0xff]   ;;  %v13866_v43 = vld [vmem:[%s18133_s2 + $0x74] ss:$8 sps:$4 sm:$0xff]  }
 0xacd   :  { %11721 = vmatprep.mubr.msk.bf16.mxu1 %vm628_vm2, %v6151_v13  ;;  %v8897_v13 = vpack.c.bf16 %v8889_v14, %v7897_v10  ;;  %v13867_v46 = vld [vmem:[%s18133_s2 + $0x80] ss:$8 sps:$4 sm:$0xff]   ;;  %v13872_v47 = vld [vmem:[%s18133_s2 + $0x94] ss:$8 sps:$4 sm:$0xff]   ;;  %v13870_v39 = vld [vmem:[%s18133_s2 + $0x90] ss:$8 sps:$4 sm:$0xff]  }
 0xace   :  { %v13878_v52 = vld [vmem:[%s18133_s2 + $0xb4] ss:$8 sps:$4 sm:$0xff]   ;;  %v13881_v54 = vld [vmem:[%s18133_s2 + $0xc4] ss:$8 sps:$4 sm:$0xff]   ;;  %v13879_v30 = vld [vmem:[%s18133_s2 + $0xc0] ss:$8 sps:$4 sm:$0xff]  }
 0xacf   :  { %6496 = vmatpush1.bf16.msra.mxu1 %v13825_v51  ;;  %v16676_v51 = vrot.slane %v8894_v7, 3  ;;  %v13882_v59 = vld [vmem:[%s18133_s2 + $0xd0] ss:$8 sps:$4 sm:$0xff]   ;;  %v13887_v14 = vld [vmem:[%s18133_s2 + $0xe4] ss:$8 sps:$4 sm:$0xff]   ;;  %vm18144_vm4 = vcmask 48128  }
 0xad0   :  { %6497 = vmatprep.subr.bf16.mxu1 %v13830_v0  ;;  %v8892_v0 = vpack.c.bf16 %v8364_v58, %v8884_v53  ;;  %v13884_v58 = vld [vmem:[%s18133_s2 + $0xd4] ss:$8 sps:$4 sm:$0xff]   ;;  %v13888_v7 = vld [vmem:[%s18133_s2 + $0xf0] ss:$8 sps:$4 sm:$0xff]   ;;  %v13893_v31 = vld [vmem:[%s18133_s2 + $0x104] ss:$8 sps:$4 sm:$0xff]  }
 0xad1   :  { %v16688_v37 = vsel %vm3648_vm8, %v8958_v9, %v16676_v51  ;;  %v13896_v10 = vld [vmem:[%s18133_s2 + $0x114] ss:$8 sps:$4 sm:$0xff]   ;;  %v13899_v53 = vld [vmem:[%s18133_s2 + $0x124] ss:$8 sps:$4 sm:$0xff]   ;;  %v13897_v9 = vld [vmem:[%s18133_s2 + $0x120] ss:$8 sps:$4 sm:$0xff]  }
 0xad2   :  { %v8964_v17 = vrot.slane %v8892_v0, 3  ;;  %v13902_v0 = vld [vmem:[%s18133_s2 + $0x134] ss:$8 sps:$4 sm:$0xff]  }
 0xad3   :  { %6498 = vmatpush1.bf16.msra.mxu1 %v13828_v56  ;;  %v16680_v56 = vsel %vm3648_vm8, %v8961_v20, %v16674_v62 }
 0xad4   :  { %6499 = vmatprep.subr.bf16.mxu1 %v13833_v45  ;;  %v8896_v45 = vpack.c.bf16 %v8888_v49, %v7896_v8  ;;  %v5973_v49 = vld [vmem:[#allocation2 + $0x48] sm:$0xf]  ;;  %v5972_v8 = vld [vmem:[#allocation2 + $0x40] sm:$0xf] }
 0xad5   :  { %v5981_v20 = vpack.c.bf16 %v5973_v49, %v5973_v49  ;;  %v13936_v49 = vld [vmem:[%s18133_s2 + $0x390] ss:$8 sps:$4 sm:$0xff]  }
 0xad7   :  { %6500 = vmatpush1.bf16.msra.mxu1 %v13831_v18  ;;  %v8967_v18 = vrot.slane %v8893_v60, 3  ;;  %v13894_v60 = vld [vmem:[%s18133_s2 + $0x110] ss:$8 sps:$4 sm:$0xff]  }
 0xad8   :  { %6501 = vmatprep.subr.bf16.mxu1 %v13836_v22  ;;  %v16690_v22 = vrot.slane %v8897_v13, 3  ;;  %v5980_v13 = vpack.c.bf16 %v5972_v8, %v5972_v8  ;;  %v13945_v8 = vld [vmem:[%s18133_s2 + $0x3c0] ss:$8 sps:$4 sm:$0xff]  }
 0xadb   :  { %6502 = vmatpush1.bf16.msra.mxu1 %v13834_v26  ;;  %v16695_v26 = vrot.slane %v8896_v45, 3 }
 0xadc   :  { %6503 = vmatprep.subr.bf16.mxu1 %v13839_v44  ;;  %v16699_v44 = vsel %vm3648_vm8, %v8967_v18, %v16690_v22  ;;  %v13905_v18 = vld [vmem:[%s18133_s2 + $0x144] ss:$8 sps:$4 sm:$0xff]  }
 0xadf   :  { %6504 = vmatpush1.bf16.msra.mxu1 %v13837_v25  ;;  %v16704_v25 = vsel %vm3648_vm8, %v8964_v17, %v16695_v26  ;;  %v13908_v17 = vld [vmem:[%s18133_s2 + $0x154] ss:$8 sps:$4 sm:$0xff]  }
 0xae0   :  { %6505 = vmatprep.subr.bf16.mxu1 %v13842_v1  ;;  %v6160_v1 = vor.u32 %v6158_v23, %v6138_v36  ;;  %v13861_v36 = vld [vmem:[%s18133_s2 + $0x60] ss:$8 sps:$4 sm:$0xff]   ;;  %v13906_v23 = vld [vmem:[%s18133_s2 + $0x150] ss:$8 sps:$4 sm:$0xff]  }
 0xae3   :  { %6506 = vmatpush1.bf16.msra.mxu1 %v13840_v61  ;;  %v13855_v61 = vld [vmem:[%s18133_s2 + $0x40] ss:$8 sps:$4 sm:$0xff]  }
 0xae4   :  { %6804 = vmatprep.subr.bf16.mxu1 %v13845_v34  ;;  %v13869_v34 = vld [vmem:[%s18133_s2 + $0x84] ss:$8 sps:$4 sm:$0xff]  }
 0xae6   :  { %6520 = vmatmul.mubr.bf16.vlgmr.msra.gmra.mrb[80].mxu1 %v6139_v63  ;;  %v13885_v63 = vld [vmem:[%s18133_s2 + $0xe0] ss:$8 sps:$4 sm:$0xff]  }
 0xae7   :  { %11722 = vmatprep.mubr.msk.bf16.mxu1 %vm628_vm2, %v6163_v50  ;;  %6805 = vmatpush1.bf16.msra.mxu1 %v13843_v21  ;;  %v13875_v21 = vld [vmem:[%s18133_s2 + $0xa4] ss:$8 sps:$4 sm:$0xff]   ;;  %v13891_v50 = vld [vmem:[%s18133_s2 + $0x100] ss:$8 sps:$4 sm:$0xff]  }
 0xae8   :  { %6806 = vmatprep.subr.bf16.mxu1 %v13848_v6  ;;  %v13890_v6 = vld [vmem:[%s18133_s2 + $0xf4] ss:$8 sps:$4 sm:$0xff]  }
 0xaeb   :  { %6807 = vmatpush1.bf16.msra.mxu1 %v13846_v11  ;;  %v13900_v11 = vld [vmem:[%s18133_s2 + $0x130] ss:$8 sps:$4 sm:$0xff]  }
 0xaec   :  { %6808 = vmatprep.subr.bf16.mxu1 %v13851_v24  ;;  %v13903_v24 = vld [vmem:[%s18133_s2 + $0x140] ss:$8 sps:$4 sm:$0xff]  }
 0xaee   :  { %6530 = vmatmul.mubr.bf16.gmra.mrb[88].mxu1 %v6160_v1  ;;  %v13909_v1 = vld [vmem:[%s18133_s2 + $0x160] ss:$8 sps:$4 sm:$0xff]  }
 0xaef   :  { %6809 = vmatpush1.bf16.msra.mxu1 %v13849_v27  ;;  %6836 = vmatprep.mubr.bf16.mxu1 %v16563_v42  ;;  %v13858_v42 = vld [vmem:[%s18133_s2 + $0x50] ss:$8 sps:$4 sm:$0xff]   ;;  %v13911_v27 = vld [vmem:[%s18133_s2 + $0x164] ss:$8 sps:$4 sm:$0xff]  }
 0xaf0   :  { %6810 = vmatprep.subr.bf16.mxu1 %v13854_v29  ;;  %v13914_v29 = vld [vmem:[%s18133_s2 + $0x174] ss:$8 sps:$4 sm:$0xff]  }
 0xaf3   :  { %6811 = vmatpush1.bf16.msra.mxu1 %v13852_v19  ;;  %v13912_v19 = vld [vmem:[%s18133_s2 + $0x170] ss:$8 sps:$4 sm:$0xff]  }
 0xaf4   :  { %6812 = vmatprep.subr.bf16.mxu1 %v13857_v4  ;;  %v13917_v4 = vld [vmem:[%s18133_s2 + $0x184] ss:$8 sps:$4 sm:$0xff]  }
 0xaf7   :  { %6813 = vmatpush1.bf16.msra.mxu1 %v13855_v61  ;;  %v13915_v61 = vld [vmem:[%s18133_s2 + $0x180] ss:$8 sps:$4 sm:$0xff]  }
 0xaf8   :  { %6814 = vmatprep.subr.bf16.mxu1 %v13860_v3  ;;  %v13920_v3 = vld [vmem:[%s18133_s2 + $0x194] ss:$8 sps:$4 sm:$0xff]  }
 0xafb   :  { %6815 = vmatpush1.bf16.msra.mxu1 %v13858_v42  ;;  %v13918_v42 = vld [vmem:[%s18133_s2 + $0x190] ss:$8 sps:$4 sm:$0xff]  }
 0xafc   :  { %6816 = vmatprep.subr.bf16.mxu1 %v13863_v5  ;;  %v13923_v5 = vld [vmem:[%s18133_s2 + $0x344] ss:$8 sps:$4 sm:$0xff]  }
 0xaff   :  { %6817 = vmatpush1.bf16.msra.mxu1 %v13861_v36  ;;  %v5975_v36 = vld [vmem:[#allocation2 + $0x58] sm:$0xf] }
 0xb00   :  { %6818 = vmatprep.subr.bf16.mxu1 %v13866_v43  ;;  %v13921_v43 = vld [vmem:[%s18133_s2 + $0x340] ss:$8 sps:$4 sm:$0xff]  }
 0xb03   :  { %6819 = vmatpush1.bf16.msra.mxu1 %v13864_v32  ;;  %v6911_v32 = vld [vmem:[#allocation2 + $0x48] sm:$0x3f] }
 0xb04   :  { %6820 = vmatprep.subr.bf16.mxu1 %v13869_v34  ;;  %v13926_v34 = vld [vmem:[%s18133_s2 + $0x354] ss:$8 sps:$4 sm:$0xff]  }
 0xb07   :  { %6821 = vmatpush1.bf16.msra.mxu1 %v13867_v46  ;;  %v5983_v46 = vpack.c.bf16 %v5975_v36, %v5975_v36 }
 0xb08   :  { %6822 = vmatprep.subr.bf16.mxu1 %v13872_v47  ;;  %v6907_v47 = vld [vmem:[#allocation2 + $0x8] sm:$0xfc] }
 0xb0b   :  { %6823 = vmatpush1.bf16.msra.mxu1 %v13870_v39  ;;  %v6919_v39 = vpack.c.bf16 %v6911_v32, %v6911_v32  ;;  %v13969_v32 = vld [vmem:[%s18133_s2 + $0x440] ss:$8 sps:$4 sm:$0xff]  }
 0xb0c   :  { %6824 = vmatprep.subr.bf16.mxu1 %v13875_v21  ;;  %v13924_v21 = vld [vmem:[%s18133_s2 + $0x350] ss:$8 sps:$4 sm:$0xff]  }
 0xb0f   :  { %6825 = vmatpush1.bf16.msra.mxu1 %v13873_v48  ;;  %v13929_v48 = vld [vmem:[%s18133_s2 + $0x364] ss:$8 sps:$4 sm:$0xff]  }
 0xb10   :  { %6826 = vmatprep.subr.bf16.mxu1 %v13878_v52  ;;  %v6915_v52 = vpack.c.bf16 %v16555_v40, %v6907_v47 }
 0xb13   :  { %6827 = vmatpush1.bf16.msra.mxu1 %v13876_v28  ;;  %v5974_v28 = vld [vmem:[#allocation2 + $0x50] sm:$0xf] }
 0xb14   :  { %6828 = vmatprep.subr.bf16.mxu1 %v13881_v54  ;;  %v16869_v54 = vrot.slane %v6919_v39, 1  ;;  %v13972_v39 = vld [vmem:[%s18133_s2 + $0x450] ss:$8 sps:$4 sm:$0xff]  }
 0xb17   :  { %6829 = vmatpush1.bf16.msra.mxu1 %v13879_v30  ;;  %v5982_v30 = vpack.c.bf16 %v5974_v28, %v5974_v28 }
 0xb18   :  { %6830 = vmatprep.subr.bf16.mxu1 %v13884_v58  ;;  %v6985_v58 = vrot.slane %v6915_v52, 1 }
 0xb1b   :  { %6831 = vmatpush1.bf16.msra.mxu1 %v13882_v59  ;;  %v13932_v59 = vld [vmem:[%s18133_s2 + $0x374] ss:$8 sps:$4 sm:$0xff]  }
 0xb1c   :  { %6832 = vmatprep.subr.bf16.mxu1 %v13887_v14  ;;  %v6987_v14 = vsel %vm1664_vm5, %v6985_v58, %v16869_v54 }
 0xb1f   :  { %6833 = vmatpush1.bf16.msra.mxu1 %v13885_v63  ;;  %v13930_v63 = vld [vmem:[%s18133_s2 + $0x370] ss:$8 sps:$4 sm:$0xff]  }
 0xb20   :  { %6834 = vmatprep.subr.bf16.mxu1 %v13890_v6  ;;  %v13935_v6 = vld [vmem:[%s18133_s2 + $0x384] ss:$8 sps:$4 sm:$0xff]  }
 0xb23   :  { %6835 = vmatpush1.bf16.msra.mxu1 %v13888_v7  ;;  %v13933_v7 = vld [vmem:[%s18133_s2 + $0x380] ss:$8 sps:$4 sm:$0xff]  }
 0xb24   :  { %6855 = vmatprep.subr.bf16.mxu1 %v13893_v31  ;;  %v13938_v31 = vld [vmem:[%s18133_s2 + $0x394] ss:$8 sps:$4 sm:$0xff]  }
 0xb26   :  { %6837 = vmatmul.mubr.bf16.vlgmr.msra.gmra.mrb[80].mxu1 %v16559_v12  ;;  %v5967_v12 = vld [vmem:[#allocation2 + $0x18] sm:$0xff] }
 0xb27   :  { %6846 = vmatprep.mubr.bf16.mxu1 %v5981_v20  ;;  %6856 = vmatpush1.bf16.msra.mxu1 %v13891_v50  ;;  %v5979_v45 = vpack.c.bf16 %v16599_v57, %v5967_v12  ;;  %v13941_v50 = vld [vmem:[%s18133_s2 + $0x3a4] ss:$8 sps:$4 sm:$0xff]   ;;  %v13944_v20 = vld [vmem:[%s18133_s2 + $0x3b4] ss:$8 sps:$4 sm:$0xff]  }
 0xb28   :  { %6857 = vmatprep.subr.bf16.mxu1 %v13896_v10  ;;  %v13939_v10 = vld [vmem:[%s18133_s2 + $0x3a0] ss:$8 sps:$4 sm:$0xff]   ;;  %v13953_v12 = vld [vmem:[%s18133_s2 + $0x3e4] ss:$8 sps:$4 sm:$0xff]  }
 0xb2b   :  { %6858 = vmatpush1.bf16.msra.mxu1 %v13894_v60  ;;  %v13942_v60 = vld [vmem:[%s18133_s2 + $0x3b0] ss:$8 sps:$4 sm:$0xff]  }
 0xb2c   :  { %6859 = vmatprep.subr.bf16.mxu1 %v13899_v53  ;;  %v13947_v53 = vld [vmem:[%s18133_s2 + $0x3c4] ss:$8 sps:$4 sm:$0xff]  }
 0xb2e   :  { %6847 = vmatmul.mubr.bf16.gmra.mrb[92].mxu1 %v5980_v13  ;;  %v13948_v13 = vld [vmem:[%s18133_s2 + $0x3d0] ss:$8 sps:$4 sm:$0xff]  }
 0xb2f   :  { %6860 = vmatpush1.bf16.msra.mxu1 %v13897_v9  ;;  %11775 = vmatprep.mubr.msk.bf16.mxu1 %vm628_vm2, %v5979_v45  ;;  %v13950_v9 = vld [vmem:[%s18133_s2 + $0x3d4] ss:$8 sps:$4 sm:$0xff]  }
 0xb30   :  { %6861 = vmatprep.subr.bf16.mxu1 %v13902_v0  ;;  %v13951_v0 = vld [vmem:[%s18133_s2 + $0x3e0] ss:$8 sps:$4 sm:$0xff]   ;;  %v13956_v45 = vld [vmem:[%s18133_s2 + $0x3f4] ss:$8 sps:$4 sm:$0xff]  }
 0xb33   :  { %6862 = vmatpush1.bf16.msra.mxu1 %v13900_v11  ;;  %v13954_v11 = vld [vmem:[%s18133_s2 + $0x3f0] ss:$8 sps:$4 sm:$0xff]  }
 0xb34   :  { %6863 = vmatprep.subr.bf16.mxu1 %v13905_v18  ;;  %v13959_v18 = vld [vmem:[%s18133_s2 + $0x404] ss:$8 sps:$4 sm:$0xff]  }
 0xb37   :  { %6864 = vmatpush1.bf16.msra.mxu1 %v13903_v24  ;;  %v13957_v24 = vld [vmem:[%s18133_s2 + $0x400] ss:$8 sps:$4 sm:$0xff]  }
 0xb38   :  { %6865 = vmatprep.subr.bf16.mxu1 %v13908_v17  ;;  %v13962_v17 = vld [vmem:[%s18133_s2 + $0x414] ss:$8 sps:$4 sm:$0xff]  }
 0xb3b   :  { %6866 = vmatpush1.bf16.msra.mxu1 %v13906_v23  ;;  %v13960_v23 = vld [vmem:[%s18133_s2 + $0x410] ss:$8 sps:$4 sm:$0xff]  }
 0xb3c   :  { %6867 = vmatprep.subr.bf16.mxu1 %v13911_v27  ;;  %v13965_v27 = vld [vmem:[%s18133_s2 + $0x424] ss:$8 sps:$4 sm:$0xff]  }
 0xb3f   :  { %6868 = vmatpush1.bf16.msra.mxu1 %v13909_v1  ;;  %v6910_v1 = vld [vmem:[#allocation2 + $0x40] sm:$0x3f] }
 0xb40   :  { %6869 = vmatprep.subr.bf16.mxu1 %v13914_v29  ;;  %v13963_v29 = vld [vmem:[%s18133_s2 + $0x420] ss:$8 sps:$4 sm:$0xff]  }
 0xb43   :  { %6870 = vmatpush1.bf16.msra.mxu1 %v13912_v19  ;;  %v13968_v19 = vld [vmem:[%s18133_s2 + $0x434] ss:$8 sps:$4 sm:$0xff]  }
 0xb44   :  { %6871 = vmatprep.subr.bf16.mxu1 %v13917_v4  ;;  %v6906_v4 = vld [vmem:[#allocation2] sm:$0xfc] }
 0xb47   :  { %6872 = vmatpush1.bf16.msra.mxu1 %v13915_v61  ;;  %v6918_v61 = vpack.c.bf16 %v6910_v1, %v6910_v1  ;;  %v14001_v1 = vld [vmem:[%s18133_s2 + $0x4e4] ss:$8 sps:$4 sm:$0xff]  }
 0xb48   :  { %6873 = vmatprep.subr.bf16.mxu1 %v13920_v3  ;;  %v13966_v3 = vld [vmem:[%s18133_s2 + $0x430] ss:$8 sps:$4 sm:$0xff]  }
 0xb49   :  { %v6983_v36 = vrot.slane %v6918_v61, 1 }
 0xb4b   :  { %6874 = vmatpush1.bf16.msra.mxu1 %v13918_v42  ;;  %v6914_v42 = vpack.c.bf16 %v16553_v35, %v6906_v4 }
 0xb4c   :  { %7266 = vmatprep.subr.bf16.mxu1 %v13923_v5  ;;  %v13971_v5 = vld [vmem:[%s18133_s2 + $0x444] ss:$8 sps:$4 sm:$0xff]  }
 0xb4e   :  { %6888 = vmatmul.mubr.bf16.vlgmr.msra.gmra.mrb[80].mxu1 %v16580_v38  ;;  %v13927_v38 = vld [vmem:[%s18133_s2 + $0x360] ss:$8 sps:$4 sm:$0xff]  }
 0xb4f   :  { %11776 = vmatprep.mubr.msk.bf16.mxu1 %vm628_vm2, %v5983_v46  ;;  %7267 = vmatpush1.bf16.msra.mxu1 %v13921_v43  ;;  %v6982_v43 = vrot.slane %v6914_v42, 1  ;;  %v13974_v46 = vld [vmem:[%s18133_s2 + $0x454] ss:$8 sps:$4 sm:$0xff]   ;;  %v13999_v42 = vld [vmem:[%s18133_s2 + $0x4e0] ss:$8 sps:$4 sm:$0xff]  }
 0xb50   :  { %7268 = vmatprep.subr.bf16.mxu1 %v13926_v34  ;;  %v6913_v34 = vld [vmem:[#allocation2 + $0x58] sm:$0x3f] }
 0xb51   :  { %v6984_v35 = vsel %vm1664_vm5, %v6982_v43, %v6983_v36  ;;  %v6921_v47 = vpack.c.bf16 %v6913_v34, %v6913_v34  ;;  %v14002_v34 = vld [vmem:[%s18133_s2 + $0x4f0] ss:$8 sps:$4 sm:$0xff]  }
 0xb53   :  { %7269 = vmatpush1.bf16.msra.mxu1 %v13924_v21  ;;  %v6909_v21 = vld [vmem:[#allocation2 + $0x18] sm:$0xfc]  ;;  %v16973_v28 = vrot.slane %v6921_v47, 1 }
 0xb54   :  { %7270 = vmatprep.subr.bf16.mxu1 %v13929_v48  ;;  %v13977_v48 = vld [vmem:[%s18133_s2 + $0x464] ss:$8 sps:$4 sm:$0xff]   ;;  %v6917_v52 = vpack.c.bf16 %v16599_v57, %v6909_v21  ;;  %v14005_v21 = vld [vmem:[%s18133_s2 + $0x500] ss:$8 sps:$4 sm:$0xff]  }
 0xb56   :  { %6898 = vmatmul.mubr.bf16.gmra.mrb[96].mxu1 %v5982_v30  ;;  %v13980_v30 = vld [vmem:[%s18133_s2 + $0x474] ss:$8 sps:$4 sm:$0xff]  }
 0xb57   :  { %7271 = vmatpush1.bf16.msra.mxu1 %v13927_v38  ;;  %7298 = vmatprep.mubr.bf16.mxu1 %v6987_v14  ;;  %v6991_v38 = vrot.slane %v6917_v52, 1  ;;  %v13983_v14 = vld [vmem:[%s18133_s2 + $0x484] ss:$8 sps:$4 sm:$0xff]   ;;  %v14010_v52 = vld [vmem:[%s18133_s2 + $0x514] ss:$8 sps:$4 sm:$0xff]  }
 0xb58   :  { %7272 = vmatprep.subr.bf16.mxu1 %v13932_v59  ;;  %v13978_v59 = vld [vmem:[%s18133_s2 + $0x470] ss:$8 sps:$4 sm:$0xff]  }
 0xb59   :  { %v6993_v58 = vsel %vm1664_vm5, %v6991_v38, %v16973_v28  ;;  %v14013_v38 = vld [vmem:[%s18133_s2 + $0x524] ss:$8 sps:$4 sm:$0xff]  }
 0xb5b   :  { %7273 = vmatpush1.bf16.msra.mxu1 %v13930_v63 }
 0xb5c   :  { %7274 = vmatprep.subr.bf16.mxu1 %v13935_v6 }
 0xb5f   :  { %7275 = vmatpush1.bf16.msra.mxu1 %v13933_v7 }
 0xb60   :  { %7276 = vmatprep.subr.bf16.mxu1 %v13938_v31  ;;  %v13981_v31 = vld [vmem:[%s18133_s2 + $0x480] ss:$8 sps:$4 sm:$0xff]  }
 0xb63   :  { %7277 = vmatpush1.bf16.msra.mxu1 %v13936_v49 }
 0xb64   :  { %7278 = vmatprep.subr.bf16.mxu1 %v13941_v50  ;;  %v13986_v50 = vld [vmem:[%s18133_s2 + $0x494] ss:$8 sps:$4 sm:$0xff]  }
 0xb67   :  { %7279 = vmatpush1.bf16.msra.mxu1 %v13939_v10  ;;  %v13984_v10 = vld [vmem:[%s18133_s2 + $0x490] ss:$8 sps:$4 sm:$0xff]  }
 0xb68   :  { %7280 = vmatprep.subr.bf16.mxu1 %v13944_v20  ;;  %v13989_v20 = vld [vmem:[%s18133_s2 + $0x4a4] ss:$8 sps:$4 sm:$0xff]  }
 0xb6b   :  { %7281 = vmatpush1.bf16.msra.mxu1 %v13942_v60  ;;  %v13987_v60 = vld [vmem:[%s18133_s2 + $0x4a0] ss:$8 sps:$4 sm:$0xff]  }
 0xb6c   :  { %7282 = vmatprep.subr.bf16.mxu1 %v13947_v53  ;;  %v13992_v53 = vld [vmem:[%s18133_s2 + $0x4b4] ss:$8 sps:$4 sm:$0xff]  }
 0xb6f   :  { %7283 = vmatpush1.bf16.msra.mxu1 %v13945_v8  ;;  %v13990_v8 = vld [vmem:[%s18133_s2 + $0x4b0] ss:$8 sps:$4 sm:$0xff]  }
 0xb70   :  { %7284 = vmatprep.subr.bf16.mxu1 %v13950_v9  ;;  %v13995_v9 = vld [vmem:[%s18133_s2 + $0x4c4] ss:$8 sps:$4 sm:$0xff]  }
 0xb73   :  { %7285 = vmatpush1.bf16.msra.mxu1 %v13948_v13  ;;  %v6912_v13 = vld [vmem:[#allocation2 + $0x50] sm:$0x3f] }
 0xb74   :  { %7286 = vmatprep.subr.bf16.mxu1 %v13953_v12  ;;  %v13993_v12 = vld [vmem:[%s18133_s2 + $0x4c0] ss:$8 sps:$4 sm:$0xff]  }
 0xb77   :  { %7287 = vmatpush1.bf16.msra.mxu1 %v13951_v0  ;;  %v7379_v0 = vld [vmem:[#allocation2 + $0x48] sm:$0x7f] }
 0xb78   :  { %7288 = vmatprep.subr.bf16.mxu1 %v13956_v45  ;;  %v13998_v45 = vld [vmem:[%s18133_s2 + $0x4d4] ss:$8 sps:$4 sm:$0xff]  }
 0xb7b   :  { %7289 = vmatpush1.bf16.msra.mxu1 %v13954_v11  ;;  %v6908_v11 = vld [vmem:[#allocation2 + $0x10] sm:$0xfc] }
 0xb7c   :  { %7290 = vmatprep.subr.bf16.mxu1 %v13959_v18  ;;  %v6920_v18 = vpack.c.bf16 %v6912_v13, %v6912_v13  ;;  %v14026_v13 = vld [vmem:[%s18133_s2 + $0x570] ss:$8 sps:$4 sm:$0xff]  }
 0xb7f   :  { %7291 = vmatpush1.bf16.msra.mxu1 %v13957_v24  ;;  %v7375_v24 = vld [vmem:[#allocation2 + $0x8] sm:$0xf8] }
 0xb80   :  { %7292 = vmatprep.subr.bf16.mxu1 %v13962_v17  ;;  %v7387_v17 = vpack.c.bf16 %v7379_v0, %v7379_v0  ;;  %v14029_v0 = vld [vmem:[%s18133_s2 + $0x580] ss:$8 sps:$4 sm:$0xff]  }
 0xb82   :  { %v7468_v4 = vshrl.u32 %v7387_v17, 16  ;;  %v7471_v61 = vshll.u32 %v7387_v17, 16  ;;  %v14035_v17 = vld [vmem:[%s18133_s2 + $0x5a0] ss:$8 sps:$4 sm:$0xff]  }
 0xb83   :  { %7293 = vmatpush1.bf16.msra.mxu1 %v13960_v23  ;;  %v13996_v23 = vld [vmem:[%s18133_s2 + $0x4d0] ss:$8 sps:$4 sm:$0xff]  }
 0xb84   :  { %7294 = vmatprep.subr.bf16.mxu1 %v13965_v27  ;;  %v6916_v27 = vpack.c.bf16 %v16575_v15, %v6908_v11  ;;  %v14004_v15 = vld [vmem:[%s18133_s2 + $0x4f4] ss:$8 sps:$4 sm:$0xff]   ;;  %v14032_v11 = vld [vmem:[%s18133_s2 + $0x590] ss:$8 sps:$4 sm:$0xff]  }
 0xb87   :  { %7295 = vmatpush1.bf16.msra.mxu1 %v13963_v29  ;;  %v7383_v29 = vpack.c.bf16 %v16555_v40, %v7375_v24  ;;  %v7470_v40 = vrot.slane %v7468_v4, 1  ;;  %v7378_v24 = vld [vmem:[#allocation2 + $0x40] sm:$0x7f] }
 0xb88   :  { %7296 = vmatprep.subr.bf16.mxu1 %v13968_v19  ;;  %v6989_v19 = vrot.slane %v6920_v18, 1  ;;  %v14037_v18 = vld [vmem:[%s18133_s2 + $0x5a4] ss:$8 sps:$4 sm:$0xff]  }
 0xb8b   :  { %7297 = vmatpush1.bf16.msra.mxu1 %v13966_v3  ;;  %v6988_v3 = vrot.slane %v6916_v27, 1  ;;  %v7374_v27 = vld [vmem:[#allocation2] sm:$0xf8] }
 0xb8c   :  { %7317 = vmatprep.subr.bf16.mxu1 %v13971_v5  ;;  %v7460_v5 = vshrl.u32 %v7383_v29, 16 }
 0xb8d   :  { %v6990_v43 = vsel %vm1664_vm5, %v6988_v3, %v6989_v19  ;;  %vm18145_vm5 = vmmov %vm18144_vm4 }
 0xb8e   :  { %7299 = vmatmul.mubr.bf16.vlgmr.msra.gmra.mrb[80].mxu1 %v6984_v35  ;;  %v7462_v35 = vrot.slane %v7460_v5, 1 }
 0xb8f   :  { %7308 = vmatprep.mubr.bf16.mxu1 %v16869_v54  ;;  %7318 = vmatpush1.bf16.msra.mxu1 %v13969_v32  ;;  %v13975_v54 = vld [vmem:[%s18133_s2 + $0x460] ss:$8 sps:$4 sm:$0xff]   ;;  %v7473_v32 = vrot.slane %v7471_v61, 2  ;;  %v14043_v61 = vld [vmem:[%s18133_s2 + $0x5c4] ss:$8 sps:$4 sm:$0xff]  }
 0xb90   :  { %7319 = vmatprep.subr.bf16.mxu1 %v13974_v46  ;;  %v14007_v46 = vld [vmem:[%s18133_s2 + $0x504] ss:$8 sps:$4 sm:$0xff]  }
 0xb93   :  { %7320 = vmatpush1.bf16.msra.mxu1 %v13972_v39  ;;  %v17047_v39 = vor.u32 %v7473_v32, %v7470_v40  ;;  %v14046_v40 = vld [vmem:[%s18133_s2 + $0x5d4] ss:$8 sps:$4 sm:$0xff]  }
 0xb94   :  { %7321 = vmatprep.subr.bf16.mxu1 %v13977_v48 }
 0xb96   :  { %7309 = vmatmul.mubr.bf16.gmra.mrb[100].mxu1 %v6983_v36  ;;  %v7463_v36 = vshll.u32 %v7383_v29, 16  ;;  %v14038_v29 = vld [vmem:[%s18133_s2 + $0x5b0] ss:$8 sps:$4 sm:$0xff]  }
 0xb97   :  { %7322 = vmatpush1.bf16.msra.mxu1 %v13975_v54  ;;  %11881 = vmatprep.mubr.msk.bf16.mxu1 %vm628_vm2, %v6993_v58  ;;  %v14008_v54 = vld [vmem:[%s18133_s2 + $0x510] ss:$8 sps:$4 sm:$0xff]  }
 0xb98   :  { %7323 = vmatprep.subr.bf16.mxu1 %v13980_v30  ;;  %v7465_v47 = vrot.slane %v7463_v36, 2 }
 0xb99   :  { %v16990_v63 = vpop.f32.mrb[84].mxu1 }
 0xb9a   :  { %v16992_v6 = vpop.f32.mrb[85].mxu1  ;;  %v7466_v48 = vor.u32 %v7465_v47, %v7462_v35  ;;  %v14044_v35 = vld [vmem:[%s18133_s2 + $0x5d0] ss:$8 sps:$4 sm:$0xff]  }
 0xb9b   :  { %7324 = vmatpush1.bf16.msra.mxu1 %v13978_v59  ;;  %v6484_v7 = vpop.f32.mrb[86].mxu1 }
 0xb9c   :  { %v6485_v49 = vpop.f32.mrb[87].mxu1  ;;  %7325 = vmatprep.subr.bf16.mxu1 %v13983_v14 }
 0xb9f   :  { %7326 = vmatpush1.bf16.msra.mxu1 %v13981_v31  ;;  %v14011_v31 = vld [vmem:[%s18133_s2 + $0x520] ss:$8 sps:$4 sm:$0xff]  }
 0xba0   :  { %7327 = vmatprep.subr.bf16.mxu1 %v13986_v50  ;;  %v14016_v50 = vld [vmem:[%s18133_s2 + $0x534] ss:$8 sps:$4 sm:$0xff]  }
 0xba3   :  { %7328 = vmatpush1.bf16.msra.mxu1 %v13984_v10  ;;  %v14017_v10 = vld [vmem:[%s18133_s2 + $0x540] ss:$8 sps:$4 sm:$0xff]  }
 0xba4   :  { %7329 = vmatprep.subr.bf16.mxu1 %v13989_v20  ;;  %v14022_v20 = vld [vmem:[%s18133_s2 + $0x554] ss:$8 sps:$4 sm:$0xff]  }
 0xba7   :  { %7330 = vmatpush1.bf16.msra.mxu1 %v13987_v60  ;;  %v14020_v60 = vld [vmem:[%s18133_s2 + $0x550] ss:$8 sps:$4 sm:$0xff]  }
 0xba8   :  { %7331 = vmatprep.subr.bf16.mxu1 %v13992_v53  ;;  %v14025_v53 = vld [vmem:[%s18133_s2 + $0x564] ss:$8 sps:$4 sm:$0xff]  }
 0xbab   :  { %7332 = vmatpush1.bf16.msra.mxu1 %v13990_v8  ;;  %v14023_v8 = vld [vmem:[%s18133_s2 + $0x560] ss:$8 sps:$4 sm:$0xff]  }
 0xbac   :  { %7333 = vmatprep.subr.bf16.mxu1 %v13995_v9  ;;  %v14028_v9 = vld [vmem:[%s18133_s2 + $0x574] ss:$8 sps:$4 sm:$0xff]  }
 0xbaf   :  { %7334 = vmatpush1.bf16.msra.mxu1 %v13993_v12  ;;  %v14031_v12 = vld [vmem:[%s18133_s2 + $0x584] ss:$8 sps:$4 sm:$0xff]  }
 0xbb0   :  { %7335 = vmatprep.subr.bf16.mxu1 %v13998_v45  ;;  %v14034_v45 = vld [vmem:[%s18133_s2 + $0x594] ss:$8 sps:$4 sm:$0xff]  }
 0xbb3   :  { %7336 = vmatpush1.bf16.msra.mxu1 %v13996_v23  ;;  %v14040_v23 = vld [vmem:[%s18133_s2 + $0x5b4] ss:$8 sps:$4 sm:$0xff]  }
 0xbb4   :  { %7782 = vmatprep.subr.bf16.mxu1 %v14001_v1  ;;  %v7386_v1 = vpack.c.bf16 %v7378_v24, %v7378_v24 }
 0xbb6   :  { %7350 = vmatmul.mubr.bf16.vlgmr.msra.gmra.mrb[80].mxu1 %v6990_v43  ;;  %v7451_v3 = vshrl.u32 %v7386_v1, 16  ;;  %v7381_v43 = vld [vmem:[#allocation2 + $0x58] sm:$0x7f] }
 0xbb7   :  { %11882 = vmatprep.mubr.msk.bf16.mxu1 %vm628_vm2, %v16973_v28  ;;  %7783 = vmatpush1.bf16.msra.mxu1 %v13999_v42  ;;  %v7475_v28 = vsel %vm2126_vm6, %v7466_v48, %v17047_v39  ;;  %v7454_v42 = vshll.u32 %v7386_v1, 16  ;;  %v7377_v48 = vld [vmem:[#allocation2 + $0x18] sm:$0xf8] }
 0xbb8   :  { %7784 = vmatprep.subr.bf16.mxu1 %v14004_v15  ;;  %v14041_v15 = vld [vmem:[%s18133_s2 + $0x5c0] ss:$8 sps:$4 sm:$0xff]   ;;  %v7453_v32 = vrot.slane %v7451_v3, 1  ;;  %v14070_v3 = vld [vmem:[%s18133_s2 + $0x654] ss:$8 sps:$4 sm:$0xff]  }
 0xbbb   :  { %7785 = vmatpush1.bf16.msra.mxu1 %v14002_v34  ;;  %v7456_v34 = vrot.slane %v7454_v42, 2  ;;  %v7376_v42 = vld [vmem:[#allocation2 + $0x10] sm:$0xf8] }
 0xbbc   :  { %7786 = vmatprep.subr.bf16.mxu1 %v14007_v46  ;;  %v7389_v46 = vpack.c.bf16 %v7381_v43, %v7381_v43 }
 0xbbe   :  { %7360 = vmatmul.mubr.bf16.gmra.mrb[104].mxu1 %v6989_v19  ;;  %v17126_v19 = vld [vmem:[#allocation2 + $0x20] sm:$0xff] }
 0xbbf   :  { %7787 = vmatpush1.bf16.msra.mxu1 %v14005_v21  ;;  %7814 = vmatprep.mubr.bf16.mxu1 %v7475_v28  ;;  %v7382_v4 = vpack.c.bf16 %v17126_v19, %v7374_v27  ;;  %v7385_v28 = vpack.c.bf16 %v16599_v57, %v7377_v48  ;;  %v14059_v27 = vld [vmem:[%s18133_s2 + $0x620] ss:$8 sps:$4 sm:$0xff]  }
 0xbc0   :  { %7788 = vmatprep.subr.bf16.mxu1 %v14010_v52  ;;  %v14049_v52 = vld [vmem:[%s18133_s2 + $0x5e4] ss:$8 sps:$4 sm:$0xff]  }
 0xbc1   :  { %v6531_v30 = vpop.f32.mrb[88].mxu1  ;;  %v7443_v5 = vshrl.u32 %v7382_v4, 16  ;;  %v7446_v36 = vshll.u32 %v7382_v4, 16  ;;  %v7380_v4 = vld [vmem:[#allocation2 + $0x50] sm:$0x7f] }
 0xbc2   :  { %v17064_v58 = vadd.f32 %v6531_v30, %v16990_v63  ;;  %v6533_v59 = vpop.f32.mrb[89].mxu1  ;;  %v14014_v63 = vld [vmem:[%s18133_s2 + $0x530] ss:$8 sps:$4 sm:$0xff]   ;;  %v7505_v30 = vshll.u32 %v7389_v46, 16 }
 0xbc3   :  { %v17067_v14 = vadd.f32 %v6533_v59, %v16992_v6  ;;  %v6535_v7 = vpop.f32.mrb[90].mxu1  ;;  %7789 = vmatpush1.bf16.msra.mxu1 %v14008_v54  ;;  %v14019_v6 = vld [vmem:[%s18133_s2 + $0x544] ss:$8 sps:$4 sm:$0xff]   ;;  %v7445_v47 = vrot.slane %v7443_v5, 1  ;;  %v7448_v21 = vrot.slane %v7446_v36, 2  ;;  %v7457_v54 = vor.u32 %v7456_v34, %v7453_v32  ;;  %v17203_v36 = vld [vmem:[#allocation2 + $0x30] sm:$0xff] }
 0xbc4   :  { %v6536_v49 = vpop.f32.mrb[91].mxu1  ;;  %7790 = vmatprep.subr.bf16.mxu1 %v14013_v38  ;;  %v7502_v38 = vshrl.u32 %v7389_v46, 16  ;;  %v14047_v7 = vld [vmem:[%s18133_s2 + $0x5e0] ss:$8 sps:$4 sm:$0xff]   ;;  %v14068_v5 = vld [vmem:[%s18133_s2 + $0x650] ss:$8 sps:$4 sm:$0xff]   ;;  %v7384_v43 = vpack.c.bf16 %v17203_v36, %v7376_v42 }
 0xbc5   :  { %v7449_v59 = vor.u32 %v7448_v21, %v7445_v47  ;;  %v7494_v49 = vshrl.u32 %v7385_v28, 16  ;;  %v14071_v46 = vld [vmem:[%s18133_s2 + $0x660] ss:$8 sps:$4 sm:$0xff]   ;;  %v14076_v21 = vld [vmem:[%s18133_s2 + $0x674] ss:$8 sps:$4 sm:$0xff]  }
 0xbc6   :  { %v7504_v57 = vrot.slane %v7502_v38, 1  ;;  %v7480_v47 = vshll.u32 %v7384_v43, 16  ;;  %v14106_v42 = vld [vmem:[%s18133_s2 + $0x714] ss:$8 sps:$4 sm:$0xff]  }
 0xbc7   :  { %7791 = vmatpush1.bf16.msra.mxu1 %v14011_v31  ;;  %v14052_v31 = vld [vmem:[%s18133_s2 + $0x5f4] ss:$8 sps:$4 sm:$0xff]  }
 0xbc8   :  { %7792 = vmatprep.subr.bf16.mxu1 %v14016_v50  ;;  %v7497_v50 = vshll.u32 %v7385_v28, 16  ;;  %v14074_v28 = vld [vmem:[%s18133_s2 + $0x670] ss:$8 sps:$4 sm:$0xff]   ;;  %v7482_v38 = vrot.slane %v7480_v47, 2 }
 0xbc9   :  { %v14116_v47 = vld [vmem:[%s18133_s2 + $0x750] ss:$8 sps:$4 sm:$0xff]  }
 0xbcb   :  { %7793 = vmatpush1.bf16.msra.mxu1 %v14014_v63  ;;  %v7458_v63 = vsel %vm2126_vm6, %v7449_v59, %v7457_v54 }
 0xbcc   :  { %7794 = vmatprep.subr.bf16.mxu1 %v14019_v6  ;;  %v7507_v6 = vrot.slane %v7505_v30, 2  ;;  %v14079_v30 = vld [vmem:[%s18133_s2 + $0x684] ss:$8 sps:$4 sm:$0xff]  }
 0xbcf   :  { %7795 = vmatpush1.bf16.msra.mxu1 %v14017_v10  ;;  %v14050_v10 = vld [vmem:[%s18133_s2 + $0x5f0] ss:$8 sps:$4 sm:$0xff]  }
 0xbd0   :  { %7796 = vmatprep.subr.bf16.mxu1 %v14022_v20  ;;  %v14055_v20 = vld [vmem:[%s18133_s2 + $0x604] ss:$8 sps:$4 sm:$0xff]  }
 0xbd3   :  { %7797 = vmatpush1.bf16.msra.mxu1 %v14020_v60  ;;  %v7496_v60 = vrot.slane %v7494_v49, 1  ;;  %v14082_v49 = vld [vmem:[%s18133_s2 + $0x694] ss:$8 sps:$4 sm:$0xff]  }
 0xbd4   :  { %7798 = vmatprep.subr.bf16.mxu1 %v14025_v53  ;;  %v7499_v53 = vrot.slane %v7497_v50, 2 }
 0xbd7   :  { %7799 = vmatpush1.bf16.msra.mxu1 %v14023_v8  ;;  %v17159_v8 = vor.u32 %v7507_v6, %v7504_v57  ;;  %v7903_v57 = vpack.c.bf16 %v16663_v41, %v16663_v41  ;;  %v14080_v6 = vld [vmem:[%s18133_s2 + $0x690] ss:$8 sps:$4 sm:$0xff]   ;;  %v14083_v41 = vld [vmem:[%s18133_s2 + $0x6a0] ss:$8 sps:$4 sm:$0xff]  }
 0xbd8   :  { %7800 = vmatprep.subr.bf16.mxu1 %v14028_v9  ;;  %v14053_v9 = vld [vmem:[%s18133_s2 + $0x600] ss:$8 sps:$4 sm:$0xff]  }
 0xbdb   :  { %7801 = vmatpush1.bf16.msra.mxu1 %v14026_v13  ;;  %v14058_v13 = vld [vmem:[%s18133_s2 + $0x614] ss:$8 sps:$4 sm:$0xff]  }
 0xbdc   :  { %7802 = vmatprep.subr.bf16.mxu1 %v14031_v12 }
 0xbdf   :  { %7803 = vmatpush1.bf16.msra.mxu1 %v14029_v0  ;;  %v14056_v0 = vld [vmem:[%s18133_s2 + $0x610] ss:$8 sps:$4 sm:$0xff]  }
 0xbe0   :  { %7804 = vmatprep.subr.bf16.mxu1 %v14034_v45  ;;  %v14061_v45 = vld [vmem:[%s18133_s2 + $0x624] ss:$8 sps:$4 sm:$0xff]  }
 0xbe3   :  { %7805 = vmatpush1.bf16.msra.mxu1 %v14032_v11 }
 0xbe4   :  { %7806 = vmatprep.subr.bf16.mxu1 %v14037_v18 }
 0xbe7   :  { %7807 = vmatpush1.bf16.msra.mxu1 %v14035_v17 }
 0xbe8   :  { %7808 = vmatprep.subr.bf16.mxu1 %v14040_v23 }
 0xbeb   :  { %7809 = vmatpush1.bf16.msra.mxu1 %v14038_v29  ;;  %v14064_v29 = vld [vmem:[%s18133_s2 + $0x634] ss:$8 sps:$4 sm:$0xff]  }
 0xbec   :  { %7810 = vmatprep.subr.bf16.mxu1 %v14043_v61  ;;  %v14065_v61 = vld [vmem:[%s18133_s2 + $0x640] ss:$8 sps:$4 sm:$0xff]  }
 0xbef   :  { %7811 = vmatpush1.bf16.msra.mxu1 %v14041_v15  ;;  %v7388_v15 = vpack.c.bf16 %v7380_v4, %v7380_v4  ;;  %v14098_v4 = vld [vmem:[%s18133_s2 + $0x6f0] ss:$8 sps:$4 sm:$0xff]  }
 0xbf0   :  { %7812 = vmatprep.subr.bf16.mxu1 %v14046_v40  ;;  %v14073_v40 = vld [vmem:[%s18133_s2 + $0x664] ss:$8 sps:$4 sm:$0xff]  }
 0xbf1   :  { %v7485_v32 = vshrl.u32 %v7388_v15, 16  ;;  %v7488_v34 = vshll.u32 %v7388_v15, 16  ;;  %v14104_v15 = vld [vmem:[%s18133_s2 + $0x710] ss:$8 sps:$4 sm:$0xff]  }
 0xbf3   :  { %7813 = vmatpush1.bf16.msra.mxu1 %v14044_v35  ;;  %v7477_v35 = vshrl.u32 %v7384_v43, 16  ;;  %v7487_v48 = vrot.slane %v7485_v32, 1  ;;  %v14107_v43 = vld [vmem:[%s18133_s2 + $0x720] ss:$8 sps:$4 sm:$0xff]   ;;  %v14110_v32 = vld [vmem:[%s18133_s2 + $0x730] ss:$8 sps:$4 sm:$0xff]  }
 0xbf4   :  { %7833 = vmatprep.subr.bf16.mxu1 %v14049_v52  ;;  %v7490_v52 = vrot.slane %v7488_v34, 2  ;;  %v14115_v34 = vld [vmem:[%s18133_s2 + $0x744] ss:$8 sps:$4 sm:$0xff]  }
 0xbf6   :  { %7815 = vmatmul.mubr.bf16.vlgmr.msra.gmra.mrb[80].mxu1 %v7458_v63  ;;  %v7491_v59 = vor.u32 %v7490_v52, %v7487_v48  ;;  %v7891_v63 = vld [vmem:[#allocation2 + $0x8] sm:$0xf0]  ;;  %v14119_v48 = vld [vmem:[%s18133_s2 + $0x760] ss:$8 sps:$4 sm:$0xff]  }
 0xbf7   :  { %7824 = vmatprep.mubr.bf16.mxu1 %v17047_v39  ;;  %7834 = vmatpush1.bf16.msra.mxu1 %v14047_v7  ;;  %v7500_v39 = vor.u32 %v7499_v53, %v7496_v60  ;;  %v17238_v53 = vrot.slane %v7903_v57, 2  ;;  %v14124_v52 = vld [vmem:[%s18133_s2 + $0x774] ss:$8 sps:$4 sm:$0xff]  }
 0xbf8   :  { %7835 = vmatprep.subr.bf16.mxu1 %v14052_v31  ;;  %v14077_v31 = vld [vmem:[%s18133_s2 + $0x680] ss:$8 sps:$4 sm:$0xff]  }
 0xbf9   :  { %v7509_v12 = vsel %vm2126_vm6, %v7500_v39, %v17159_v8 }
 0xbfb   :  { %7836 = vmatpush1.bf16.msra.mxu1 %v14050_v10  ;;  %v14085_v10 = vld [vmem:[%s18133_s2 + $0x6a4] ss:$8 sps:$4 sm:$0xff]  }
 0xbfc   :  { %7837 = vmatprep.subr.bf16.mxu1 %v14055_v20  ;;  %v14385_v20 = vld [vmem:[#allocation2 + $0x28] sm:$0xff] }
 0xbfd   :  { %v7899_v60 = vpack.c.bf16 %v14385_v20, %v7891_v63  ;;  %v14130_v63 = vld [vmem:[%s18133_s2 + $0x794] ss:$8 sps:$4 sm:$0xff]   ;;  %v7893_v20 = vld [vmem:[#allocation2 + $0x18] sm:$0xf0] }
 0xbfe   :  { %7825 = vmatmul.mubr.bf16.gmra.mrb[108].mxu1 %v7457_v54  ;;  %v7479_v54 = vrot.slane %v7477_v35, 1  ;;  %v14118_v35 = vld [vmem:[%s18133_s2 + $0x754] ss:$8 sps:$4 sm:$0xff]  }
 0xbff   :  { %7838 = vmatpush1.bf16.msra.mxu1 %v14053_v9  ;;  %11987 = vmatprep.mubr.msk.bf16.mxu1 %vm628_vm2, %v7509_v12  ;;  %v14088_v9 = vld [vmem:[%s18133_s2 + $0x6b4] ss:$8 sps:$4 sm:$0xff]   ;;  %v14091_v12 = vld [vmem:[%s18133_s2 + $0x6c4] ss:$8 sps:$4 sm:$0xff]  }
 0xc00   :  { %7839 = vmatprep.subr.bf16.mxu1 %v14058_v13  ;;  %v7483_v7 = vor.u32 %v7482_v38, %v7479_v54  ;;  %v14086_v13 = vld [vmem:[%s18133_s2 + $0x6b0] ss:$8 sps:$4 sm:$0xff]   ;;  %v17326_v54 = vld [vmem:[#allocation2 + $0x40] sm:$0xff] }
 0xc01   :  { %v6848_v11 = vpop.f32.mrb[92].mxu1  ;;  %v7902_v38 = vpack.c.bf16 %v17326_v54, %v17326_v54 }
 0xc02   :  { %v17177_v18 = vadd.f32 %v6848_v11, %v17064_v58  ;;  %v6850_v24 = vpop.f32.mrb[93].mxu1  ;;  %v14062_v58 = vld [vmem:[%s18133_s2 + $0x630] ss:$8 sps:$4 sm:$0xff]   ;;  %v7492_v50 = vsel %vm2126_vm6, %v7483_v7, %v7491_v59  ;;  %v14127_v7 = vld [vmem:[%s18133_s2 + $0x784] ss:$8 sps:$4 sm:$0xff]  }
 0xc03   :  { %v17180_v17 = vadd.f32 %v6850_v24, %v17067_v14  ;;  %v6852_v23 = vpop.f32.mrb[94].mxu1  ;;  %7840 = vmatpush1.bf16.msra.mxu1 %v14056_v0  ;;  %v14067_v14 = vld [vmem:[%s18133_s2 + $0x644] ss:$8 sps:$4 sm:$0xff]  }
 0xc04   :  { %v6853_v1 = vpop.f32.mrb[95].mxu1  ;;  %7841 = vmatprep.subr.bf16.mxu1 %v14061_v45 }
 0xc07   :  { %7842 = vmatpush1.bf16.msra.mxu1 %v14059_v27  ;;  %v14089_v27 = vld [vmem:[%s18133_s2 + $0x6c0] ss:$8 sps:$4 sm:$0xff]  }
 0xc08   :  { %7843 = vmatprep.subr.bf16.mxu1 %v14064_v29  ;;  %v14094_v29 = vld [vmem:[%s18133_s2 + $0x6d4] ss:$8 sps:$4 sm:$0xff]  }
 0xc0b   :  { %7844 = vmatpush1.bf16.msra.mxu1 %v14062_v58  ;;  %v14095_v58 = vld [vmem:[%s18133_s2 + $0x6e0] ss:$8 sps:$4 sm:$0xff]  }
 0xc0c   :  { %7845 = vmatprep.subr.bf16.mxu1 %v14067_v14  ;;  %v14100_v14 = vld [vmem:[%s18133_s2 + $0x6f4] ss:$8 sps:$4 sm:$0xff]  }
 0xc0f   :  { %7846 = vmatpush1.bf16.msra.mxu1 %v14065_v61  ;;  %v14103_v61 = vld [vmem:[%s18133_s2 + $0x704] ss:$8 sps:$4 sm:$0xff]  }
 0xc10   :  { %7847 = vmatprep.subr.bf16.mxu1 %v14070_v3  ;;  %v14101_v3 = vld [vmem:[%s18133_s2 + $0x700] ss:$8 sps:$4 sm:$0xff]  }
 0xc13   :  { %7848 = vmatpush1.bf16.msra.mxu1 %v14068_v5  ;;  %v14109_v5 = vld [vmem:[%s18133_s2 + $0x724] ss:$8 sps:$4 sm:$0xff]  }
 0xc14   :  { %7849 = vmatprep.subr.bf16.mxu1 %v14073_v40  ;;  %v14112_v40 = vld [vmem:[%s18133_s2 + $0x734] ss:$8 sps:$4 sm:$0xff]  }
 0xc17   :  { %7850 = vmatpush1.bf16.msra.mxu1 %v14071_v46  ;;  %v14113_v46 = vld [vmem:[%s18133_s2 + $0x740] ss:$8 sps:$4 sm:$0xff]  }
 0xc18   :  { %7851 = vmatprep.subr.bf16.mxu1 %v14076_v21  ;;  %v14121_v21 = vld [vmem:[%s18133_s2 + $0x764] ss:$8 sps:$4 sm:$0xff]  }
 0xc1b   :  { %7852 = vmatpush1.bf16.msra.mxu1 %v14074_v28  ;;  %v7890_v28 = vld [vmem:[#allocation2] sm:$0xf0] }
 0xc1c   :  { %8250 = vmatprep.subr.bf16.mxu1 %v14079_v30  ;;  %v14122_v30 = vld [vmem:[%s18133_s2 + $0x770] ss:$8 sps:$4 sm:$0xff]  }
 0xc1e   :  { %7866 = vmatmul.mubr.bf16.vlgmr.msra.gmra.mrb[80].mxu1 %v7492_v50  ;;  %v14125_v50 = vld [vmem:[%s18133_s2 + $0x780] ss:$8 sps:$4 sm:$0xff]  }
 0xc1f   :  { %11988 = vmatprep.mubr.msk.bf16.mxu1 %vm628_vm2, %v17159_v8  ;;  %8251 = vmatpush1.bf16.msra.mxu1 %v14077_v31  ;;  %v7969_v8 = vrot.slane %v7899_v60, 2  ;;  %v7967_v31 = vrot.slane %v7902_v38, 2  ;;  %v14133_v60 = vld [vmem:[%s18133_s2 + $0x7a4] ss:$8 sps:$4 sm:$0xff]  }
 0xc20   :  { %8252 = vmatprep.subr.bf16.mxu1 %v14082_v49 }
 0xc21   :  { %v7971_v39 = vsel %vm102_vm0, %v7969_v8, %v17238_v53 }
 0xc23   :  { %8253 = vmatpush1.bf16.msra.mxu1 %v14080_v6 }
 0xc24   :  { %8254 = vmatprep.subr.bf16.mxu1 %v14085_v10  ;;  %v14128_v10 = vld [vmem:[%s18133_s2 + $0x790] ss:$8 sps:$4 sm:$0xff]  }
 0xc26   :  { %7876 = vmatmul.mubr.bf16.gmra.mrb[112].mxu1 %v7491_v59  ;;  %v7898_v59 = vpack.c.bf16 %v17126_v19, %v7890_v28  ;;  %v17344_v19 = vld [vmem:[#allocation2 + $0x58] sm:$0xff]  ;;  %v14391_v28 = vld [vmem:[#allocation2 + $0x28] sm:$0xff] }
 0xc27   :  { %8255 = vmatpush1.bf16.msra.mxu1 %v14083_v41  ;;  %8282 = vmatprep.mubr.bf16.mxu1 %v7971_v39  ;;  %v7905_v6 = vpack.c.bf16 %v17344_v19, %v17344_v19  ;;  %v14388_v41 = vld [vmem:[#allocation2 + $0x38] sm:$0xff] }
 0xc28   :  { %8256 = vmatprep.subr.bf16.mxu1 %v14088_v9  ;;  %v7966_v49 = vrot.slane %v7898_v59, 2  ;;  %v7901_v8 = vpack.c.bf16 %v14388_v41, %v7893_v20  ;;  %v14158_v20 = vld [vmem:[%s18133_s2 + $0x830] ss:$8 sps:$4 sm:$0xff]  }
 0xc29   :  { %v6899_v0 = vpop.f32.mrb[96].mxu1  ;;  %v17355_v9 = vrot.slane %v7905_v6, 2 }
 0xc2a   :  { %v17255_v45 = vadd.f32 %v6899_v0, %v17177_v18  ;;  %v6901_v11 = vpop.f32.mrb[97].mxu1  ;;  %v14092_v18 = vld [vmem:[%s18133_s2 + $0x6d0] ss:$8 sps:$4 sm:$0xff]   ;;  %v7968_v57 = vsel %vm102_vm0, %v7966_v49, %v7967_v31  ;;  %v7975_v39 = vrot.slane %v7901_v8, 2  ;;  %v14155_v49 = vld [vmem:[%s18133_s2 + $0x820] ss:$8 sps:$4 sm:$0xff]  }
 0xc2b   :  { %v17258_v24 = vadd.f32 %v6901_v11, %v17180_v17  ;;  %v6903_v23 = vpop.f32.mrb[98].mxu1  ;;  %8257 = vmatpush1.bf16.msra.mxu1 %v14086_v13  ;;  %v14097_v17 = vld [vmem:[%s18133_s2 + $0x6e4] ss:$8 sps:$4 sm:$0xff]   ;;  %v14136_v13 = vld [vmem:[%s18133_s2 + $0x7b4] ss:$8 sps:$4 sm:$0xff]  }
 0xc2c   :  { %v6904_v1 = vpop.f32.mrb[99].mxu1  ;;  %8258 = vmatprep.subr.bf16.mxu1 %v14091_v12  ;;  %v7977_v12 = vsel %vm102_vm0, %v7975_v39, %v17355_v9  ;;  %v14134_v0 = vld [vmem:[%s18133_s2 + $0x7b0] ss:$8 sps:$4 sm:$0xff]   ;;  %v14139_v11 = vld [vmem:[%s18133_s2 + $0x7c4] ss:$8 sps:$4 sm:$0xff]  }
 0xc2d   :  { %v14161_v39 = vld [vmem:[%s18133_s2 + $0x840] ss:$8 sps:$4 sm:$0xff]  }
 0xc2f   :  { %8259 = vmatpush1.bf16.msra.mxu1 %v14089_v27 }
 0xc30   :  { %8260 = vmatprep.subr.bf16.mxu1 %v14094_v29  ;;  %v14137_v29 = vld [vmem:[%s18133_s2 + $0x7c0] ss:$8 sps:$4 sm:$0xff]  }
 0xc33   :  { %8261 = vmatpush1.bf16.msra.mxu1 %v14092_v18 }
 0xc34   :  { %8262 = vmatprep.subr.bf16.mxu1 %v14097_v17  ;;  %v14142_v17 = vld [vmem:[%s18133_s2 + $0x7d4] ss:$8 sps:$4 sm:$0xff]  }
 0xc37   :  { %8263 = vmatpush1.bf16.msra.mxu1 %v14095_v58  ;;  %v14140_v58 = vld [vmem:[%s18133_s2 + $0x7d0] ss:$8 sps:$4 sm:$0xff]  }
 0xc38   :  { %8264 = vmatprep.subr.bf16.mxu1 %v14100_v14  ;;  %v14145_v14 = vld [vmem:[%s18133_s2 + $0x7e4] ss:$8 sps:$4 sm:$0xff]  }
 0xc3b   :  { %8265 = vmatpush1.bf16.msra.mxu1 %v14098_v4  ;;  %v14143_v4 = vld [vmem:[%s18133_s2 + $0x7e0] ss:$8 sps:$4 sm:$0xff]  }
 0xc3c   :  { %8266 = vmatprep.subr.bf16.mxu1 %v14103_v61  ;;  %v14148_v61 = vld [vmem:[%s18133_s2 + $0x7f4] ss:$8 sps:$4 sm:$0xff]  }
 0xc3f   :  { %8267 = vmatpush1.bf16.msra.mxu1 %v14101_v3  ;;  %v14146_v3 = vld [vmem:[%s18133_s2 + $0x7f0] ss:$8 sps:$4 sm:$0xff]  }
 0xc40   :  { %8268 = vmatprep.subr.bf16.mxu1 %v14106_v42  ;;  %v14151_v42 = vld [vmem:[%s18133_s2 + $0x804] ss:$8 sps:$4 sm:$0xff]  }
 0xc43   :  { %8269 = vmatpush1.bf16.msra.mxu1 %v14104_v15  ;;  %v14149_v15 = vld [vmem:[%s18133_s2 + $0x800] ss:$8 sps:$4 sm:$0xff]  }
 0xc44   :  { %8270 = vmatprep.subr.bf16.mxu1 %v14109_v5  ;;  %v8371_v5 = vld [vmem:[#allocation2 + $0x68] sm:$0x1] }
 0xc47   :  { %8271 = vmatpush1.bf16.msra.mxu1 %v14107_v43  ;;  %v14154_v43 = vld [vmem:[%s18133_s2 + $0x814] ss:$8 sps:$4 sm:$0xff]  }
 0xc48   :  { %8272 = vmatprep.subr.bf16.mxu1 %v14112_v40  ;;  %v7892_v40 = vld [vmem:[#allocation2 + $0x10] sm:$0xf0] }
 0xc4b   :  { %8273 = vmatpush1.bf16.msra.mxu1 %v14110_v32  ;;  %v17406_v32 = vld [vmem:[#allocation2 + $0x50] sm:$0xff] }
 0xc4c   :  { %8274 = vmatprep.subr.bf16.mxu1 %v14115_v34  ;;  %v7904_v34 = vpack.c.bf16 %v17406_v32, %v17406_v32 }
 0xc4f   :  { %8275 = vmatpush1.bf16.msra.mxu1 %v14113_v46  ;;  %v14390_v46 = vld [vmem:[#allocation2 + $0x48] sm:$0xff] }
 0xc50   :  { %8276 = vmatprep.subr.bf16.mxu1 %v14118_v35  ;;  %v8379_v35 = vpack.c.bf16 %v8371_v5, %v14390_v46  ;;  %v14181_v5 = vld [vmem:[%s18133_s2 + $0x8a4] ss:$8 sps:$4 sm:$0xff]  }
 0xc51   :  { %v14187_v46 = vld [vmem:[%s18133_s2 + $0x8c4] ss:$8 sps:$4 sm:$0xff]  }
 0xc52   :  { %v8460_v59 = vshrl.u32 %v8379_v35, 16 }
 0xc53   :  { %8277 = vmatpush1.bf16.msra.mxu1 %v14116_v47  ;;  %v14152_v47 = vld [vmem:[%s18133_s2 + $0x810] ss:$8 sps:$4 sm:$0xff]  }
 0xc54   :  { %8278 = vmatprep.subr.bf16.mxu1 %v14121_v21  ;;  %v7900_v21 = vpack.c.bf16 %v17203_v36, %v7892_v40  ;;  %v14160_v36 = vld [vmem:[%s18133_s2 + $0x834] ss:$8 sps:$4 sm:$0xff]   ;;  %v8462_v6 = vrot.slane %v8460_v59, 2  ;;  %v8358_v59 = vld [vmem:[#allocation2] sm:$0xe0] }
 0xc55   :  { %v14184_v40 = vld [vmem:[%s18133_s2 + $0x8b4] ss:$8 sps:$4 sm:$0xff]  }
 0xc57   :  { %8279 = vmatpush1.bf16.msra.mxu1 %v14119_v48  ;;  %v8359_v48 = vld [vmem:[#allocation2 + $0x8] sm:$0xe0] }
 0xc58   :  { %8280 = vmatprep.subr.bf16.mxu1 %v14124_v52  ;;  %v14157_v52 = vld [vmem:[%s18133_s2 + $0x824] ss:$8 sps:$4 sm:$0xff]   ;;  %v8375_v38 = vpack.c.bf16 %v14391_v28, %v8359_v48  ;;  %v14191_v28 = vld [vmem:[%s18133_s2 + $0x8e0] ss:$8 sps:$4 sm:$0xff]  }
 0xc59   :  { %v14193_v48 = vld [vmem:[%s18133_s2 + $0x8e4] ss:$8 sps:$4 sm:$0xff]  }
 0xc5b   :  { %8281 = vmatpush1.bf16.msra.mxu1 %v14122_v30  ;;  %v7973_v30 = vrot.slane %v7904_v34, 2  ;;  %v14182_v34 = vld [vmem:[%s18133_s2 + $0x8b0] ss:$8 sps:$4 sm:$0xff]  }
 0xc5c   :  { %8301 = vmatprep.subr.bf16.mxu1 %v14127_v7  ;;  %v8463_v7 = vshll.u32 %v8379_v35, 16  ;;  %v14185_v35 = vld [vmem:[%s18133_s2 + $0x8c0] ss:$8 sps:$4 sm:$0xff]  }
 0xc5e   :  { %8283 = vmatmul.mubr.bf16.vlgmr.msra.gmra.mrb[80].mxu1 %v7968_v57 }
 0xc5f   :  { %8292 = vmatprep.mubr.bf16.mxu1 %v17238_v53  ;;  %8302 = vmatpush1.bf16.msra.mxu1 %v14125_v50  ;;  %v14131_v53 = vld [vmem:[%s18133_s2 + $0x7a0] ss:$8 sps:$4 sm:$0xff]   ;;  %v8452_v50 = vshrl.u32 %v8375_v38, 16 }
 0xc60   :  { %8303 = vmatprep.subr.bf16.mxu1 %v14130_v63  ;;  %v8455_v63 = vshll.u32 %v8375_v38, 16  ;;  %v14196_v38 = vld [vmem:[%s18133_s2 + $0x8f4] ss:$8 sps:$4 sm:$0xff]  }
 0xc61   :  { %v8454_v41 = vrot.slane %v8452_v50, 2 }
 0xc62   :  { %v8457_v8 = vrot.slane %v8455_v63, 3 }
 0xc63   :  { %8304 = vmatpush1.bf16.msra.mxu1 %v14128_v10  ;;  %v8465_v10 = vrot.slane %v8463_v7, 3  ;;  %v14194_v7 = vld [vmem:[%s18133_s2 + $0x8f0] ss:$8 sps:$4 sm:$0xff]  }
 0xc64   :  { %8305 = vmatprep.subr.bf16.mxu1 %v14133_v60  ;;  %v14163_v60 = vld [vmem:[%s18133_s2 + $0x844] ss:$8 sps:$4 sm:$0xff]  }
 0xc66   :  { %8293 = vmatmul.mubr.bf16.gmra.mrb[116].mxu1 %v7967_v31  ;;  %v7972_v31 = vrot.slane %v7900_v21, 2  ;;  %v14188_v21 = vld [vmem:[%s18133_s2 + $0x8d0] ss:$8 sps:$4 sm:$0xff]  }
 0xc67   :  { %8306 = vmatpush1.bf16.msra.mxu1 %v14131_v53  ;;  %12093 = vmatprep.mubr.msk.bf16.mxu1 %vm628_vm2, %v7977_v12  ;;  %v17432_v53 = vor.u32 %v8465_v10, %v8462_v6  ;;  %v8373_v10 = vld [vmem:[#allocation2 + $0x78] sm:$0x1] }
 0xc68   :  { %8307 = vmatprep.subr.bf16.mxu1 %v14136_v13  ;;  %v7974_v57 = vsel %vm102_vm0, %v7972_v31, %v7973_v30  ;;  %v14166_v13 = vld [vmem:[%s18133_s2 + $0x854] ss:$8 sps:$4 sm:$0xff]   ;;  %v14392_v31 = vld [vmem:[#allocation2 + $0x20] sm:$0xff]  ;;  %vm18141_vm0 = vcmask 785408  }
 0xc69   :  { %v17372_v23 = vpop.f32.mrb[100].mxu1 }
 0xc6a   :  { %v17374_v27 = vpop.f32.mrb[101].mxu1 }
 0xc6b   :  { %v7314_v1 = vpop.f32.mrb[102].mxu1  ;;  %8308 = vmatpush1.bf16.msra.mxu1 %v14134_v0  ;;  %v14164_v0 = vld [vmem:[%s18133_s2 + $0x850] ss:$8 sps:$4 sm:$0xff]  }
 0xc6c   :  { %v7315_v18 = vpop.f32.mrb[103].mxu1  ;;  %8309 = vmatprep.subr.bf16.mxu1 %v14139_v11  ;;  %v14169_v11 = vld [vmem:[%s18133_s2 + $0x864] ss:$8 sps:$4 sm:$0xff]  }
 0xc6f   :  { %8310 = vmatpush1.bf16.msra.mxu1 %v14137_v29 }
 0xc70   :  { %8311 = vmatprep.subr.bf16.mxu1 %v14142_v17 }
 0xc73   :  { %8312 = vmatpush1.bf16.msra.mxu1 %v14140_v58 }
 0xc74   :  { %8313 = vmatprep.subr.bf16.mxu1 %v14145_v14  ;;  %v14167_v14 = vld [vmem:[%s18133_s2 + $0x860] ss:$8 sps:$4 sm:$0xff]  }
 0xc77   :  { %8314 = vmatpush1.bf16.msra.mxu1 %v14143_v4 }
 0xc78   :  { %8315 = vmatprep.subr.bf16.mxu1 %v14148_v61 }
 0xc7b   :  { %8316 = vmatpush1.bf16.msra.mxu1 %v14146_v3  ;;  %v14172_v3 = vld [vmem:[%s18133_s2 + $0x874] ss:$8 sps:$4 sm:$0xff]  }
 0xc7c   :  { %8317 = vmatprep.subr.bf16.mxu1 %v14151_v42  ;;  %v14173_v42 = vld [vmem:[%s18133_s2 + $0x880] ss:$8 sps:$4 sm:$0xff]  }
 0xc7f   :  { %8318 = vmatpush1.bf16.msra.mxu1 %v14149_v15  ;;  %v14176_v15 = vld [vmem:[%s18133_s2 + $0x890] ss:$8 sps:$4 sm:$0xff]  }
 0xc80   :  { %8319 = vmatprep.subr.bf16.mxu1 %v14154_v43  ;;  %v14179_v43 = vld [vmem:[%s18133_s2 + $0x8a0] ss:$8 sps:$4 sm:$0xff]  }
 0xc83   :  { %8320 = vmatpush1.bf16.msra.mxu1 %v14152_v47  ;;  %v14190_v47 = vld [vmem:[%s18133_s2 + $0x8d4] ss:$8 sps:$4 sm:$0xff]  }
 0xc84   :  { %8774 = vmatprep.subr.bf16.mxu1 %v14157_v52  ;;  %v8370_v52 = vld [vmem:[#allocation2 + $0x60] sm:$0x1] }
 0xc86   :  { %8334 = vmatmul.mubr.bf16.vlgmr.msra.gmra.mrb[80].mxu1 %v7974_v57 }
 0xc87   :  { %12094 = vmatprep.mubr.msk.bf16.mxu1 %vm628_vm2, %v17355_v9  ;;  %8775 = vmatpush1.bf16.msra.mxu1 %v14155_v49  ;;  %v8458_v9 = vor.u32 %v8457_v8, %v8454_v41  ;;  %v8374_v49 = vpack.c.bf16 %v14392_v31, %v8358_v59  ;;  %v8381_v8 = vpack.c.bf16 %v8373_v10, %v17344_v19  ;;  %v14220_v59 = vld [vmem:[%s18133_s2 + $0x974] ss:$8 sps:$4 sm:$0xff]   ;;  %v14223_v31 = vld [vmem:[%s18133_s2 + $0x984] ss:$8 sps:$4 sm:$0xff]  }
 0xc88   :  { %8776 = vmatprep.subr.bf16.mxu1 %v14160_v36  ;;  %v14199_v36 = vld [vmem:[%s18133_s2 + $0x904] ss:$8 sps:$4 sm:$0xff]  }
 0xc89   :  { %v8467_v12 = vsel %vm3122_vm7, %v8458_v9, %v17432_v53  ;;  %v8435_v57 = vshrl.u32 %v8374_v49, 16  ;;  %v8438_v6 = vshll.u32 %v8374_v49, 16  ;;  %v8372_v49 = vld [vmem:[#allocation2 + $0x70] sm:$0x1] }
 0xc8b   :  { %8777 = vmatpush1.bf16.msra.mxu1 %v14158_v20  ;;  %v14202_v20 = vld [vmem:[%s18133_s2 + $0x914] ss:$8 sps:$4 sm:$0xff]   ;;  %v8437_v9 = vrot.slane %v8435_v57, 2  ;;  %v14224_v57 = vld [vmem:[%s18133_s2 + $0x990] ss:$8 sps:$4 sm:$0xff]  }
 0xc8c   :  { %8778 = vmatprep.subr.bf16.mxu1 %v14163_v60 }
 0xc8e   :  { %8344 = vmatmul.mubr.bf16.gmra.mrb[120].mxu1 %v7973_v30  ;;  %v8378_v30 = vpack.c.bf16 %v8370_v52, %v17326_v54  ;;  %v14197_v54 = vld [vmem:[%s18133_s2 + $0x900] ss:$8 sps:$4 sm:$0xff]  }
 0xc8f   :  { %8779 = vmatpush1.bf16.msra.mxu1 %v14161_v39  ;;  %8806 = vmatprep.mubr.bf16.mxu1 %v8467_v12  ;;  %v14200_v39 = vld [vmem:[%s18133_s2 + $0x910] ss:$8 sps:$4 sm:$0xff]   ;;  %v8361_v12 = vld [vmem:[#allocation2 + $0x18] sm:$0xe0] }
 0xc90   :  { %8780 = vmatprep.subr.bf16.mxu1 %v14166_v13  ;;  %v8443_v50 = vshrl.u32 %v8378_v30, 16  ;;  %v8446_v63 = vshll.u32 %v8378_v30, 16  ;;  %v8440_v13 = vrot.slane %v8438_v6, 3  ;;  %v14394_v6 = vld [vmem:[#allocation2 + $0x30] sm:$0xff] }
 0xc91   :  { %v7361_v1 = vpop.f32.mrb[104].mxu1 }
 0xc92   :  { %v7362_v29 = vadd.f32 %v7361_v1, %v17372_v23  ;;  %v7363_v18 = vpop.f32.mrb[105].mxu1  ;;  %v8445_v60 = vrot.slane %v8443_v50, 2  ;;  %v8448_v41 = vrot.slane %v8446_v63, 3  ;;  %v8441_v19 = vor.u32 %v8440_v13, %v8437_v9  ;;  %v14226_v50 = vld [vmem:[%s18133_s2 + $0x994] ss:$8 sps:$4 sm:$0xff]  }
 0xc93   :  { %v7364_v17 = vadd.f32 %v7363_v18, %v17374_v27  ;;  %v7365_v58 = vpop.f32.mrb[106].mxu1  ;;  %8781 = vmatpush1.bf16.msra.mxu1 %v14164_v0  ;;  %v14170_v27 = vld [vmem:[%s18133_s2 + $0x870] ss:$8 sps:$4 sm:$0xff]   ;;  %v14205_v0 = vld [vmem:[%s18133_s2 + $0x924] ss:$8 sps:$4 sm:$0xff]   ;;  %v8494_v18 = vshrl.u32 %v8381_v8, 16  ;;  %v8380_v63 = vpack.c.bf16 %v8372_v49, %v17406_v32 }
 0xc94   :  { %v17454_v4 = vadd.f32 %v7362_v29, %v17255_v45  ;;  %v7366_v61 = vpop.f32.mrb[107].mxu1  ;;  %8782 = vmatprep.subr.bf16.mxu1 %v14169_v11  ;;  %v14175_v45 = vld [vmem:[%s18133_s2 + $0x884] ss:$8 sps:$4 sm:$0xff]   ;;  %v8449_v29 = vor.u32 %v8448_v41, %v8445_v60  ;;  %v14203_v58 = vld [vmem:[%s18133_s2 + $0x920] ss:$8 sps:$4 sm:$0xff]  }
 0xc95   :  { %v17460_v23 = vadd.f32 %v7364_v17, %v17258_v24  ;;  %v14178_v24 = vld [vmem:[%s18133_s2 + $0x894] ss:$8 sps:$4 sm:$0xff]   ;;  %v14393_v11 = vld [vmem:[#allocation2 + $0x38] sm:$0xff]  ;;  %v8497_v17 = vshll.u32 %v8381_v8, 16  ;;  %v8477_v60 = vshrl.u32 %v8380_v63, 16  ;;  %v8480_v41 = vshll.u32 %v8380_v63, 16 }
 0xc96   :  { %v8377_v1 = vpack.c.bf16 %v14393_v11, %v8361_v12  ;;  %v14227_v32 = vld [vmem:[%s18133_s2 + $0x9a0] ss:$8 sps:$4 sm:$0xff]   ;;  %v14232_v9 = vld [vmem:[%s18133_s2 + $0x9b4] ss:$8 sps:$4 sm:$0xff]  }
 0xc97   :  { %8783 = vmatpush1.bf16.msra.mxu1 %v14167_v14  ;;  %v14208_v14 = vld [vmem:[%s18133_s2 + $0x934] ss:$8 sps:$4 sm:$0xff]   ;;  %v8479_v13 = vrot.slane %v8477_v60, 2  ;;  %v8482_v12 = vrot.slane %v8480_v41, 3  ;;  %v14269_v63 = vld [vmem:[%s18133_s2 + $0xa80] ss:$8 sps:$4 sm:$0xff]  }
 0xc98   :  { %8784 = vmatprep.subr.bf16.mxu1 %v14172_v3  ;;  %v8486_v61 = vshrl.u32 %v8377_v1, 16  ;;  %v8489_v3 = vshll.u32 %v8377_v1, 16  ;;  %v14268_v49 = vld [vmem:[%s18133_s2 + $0xa74] ss:$8 sps:$4 sm:$0xff]   ;;  %v14278_v60 = vld [vmem:[%s18133_s2 + $0xab0] ss:$8 sps:$4 sm:$0xff]  }
 0xc99   :  { %v14283_v41 = vld [vmem:[%s18133_s2 + $0xac4] ss:$8 sps:$4 sm:$0xff]  }
 0xc9b   :  { %8785 = vmatpush1.bf16.msra.mxu1 %v14170_v27  ;;  %v8450_v27 = vsel %vm3122_vm7, %v8441_v19, %v8449_v29  ;;  %v14233_v19 = vld [vmem:[%s18133_s2 + $0x9c0] ss:$8 sps:$4 sm:$0xff]  }
 0xc9c   :  { %8786 = vmatprep.subr.bf16.mxu1 %v14175_v45  ;;  %v8496_v45 = vrot.slane %v8494_v18, 2  ;;  %v8483_v18 = vor.u32 %v8482_v12, %v8479_v13  ;;  %v14287_v13 = vld [vmem:[%s18133_s2 + $0xae0] ss:$8 sps:$4 sm:$0xff]   ;;  %v14295_v12 = vld [vmem:[%s18133_s2 + $0xb04] ss:$8 sps:$4 sm:$0xff]  }
 0xc9f   :  { %8787 = vmatpush1.bf16.msra.mxu1 %v14173_v42  ;;  %v8499_v42 = vrot.slane %v8497_v17, 3 }
 0xca0   :  { %8788 = vmatprep.subr.bf16.mxu1 %v14178_v24  ;;  %v14206_v24 = vld [vmem:[%s18133_s2 + $0x930] ss:$8 sps:$4 sm:$0xff]  }
 0xca3   :  { %8789 = vmatpush1.bf16.msra.mxu1 %v14176_v15  ;;  %v14211_v15 = vld [vmem:[%s18133_s2 + $0x944] ss:$8 sps:$4 sm:$0xff]  }
 0xca4   :  { %8790 = vmatprep.subr.bf16.mxu1 %v14181_v5  ;;  %v8488_v5 = vrot.slane %v8486_v61, 2  ;;  %v14236_v61 = vld [vmem:[%s18133_s2 + $0x9d0] ss:$8 sps:$4 sm:$0xff]  }
 0xca7   :  { %8791 = vmatpush1.bf16.msra.mxu1 %v14179_v43  ;;  %v8491_v43 = vrot.slane %v8489_v3, 3  ;;  %v14241_v3 = vld [vmem:[%s18133_s2 + $0x9e4] ss:$8 sps:$4 sm:$0xff]  }
 0xca8   :  { %8792 = vmatprep.subr.bf16.mxu1 %v14184_v40  ;;  %v8500_v40 = vor.u32 %v8499_v42, %v8496_v45  ;;  %v14244_v45 = vld [vmem:[%s18133_s2 + $0x9f4] ss:$8 sps:$4 sm:$0xff]   ;;  %v14242_v42 = vld [vmem:[%s18133_s2 + $0x9f0] ss:$8 sps:$4 sm:$0xff]  }
 0xcab   :  { %8793 = vmatpush1.bf16.msra.mxu1 %v14182_v34  ;;  %v14209_v34 = vld [vmem:[%s18133_s2 + $0x940] ss:$8 sps:$4 sm:$0xff]  }
 0xcac   :  { %8794 = vmatprep.subr.bf16.mxu1 %v14187_v46  ;;  %v14214_v46 = vld [vmem:[%s18133_s2 + $0x954] ss:$8 sps:$4 sm:$0xff]  }
 0xcaf   :  { %8795 = vmatpush1.bf16.msra.mxu1 %v14185_v35 }
 0xcb0   :  { %8796 = vmatprep.subr.bf16.mxu1 %v14190_v47  ;;  %v14212_v47 = vld [vmem:[%s18133_s2 + $0x950] ss:$8 sps:$4 sm:$0xff]  }
 0xcb3   :  { %8797 = vmatpush1.bf16.msra.mxu1 %v14188_v21  ;;  %v14217_v21 = vld [vmem:[%s18133_s2 + $0x964] ss:$8 sps:$4 sm:$0xff]  }
 0xcb4   :  { %8798 = vmatprep.subr.bf16.mxu1 %v14193_v48 }
 0xcb7   :  { %8799 = vmatpush1.bf16.msra.mxu1 %v14191_v28 }
 0xcb8   :  { %8800 = vmatprep.subr.bf16.mxu1 %v14196_v38  ;;  %v14215_v38 = vld [vmem:[%s18133_s2 + $0x960] ss:$8 sps:$4 sm:$0xff]  }
 0xcbb   :  { %8801 = vmatpush1.bf16.msra.mxu1 %v14194_v7  ;;  %v14218_v7 = vld [vmem:[%s18133_s2 + $0x970] ss:$8 sps:$4 sm:$0xff]  }
 0xcbc   :  { %8802 = vmatprep.subr.bf16.mxu1 %v14199_v36  ;;  %v14221_v36 = vld [vmem:[%s18133_s2 + $0x980] ss:$8 sps:$4 sm:$0xff]  }
 0xcbf   :  { %8803 = vmatpush1.bf16.msra.mxu1 %v14197_v54  ;;  %v8360_v54 = vld [vmem:[#allocation2 + $0x10] sm:$0xe0] }
 0xcc0   :  { %8804 = vmatprep.subr.bf16.mxu1 %v14202_v20  ;;  %v8376_v10 = vpack.c.bf16 %v14394_v6, %v8360_v54  ;;  %v14229_v20 = vld [vmem:[%s18133_s2 + $0x9a4] ss:$8 sps:$4 sm:$0xff]   ;;  %v14274_v54 = vld [vmem:[%s18133_s2 + $0xa94] ss:$8 sps:$4 sm:$0xff]  }
 0xcc1   :  { %v14277_v6 = vld [vmem:[%s18133_s2 + $0xaa4] ss:$8 sps:$4 sm:$0xff]  }
 0xcc2   :  { %v8469_v8 = vshrl.u32 %v8376_v10, 16 }
 0xcc3   :  { %8805 = vmatpush1.bf16.msra.mxu1 %v14200_v39  ;;  %v8472_v39 = vshll.u32 %v8376_v10, 16  ;;  %v14275_v10 = vld [vmem:[%s18133_s2 + $0xaa0] ss:$8 sps:$4 sm:$0xff]  }
 0xcc4   :  { %8825 = vmatprep.subr.bf16.mxu1 %v14205_v0  ;;  %v14230_v0 = vld [vmem:[%s18133_s2 + $0x9b0] ss:$8 sps:$4 sm:$0xff]   ;;  %v8471_v11 = vrot.slane %v8469_v8, 2  ;;  %v14286_v8 = vld [vmem:[%s18133_s2 + $0xad4] ss:$8 sps:$4 sm:$0xff]  }
 0xcc5   :  { %v8474_v1 = vrot.slane %v8472_v39, 3  ;;  %v14284_v39 = vld [vmem:[%s18133_s2 + $0xad0] ss:$8 sps:$4 sm:$0xff]  }
 0xcc6   :  { %8807 = vmatmul.mubr.bf16.vlgmr.msra.gmra.mrb[80].mxu1 %v8450_v27  ;;  %v14239_v27 = vld [vmem:[%s18133_s2 + $0x9e0] ss:$8 sps:$4 sm:$0xff]  }
 0xcc7   :  { %8816 = vmatprep.mubr.bf16.mxu1 %v17432_v53  ;;  %8826 = vmatpush1.bf16.msra.mxu1 %v14203_v58  ;;  %v8492_v53 = vor.u32 %v8491_v43, %v8488_v5  ;;  %v8475_v17 = vor.u32 %v8474_v1, %v8471_v11  ;;  %v14238_v58 = vld [vmem:[%s18133_s2 + $0x9d4] ss:$8 sps:$4 sm:$0xff]  }
 0xcc8   :  { %8827 = vmatprep.subr.bf16.mxu1 %v14208_v14 }
 0xcc9   :  { %v8501_v35 = vsel %vm3122_vm7, %v8492_v53, %v8500_v40  ;;  %v8484_v14 = vsel %vm3122_vm7, %v8475_v17, %v8483_v18  ;;  %v14301_v17 = vld [vmem:[%s18133_s2 + $0xb24] ss:$8 sps:$4 sm:$0xff]  }
 0xccb   :  { %8828 = vmatpush1.bf16.msra.mxu1 %v14206_v24  ;;  %v14247_v24 = vld [vmem:[%s18133_s2 + $0xa04] ss:$8 sps:$4 sm:$0xff]  }
 0xccc   :  { %8829 = vmatprep.subr.bf16.mxu1 %v14211_v15 }
 0xcce   :  { %8817 = vmatmul.mubr.bf16.gmra.mrb[124].mxu1 %v8449_v29  ;;  %v14235_v29 = vld [vmem:[%s18133_s2 + $0x9c4] ss:$8 sps:$4 sm:$0xff]  }
 0xccf   :  { %8830 = vmatpush1.bf16.msra.mxu1 %v14209_v34  ;;  %12199 = vmatprep.mubr.msk.bf16.mxu1 %vm628_vm2, %v8501_v35  ;;  %v14250_v35 = vld [vmem:[%s18133_s2 + $0xa14] ss:$8 sps:$4 sm:$0xff]  }
 0xcd0   :  { %8831 = vmatprep.subr.bf16.mxu1 %v14214_v46 }
 0xcd1   :  { %v17558_v48 = vpop.f32.mrb[108].mxu1 }
 0xcd2   :  { %v17560_v52 = vpop.f32.mrb[109].mxu1 }
 0xcd3   :  { %v7830_v28 = vpop.f32.mrb[110].mxu1  ;;  %8832 = vmatpush1.bf16.msra.mxu1 %v14212_v47 }
 0xcd4   :  { %v7831_v30 = vpop.f32.mrb[111].mxu1  ;;  %8833 = vmatprep.subr.bf16.mxu1 %v14217_v21  ;;  %v14248_v21 = vld [vmem:[%s18133_s2 + $0xa10] ss:$8 sps:$4 sm:$0xff]   ;;  %v14259_v28 = vld [vmem:[%s18133_s2 + $0xa44] ss:$8 sps:$4 sm:$0xff]  }
 0xcd5   :  { %v14262_v30 = vld [vmem:[%s18133_s2 + $0xa54] ss:$8 sps:$4 sm:$0xff]  }
 0xcd7   :  { %8834 = vmatpush1.bf16.msra.mxu1 %v14215_v38  ;;  %v14257_v38 = vld [vmem:[%s18133_s2 + $0xa40] ss:$8 sps:$4 sm:$0xff]  }
 0xcd8   :  { %8835 = vmatprep.subr.bf16.mxu1 %v14220_v59  ;;  %v14260_v59 = vld [vmem:[%s18133_s2 + $0xa50] ss:$8 sps:$4 sm:$0xff]  }
 0xcdb   :  { %8836 = vmatpush1.bf16.msra.mxu1 %v14218_v7  ;;  %v14265_v7 = vld [vmem:[%s18133_s2 + $0xa64] ss:$8 sps:$4 sm:$0xff]  }
 0xcdc   :  { %8837 = vmatprep.subr.bf16.mxu1 %v14223_v31  ;;  %v14263_v31 = vld [vmem:[%s18133_s2 + $0xa60] ss:$8 sps:$4 sm:$0xff]  }
 0xcdf   :  { %8838 = vmatpush1.bf16.msra.mxu1 %v14221_v36  ;;  %v14266_v36 = vld [vmem:[%s18133_s2 + $0xa70] ss:$8 sps:$4 sm:$0xff]  }
 0xce0   :  { %8839 = vmatprep.subr.bf16.mxu1 %v14226_v50  ;;  %v14271_v50 = vld [vmem:[%s18133_s2 + $0xa84] ss:$8 sps:$4 sm:$0xff]  }
 0xce3   :  { %8840 = vmatpush1.bf16.msra.mxu1 %v14224_v57  ;;  %v14272_v57 = vld [vmem:[%s18133_s2 + $0xa90] ss:$8 sps:$4 sm:$0xff]  }
 0xce4   :  { %8841 = vmatprep.subr.bf16.mxu1 %v14229_v20  ;;  %v14280_v20 = vld [vmem:[%s18133_s2 + $0xab4] ss:$8 sps:$4 sm:$0xff]  }
 0xce7   :  { %8842 = vmatpush1.bf16.msra.mxu1 %v14227_v32  ;;  %v14281_v32 = vld [vmem:[%s18133_s2 + $0xac0] ss:$8 sps:$4 sm:$0xff]  }
 0xce8   :  { %8843 = vmatprep.subr.bf16.mxu1 %v14232_v9  ;;  %v14289_v9 = vld [vmem:[%s18133_s2 + $0xae4] ss:$8 sps:$4 sm:$0xff]  }
 0xceb   :  { %8844 = vmatpush1.bf16.msra.mxu1 %v14230_v0 }
 0xcec   :  { %9242 = vmatprep.subr.bf16.mxu1 %v14235_v29 }
 0xcee   :  { %8858 = vmatmul.mubr.bf16.vlgmr.msra.gmra.mrb[80].mxu1 %v8484_v14  ;;  %v14302_v14 = vld [vmem:[%s18133_s2 + $0xb30] ss:$8 sps:$4 sm:$0xff]  }
 0xcef   :  { %12200 = vmatprep.mubr.msk.bf16.mxu1 %vm628_vm2, %v8500_v40  ;;  %9243 = vmatpush1.bf16.msra.mxu1 %v14233_v19  ;;  %v14299_v19 = vld [vmem:[%s18133_s2 + $0xb20] ss:$8 sps:$4 sm:$0xff]  }
 0xcf0   :  { %9244 = vmatprep.subr.bf16.mxu1 %v14238_v58  ;;  %v14304_v58 = vld [vmem:[%s18133_s2 + $0xb34] ss:$8 sps:$4 sm:$0xff]  }
 0xcf3   :  { %9245 = vmatpush1.bf16.msra.mxu1 %v14236_v61  ;;  %v14307_v61 = vld [vmem:[%s18133_s2 + $0xb44] ss:$8 sps:$4 sm:$0xff]  }
 0xcf4   :  { %9246 = vmatprep.subr.bf16.mxu1 %v14241_v3  ;;  %v14305_v3 = vld [vmem:[%s18133_s2 + $0xb40] ss:$8 sps:$4 sm:$0xff]  }
 0xcf6   :  { %8868 = vmatmul.mubr.bf16.gmra.mrb[128].mxu1 %v8483_v18  ;;  %v14296_v18 = vld [vmem:[%s18133_s2 + $0xb10] ss:$8 sps:$4 sm:$0xff]  }
 0xcf7   :  { %9247 = vmatpush1.bf16.msra.mxu1 %v14239_v27  ;;  %9274 = vmatprep.mubr.bf16.mxu1 %v16680_v56  ;;  %v14245_v56 = vld [vmem:[%s18133_s2 + $0xa00] ss:$8 sps:$4 sm:$0xff]   ;;  %v14310_v27 = vld [vmem:[%s18133_s2 + $0xb54] ss:$8 sps:$4 sm:$0xff]  }
 0xcf8   :  { %9248 = vmatprep.subr.bf16.mxu1 %v14244_v45  ;;  %v14308_v45 = vld [vmem:[%s18133_s2 + $0xb50] ss:$8 sps:$4 sm:$0xff]  }
 0xcf9   :  { %v7877_v15 = vpop.f32.mrb[112].mxu1 }
 0xcfa   :  { %v7878_v5 = vadd.f32 %v7877_v15, %v17558_v48  ;;  %v7879_v43 = vpop.f32.mrb[113].mxu1  ;;  %v14251_v48 = vld [vmem:[%s18133_s2 + $0xa20] ss:$8 sps:$4 sm:$0xff]  }
 0xcfb   :  { %v7880_v40 = vadd.f32 %v7879_v43, %v17560_v52  ;;  %v7881_v34 = vpop.f32.mrb[114].mxu1  ;;  %9249 = vmatpush1.bf16.msra.mxu1 %v14242_v42  ;;  %v14254_v52 = vld [vmem:[%s18133_s2 + $0xa30] ss:$8 sps:$4 sm:$0xff]  }
 0xcfc   :  { %v17632_v53 = vadd.f32 %v7878_v5, %v17454_v4  ;;  %v7882_v46 = vpop.f32.mrb[115].mxu1  ;;  %9250 = vmatprep.subr.bf16.mxu1 %v14247_v24  ;;  %v14253_v4 = vld [vmem:[%s18133_s2 + $0xa24] ss:$8 sps:$4 sm:$0xff]  }
 0xcfd   :  { %v17638_v47 = vadd.f32 %v7880_v40, %v17460_v23  ;;  %v14256_v23 = vld [vmem:[%s18133_s2 + $0xa34] ss:$8 sps:$4 sm:$0xff]   ;;  %v14311_v46 = vld [vmem:[%s18135_s4] sm:$0xff]  }
 0xcfe   :  { %9453 = vmatpush1.bf16.msra.mxu0 %v14311_v46  ;;  %v14329_v46 = vld [vmem:[%s18135_s4 + $0x90] sm:$0xff]  }
 0xcff   :  { %9251 = vmatpush1.bf16.msra.mxu1 %v14245_v56  ;;  %9454 = vmatprep.subr.bf16.mxu0 %v14421_v2 }
 0xd00   :  { %9252 = vmatprep.subr.bf16.mxu1 %v14250_v35  ;;  %v14316_v35 = vld [vmem:[%s18135_s4 + $0x28] sm:$0xff]  }
 0xd03   :  { %9253 = vmatpush1.bf16.msra.mxu1 %v14248_v21 }
 0xd04   :  { %9254 = vmatprep.subr.bf16.mxu1 %v14253_v4  ;;  %v14317_v4 = vld [vmem:[%s18135_s4 + $0x30] sm:$0xff]  }
 0xd07   :  { %9255 = vmatpush1.bf16.msra.mxu1 %v14251_v48 }
 0xd08   :  { %9256 = vmatprep.subr.bf16.mxu1 %v14256_v23 }
 0xd0b   :  { %9257 = vmatpush1.bf16.msra.mxu1 %v14254_v52  ;;  %v14318_v52 = vld [vmem:[%s18135_s4 + $0x38] sm:$0xff]  }
 0xd0c   :  { %9258 = vmatprep.subr.bf16.mxu1 %v14259_v28  ;;  %v14319_v28 = vld [vmem:[%s18135_s4 + $0x40] sm:$0xff]  }
 0xd0f   :  { %9259 = vmatpush1.bf16.msra.mxu1 %v14257_v38  ;;  %v14320_v38 = vld [vmem:[%s18135_s4 + $0x48] sm:$0xff]  }
 0xd10   :  { %9260 = vmatprep.subr.bf16.mxu1 %v14262_v30 }
 0xd13   :  { %9261 = vmatpush1.bf16.msra.mxu1 %v14260_v59 }
 0xd14   :  { %9262 = vmatprep.subr.bf16.mxu1 %v14265_v7 }
 0xd17   :  { %9263 = vmatpush1.bf16.msra.mxu1 %v14263_v31 }
 0xd18   :  { %9264 = vmatprep.subr.bf16.mxu1 %v14268_v49 }
 0xd1b   :  { %9265 = vmatpush1.bf16.msra.mxu1 %v14266_v36 }
 0xd1c   :  { %9266 = vmatprep.subr.bf16.mxu1 %v14271_v50 }
 0xd1f   :  { %9267 = vmatpush1.bf16.msra.mxu1 %v14269_v63 }
 0xd20   :  { %9268 = vmatprep.subr.bf16.mxu1 %v14274_v54 }
 0xd23   :  { %9269 = vmatpush1.bf16.msra.mxu1 %v14272_v57 }
 0xd24   :  { %9270 = vmatprep.subr.bf16.mxu1 %v14277_v6 }
 0xd27   :  { %9271 = vmatpush1.bf16.msra.mxu1 %v14275_v10 }
 0xd28   :  { %9272 = vmatprep.subr.bf16.mxu1 %v14280_v20 }
 0xd2b   :  { %9273 = vmatpush1.bf16.msra.mxu1 %v14278_v60 }
 0xd2c   :  { %9293 = vmatprep.subr.bf16.mxu1 %v14283_v41 }
 0xd2e   :  { %9275 = vmatmul.mubr.bf16.vlgmr.msra.gmra.mrb[80].mxu1 %v16688_v37  ;;  %v14290_v37 = vld [vmem:[%s18133_s2 + $0xaf0] ss:$8 sps:$4 sm:$0xff]  }
 0xd2f   :  { %9284 = vmatprep.mubr.bf16.mxu1 %v16674_v62  ;;  %9294 = vmatpush1.bf16.msra.mxu1 %v14281_v32  ;;  %v14292_v62 = vld [vmem:[%s18133_s2 + $0xaf4] ss:$8 sps:$4 sm:$0xff]  }
 0xd30   :  { %9295 = vmatprep.subr.bf16.mxu1 %v14286_v8 }
 0xd33   :  { %9296 = vmatpush1.bf16.msra.mxu1 %v14284_v39 }
 0xd34   :  { %9297 = vmatprep.subr.bf16.mxu1 %v14289_v9 }
 0xd36   :  { %9285 = vmatmul.mubr.bf16.gmra.mrb[132].mxu1 %v16676_v51  ;;  %v14293_v51 = vld [vmem:[%s18133_s2 + $0xb00] ss:$8 sps:$4 sm:$0xff]  }
 0xd37   :  { %9298 = vmatpush1.bf16.msra.mxu1 %v14287_v13  ;;  %12305 = vmatprep.mubr.msk.bf16.mxu1 %vm628_vm2, %v16699_v44  ;;  %v14298_v44 = vld [vmem:[%s18133_s2 + $0xb14] ss:$8 sps:$4 sm:$0xff]  }
 0xd38   :  { %9299 = vmatprep.subr.bf16.mxu1 %v14292_v62 }
 0xd39   :  { %v8294_v0 = vpop.f32.mrb[116].mxu1 }
 0xd3a   :  { %v8296_v11 = vpop.f32.mrb[117].mxu1 }
 0xd3b   :  { %v8298_v1 = vpop.f32.mrb[118].mxu1  ;;  %9300 = vmatpush1.bf16.msra.mxu1 %v14290_v37 }
 0xd3c   :  { %v8299_v29 = vpop.f32.mrb[119].mxu1  ;;  %9301 = vmatprep.subr.bf16.mxu1 %v14295_v12 }
 0xd3d   :  { %v14321_v29 = vld [vmem:[%s18135_s4 + $0x50] sm:$0xff]  }
 0xd3f   :  { %9302 = vmatpush1.bf16.msra.mxu1 %v14293_v51 }
 0xd40   :  { %9303 = vmatprep.subr.bf16.mxu1 %v14298_v44 }
 0xd43   :  { %9304 = vmatpush1.bf16.msra.mxu1 %v14296_v18 }
 0xd44   :  { %9305 = vmatprep.subr.bf16.mxu1 %v14301_v17 }
 0xd47   :  { %9306 = vmatpush1.bf16.msra.mxu1 %v14299_v19 }
 0xd48   :  { %9307 = vmatprep.subr.bf16.mxu1 %v14304_v58 }
 0xd4b   :  { %9308 = vmatpush1.bf16.msra.mxu1 %v14302_v14 }
 0xd4c   :  { %9309 = vmatprep.subr.bf16.mxu1 %v14307_v61 }
 0xd4f   :  { %9310 = vmatpush1.bf16.msra.mxu1 %v14305_v3  ;;  %v14322_v3 = vld [vmem:[%s18135_s4 + $0x58] sm:$0xff]  }
 0xd50   :  { %9311 = vmatprep.subr.bf16.mxu1 %v14310_v27 }
 0xd53   :  { %9312 = vmatpush1.bf16.msra.mxu1 %v14308_v45 }
 0xd56   :  { %9326 = vmatmul.mubr.bf16.vlgmr.msra.gmra.mrb[80].mxu1 %v16704_v25  ;;  %v14314_v25 = vld [vmem:[%s18135_s4 + $0x18] sm:$0xff]  }
 0xd57   :  { %12306 = vmatprep.mubr.msk.bf16.mxu1 %vm628_vm2, %v16690_v22  ;;  %v14312_v22 = vld [vmem:[%s18135_s4 + $0x8] sm:$0xff]  }
 0xd58   :  { %9455 = vmatpush1.bf16.msra.mxu0 %v14312_v22  ;;  %v14330_v22 = vld [vmem:[%s18135_s4 + $0x98] sm:$0xff]  }
 0xd59   :  { %9456 = vmatprep.subr.bf16.mxu0 %v14421_v2 }
 0xd5e   :  { %9336 = vmatmul.mubr.bf16.gmra.mrb[136].mxu1 %v16695_v26  ;;  %v14313_v26 = vld [vmem:[%s18135_s4 + $0x10] sm:$0xff]  }
 0xd5f   :  { %9457 = vmatpush1.bf16.msra.mxu0 %v14313_v26 }
 0xd60   :  { %9458 = vmatprep.subr.bf16.mxu0 %v14421_v2 }
 0xd61   :  { %v8345_v42 = vpop.f32.mrb[120].mxu1 }
 0xd62   :  { %v8346_v24 = vadd.f32 %v8345_v42, %v8294_v0  ;;  %v8347_v15 = vpop.f32.mrb[121].mxu1 }
 0xd63   :  { %v8348_v5 = vadd.f32 %v8347_v15, %v8296_v11  ;;  %v8349_v43 = vpop.f32.mrb[122].mxu1  ;;  %9459 = vmatpush1.bf16.msra.mxu0 %v14314_v25  ;;  %v14323_v15 = vld [vmem:[%s18135_s4 + $0x60] sm:$0xff]  }
 0xd64   :  { %v8356_v40 = vadd.f32 %v8346_v24, %v17632_v53  ;;  %v8350_v34 = vpop.f32.mrb[123].mxu1  ;;  %v14315_v53 = vld [vmem:[%s18135_s4 + $0x20] sm:$0xff]   ;;  %9460 = vmatprep.subr.bf16.mxu0 %v14421_v2 }
 0xd65   :  { %v8357_v56 = vadd.f32 %v8348_v5, %v17638_v47  ;;  %v14327_v34 = vld [vmem:[%s18135_s4 + $0x80] sm:$0xff]  }
 0xd67   :  { %9461 = vmatpush1.bf16.msra.mxu0 %v14315_v53 }
 0xd68   :  { %9462 = vmatprep.subr.bf16.mxu0 %v14421_v2 }
 0xd6b   :  { %9463 = vmatpush1.bf16.msra.mxu0 %v14316_v35 }
 0xd6c   :  { %9464 = vmatprep.subr.bf16.mxu0 %v14421_v2 }
 0xd6f   :  { %9465 = vmatpush1.bf16.msra.mxu0 %v14317_v4 }
 0xd70   :  { %9466 = vmatprep.subr.bf16.mxu0 %v14421_v2 }
 0xd73   :  { %9467 = vmatpush1.bf16.msra.mxu0 %v14318_v52 }
 0xd74   :  { %9468 = vmatprep.subr.bf16.mxu0 %v14421_v2 }
 0xd77   :  { %9469 = vmatpush1.bf16.msra.mxu0 %v14319_v28 }
 0xd78   :  { %9470 = vmatprep.subr.bf16.mxu0 %v14421_v2 }
 0xd7b   :  { %9471 = vmatpush1.bf16.msra.mxu0 %v14320_v38 }
 0xd7c   :  { %9580 = vmatprep.subr.bf16.mxu0 %v14421_v2 }
 0xda1   :  { %v8818_v47 = vpop.f32.mrb[124].mxu1 }
 0xda2   :  { %v8820_v21 = vpop.f32.mrb[125].mxu1 }
 0xda3   :  { %v8822_v48 = vpop.f32.mrb[126].mxu1 }
 0xda4   :  { %v8823_v23 = vpop.f32.mrb[127].mxu1 }
 0xdc9   :  { %v8869_v30 = vpop.f32.mrb[128].mxu1 }
 0xdca   :  { %v8870_v59 = vadd.f32 %v8869_v30, %v8818_v47  ;;  %v8871_v7 = vpop.f32.mrb[129].mxu1 }
 0xdcb   :  { %v8872_v31 = vadd.f32 %v8871_v7, %v8820_v21  ;;  %v8873_v49 = vpop.f32.mrb[130].mxu1 }
 0xdcc   :  { %v8880_v36 = vadd.f32 %v8870_v59, %v8356_v40  ;;  %v8874_v50 = vpop.f32.mrb[131].mxu1  ;;  %v14326_v40 = vld [vmem:[%s18135_s4 + $0x78] sm:$0xff]  }
 0xdcd   :  { %v8881_v63 = vadd.f32 %v8872_v31, %v8357_v56  ;;  %v14328_v56 = vld [vmem:[%s18135_s4 + $0x88] sm:$0xff]  }
 0xe09   :  { %v9286_v54 = vpop.f32.mrb[132].mxu1 }
 0xe0a   :  { %v9288_v57 = vpop.f32.mrb[133].mxu1 }
 0xe0b   :  { %v9290_v6 = vpop.f32.mrb[134].mxu1 }
 0xe0c   :  { %v9291_v10 = vpop.f32.mrb[135].mxu1  ;;  %v14332_v6 = vld [vmem:[%s18135_s4 + $0x108] sm:$0x1f]  }
 0xe0d   :  { %v14333_v10 = vld [vmem:[%s18134_s3 + $0x28] sm:$0xff]  }
 0xe29   :  { %v9327_v20 = vpop.f32.mrb[80].mxu1 }
 0xe2a   :  { %v9350_v60 = vadd.f32 %v9327_v20, %v16034_v55  ;;  %v9329_v41 = vpop.f32.mrb[81].mxu1  ;;  %v14334_v20 = vld [vmem:[%s18134_s3 + $0x30] sm:$0xff]  }
 0xe2b   :  { %v9351_v32 = vadd.f32 %v9329_v41, %v16038_v33  ;;  %v9331_v8 = vpop.f32.mrb[82].mxu1  ;;  %v14336_v41 = vld [vmem:[%s18134_s3 + $0x40] sm:$0xff]  }
 0xe2c   :  { %v9352_v39 = vadd.f32 %v9331_v8, %v16034_v55  ;;  %v9333_v9 = vpop.f32.mrb[83].mxu1  ;;  %v9356_v62 = vmax.f32 %v9350_v60, 0.0  ;;  %v14335_v60 = vld [vmem:[%s18134_s3 + $0x38] sm:$0xff]  }
 0xe2d   :  { %v9353_v13 = vadd.f32 %v9333_v9, %v16038_v33  ;;  %v9357_v12 = vmax.f32 %v9351_v32, 0.0  ;;  %v14337_v32 = vld [vmem:[%s18134_s3 + $0x48] sm:$0xff]  }
 0xe2e   :  { %v9358_v37 = vmax.f32 %v9352_v39, 0.0 }
 0xe2f   :  { %v9359_v0 = vmax.f32 %v9353_v13, 0.0 }
 0xe30   :  { %v9362_v11 = vpack.c.bf16 %v9358_v37, %v9356_v62 }
 0xe31   :  { %v9363_v1 = vpack.c.bf16 %v9359_v0, %v9357_v12  ;;  %v9337_v51 = vpop.f32.mrb[136].mxu1 }
 0xe32   :  { %v9338_v44 = vadd.f32 %v9337_v51, %v9286_v54  ;;  %v9339_v18 = vpop.f32.mrb[137].mxu1 }
 0xe33   :  { %v9340_v17 = vadd.f32 %v9339_v18, %v9288_v57  ;;  %v9341_v19 = vpop.f32.mrb[138].mxu1  ;;  %12317 = vmatprep.mubr.msk.bf16.mxu0 %vm628_vm2, %v9363_v1  ;;  %v14331_v57 = vld [vmem:[%s18135_s4 + $0x100] sm:$0x1f]   ;;  %v14339_v18 = vld [vmem:[%s18134_s3 + $0x8] sm:$0xff]  }
 0xe34   :  { %v9348_v58 = vadd.f32 %v9338_v44, %v8880_v36  ;;  %v9342_v14 = vpop.f32.mrb[139].mxu1  ;;  %9485 = vmatmul.mubr.bf16.vlgmr.msra.gmra.mrb[80].mxu0 %v9362_v11  ;;  %v14341_v19 = vld [vmem:[%s18134_s3 + $0x18] sm:$0xff]  }
 0xe35   :  { %v9349_v61 = vadd.f32 %v9340_v17, %v8881_v63  ;;  %9581 = vmatpush1.bf16.msra.mxu0 %v14321_v29  ;;  %v14338_v29 = vld [vmem:[%s18134_s3] sm:$0xff]   ;;  %v14340_v17 = vld [vmem:[%s18134_s3 + $0x10] sm:$0xff]  }
 0xe36   :  { %v9354_v27 = vadd.f32 %v9348_v58, %v16034_v55  ;;  %9582 = vmatprep.subr.bf16.mxu0 %v14421_v2  ;;  %v14324_v55 = vld [vmem:[%s18135_s4 + $0x68] sm:$0xff]   ;;  %v14342_v58 = vld [vmem:[%s18134_s3 + $0x20] sm:$0xff]  }
 0xe37   :  { %v9355_v45 = vadd.f32 %v9349_v61, %v16038_v33  ;;  %v14325_v33 = vld [vmem:[%s18135_s4 + $0x70] sm:$0xff]  }
 0xe38   :  { %v9360_v42 = vmax.f32 %v9354_v27, 0.0  ;;  %v14343_v61 = vld [vmem:[%s18134_s3 + $0x50] sm:$0xff]   ;;  %v14344_v27 = vld [vmem:[%s18134_s3 + $0x58] sm:$0xff]  }
 0xe39   :  { %v9361_v24 = vmax.f32 %v9355_v45, 0.0  ;;  %9583 = vmatpush1.bf16.msra.mxu0 %v14322_v3  ;;  %v14345_v45 = vld [vmem:[%s18134_s3 + $0x60] sm:$0xff]  }
 0xe3a   :  { %9584 = vmatprep.subr.bf16.mxu0 %v14421_v2  ;;  %v9364_v43 = vpack.c.bf16 %v9360_v42, %v9360_v42  ;;  %v14346_v42 = vld [vmem:[%s18134_s3 + $0x68] sm:$0xff]  }
 0xe3b   :  { %v9365_v5 = vpack.c.bf16 %v9361_v24, %v9361_v24  ;;  %v14347_v24 = vld [vmem:[%s18134_s3 + $0x70] sm:$0xff]  }
 0xe3d   :  { %9585 = vmatpush1.bf16.msra.mxu0 %v14323_v15  ;;  %12318 = vmatprep.mubr.msk.bf16.mxu0 %vm628_vm2, %v9365_v5 }
 0xe3e   :  { %9493 = vmatmul.mubr.bf16.gmra.mrb[84].mxu0 %v9364_v43  ;;  %9586 = vmatprep.subr.bf16.mxu0 %v14421_v2 }
 0xe3f   :  { %12329 = vmatprep.mubr.msk.bf16.mxu0 %vm628_vm2, %v9363_v1 }
 0xe41   :  { %9587 = vmatpush1.bf16.msra.mxu0 %v14324_v55  ;;  %v14349_v55 = vld [vmem:[%s18134_s3 + $0x80] sm:$0xff]  }
 0xe42   :  { %9588 = vmatprep.subr.bf16.mxu0 %v14421_v2 }
 0xe45   :  { %9589 = vmatpush1.bf16.msra.mxu0 %v14325_v33  ;;  %v14350_v33 = vld [vmem:[%s18134_s3 + $0x88] sm:$0xff]  }
 0xe46   :  { %9590 = vmatprep.subr.bf16.mxu0 %v14421_v2 }
 0xe49   :  { %9591 = vmatpush1.bf16.msra.mxu0 %v14326_v40  ;;  %v14351_v40 = vld [vmem:[%s18134_s3 + $0x90] sm:$0xff]  }
 0xe4a   :  { %9592 = vmatprep.subr.bf16.mxu0 %v14421_v2 }
 0xe4d   :  { %9593 = vmatpush1.bf16.msra.mxu0 %v14327_v34  ;;  %v14352_v34 = vld [vmem:[%s18134_s3 + $0x98] sm:$0xff]  }
 0xe4e   :  { %9594 = vmatprep.subr.bf16.mxu0 %v14421_v2 }
 0xe51   :  { %9595 = vmatpush1.bf16.msra.mxu0 %v14328_v56 }
 0xe52   :  { %9596 = vmatprep.subr.bf16.mxu0 %v14421_v2 }
 0xe55   :  { %9597 = vmatpush1.bf16.msra.mxu0 %v14329_v46  ;;  %v14353_v46 = vld [vmem:[%s18134_s3 + $0xa0] sm:$0xff]  }
 0xe56   :  { %9598 = vmatprep.subr.bf16.mxu0 %v14421_v2 }
 0xe59   :  { %9599 = vmatpush1.bf16.msra.mxu0 %v14330_v22 }
 0xe5a   :  { %12725 = vmatprep.subr.bf16.mxu0 %v14422_v16 }
 0xe5c   :  { %9613 = vmatmul.mubr.bf16.vlgmr.msra.gmra.mrb[88].mxu0 %v9362_v11 }
 0xe5d   :  { %12330 = vmatprep.mubr.msk.bf16.mxu0 %vm628_vm2, %v9365_v5  ;;  %v14348_v5 = vld [vmem:[%s18134_s3 + $0x78] sm:$0xff]   ;;  %vm18142_vm2 = vmmov %vm18141_vm0 }
 0xe64   :  { %9621 = vmatmul.mubr.bf16.gmra.mrb[92].mxu0 %v9364_v43 }
 0xe65   :  { %12729 = vmatprep.mubr.msk.bf16.mxu0 %vm14423_vm9, %v14422_v16 }
 0xf07   :  { %v9486_v26 = vpop.f32.mrb[80].mxu0 }
 0xf08   :  { %v9488_v25 = vpop.f32.mrb[81].mxu0 }
 0xf09   :  { %v9489_v53 = vpop.f32.mrb[82].mxu0  ;;  %v14355_v25 = vld [vmem:[%s18134_s3 + $0xb0] sm:$0xff]  }
 0xf0a   :  { %v9491_v35 = vpop.f32.mrb[83].mxu0 }
 0xf0b   :  { %v14357_v35 = vld [vmem:[%s18134_s3 + $0xc0] sm:$0xff]  }
 0xf11   :  { %v9494_v47 = vpop.f32.mrb[84].mxu0 }
 0xf12   :  { %v9496_v21 = vpop.f32.mrb[85].mxu0 }
 0xf13   :  { %v9497_v4 = vpop.f32.mrb[86].mxu0 }
 0xf14   :  { %v9498_v48 = vpop.f32.mrb[87].mxu0  ;;  %v14358_v4 = vld [vmem:[%s18135_s4 + $0xa0] sm:$0xff]  }
 0xf15   :  { %v14359_v48 = vld [vmem:[%s18135_s4 + $0xa8] sm:$0xff]  }
 0xf2f   :  { %v9614_v23 = vpop.f32.mrb[88].mxu0 }
 0xf30   :  { %v9628_v2 = vmax.f32 %v9486_v26, %v9614_v23  ;;  %v9616_v52 = vpop.f32.mrb[89].mxu0  ;;  %v14354_v26 = vld [vmem:[%s18134_s3 + $0xa8] sm:$0xff]   ;;  %v14360_v23 = vld [vmem:[%s18135_s4 + $0xb0] sm:$0xff]  }
 0xf31   :  { %v9617_v28 = vpop.f32.mrb[90].mxu0  ;;  %v14362_v52 = vld [vmem:[%s18135_s4 + $0xc0] sm:$0xff]  }
 0xf32   :  { %v9629_v38 = vmax.f32 %v9489_v53, %v9617_v28  ;;  %v9619_v30 = vpop.f32.mrb[91].mxu0  ;;  %v14356_v53 = vld [vmem:[%s18134_s3 + $0xb8] sm:$0xff]   ;;  %v14363_v28 = vld [vmem:[%s18135_s4 + $0xc8] sm:$0xff]  }
 0xf34   :  { %v9631_v59 = vpack.c.bf16 %v9629_v38, %v9628_v2  ;;  %v14361_v2 = vld [vmem:[%s18135_s4 + $0xb8] sm:$0xff]  }
 0xf36   :  { %12726 = vmatpush3.bf16.msra.mxu0 %v9631_v59 }
 0xf37   :  { %v9622_v7 = vpop.f32.mrb[92].mxu0  ;;  %12727 = vmatprep.subr.bf16.mxu0 %v14422_v16 }
 0xf38   :  { %v9630_v31 = vmax.f32 %v9494_v47, %v9622_v7  ;;  %v9624_v49 = vpop.f32.mrb[93].mxu0 }
 0xf39   :  { %v9625_v36 = vpop.f32.mrb[94].mxu0 }
 0xf3a   :  { %v9632_v50 = vpack.c.bf16 %v9630_v31, %v9630_v31  ;;  %v9626_v63 = vpop.f32.mrb[95].mxu0 }
 0xf3c   :  { %v9644_v54 = vsel %vm4346_vm10, %v9632_v50, 0 }
 0xf3d   :  { %12728 = vmatpush3.bf16.msra.mxu0 %v9644_v54 }
 0xf3e   :  { %12733 = vmatprep.subr.bf16.mxu0 %v14422_v16 }
 0xf40   :  { %12730 = vmatmul.mubr.msk.bf16.vlgmr.msra.gmra.mrb[96].mxu0 %vm4342_vm11, %v14331_v57 }
 0xf41   :  { %12734 = vmatpush3.bf16.msra.mxu0 %v9631_v59  ;;  %12737 = vmatprep.mubr.msk.bf16.mxu0 %vm14423_vm9, %v14422_v16 }
 0xf42   :  { %12735 = vmatprep.subr.bf16.mxu0 %v14422_v16 }
 0xf45   :  { %12736 = vmatpush3.bf16.msra.mxu0 %v9644_v54 }
 0xf46   :  { %12741 = vmatprep.subr.bf16.mxu0 %v14422_v16 }
 0xf48   :  { %12738 = vmatmul.mubr.msk.bf16.vlgmr.msra.gmra.mrb[100].mxu0 %vm4342_vm11, %v14332_v6 }
 0xf49   :  { %12751 = vmatprep.mubr.msk.bf16.mxu0 %vm14423_vm9, %v14422_v16  ;;  %12742 = vmatpush3.bf16.msra.mxu0 %v14333_v10 }
 0xf4a   :  { %12743 = vmatprep.subr.bf16.mxu0 %v14422_v16 }
 0xf4d   :  { %12744 = vmatpush3.bf16.msra.mxu0 %v14334_v20 }
 0xf4e   :  { %12745 = vmatprep.subr.bf16.mxu0 %v14422_v16 }
 0xf51   :  { %12746 = vmatpush3.bf16.msra.mxu0 %v14335_v60 }
 0xf52   :  { %12747 = vmatprep.subr.bf16.mxu0 %v14422_v16 }
 0xf55   :  { %12748 = vmatpush3.bf16.msra.mxu0 %v14336_v41 }
 0xf56   :  { %12749 = vmatprep.subr.bf16.mxu0 %v14422_v16 }
 0xf59   :  { %12750 = vmatpush3.bf16.msra.mxu0 %v14337_v32 }
 0xf5a   :  { %12755 = vmatprep.subr.bf16.mxu0 %v14422_v16 }
0x1013   :  { %v9680_v8 = vpop.f32.mrb[96].mxu0 }
0x1014   :  { %v12731_v39 = vpop.f32.mrb[97].mxu0 }
0x1015   :  { %v9683_v9 = vpop.f32.mrb[98].mxu0 }
0x1016   :  { %v12732_v13 = vpop.f32.mrb[99].mxu0 }
0x101b   :  { %v9731_v62 = vpop.f32.mrb[100].mxu0 }
0x101c   :  { %v9738_v37 = vmax.f32 %v9680_v8, %v9731_v62  ;;  %v12739_v12 = vpop.f32.mrb[101].mxu0 }
0x101d   :  { %v9734_v0 = vpop.f32.mrb[102].mxu0  ;;  %v14395_v12 = vld [vmem:[%s18136_s5 + $0x2] ss:$0 sm:$0xff] }
0x101e   :  { %9740 = vst.msk [vmem:[#allocation3] sm:$0xff] %vm4444_vm12, %v9738_v37  ;;  %v9739_v11 = vmax.f32 %v9683_v9, %v9734_v0  ;;  %v12740_v1 = vpop.f32.mrb[103].mxu0 }
0x101f   :  { %v14364_v1 = vld [vmem:[%s18135_s4 + $0xd0] sm:$0xff]  }
0x1020   :  { %9741 = vst.msk [vmem:[#allocation3 + $0x8] sm:$0x3] %vm4446_vm13, %v9739_v11 }
0x1025   :  { %v9754_v51 = vld [vmem:[#allocation3 + $0x1] sm:$0x3f] }
0x1026   :  { %v9755_v44 = vpack.c.bf16 %v9754_v51, %v9754_v51  ;;  %v9742_v14 = vld [vmem:[#allocation3] sm:$0x3f] }
0x1027   :  { %v9743_v3 = vpack.c.bf16 %v9742_v14, %v9742_v14  ;;  %v9912_v15 = vld [vmem:[#allocation3 + $0x2] sm:$0x3f] }
0x1028   :  { %12752 = vmatmul.mubr.msk.bf16.vlgmr.msra.gmra.mrb[104].mxu0 %vm4444_vm12, %v9755_v44  ;;  %v9913_v43 = vpack.c.bf16 %v9912_v15, %v9912_v15  ;;  %v9998_v56 = vld [vmem:[#allocation3 + $0x3] sm:$0x3f]  ;;  %v14366_v44 = vld [vmem:[%s18135_s4 + $0xe0] sm:$0xff]  }
0x1029   :  { %12756 = vmatpush3.bf16.msra.mxu0 %v14338_v29  ;;  %12765 = vmatprep.mubr.msk.bf16.mxu0 %vm14423_vm9, %v14422_v16  ;;  %v9999_v22 = vpack.c.bf16 %v9998_v56, %v9998_v56  ;;  %v10084_v47 = vld [vmem:[#allocation3 + $0x4] sm:$0x3f]  ;;  %v14365_v29 = vld [vmem:[%s18135_s4 + $0xd8] sm:$0xff]  }
0x102a   :  { %12757 = vmatprep.subr.bf16.mxu0 %v14422_v16  ;;  %v10085_v21 = vpack.c.bf16 %v10084_v47, %v10084_v47  ;;  %v14372_v56 = vld [vmem:[%s18135_s4 + $0x130] sm:$0xff]  }
0x102d   :  { %12758 = vmatpush3.bf16.msra.mxu0 %v14339_v18  ;;  %v14367_v18 = vld [vmem:[%s18135_s4 + $0xe8] sm:$0xff]  }
0x102e   :  { %12759 = vmatprep.subr.bf16.mxu0 %v14422_v16 }
0x1031   :  { %12760 = vmatpush3.bf16.msra.mxu0 %v14340_v17  ;;  %v14368_v17 = vld [vmem:[%s18135_s4 + $0xf0] sm:$0xff]  }
0x1032   :  { %12761 = vmatprep.subr.bf16.mxu0 %v14422_v16 }
0x1035   :  { %12762 = vmatpush3.bf16.msra.mxu0 %v14341_v19  ;;  %v14369_v19 = vld [vmem:[%s18135_s4 + $0xf8] sm:$0xff]  }
0x1036   :  { %12763 = vmatprep.subr.bf16.mxu0 %v14422_v16 }
0x1039   :  { %12764 = vmatpush3.bf16.msra.mxu0 %v14342_v58 }
0x103a   :  { %12769 = vmatprep.subr.bf16.mxu0 %v14422_v16 }
0x103c   :  { %12766 = vmatmul.mubr.msk.bf16.vlgmr.msra.gmra.mrb[108].mxu0 %vm4444_vm12, %v9743_v3 }
0x103d   :  { %12770 = vmatpush3.bf16.msra.mxu0 %v14343_v61  ;;  %12779 = vmatprep.mubr.msk.bf16.mxu0 %vm14423_vm9, %v14422_v16 }
0x103e   :  { %12771 = vmatprep.subr.bf16.mxu0 %v14422_v16 }
0x1041   :  { %12772 = vmatpush3.bf16.msra.mxu0 %v14344_v27 }
0x1042   :  { %12773 = vmatprep.subr.bf16.mxu0 %v14422_v16 }
0x1045   :  { %12774 = vmatpush3.bf16.msra.mxu0 %v14345_v45 }
0x1046   :  { %12775 = vmatprep.subr.bf16.mxu0 %v14422_v16 }
0x1049   :  { %12776 = vmatpush3.bf16.msra.mxu0 %v14346_v42 }
0x104a   :  { %12777 = vmatprep.subr.bf16.mxu0 %v14422_v16 }
0x104d   :  { %12778 = vmatpush3.bf16.msra.mxu0 %v14347_v24 }
0x104e   :  { %12783 = vmatprep.subr.bf16.mxu0 %v14422_v16 }
0x1050   :  { %12780 = vmatmul.mubr.msk.bf16.vlgmr.msra.gmra.mrb[112].mxu0 %vm4444_vm12, %v9913_v43 }
0x1051   :  { %12784 = vmatpush3.bf16.msra.mxu0 %v14348_v5  ;;  %12793 = vmatprep.mubr.msk.bf16.mxu0 %vm14423_vm9, %v14422_v16 }
0x1052   :  { %12785 = vmatprep.subr.bf16.mxu0 %v14422_v16 }
0x1055   :  { %12786 = vmatpush3.bf16.msra.mxu0 %v14349_v55  ;;  %v10353_v55 = vld [vmem:[%s18135_s4 + $0x110] sm:$0x3] }
0x1056   :  { %12787 = vmatprep.subr.bf16.mxu0 %v14422_v16 }
0x1059   :  { %12788 = vmatpush3.bf16.msra.mxu0 %v14350_v33  ;;  %v10400_v33 = vld [vmem:[%s18135_s4 + $0x118] sm:$0x3] }
0x105a   :  { %12789 = vmatprep.subr.bf16.mxu0 %v14422_v16 }
0x105d   :  { %12790 = vmatpush3.bf16.msra.mxu0 %v14351_v40  ;;  %v14370_v40 = vld [vmem:[%s18135_s4 + $0x120] sm:$0xff]  }
0x105e   :  { %12791 = vmatprep.subr.bf16.mxu0 %v14422_v16 }
0x1061   :  { %12792 = vmatpush3.bf16.msra.mxu0 %v14352_v34  ;;  %v14371_v34 = vld [vmem:[%s18135_s4 + $0x128] sm:$0xff]  }
0x1062   :  { %12797 = vmatprep.subr.bf16.mxu0 %v14422_v16 }
0x1064   :  { %12794 = vmatmul.mubr.msk.bf16.vlgmr.msra.gmra.mrb[116].mxu0 %vm4444_vm12, %v9999_v22 }
0x1065   :  { %12798 = vmatpush3.bf16.msra.mxu0 %v14353_v46  ;;  %12807 = vmatprep.mubr.msk.bf16.mxu0 %vm14423_vm9, %v14422_v16 }
0x1066   :  { %12799 = vmatprep.subr.bf16.mxu0 %v14422_v16 }
0x1069   :  { %12800 = vmatpush3.bf16.msra.mxu0 %v14354_v26 }
0x106a   :  { %12801 = vmatprep.subr.bf16.mxu0 %v14422_v16 }
0x106d   :  { %12802 = vmatpush3.bf16.msra.mxu0 %v14355_v25 }
0x106e   :  { %12803 = vmatprep.subr.bf16.mxu0 %v14422_v16 }
0x1071   :  { %12804 = vmatpush3.bf16.msra.mxu0 %v14356_v53 }
0x1072   :  { %12805 = vmatprep.subr.bf16.mxu0 %v14422_v16 }
0x1075   :  { %12806 = vmatpush3.bf16.msra.mxu0 %v14357_v35 }
0x1076   :  { %12811 = vmatprep.subr.bf16.mxu0 %v14422_v16 }
0x1078   :  { %12808 = vmatmul.mubr.msk.bf16.vlgmr.msra.gmra.mrb[120].mxu0 %vm4444_vm12, %v10085_v21 }
0x1079   :  { %12823 = vmatprep.mubr.msk.bf16.mxu0 %vm14423_vm9, %v14422_v16  ;;  %12812 = vmatpush3.bf16.msra.mxu0 %v14358_v4 }
0x107a   :  { %12813 = vmatprep.subr.bf16.mxu0 %v14422_v16 }
0x107d   :  { %12814 = vmatpush3.bf16.msra.mxu0 %v14359_v48 }
0x107e   :  { %12815 = vmatprep.subr.bf16.mxu0 %v14422_v16 }
0x1081   :  { %12816 = vmatpush3.bf16.msra.mxu0 %v14360_v23  ;;  %v14373_v23 = vld [vmem:[%s18135_s4 + $0x138] sm:$0xff]  }
0x1082   :  { %12817 = vmatprep.subr.bf16.mxu0 %v14422_v16 }
0x1085   :  { %12818 = vmatpush3.bf16.msra.mxu0 %v14361_v2 }
0x1086   :  { %12819 = vmatprep.subr.bf16.mxu0 %v14422_v16 }
0x1089   :  { %12820 = vmatpush3.bf16.msra.mxu0 %v14362_v52  ;;  %v14374_v52 = vld [vmem:[%s18135_s4 + $0x140] sm:$0xff]  }
0x108a   :  { %12821 = vmatprep.subr.bf16.mxu0 %v14422_v16 }
0x108d   :  { %12822 = vmatpush3.bf16.msra.mxu0 %v14363_v28  ;;  %v14375_v28 = vld [vmem:[%s18135_s4 + $0x148] sm:$0xff]  }
0x108e   :  { %12827 = vmatprep.subr.bf16.mxu0 %v14422_v16 }
0x10fb   :  { %v9833_v38 = vpop.f32.mrb[104].mxu0 }
0x10fc   :  { %v12753_v30 = vpop.f32.mrb[105].mxu0 }
0x10fd   :  { %v9836_v59 = vpop.f32.mrb[106].mxu0  ;;  %v14376_v30 = vld [vmem:[%s18135_s4 + $0x150] sm:$0xff]  }
0x10fe   :  { %v12754_v7 = vpop.f32.mrb[107].mxu0 }
0x10ff   :  { %v14377_v7 = vld [vmem:[%s18135_s4 + $0x158] sm:$0xff]  }
0x110f   :  { %v9906_v31 = vpop.f32.mrb[108].mxu0 }
0x1110   :  { %v9907_v49 = vadd.f32 %v9906_v31, %v9833_v38  ;;  %v12767_v36 = vpop.f32.mrb[109].mxu0  ;;  %v14378_v31 = vld [vmem:[%s18135_s4 + $0x160] sm:$0xff]   ;;  %s14397_s4 = scalar_lea.vmem %s10664_s12, 32 }
0x1111   :  { %v9909_v50 = vpop.f32.mrb[110].mxu0  ;;  %p14398_p0 = scmp.ne.s32.totalorder %s10664_s12, %s14397_s4  ;;  %p14403_p2 = scmp.lt.s32.totalorder %s14397_s4, %s14397_s4 }
0x1112   :  { %v12768_v63 = vpop.f32.mrb[111].mxu0 }
0x1113   :  { %v14396_v63 = vld [vmem:[%s18136_s5 + $0x3] sm:$0x1]  ;;  %p14404_p3 = por %p14403_p2, %p14402_p1 }
0x1115   :  { %p14405_p4 = pnand %p14404_p3, %p14398_p0 }
0x1123   :  { %v9991_v54 = vpop.f32.mrb[112].mxu0 }
0x1124   :  { %v9997_v57 = vadd.f32 %v9991_v54, %v9907_v49  ;;  %v12781_v6 = vpop.f32.mrb[113].mxu0 }
0x1125   :  { %v9994_v10 = vpop.f32.mrb[114].mxu0 }
0x1126   :  { %v12782_v20 = vpop.f32.mrb[115].mxu0 }
0x1137   :  { %v10077_v60 = vpop.f32.mrb[116].mxu0 }
0x1138   :  { %v10083_v41 = vadd.f32 %v10077_v60, %v9997_v57  ;;  %v12795_v32 = vpop.f32.mrb[117].mxu0 }
0x1139   :  { %v10080_v8 = vpop.f32.mrb[118].mxu0 }
0x113a   :  { %v12796_v39 = vpop.f32.mrb[119].mxu0 }
0x114b   :  { %v10163_v9 = vpop.f32.mrb[120].mxu0 }
0x114c   :  { %v10169_v13 = vadd.f32 %v10163_v9, %v10083_v41  ;;  %v12809_v62 = vpop.f32.mrb[121].mxu0 }
0x114d   :  { %v10166_v37 = vpop.f32.mrb[122].mxu0 }
0x114e   :  { %v10170_v0 = vadd.f32 %v14395_v12, %v10169_v13  ;;  %v12810_v11 = vpop.f32.mrb[123].mxu0 }
0x1150   :  { %v10171_v51 = vpack.c.bf16 %v10170_v0, %v10170_v0 }
0x1152   :  { %12824 = vmatmul.mubr.msk.bf16.vlgmr.msra.gmra.mrb[124].mxu0 %vm18141_vm0, %v10171_v51 }
0x1153   :  { %12828 = vmatpush3.bf16.msra.mxu0 %v14364_v1  ;;  %12839 = vmatprep.mubr.msk.bf16.mxu0 %vm14423_vm9, %v14422_v16 }
0x1154   :  { %12829 = vmatprep.subr.bf16.mxu0 %v14422_v16 }
0x1157   :  { %12830 = vmatpush3.bf16.msra.mxu0 %v14365_v29 }
0x1158   :  { %12831 = vmatprep.subr.bf16.mxu0 %v14422_v16 }
0x115b   :  { %12832 = vmatpush3.bf16.msra.mxu0 %v14366_v44 }
0x115c   :  { %12833 = vmatprep.subr.bf16.mxu0 %v14422_v16 }
0x115f   :  { %12834 = vmatpush3.bf16.msra.mxu0 %v14367_v18 }
0x1160   :  { %12835 = vmatprep.subr.bf16.mxu0 %v14422_v16 }
0x1163   :  { %12836 = vmatpush3.bf16.msra.mxu0 %v14368_v17 }
0x1164   :  { %12837 = vmatprep.subr.bf16.mxu0 %v14422_v16 }
0x1167   :  { %12838 = vmatpush3.bf16.msra.mxu0 %v14369_v19 }
0x1168   :  { %12843 = vmatprep.subr.bf16.mxu0 %v14422_v16 }
0x116a   :  { %12840 = vmatmul.mubr.msk.bf16.vlgmr.msra.gmra.mrb[128].mxu0 %vm18142_vm2, %v10171_v51 }
0x116b   :  { %12845 = vmatprep.mubr.msk.bf16.mxu0 %vm14423_vm9, %v14422_v16 }
0x1225   :  { %v10257_v58 = vpop.f32.mrb[124].mxu0 }
0x1226   :  { %v12825_v14 = vpop.f32.mrb[125].mxu0 }
0x1227   :  { %v10260_v61 = vpop.f32.mrb[126].mxu0 }
0x1228   :  { %v12826_v3 = vpop.f32.mrb[127].mxu0 }
0x123d   :  { %v10345_v27 = vpop.f32.mrb[128].mxu0 }
0x123e   :  { %v10351_v45 = vmax.f32 %v10257_v58, %v10345_v27  ;;  %v12841_v42 = vpop.f32.mrb[129].mxu0 }
0x123f   :  { %v10348_v24 = vpop.f32.mrb[130].mxu0 }
0x1240   :  { %v10352_v15 = vpack.c.bf16 %v10351_v45, %v10351_v45  ;;  %v12842_v5 = vpop.f32.mrb[131].mxu0 }
0x1242   :  { %v10358_v43 = vsel %vm18143_vm3, %v10352_v15, 0 }
0x1243   :  { %12844 = vmatpush3.bf16.msra.mxu0 %v10358_v43 }
0x1244   :  { %12849 = vmatprep.subr.bf16.mxu0 %v14422_v16 }
0x1246   :  { %12846 = vmatmul.mubr.msk.bf16.vlgmr.msra.gmra.mrb[132].mxu0 %vm18144_vm4, %v10353_v55 }
0x1247   :  { %12850 = vmatpush3.bf16.msra.mxu0 %v10358_v43  ;;  %12851 = vmatprep.mubr.msk.bf16.mxu0 %vm14423_vm9, %v14422_v16 }
0x1248   :  { %12855 = vmatprep.subr.bf16.mxu0 %v14422_v16 }
0x124e   :  { %12852 = vmatmul.mubr.msk.bf16.vlgmr.msra.gmra.mrb[136].mxu0 %vm18145_vm5, %v10400_v33 }
0x124f   :  { %12861 = vmatprep.mubr.msk.bf16.mxu0 %vm14423_vm9, %v14422_v16  ;;  %12856 = vmatpush3.bf16.msra.mxu0 %v14370_v40 }
0x1250   :  { %12857 = vmatprep.subr.bf16.mxu0 %v14422_v16 }
0x1253   :  { %12858 = vmatpush3.bf16.msra.mxu0 %v14371_v34 }
0x1254   :  { %12859 = vmatprep.subr.bf16.mxu0 %v14422_v16 }
0x1257   :  { %12860 = vmatpush3.bf16.msra.mxu0 %v14372_v56 }
0x1258   :  { %12865 = vmatprep.subr.bf16.mxu0 %v14422_v16 }
0x1319   :  { %v10394_v46 = vpop.f32.mrb[132].mxu0 }
0x131a   :  { %v12847_v22 = vpop.f32.mrb[133].mxu0 }
0x131b   :  { %v10397_v26 = vpop.f32.mrb[134].mxu0 }
0x131c   :  { %v12848_v25 = vpop.f32.mrb[135].mxu0 }
0x1321   :  { %v10438_v53 = vpop.f32.mrb[136].mxu0 }
0x1322   :  { %v10444_v35 = vmax.f32 %v10394_v46, %v10438_v53  ;;  %v12853_v47 = vpop.f32.mrb[137].mxu0 }
0x1323   :  { %v10441_v21 = vpop.f32.mrb[138].mxu0 }
0x1324   :  { %10445 = vst.msk [vmem:[#allocation4] sm:$0x7] %vm5162_vm14, %v10444_v35  ;;  %v12854_v4 = vpop.f32.mrb[139].mxu0 }
0x132b   :  { %v10446_v48 = vld [vmem:[#allocation4] sm:$0x1]  ;;  %v10516_v38 = vld [vmem:[#allocation4 + $0x1] sm:$0x1]  ;;  %v10586_v49 = vld [vmem:[#allocation4 + $0x2] sm:$0x1] }
0x132c   :  { %v10447_v2 = vpack.c.bf16 %v10446_v48, %v10446_v48  ;;  %v10517_v59 = vpack.c.bf16 %v10516_v38, %v10516_v38  ;;  %v10587_v36 = vpack.c.bf16 %v10586_v49, %v10586_v49 }
0x132e   :  { %12862 = vmatmul.mubr.msk.bf16.vlgmr.msra.gmra.mrb[140].mxu0 %vm5190_vm15, %v10447_v2 }
0x132f   :  { %12866 = vmatpush3.bf16.msra.mxu0 %v14373_v23  ;;  %12871 = vmatprep.mubr.msk.bf16.mxu0 %vm14423_vm9, %v14422_v16 }
0x1330   :  { %12867 = vmatprep.subr.bf16.mxu0 %v14422_v16 }
0x1333   :  { %12868 = vmatpush3.bf16.msra.mxu0 %v14374_v52 }
0x1334   :  { %12869 = vmatprep.subr.bf16.mxu0 %v14422_v16 }
0x1337   :  { %12870 = vmatpush3.bf16.msra.mxu0 %v14375_v28 }
0x1338   :  { %12875 = vmatprep.subr.bf16.mxu0 %v14422_v16 }
0x133a   :  { %12872 = vmatmul.mubr.msk.bf16.vlgmr.msra.gmra.mrb[140].mxu0 %vm5190_vm15, %v10517_v59 }
0x133b   :  { %12876 = vmatpush3.bf16.msra.mxu0 %v14376_v30  ;;  %12881 = vmatprep.mubr.msk.bf16.mxu0 %vm14423_vm9, %v14422_v16 }
0x133c   :  { %12877 = vmatprep.subr.bf16.mxu0 %v14422_v16 }
0x133f   :  { %12878 = vmatpush3.bf16.msra.mxu0 %v14377_v7 }
0x1340   :  { %12879 = vmatprep.subr.bf16.mxu0 %v14422_v16 }
0x1343   :  { %12880 = vmatpush3.bf16.msra.mxu0 %v14378_v31 }
0x1346   :  { %12882 = vmatmul.mubr.msk.bf16.vlgmr.msra.gmra.mrb[140].mxu0 %vm5190_vm15, %v10587_v36 }
0x1419   :  { %v10649_v50 = vpop.f32.mrb[140].mxu0 }
0x141a   :  { %v12894_v54 = vadd.f32 %v14396_v63, %v10649_v50  ;;  %v12883_v57 = vpop.f32.mrb[141].mxu0 }
0x141b   :  { %v10652_v6 = vpop.f32.mrb[142].mxu0 }
0x141c   :  { %10656 = vst.msk [vmem:[#allocation5 + $0x1] sm:$0x1] %vm5375_vm1, %v12894_v54  ;;  %v12884_v10 = vpop.f32.mrb[143].mxu0 }
0x141d   :  { %14408 = shalt.err (!%p14405_p4)
}
0x141e   :  { %s14409_s17 = scalar_lea.hbm %s18137_s6, 32 }
0x141f   :  { %p14410_p5 = scmp.ne.s32.totalorder %s18137_s6, %s14409_s17  ;;  %p14413_p6 = scmp.lt.u32.totalorder %s14409_s17, %s18137_s6 }
0x1421   :  { %p14415_p7 = pnand %p14413_p6, %p14410_p5 }
0x1423   :  { %14418 = shalt.err (!%p14415_p7)
}
0x1424   :  { %10666 = dma.vmem_to_hbm [thread:$0]  %s10664_s12, 32, %s18137_s6, [#allocation6]  }
0x1425   :  { %14419 = dma.done.wait [#allocation6], 32  }
0x1426   :  { %14420 = vsyncadd [#allocation6], 4294967264 }
0x1427   :  { %10670 = vsyncpa [#allocation6], 1 }

</bundles_post_ra>
